<compile_context>
chip_gen: v6e
topology: v6e:2x2x1
jax: 0.10.0
libtpu: 0.0.40
codegen_flags: <defaults>
</compile_context>

<pallas_src>
import numpy as np
import jax
import jax.numpy as jnp
from jax.experimental import pallas as pl
from jax.experimental.pallas import tpu as pltpu


def _round_up(x, m):
    return ((x + m - 1) // m) * m


def _detect_vmem_budget():
    """Generation-aware VMEM budget for vmem_limit_bytes / tile derivation."""
    try:
        cap = getattr(pltpu.get_tpu_info(), "vmem_capacity_bytes", None)
    except Exception:
        cap = None
    if cap is None:
        return 48 * (1 << 20)                      # safe everywhere
    if cap >= 100 * (1 << 20):
        return 96 * (1 << 20)                      # v5e / v6e (128 MiB physical)
    return max(24 * (1 << 20), min(cap - 20 * (1 << 20), 44 * (1 << 20)))  # v7x


_VMEM_BUDGET = _detect_vmem_budget()
_MAX_ROWS_IN_FLIGHT = 32768    # tm * kc cap for the SA kernel
_MAX_FP_ROW_TILE = 4096        # row-tile cap for the FP kernel


def _pick_row_tile(G, cap):
    """Pick a row tile <= cap.  Prefers (a) tiles that divide G (no pad copy),
    (b) an even number of grid steps (v7x megacore balance), (c) multiples of
    16 (bf16 sublane packing).  Falls back to padding G."""
    if G < 16:
        return G, G                       # single full-extent block
    cap = max(8, min(cap, G))
    if cap * 2 > G:                       # keep >= 2 parallel steps
        cap = min(G, _round_up((G + 1) // 2, 8))
    for require_even, mult in ((True, 16), (True, 8), (False, 16), (False, 8)):
        t = cap - cap % mult
        while t >= mult:
            if G % t == 0 and (not require_even or (G // t) % 2 == 0):
                return t, G
            t -= mult
    t = max(8, cap - cap % 8)
    return t, _round_up(G, t)


# ----------------------------------------------------------------------------
# Pallas kernels
# ----------------------------------------------------------------------------

def _make_sa_kernel(n_parts, n_layers):
    """Fused SharedMLP (n_layers) + running max-pool over the nsample grid axis.

    Kernel args: data refs (n_parts, each (tm, kc, Ci) bf16),
                 layer-1 weight splits (n_parts, (Ci, C1) bf16), bias1 (1,C1) f32,
                 then (w, b) per remaining layer, then the (tm, Cout) f32 output,
                 which doubles as the max accumulator (resident across the K axis).
    """
    def kernel(*args):
        data = args[:n_parts]
        w1s = args[n_parts:2 * n_parts]
        b1 = args[2 * n_parts]
        rest = args[2 * n_parts + 1:-1]
        o_ref = args[-1]

        j = pl.program_id(1)                      # nsample-chunk index (reduction)

        @pl.when(j == 0)
        def _init():
            o_ref[...] = jnp.zeros_like(o_ref)    # ReLU output >= 0, so 0 == -inf here

        tm, kc = data[0].shape[0], data[0].shape[1]
        # layer 1: split matmul (xyz part + feature part), f32 accumulation
        y = None
        for d, w in zip(data, w1s):
            rows = d[...].reshape(tm * kc, d.shape[2])
            part = jnp.dot(rows, w[...], preferred_element_type=jnp.float32)
            y = part if y is None else y + part
        y = y + b1[...]
        # layers 2..n
        for li in range(1, n_layers):
            w, b = rest[2 * (li - 1)], rest[2 * (li - 1) + 1]
            y = jnp.maximum(y, 0.0).astype(jnp.bfloat16)
            y = jnp.dot(y, w[...], preferred_element_type=jnp.float32) + b[...]
        y = jnp.maximum(y, 0.0)
        cout = o_ref.shape[1]
        o_ref[...] = jnp.maximum(o_ref[...], jnp.max(y.reshape(tm, kc, cout), axis=1))
    return kernel


def _make_mlp_kernel(n_layers):
    """Shared MLP over rows: (tr, Cin) bf16 -> (tr, Cout) f32 (FP modules)."""
    def kernel(*args):
        x_ref, o_ref = args[0], args[-1]
        wb = args[1:-1]
        y = jnp.dot(x_ref[...], wb[0][...], preferred_element_type=jnp.float32) + wb[1][...]
        for li in range(1, n_layers):
            y = jnp.maximum(y, 0.0).astype(jnp.bfloat16)
            y = jnp.dot(y, wb[2 * li][...],
                        preferred_element_type=jnp.float32) + wb[2 * li + 1][...]
        o_ref[...] = jnp.maximum(y, 0.0)
    return kernel


# ----------------------------------------------------------------------------
# Pallas wrappers
# ----------------------------------------------------------------------------

def sa_mlp_maxpool(parts, layers):
    """parts: list of grouped tensors [(G, K, Ci), ...] whose channel concat is
    the layer-1 input (xyz first, then features).  Applies the full SharedMLP
    (1x1 conv + folded BN + ReLU per layer) and the nsample max-pool inside one
    fused Pallas kernel.  Returns (G, Cout) f32."""
    n_layers = len(layers)
    G, K = parts[0].shape[0], parts[0].shape[1]
    cout = layers[-1][0].shape[1]
    cs = [layers[i][0].shape[1] for i in range(n_layers)]

    # Split layer-1 weights row-wise per part; lane-pad only the small xyz part.
    w1, b1 = layers[0]
    data, w1s, row0 = [], [], 0
    for p in parts:
        ci = p.shape[-1]
        cp = max(8, _round_up(ci, 8))
        w_part = w1[row0:row0 + ci]
        if cp != ci:                       # zero lane-pad (numerically neutral)
            p = jnp.pad(p, ((0, 0), (0, 0), (0, cp - ci)))
            w_part = jnp.pad(w_part, ((0, cp - ci), (0, 0)))
        data.append(p.astype(jnp.bfloat16))
        w1s.append(w_part.astype(jnp.bfloat16))
        row0 += ci

    # nsample chunk: bound in-kernel intermediates; never pad K (kc==K is legal).
    kc = K
    if K > 32:
        for cand in (32, 16, 8):
            if K % cand == 0:
                kc = cand
                break

    # Group tile from the VMEM budget (inputs double-buffered + layer temps + out).
    cin_tot = sum(d.shape[-1] for d in data)
    per_tm = (3 * kc * cin_tot * 2                       # bf16 input tiles (2x buf + load)
              + kc * sum(6 * c for c in cs[:-1])         # f32 + bf16 layer temps
              + kc * 4 * cs[-1]                          # last-layer f32 temp
              + 12 * cout)                               # resident out + writeback
    usable = int((_VMEM_BUDGET - (1 << 20)) * 0.7)
    cap = max(8, usable // per_tm)
    cap = min(cap, max(8, _MAX_ROWS_IN_FLIGHT // kc))
    tm, Gp = _pick_row_tile(G, cap)
    if Gp != G:
        data = [jnp.pad(d, ((0, Gp - G), (0, 0), (0, 0))) for d in data]

    # Flat operand list: data..., w1 splits..., b1, (w, b) for layers 2..n.
    ops = list(data) + list(w1s) + [b1.reshape(1, -1).astype(jnp.float32)]
    for (w, b) in layers[1:]:
        ops += [w.astype(jnp.bfloat16), b.reshape(1, -1).astype(jnp.float32)]

    # TODO(synk): weight/bias specs could use pipeline_mode=pl.Buffered(1) to
    # skip double-buffering resident constants (saves <1 MiB VMEM).
    in_specs = [pl.BlockSpec((tm, kc, d.shape[-1]), lambda i, j: (i, j, 0)) for d in data]
    in_specs += [pl.BlockSpec(a.shape, lambda i, j: (0, 0)) for a in ops[len(data):]]

    out = pl.pallas_call(
        _make_sa_kernel(len(data), n_layers),
        out_shape=jax.ShapeDtypeStruct((Gp, cout), jnp.float32),
        grid=(Gp // tm, K // kc),
        in_specs=in_specs,
        out_specs=pl.BlockSpec((tm, cout), lambda i, j: (i, 0)),
        compiler_params=pltpu.CompilerParams(
            dimension_semantics=("parallel", "arbitrary"),
            vmem_limit_bytes=_VMEM_BUDGET),
    )(*ops)
    return out[:G]


def mlp_rows(x, layers):
    """x: (R, Cin) channel-last.  Full shared-MLP stack (1x1 conv + folded BN +
    ReLU per layer) in a single Pallas kernel.  Returns (R, Cout) f32."""
    R, Cin = x.shape
    n_layers = len(layers)
    cout = layers[-1][0].shape[1]
    cs = [layers[i][0].shape[1] for i in range(n_layers)]

    cp = max(8, _round_up(Cin, 8))        # FP inputs are 512-wide -> no pad in practice
    if cp != Cin:
        x = jnp.pad(x, ((0, 0), (0, cp - Cin)))
    x = x.astype(jnp.bfloat16)

    flat = []
    for li, (w, b) in enumerate(layers):
        if li == 0 and cp != w.shape[0]:
            w = jnp.pad(w, ((0, cp - w.shape[0]), (0, 0)))
        flat += [w.astype(jnp.bfloat16), b.reshape(1, -1).astype(jnp.float32)]

    per_tr = (3 * cp * 2
              + sum(6 * c for c in cs[:-1])
              + 4 * cs[-1]
              + 12 * cout)
    usable = int((_VMEM_BUDGET - (1 << 20)) * 0.7)
    cap = min(max(8, usable // per_tr), _MAX_FP_ROW_TILE)
    tr, Rp = _pick_row_tile(R, cap)
    if Rp != R:
        x = jnp.pad(x, ((0, Rp - R), (0, 0)))

    in_specs = [pl.BlockSpec((tr, cp), lambda i: (i, 0))]
    in_specs += [pl.BlockSpec(a.shape, lambda i: (0, 0)) for a in flat]

    out = pl.pallas_call(
        _make_mlp_kernel(n_layers),
        out_shape=jax.ShapeDtypeStruct((Rp, cout), jnp.float32),
        grid=(Rp // tr,),
        in_specs=in_specs,
        out_specs=pl.BlockSpec((tr, cout), lambda i: (i, 0)),
        compiler_params=pltpu.CompilerParams(
            dimension_semantics=("parallel",),
            vmem_limit_bytes=_VMEM_BUDGET),
    )(x, *flat)
    return out[:R]


# ----------------------------------------------------------------------------
# Plain-JAX glue: sampling / grouping / interpolation (data-dependent gathers)
# ----------------------------------------------------------------------------
# TODO(synk): furthest_point_sample / ball_query / three_nn are irregular
# data-dependent gather ops; at production point counts they dominate wall
# clock and should move to a scalar-prefetch Pallas gather kernel next.

def _gather_points(points, idx):
    # points: (B, N, C), idx: (B, ...) int -> (B, ..., C)
    return jax.vmap(lambda p, i: p[i])(points, idx)


def furthest_point_sample(xyz, npoint):
    """xyz: (B, N, 3) -> (B, npoint) int32.  Matches the CUDA FPS (starts at 0)."""
    B, N, _ = xyz.shape

    def body(j, carry):
        inds, mind = carry
        last = jax.lax.dynamic_slice_in_dim(inds, j - 1, 1, axis=1)          # (B, 1)
        last_xyz = jnp.take_along_axis(xyz, last[..., None], axis=1)         # (B, 1, 3)
        d = jnp.sum((xyz - last_xyz) ** 2, axis=-1)                          # (B, N)
        mind = jnp.minimum(mind, d)
        nxt = jnp.argmax(mind, axis=1).astype(jnp.int32)                     # (B,)
        inds = jax.lax.dynamic_update_slice_in_dim(inds, nxt[:, None], j, axis=1)
        return inds, mind

    inds0 = jnp.zeros((B, npoint), jnp.int32)
    mind0 = jnp.full((B, N), 1e10, jnp.float32)
    inds, _ = jax.lax.fori_loop(1, npoint, body, (inds0, mind0))
    return inds


def ball_query(radius, nsample, xyz, new_xyz):
    """xyz: (B, N, 3), new_xyz: (B, M, 3) -> (B, M, nsample) int32.
    First `nsample` in-radius indices (in index order); remainder filled with
    the first found index — same semantics as the pointnet2 CUDA op."""
    B, N, _ = xyz.shape
    d2 = jnp.sum((new_xyz[:, :, None, :] - xyz[:, None, :, :]) ** 2, axis=-1)  # (B, M, N)
    valid = d2 < (radius ** 2)
    ar = jnp.arange(N, dtype=jnp.int32)
    key = jnp.where(valid, ar[None, None, :], N + ar[None, None, :])
    # nsample smallest (unique) keys == first nsample in-radius indices.
    _, order = jax.lax.top_k(-key, nsample)                                   # O(N*nsample)
    order = order.astype(jnp.int32)
    cnt = jnp.sum(valid, axis=-1)                                             # (B, M)
    k_ar = jnp.arange(nsample)
    first = order[:, :, 0:1]
    idx = jnp.where(k_ar[None, None, :] < cnt[:, :, None], order, first)
    return idx.astype(jnp.int32)


# ----------------------------------------------------------------------------
# PointnetSAModuleVotes / PointnetFPModule forward
# ----------------------------------------------------------------------------

def sa_module(xyz, features, layers, npoint, radius, nsample,
              use_xyz=True, normalize_xyz=True):
    """xyz: (B, N, 3); features: (B, N, C) channel-last or None.
    Returns new_xyz (B, M, 3), new_features (B, M, Cout) channel-last, fps_inds."""
    B, N, _ = xyz.shape
    M, K = npoint, nsample
    fps_inds = furthest_point_sample(xyz, npoint)                    # (B, M)
    new_xyz = _gather_points(xyz, fps_inds)                          # (B, M, 3)
    idx = ball_query(radius, nsample, xyz, new_xyz)                  # (B, M, K)

    grouped_xyz = _gather_points(xyz, idx) - new_xyz[:, :, None, :]  # (B, M, K, 3)
    if normalize_xyz:
        grouped_xyz = grouped_xyz / radius

    parts = []
    if use_xyz:
        parts.append(grouped_xyz.reshape(B * M, K, 3))
    if features is not None:
        # gather directly in bf16: grouped tensor is written/read once in bf16
        gf = _gather_points(features.astype(jnp.bfloat16), idx)      # (B, M, K, C)
        parts.append(gf.reshape(B * M, K, features.shape[-1]))

    pooled = sa_mlp_maxpool(parts, layers)    # Pallas: fused SharedMLP + K-maxpool
    return new_xyz, pooled.reshape(B, M, -1), fps_inds


def fp_module(unknown_xyz, known_xyz, unknown_feats, known_feats, layers):
    """three_nn + inverse-distance interpolation + skip concat + shared MLP.
    Features are channel-last: (B, n, C1), (B, m, C2) -> (B, n, Cout)."""
    d2 = jnp.sum((unknown_xyz[:, :, None, :] - known_xyz[:, None, :, :]) ** 2, axis=-1)
    neg_d, idx = jax.lax.top_k(-d2, 3)                               # (B, n, 3)
    dist = -neg_d                                                    # squared dists (CUDA op)
    dist_recip = 1.0 / (dist + 1e-8)
    norm = jnp.sum(dist_recip, axis=2, keepdims=True)
    weight = dist_recip / norm
    gathered = _gather_points(known_feats, idx)                      # (B, n, 3, C2)
    interp = jnp.sum(gathered * weight[..., None], axis=2)           # (B, n, C2)
    new_feats = jnp.concatenate([interp, unknown_feats], axis=-1)    # (B, n, C2+C1)
    B, n, Cin = new_feats.shape
    out = mlp_rows(new_feats.reshape(B * n, Cin), layers)            # Pallas: fused MLP
    return out.reshape(B, n, -1)


# ----------------------------------------------------------------------------
# Backbone forward (mirrors Pointnet2Backbone.forward)
# ----------------------------------------------------------------------------

def pointnet2_backbone_forward(pointcloud, params, cfg):
    xyz = pointcloud[..., 0:3]
    features = pointcloud[..., 3:] if pointcloud.shape[-1] > 3 else None  # (B, N, C)

    end_points = {}
    xyz1, f1, i1 = sa_module(xyz, features, params['sa1'], *cfg['sa1'])
    end_points['sa1_inds'] = i1
    end_points['sa1_xyz'] = xyz1
    end_points['sa1_features'] = jnp.transpose(f1, (0, 2, 1))   # (B, C, M) like PyTorch

    xyz2, f2, i2 = sa_module(xyz1, f1, params['sa2'], *cfg['sa2'])
    end_points['sa2_inds'] = i2
    end_points['sa2_xyz'] = xyz2
    end_points['sa2_features'] = jnp.transpose(f2, (0, 2, 1))

    xyz3, f3, i3 = sa_module(xyz2, f2, params['sa3'], *cfg['sa3'])
    end_points['sa3_xyz'] = xyz3
    end_points['sa3_features'] = jnp.transpose(f3, (0, 2, 1))

    xyz4, f4, i4 = sa_module(xyz3, f3, params['sa4'], *cfg['sa4'])
    end_points['sa4_xyz'] = xyz4
    end_points['sa4_features'] = jnp.transpose(f4, (0, 2, 1))

    f_fp1 = fp_module(xyz3, xyz4, f3, f4, params['fp1'])
    f_fp2 = fp_module(xyz2, xyz3, f2, f_fp1, params['fp2'])

    end_points['fp2_features'] = jnp.transpose(f_fp2, (0, 2, 1))
    end_points['fp2_xyz'] = end_points['sa2_xyz']
    num_seed = end_points['fp2_xyz'].shape[1]
    end_points['fp2_inds'] = i1[:, 0:num_seed]
    return end_points


# ----------------------------------------------------------------------------
# Deterministic parameter init (Conv 1x1 weights, eval-mode BN folded, no bias)
# ----------------------------------------------------------------------------

def init_params(key, input_feature_dim=0):
    bn_eps = 1e-5
    bn_scale = float(1.0 / np.sqrt(1.0 + bn_eps))   # eval-mode BN with default stats

    def mlp_params(key, dims):
        layers = []
        for cin, cout in zip(dims[:-1], dims[1:]):
            key, sub = jax.random.split(key)
            w = jax.random.normal(sub, (cin, cout), dtype=jnp.float32) * (1.0 / np.sqrt(cin))
            layers.append((w * bn_scale, jnp.zeros((cout,), jnp.float32)))
        return key, layers

    params = {}
    key, params['sa1'] = mlp_params(key, [input_feature_dim + 3, 64, 64, 128])
    key, params['sa2'] = mlp_params(key, [128 + 3, 128, 128, 256])
    key, params['sa3'] = mlp_params(key, [256 + 3, 128, 128, 256])
    key, params['sa4'] = mlp_params(key, [256 + 3, 128, 128, 256])
    key, params['fp1'] = mlp_params(key, [256 + 256, 256, 256])
    key, params['fp2'] = mlp_params(key, [256 + 256, 256, 256])
    return params


if __name__ == "__main__":
    key = jax.random.PRNGKey(0)
    k_pc, k_par = jax.random.split(key)

    B, N, input_feature_dim = 2, 128, 0
    pointcloud = jax.random.uniform(k_pc, (B, N, 3 + input_feature_dim),
                                    jnp.float32, -1.0, 1.0)
    params = init_params(k_par, input_feature_dim)

    # Down-scaled point counts (original module: npoint=2048/1024/512/256,
    # nsample=64/32/16/16); radii and MLP channel widths kept as in the module.
    cfg = {
        'sa1': (64, 0.2, 16),
        'sa2': (32, 0.4, 8),
        'sa3': (16, 0.8, 8),
        'sa4': (8, 1.2, 8),
    }

    fwd = jax.jit(lambda pc, p: pointnet2_backbone_forward(pc, p, cfg))
    end_points = fwd(pointcloud, params)
    jax.block_until_ready(end_points)

    assert end_points['sa1_features'].shape == (B, 128, cfg['sa1'][0])
    assert end_points['sa4_features'].shape == (B, 256, cfg['sa4'][0])
    assert end_points['fp2_features'].shape == (B, 256, cfg['sa2'][0])
    assert end_points['fp2_xyz'].shape == (B, cfg['sa2'][0], 3)
    assert end_points['fp2_inds'].shape == (B, cfg['sa2'][0])
    assert bool(jnp.all(jnp.isfinite(end_points['fp2_features'])))
    assert bool(jnp.all(jnp.isfinite(end_points['sa4_features'])))
    print("KERNEL_OK")
</pallas_src>

<mosaic_0001>
module attributes {stable_mosaic.version = 11 : i64} {
  func.func @kernel(%arg0: i32, %arg1: i32, %arg2: memref<64x16x8xbf16, #tpu.memory_space<vmem>>, %arg3: memref<8x64xbf16, #tpu.memory_space<vmem>>, %arg4: memref<1x64xf32, #tpu.memory_space<vmem>>, %arg5: memref<64x64xbf16, #tpu.memory_space<vmem>>, %arg6: memref<1x64xf32, #tpu.memory_space<vmem>>, %arg7: memref<64x128xbf16, #tpu.memory_space<vmem>>, %arg8: memref<1x128xf32, #tpu.memory_space<vmem>>, %arg9: memref<64x128xf32, #tpu.memory_space<vmem>>) attributes {dimension_semantics = [#tpu.dimension_semantics<parallel>, #tpu.dimension_semantics<arbitrary>], iteration_bounds = array<i64: 2, 1>, scalar_prefetch = 0 : i64, scratch_operands = 0 : i64, tpu.core_type = #tpu.core_type<tc>, window_params = [{transform_indices = @transform_0, window_bounds = array<i64: 64, 16, 8>}, {pipeline_mode = #tpu.pipeline_mode<synchronous>, transform_indices = @transform_1, window_bounds = array<i64: 8, 64>}, {pipeline_mode = #tpu.pipeline_mode<synchronous>, transform_indices = @transform_2, window_bounds = array<i64: 1, 64>}, {pipeline_mode = #tpu.pipeline_mode<synchronous>, transform_indices = @transform_3, window_bounds = array<i64: 64, 64>}, {pipeline_mode = #tpu.pipeline_mode<synchronous>, transform_indices = @transform_4, window_bounds = array<i64: 1, 64>}, {pipeline_mode = #tpu.pipeline_mode<synchronous>, transform_indices = @transform_5, window_bounds = array<i64: 64, 128>}, {pipeline_mode = #tpu.pipeline_mode<synchronous>, transform_indices = @transform_6, window_bounds = array<i64: 1, 128>}, {transform_indices = @transform_7, window_bounds = array<i64: 64, 128>}]} {
    %c0_i32 = arith.constant 0 : i32
    %0 = arith.cmpi eq, %arg1, %c0_i32 : i32
    %1 = arith.extui %0 : i1 to i32
    %c0_i32_0 = arith.constant 0 : i32
    %2 = arith.cmpi ne, %1, %c0_i32_0 : i32
    scf.if %2 {
      %cst_25 = arith.constant 0.000000e+00 : f32
      %33 = vector.broadcast %cst_25 : f32 to vector<64x128xf32>
      %c0_26 = arith.constant 0 : index
      %c0_27 = arith.constant 0 : index
      %34 = vector.load %arg9[%c0_26, %c0_27] : memref<64x128xf32, #tpu.memory_space<vmem>>, vector<64x128xf32>
      tpu.vector_store %arg9[%c0_26, %c0_27], %33 {strides = array<i32>} : memref<64x128xf32, #tpu.memory_space<vmem>>, vector<64x128xf32>,
    } else {
    }
    %c0 = arith.constant 0 : index
    %c0_1 = arith.constant 0 : index
    %c0_2 = arith.constant 0 : index
    %3 = vector.load %arg2[%c0, %c0_1, %c0_2] : memref<64x16x8xbf16, #tpu.memory_space<vmem>>, vector<64x16x8xbf16>
    %4 = vector.shape_cast %3 : vector<64x16x8xbf16> to vector<1024x8xbf16>
    %c0_3 = arith.constant 0 : index
    %c0_4 = arith.constant 0 : index
    %5 = vector.load %arg3[%c0_3, %c0_4] : memref<8x64xbf16, #tpu.memory_space<vmem>>, vector<8x64xbf16>
    %cst = arith.constant dense<0.000000e+00> : vector<1024x64xf32>
    %6 = tpu.matmul %4, %5, %cst {dimension_numbers = #tpu.dot_dimension_numbers<[1], [0], [0], [1], [0, 0, 1, 1], [], []>} : vector<1024x8xbf16>, vector<8x64xbf16>, vector<1024x64xf32> -> vector<1024x64xf32>
    %c0_5 = arith.constant 0 : index
    %c0_6 = arith.constant 0 : index
    %7 = vector.load %arg4[%c0_5, %c0_6] : memref<1x64xf32, #tpu.memory_space<vmem>>, vector<1x64xf32>
    %8 = vector.broadcast %7 : vector<1x64xf32> to vector<1024x64xf32>
    %9 = arith.addf %6, %8 : vector<1024x64xf32>
    %cst_7 = arith.constant 0.000000e+00 : f32
    %10 = vector.broadcast %cst_7 : f32 to vector<1024x64xf32>
    %11 = arith.maximumf %9, %10 : vector<1024x64xf32>
    %12 = arith.truncf %11 : vector<1024x64xf32> to vector<1024x64xbf16>
    %c0_8 = arith.constant 0 : index
    %c0_9 = arith.constant 0 : index
    %13 = vector.load %arg5[%c0_8, %c0_9] : memref<64x64xbf16, #tpu.memory_space<vmem>>, vector<64x64xbf16>
    %cst_10 = arith.constant dense<0.000000e+00> : vector<1024x64xf32>
    %14 = tpu.matmul %12, %13, %cst_10 {dimension_numbers = #tpu.dot_dimension_numbers<[1], [0], [0], [1], [0, 0, 1, 1], [], []>} : vector<1024x64xbf16>, vector<64x64xbf16>, vector<1024x64xf32> -> vector<1024x64xf32>
    %c0_11 = arith.constant 0 : index
    %c0_12 = arith.constant 0 : index
    %15 = vector.load %arg6[%c0_11, %c0_12] : memref<1x64xf32, #tpu.memory_space<vmem>>, vector<1x64xf32>
    %16 = vector.broadcast %15 : vector<1x64xf32> to vector<1024x64xf32>
    %17 = arith.addf %14, %16 : vector<1024x64xf32>
    %cst_13 = arith.constant 0.000000e+00 : f32
    %18 = vector.broadcast %cst_13 : f32 to vector<1024x64xf32>
    %19 = arith.maximumf %17, %18 : vector<1024x64xf32>
    %20 = arith.truncf %19 : vector<1024x64xf32> to vector<1024x64xbf16>
    %c0_14 = arith.constant 0 : index
    %c0_15 = arith.constant 0 : index
    %21 = vector.load %arg7[%c0_14, %c0_15] : memref<64x128xbf16, #tpu.memory_space<vmem>>, vector<64x128xbf16>
    %cst_16 = arith.constant dense<0.000000e+00> : vector<1024x128xf32>
    %22 = tpu.matmul %20, %21, %cst_16 {dimension_numbers = #tpu.dot_dimension_numbers<[1], [0], [0], [1], [0, 0, 1, 1], [], []>} : vector<1024x64xbf16>, vector<64x128xbf16>, vector<1024x128xf32> -> vector<1024x128xf32>
    %c0_17 = arith.constant 0 : index
    %c0_18 = arith.constant 0 : index
    %23 = vector.load %arg8[%c0_17, %c0_18] : memref<1x128xf32, #tpu.memory_space<vmem>>, vector<1x128xf32>
    %24 = vector.broadcast %23 : vector<1x128xf32> to vector<1024x128xf32>
    %25 = arith.addf %22, %24 : vector<1024x128xf32>
    %cst_19 = arith.constant 0.000000e+00 : f32
    %26 = vector.broadcast %cst_19 : f32 to vector<1024x128xf32>
    %27 = arith.maximumf %25, %26 : vector<1024x128xf32>
    %c0_20 = arith.constant 0 : index
    %c0_21 = arith.constant 0 : index
    %28 = vector.load %arg9[%c0_20, %c0_21] : memref<64x128xf32, #tpu.memory_space<vmem>>, vector<64x128xf32>
    %29 = vector.shape_cast %27 : vector<1024x128xf32> to vector<64x16x128xf32>
    %cst_22 = arith.constant dense<0xFF800000> : vector<64x128xf32>
    %30 = vector.multi_reduction <maximumf>, %29, %cst_22 [1] : vector<64x16x128xf32> to vector<64x128xf32>
    %31 = arith.maximumf %28, %30 : vector<64x128xf32>
    %c0_23 = arith.constant 0 : index
    %c0_24 = arith.constant 0 : index
    %32 = vector.load %arg9[%c0_23, %c0_24] : memref<64x128xf32, #tpu.memory_space<vmem>>, vector<64x128xf32>
    tpu.vector_store %arg9[%c0_23, %c0_24], %31 {strides = array<i32>} : memref<64x128xf32, #tpu.memory_space<vmem>>, vector<64x128xf32>,
    return
  }
  func.func @transform_0(%arg0: i32, %arg1: i32) -> (i32, i32, i32) {
    %c0_i32 = arith.constant 0 : i32
    %c0_i32_0 = arith.constant 0 : i32
    return %arg0, %arg1, %c0_i32 : i32, i32, i32
  }
  func.func @transform_1(%arg0: i32, %arg1: i32) -> (i32, i32) {
    %c0_i32 = arith.constant 0 : i32
    %c0_i32_0 = arith.constant 0 : i32
    %c0_i32_1 = arith.constant 0 : i32
    return %c0_i32, %c0_i32_0 : i32, i32
  }
  func.func @transform_2(%arg0: i32, %arg1: i32) -> (i32, i32) {
    %c0_i32 = arith.constant 0 : i32
    %c0_i32_0 = arith.constant 0 : i32
    %c0_i32_1 = arith.constant 0 : i32
    return %c0_i32, %c0_i32_0 : i32, i32
  }
  func.func @transform_3(%arg0: i32, %arg1: i32) -> (i32, i32) {
    %c0_i32 = arith.constant 0 : i32
    %c0_i32_0 = arith.constant 0 : i32
    %c0_i32_1 = arith.constant 0 : i32
    return %c0_i32, %c0_i32_0 : i32, i32
  }
  func.func @transform_4(%arg0: i32, %arg1: i32) -> (i32, i32) {
    %c0_i32 = arith.constant 0 : i32
    %c0_i32_0 = arith.constant 0 : i32
    %c0_i32_1 = arith.constant 0 : i32
    return %c0_i32, %c0_i32_0 : i32, i32
  }
  func.func @transform_5(%arg0: i32, %arg1: i32) -> (i32, i32) {
    %c0_i32 = arith.constant 0 : i32
    %c0_i32_0 = arith.constant 0 : i32
    %c0_i32_1 = arith.constant 0 : i32
    return %c0_i32, %c0_i32_0 : i32, i32
  }
  func.func @transform_6(%arg0: i32, %arg1: i32) -> (i32, i32) {
    %c0_i32 = arith.constant 0 : i32
    %c0_i32_0 = arith.constant 0 : i32
    %c0_i32_1 = arith.constant 0 : i32
    return %c0_i32, %c0_i32_0 : i32, i32
  }
  func.func @transform_7(%arg0: i32, %arg1: i32) -> (i32, i32) {
    %c0_i32 = arith.constant 0 : i32
    %c0_i32_0 = arith.constant 0 : i32
    return %arg0, %c0_i32 : i32, i32
  }
}

module attributes {stable_mosaic.version = 11 : i64} {
  func.func @kernel(%arg0: i32, %arg1: i32, %arg2: memref<32x8x8xbf16, #tpu.memory_space<vmem>>, %arg3: memref<32x8x128xbf16, #tpu.memory_space<vmem>>, %arg4: memref<8x128xbf16, #tpu.memory_space<vmem>>, %arg5: memref<128x128xbf16, #tpu.memory_space<vmem>>, %arg6: memref<1x128xf32, #tpu.memory_space<vmem>>, %arg7: memref<128x128xbf16, #tpu.memory_space<vmem>>, %arg8: memref<1x128xf32, #tpu.memory_space<vmem>>, %arg9: memref<128x256xbf16, #tpu.memory_space<vmem>>, %arg10: memref<1x256xf32, #tpu.memory_space<vmem>>, %arg11: memref<32x256xf32, #tpu.memory_space<vmem>>) attributes {dimension_semantics = [#tpu.dimension_semantics<parallel>, #tpu.dimension_semantics<arbitrary>], iteration_bounds = array<i64: 2, 1>, scalar_prefetch = 0 : i64, scratch_operands = 0 : i64, tpu.core_type = #tpu.core_type<tc>, window_params = [{transform_indices = @transform_0, window_bounds = array<i64: 32, 8, 8>}, {transform_indices = @transform_1, window_bounds = array<i64: 32, 8, 128>}, {pipeline_mode = #tpu.pipeline_mode<synchronous>, transform_indices = @transform_2, window_bounds = array<i64: 8, 128>}, {pipeline_mode = #tpu.pipeline_mode<synchronous>, transform_indices = @transform_3, window_bounds = array<i64: 128, 128>}, {pipeline_mode = #tpu.pipeline_mode<synchronous>, transform_indices = @transform_4, window_bounds = array<i64: 1, 128>}, {pipeline_mode = #tpu.pipeline_mode<synchronous>, transform_indices = @transform_5, window_bounds = array<i64: 128, 128>}, {pipeline_mode = #tpu.pipeline_mode<synchronous>, transform_indices = @transform_6, window_bounds = array<i64: 1, 128>}, {pipeline_mode = #tpu.pipeline_mode<synchronous>, transform_indices = @transform_7, window_bounds = array<i64: 128, 256>}, {pipeline_mode = #tpu.pipeline_mode<synchronous>, transform_indices = @transform_8, window_bounds = array<i64: 1, 256>}, {transform_indices = @transform_9, window_bounds = array<i64: 32, 256>}]} {
    %c0_i32 = arith.constant 0 : i32
    %0 = arith.cmpi eq, %arg1, %c0_i32 : i32
    %1 = arith.extui %0 : i1 to i32
    %c0_i32_0 = arith.constant 0 : i32
    %2 = arith.cmpi ne, %1, %c0_i32_0 : i32
    scf.if %2 {
      %cst_31 = arith.constant 0.000000e+00 : f32
      %38 = vector.broadcast %cst_31 : f32 to vector<32x256xf32>
      %c0_32 = arith.constant 0 : index
      %c0_33 = arith.constant 0 : index
      %39 = vector.load %arg11[%c0_32, %c0_33] : memref<32x256xf32, #tpu.memory_space<vmem>>, vector<32x256xf32>
      tpu.vector_store %arg11[%c0_32, %c0_33], %38 {strides = array<i32>} : memref<32x256xf32, #tpu.memory_space<vmem>>, vector<32x256xf32>,
    } else {
    }
    %c0 = arith.constant 0 : index
    %c0_1 = arith.constant 0 : index
    %c0_2 = arith.constant 0 : index
    %3 = vector.load %arg2[%c0, %c0_1, %c0_2] : memref<32x8x8xbf16, #tpu.memory_space<vmem>>, vector<32x8x8xbf16>
    %4 = vector.shape_cast %3 : vector<32x8x8xbf16> to vector<256x8xbf16>
    %c0_3 = arith.constant 0 : index
    %c0_4 = arith.constant 0 : index
    %5 = vector.load %arg4[%c0_3, %c0_4] : memref<8x128xbf16, #tpu.memory_space<vmem>>, vector<8x128xbf16>
    %cst = arith.constant dense<0.000000e+00> : vector<256x128xf32>
    %6 = tpu.matmul %4, %5, %cst {dimension_numbers = #tpu.dot_dimension_numbers<[1], [0], [0], [1], [0, 0, 1, 1], [], []>} : vector<256x8xbf16>, vector<8x128xbf16>, vector<256x128xf32> -> vector<256x128xf32>
    %c0_5 = arith.constant 0 : index
    %c0_6 = arith.constant 0 : index
    %c0_7 = arith.constant 0 : index
    %7 = vector.load %arg3[%c0_5, %c0_6, %c0_7] : memref<32x8x128xbf16, #tpu.memory_space<vmem>>, vector<32x8x128xbf16>
    %8 = vector.shape_cast %7 : vector<32x8x128xbf16> to vector<256x128xbf16>
    %c0_8 = arith.constant 0 : index
    %c0_9 = arith.constant 0 : index
    %9 = vector.load %arg5[%c0_8, %c0_9] : memref<128x128xbf16, #tpu.memory_space<vmem>>, vector<128x128xbf16>
    %cst_10 = arith.constant dense<0.000000e+00> : vector<256x128xf32>
    %10 = tpu.matmul %8, %9, %cst_10 {dimension_numbers = #tpu.dot_dimension_numbers<[1], [0], [0], [1], [0, 0, 1, 1], [], []>} : vector<256x128xbf16>, vector<128x128xbf16>, vector<256x128xf32> -> vector<256x128xf32>
    %11 = arith.addf %6, %10 : vector<256x128xf32>
    %c0_11 = arith.constant 0 : index
    %c0_12 = arith.constant 0 : index
    %12 = vector.load %arg6[%c0_11, %c0_12] : memref<1x128xf32, #tpu.memory_space<vmem>>, vector<1x128xf32>
    %13 = vector.broadcast %12 : vector<1x128xf32> to vector<256x128xf32>
    %14 = arith.addf %11, %13 : vector<256x128xf32>
    %cst_13 = arith.constant 0.000000e+00 : f32
    %15 = vector.broadcast %cst_13 : f32 to vector<256x128xf32>
    %16 = arith.maximumf %14, %15 : vector<256x128xf32>
    %17 = arith.truncf %16 : vector<256x128xf32> to vector<256x128xbf16>
    %c0_14 = arith.constant 0 : index
    %c0_15 = arith.constant 0 : index
    %18 = vector.load %arg7[%c0_14, %c0_15] : memref<128x128xbf16, #tpu.memory_space<vmem>>, vector<128x128xbf16>
    %cst_16 = arith.constant dense<0.000000e+00> : vector<256x128xf32>
    %19 = tpu.matmul %17, %18, %cst_16 {dimension_numbers = #tpu.dot_dimension_numbers<[1], [0], [0], [1], [0, 0, 1, 1], [], []>} : vector<256x128xbf16>, vector<128x128xbf16>, vector<256x128xf32> -> vector<256x128xf32>
    %c0_17 = arith.constant 0 : index
    %c0_18 = arith.constant 0 : index
    %20 = vector.load %arg8[%c0_17, %c0_18] : memref<1x128xf32, #tpu.memory_space<vmem>>, vector<1x128xf32>
    %21 = vector.broadcast %20 : vector<1x128xf32> to vector<256x128xf32>
    %22 = arith.addf %19, %21 : vector<256x128xf32>
    %cst_19 = arith.constant 0.000000e+00 : f32
    %23 = vector.broadcast %cst_19 : f32 to vector<256x128xf32>
    %24 = arith.maximumf %22, %23 : vector<256x128xf32>
    %25 = arith.truncf %24 : vector<256x128xf32> to vector<256x128xbf16>
    %c0_20 = arith.constant 0 : index
    %c0_21 = arith.constant 0 : index
    %26 = vector.load %arg9[%c0_20, %c0_21] : memref<128x256xbf16, #tpu.memory_space<vmem>>, vector<128x256xbf16>
    %cst_22 = arith.constant dense<0.000000e+00> : vector<256x256xf32>
    %27 = tpu.matmul %25, %26, %cst_22 {dimension_numbers = #tpu.dot_dimension_numbers<[1], [0], [0], [1], [0, 0, 1, 1], [], []>} : vector<256x128xbf16>, vector<128x256xbf16>, vector<256x256xf32> -> vector<256x256xf32>
    %c0_23 = arith.constant 0 : index
    %c0_24 = arith.constant 0 : index
    %28 = vector.load %arg10[%c0_23, %c0_24] : memref<1x256xf32, #tpu.memory_space<vmem>>, vector<1x256xf32>
    %29 = vector.broadcast %28 : vector<1x256xf32> to vector<256x256xf32>
    %30 = arith.addf %27, %29 : vector<256x256xf32>
    %cst_25 = arith.constant 0.000000e+00 : f32
    %31 = vector.broadcast %cst_25 : f32 to vector<256x256xf32>
    %32 = arith.maximumf %30, %31 : vector<256x256xf32>
    %c0_26 = arith.constant 0 : index
    %c0_27 = arith.constant 0 : index
    %33 = vector.load %arg11[%c0_26, %c0_27] : memref<32x256xf32, #tpu.memory_space<vmem>>, vector<32x256xf32>
    %34 = vector.shape_cast %32 : vector<256x256xf32> to vector<32x8x256xf32>
    %cst_28 = arith.constant dense<0xFF800000> : vector<32x256xf32>
    %35 = vector.multi_reduction <maximumf>, %34, %cst_28 [1] : vector<32x8x256xf32> to vector<32x256xf32>
    %36 = arith.maximumf %33, %35 : vector<32x256xf32>
    %c0_29 = arith.constant 0 : index
    %c0_30 = arith.constant 0 : index
    %37 = vector.load %arg11[%c0_29, %c0_30] : memref<32x256xf32, #tpu.memory_space<vmem>>, vector<32x256xf32>
    tpu.vector_store %arg11[%c0_29, %c0_30], %36 {strides = array<i32>} : memref<32x256xf32, #tpu.memory_space<vmem>>, vector<32x256xf32>,
    return
  }
  func.func @transform_0(%arg0: i32, %arg1: i32) -> (i32, i32, i32) {
    %c0_i32 = arith.constant 0 : i32
    %c0_i32_0 = arith.constant 0 : i32
    return %arg0, %arg1, %c0_i32 : i32, i32, i32
  }
  func.func @transform_1(%arg0: i32, %arg1: i32) -> (i32, i32, i32) {
    %c0_i32 = arith.constant 0 : i32
    %c0_i32_0 = arith.constant 0 : i32
    return %arg0, %arg1, %c0_i32 : i32, i32, i32
  }
  func.func @transform_2(%arg0: i32, %arg1: i32) -> (i32, i32) {
    %c0_i32 = arith.constant 0 : i32
    %c0_i32_0 = arith.constant 0 : i32
    %c0_i32_1 = arith.constant 0 : i32
    return %c0_i32, %c0_i32_0 : i32, i32
  }
  func.func @transform_3(%arg0: i32, %arg1: i32) -> (i32, i32) {
    %c0_i32 = arith.constant 0 : i32
    %c0_i32_0 = arith.constant 0 : i32
    %c0_i32_1 = arith.constant 0 : i32
    return %c0_i32, %c0_i32_0 : i32, i32
  }
  func.func @transform_4(%arg0: i32, %arg1: i32) -> (i32, i32) {
    %c0_i32 = arith.constant 0 : i32
    %c0_i32_0 = arith.constant 0 : i32
    %c0_i32_1 = arith.constant 0 : i32
    return %c0_i32, %c0_i32_0 : i32, i32
  }
  func.func @transform_5(%arg0: i32, %arg1: i32) -> (i32, i32) {
    %c0_i32 = arith.constant 0 : i32
    %c0_i32_0 = arith.constant 0 : i32
    %c0_i32_1 = arith.constant 0 : i32
    return %c0_i32, %c0_i32_0 : i32, i32
  }
  func.func @transform_6(%arg0: i32, %arg1: i32) -> (i32, i32) {
    %c0_i32 = arith.constant 0 : i32
    %c0_i32_0 = arith.constant 0 : i32
    %c0_i32_1 = arith.constant 0 : i32
    return %c0_i32, %c0_i32_0 : i32, i32
  }
  func.func @transform_7(%arg0: i32, %arg1: i32) -> (i32, i32) {
    %c0_i32 = arith.constant 0 : i32
    %c0_i32_0 = arith.constant 0 : i32
    %c0_i32_1 = arith.constant 0 : i32
    return %c0_i32, %c0_i32_0 : i32, i32
  }
  func.func @transform_8(%arg0: i32, %arg1: i32) -> (i32, i32) {
    %c0_i32 = arith.constant 0 : i32
    %c0_i32_0 = arith.constant 0 : i32
    %c0_i32_1 = arith.constant 0 : i32
    return %c0_i32, %c0_i32_0 : i32, i32
  }
  func.func @transform_9(%arg0: i32, %arg1: i32) -> (i32, i32) {
    %c0_i32 = arith.constant 0 : i32
    %c0_i32_0 = arith.constant 0 : i32
    return %arg0, %c0_i32 : i32, i32
  }
}

module attributes {stable_mosaic.version = 11 : i64} {
  func.func @kernel(%arg0: i32, %arg1: i32, %arg2: memref<16x8x8xbf16, #tpu.memory_space<vmem>>, %arg3: memref<16x8x256xbf16, #tpu.memory_space<vmem>>, %arg4: memref<8x128xbf16, #tpu.memory_space<vmem>>, %arg5: memref<256x128xbf16, #tpu.memory_space<vmem>>, %arg6: memref<1x128xf32, #tpu.memory_space<vmem>>, %arg7: memref<128x128xbf16, #tpu.memory_space<vmem>>, %arg8: memref<1x128xf32, #tpu.memory_space<vmem>>, %arg9: memref<128x256xbf16, #tpu.memory_space<vmem>>, %arg10: memref<1x256xf32, #tpu.memory_space<vmem>>, %arg11: memref<16x256xf32, #tpu.memory_space<vmem>>) attributes {dimension_semantics = [#tpu.dimension_semantics<parallel>, #tpu.dimension_semantics<arbitrary>], iteration_bounds = array<i64: 2, 1>, scalar_prefetch = 0 : i64, scratch_operands = 0 : i64, tpu.core_type = #tpu.core_type<tc>, window_params = [{transform_indices = @transform_0, window_bounds = array<i64: 16, 8, 8>}, {transform_indices = @transform_1, window_bounds = array<i64: 16, 8, 256>}, {pipeline_mode = #tpu.pipeline_mode<synchronous>, transform_indices = @transform_2, window_bounds = array<i64: 8, 128>}, {pipeline_mode = #tpu.pipeline_mode<synchronous>, transform_indices = @transform_3, window_bounds = array<i64: 256, 128>}, {pipeline_mode = #tpu.pipeline_mode<synchronous>, transform_indices = @transform_4, window_bounds = array<i64: 1, 128>}, {pipeline_mode = #tpu.pipeline_mode<synchronous>, transform_indices = @transform_5, window_bounds = array<i64: 128, 128>}, {pipeline_mode = #tpu.pipeline_mode<synchronous>, transform_indices = @transform_6, window_bounds = array<i64: 1, 128>}, {pipeline_mode = #tpu.pipeline_mode<synchronous>, transform_indices = @transform_7, window_bounds = array<i64: 128, 256>}, {pipeline_mode = #tpu.pipeline_mode<synchronous>, transform_indices = @transform_8, window_bounds = array<i64: 1, 256>}, {transform_indices = @transform_9, window_bounds = array<i64: 16, 256>}]} {
    %c0_i32 = arith.constant 0 : i32
    %0 = arith.cmpi eq, %arg1, %c0_i32 : i32
    %1 = arith.extui %0 : i1 to i32
    %c0_i32_0 = arith.constant 0 : i32
    %2 = arith.cmpi ne, %1, %c0_i32_0 : i32
    scf.if %2 {
      %cst_31 = arith.constant 0.000000e+00 : f32
      %38 = vector.broadcast %cst_31 : f32 to vector<16x256xf32>
      %c0_32 = arith.constant 0 : index
      %c0_33 = arith.constant 0 : index
      %39 = vector.load %arg11[%c0_32, %c0_33] : memref<16x256xf32, #tpu.memory_space<vmem>>, vector<16x256xf32>
      tpu.vector_store %arg11[%c0_32, %c0_33], %38 {strides = array<i32>} : memref<16x256xf32, #tpu.memory_space<vmem>>, vector<16x256xf32>,
    } else {
    }
    %c0 = arith.constant 0 : index
    %c0_1 = arith.constant 0 : index
    %c0_2 = arith.constant 0 : index
    %3 = vector.load %arg2[%c0, %c0_1, %c0_2] : memref<16x8x8xbf16, #tpu.memory_space<vmem>>, vector<16x8x8xbf16>
    %4 = vector.shape_cast %3 : vector<16x8x8xbf16> to vector<128x8xbf16>
    %c0_3 = arith.constant 0 : index
    %c0_4 = arith.constant 0 : index
    %5 = vector.load %arg4[%c0_3, %c0_4] : memref<8x128xbf16, #tpu.memory_space<vmem>>, vector<8x128xbf16>
    %cst = arith.constant dense<0.000000e+00> : vector<128x128xf32>
    %6 = tpu.matmul %4, %5, %cst {dimension_numbers = #tpu.dot_dimension_numbers<[1], [0], [0], [1], [0, 0, 1, 1], [], []>} : vector<128x8xbf16>, vector<8x128xbf16>, vector<128x128xf32> -> vector<128x128xf32>
    %c0_5 = arith.constant 0 : index
    %c0_6 = arith.constant 0 : index
    %c0_7 = arith.constant 0 : index
    %7 = vector.load %arg3[%c0_5, %c0_6, %c0_7] : memref<16x8x256xbf16, #tpu.memory_space<vmem>>, vector<16x8x256xbf16>
    %8 = vector.shape_cast %7 : vector<16x8x256xbf16> to vector<128x256xbf16>
    %c0_8 = arith.constant 0 : index
    %c0_9 = arith.constant 0 : index
    %9 = vector.load %arg5[%c0_8, %c0_9] : memref<256x128xbf16, #tpu.memory_space<vmem>>, vector<256x128xbf16>
    %cst_10 = arith.constant dense<0.000000e+00> : vector<128x128xf32>
    %10 = tpu.matmul %8, %9, %cst_10 {dimension_numbers = #tpu.dot_dimension_numbers<[1], [0], [0], [1], [0, 0, 1, 1], [], []>} : vector<128x256xbf16>, vector<256x128xbf16>, vector<128x128xf32> -> vector<128x128xf32>
    %11 = arith.addf %6, %10 : vector<128x128xf32>
    %c0_11 = arith.constant 0 : index
    %c0_12 = arith.constant 0 : index
    %12 = vector.load %arg6[%c0_11, %c0_12] : memref<1x128xf32, #tpu.memory_space<vmem>>, vector<1x128xf32>
    %13 = vector.broadcast %12 : vector<1x128xf32> to vector<128x128xf32>
    %14 = arith.addf %11, %13 : vector<128x128xf32>
    %cst_13 = arith.constant 0.000000e+00 : f32
    %15 = vector.broadcast %cst_13 : f32 to vector<128x128xf32>
    %16 = arith.maximumf %14, %15 : vector<128x128xf32>
    %17 = arith.truncf %16 : vector<128x128xf32> to vector<128x128xbf16>
    %c0_14 = arith.constant 0 : index
    %c0_15 = arith.constant 0 : index
    %18 = vector.load %arg7[%c0_14, %c0_15] : memref<128x128xbf16, #tpu.memory_space<vmem>>, vector<128x128xbf16>
    %cst_16 = arith.constant dense<0.000000e+00> : vector<128x128xf32>
    %19 = tpu.matmul %17, %18, %cst_16 {dimension_numbers = #tpu.dot_dimension_numbers<[1], [0], [0], [1], [0, 0, 1, 1], [], []>} : vector<128x128xbf16>, vector<128x128xbf16>, vector<128x128xf32> -> vector<128x128xf32>
    %c0_17 = arith.constant 0 : index
    %c0_18 = arith.constant 0 : index
    %20 = vector.load %arg8[%c0_17, %c0_18] : memref<1x128xf32, #tpu.memory_space<vmem>>, vector<1x128xf32>
    %21 = vector.broadcast %20 : vector<1x128xf32> to vector<128x128xf32>
    %22 = arith.addf %19, %21 : vector<128x128xf32>
    %cst_19 = arith.constant 0.000000e+00 : f32
    %23 = vector.broadcast %cst_19 : f32 to vector<128x128xf32>
    %24 = arith.maximumf %22, %23 : vector<128x128xf32>
    %25 = arith.truncf %24 : vector<128x128xf32> to vector<128x128xbf16>
    %c0_20 = arith.constant 0 : index
    %c0_21 = arith.constant 0 : index
    %26 = vector.load %arg9[%c0_20, %c0_21] : memref<128x256xbf16, #tpu.memory_space<vmem>>, vector<128x256xbf16>
    %cst_22 = arith.constant dense<0.000000e+00> : vector<128x256xf32>
    %27 = tpu.matmul %25, %26, %cst_22 {dimension_numbers = #tpu.dot_dimension_numbers<[1], [0], [0], [1], [0, 0, 1, 1], [], []>} : vector<128x128xbf16>, vector<128x256xbf16>, vector<128x256xf32> -> vector<128x256xf32>
    %c0_23 = arith.constant 0 : index
    %c0_24 = arith.constant 0 : index
    %28 = vector.load %arg10[%c0_23, %c0_24] : memref<1x256xf32, #tpu.memory_space<vmem>>, vector<1x256xf32>
    %29 = vector.broadcast %28 : vector<1x256xf32> to vector<128x256xf32>
    %30 = arith.addf %27, %29 : vector<128x256xf32>
    %cst_25 = arith.constant 0.000000e+00 : f32
    %31 = vector.broadcast %cst_25 : f32 to vector<128x256xf32>
    %32 = arith.maximumf %30, %31 : vector<128x256xf32>
    %c0_26 = arith.constant 0 : index
    %c0_27 = arith.constant 0 : index
    %33 = vector.load %arg11[%c0_26, %c0_27] : memref<16x256xf32, #tpu.memory_space<vmem>>, vector<16x256xf32>
    %34 = vector.shape_cast %32 : vector<128x256xf32> to vector<16x8x256xf32>
    %cst_28 = arith.constant dense<0xFF800000> : vector<16x256xf32>
    %35 = vector.multi_reduction <maximumf>, %34, %cst_28 [1] : vector<16x8x256xf32> to vector<16x256xf32>
    %36 = arith.maximumf %33, %35 : vector<16x256xf32>
    %c0_29 = arith.constant 0 : index
    %c0_30 = arith.constant 0 : index
    %37 = vector.load %arg11[%c0_29, %c0_30] : memref<16x256xf32, #tpu.memory_space<vmem>>, vector<16x256xf32>
    tpu.vector_store %arg11[%c0_29, %c0_30], %36 {strides = array<i32>} : memref<16x256xf32, #tpu.memory_space<vmem>>, vector<16x256xf32>,
    return
  }
  func.func @transform_0(%arg0: i32, %arg1: i32) -> (i32, i32, i32) {
    %c0_i32 = arith.constant 0 : i32
    %c0_i32_0 = arith.constant 0 : i32
    return %arg0, %arg1, %c0_i32 : i32, i32, i32
  }
  func.func @transform_1(%arg0: i32, %arg1: i32) -> (i32, i32, i32) {
    %c0_i32 = arith.constant 0 : i32
    %c0_i32_0 = arith.constant 0 : i32
    return %arg0, %arg1, %c0_i32 : i32, i32, i32
  }
  func.func @transform_2(%arg0: i32, %arg1: i32) -> (i32, i32) {
    %c0_i32 = arith.constant 0 : i32
    %c0_i32_0 = arith.constant 0 : i32
    %c0_i32_1 = arith.constant 0 : i32
    return %c0_i32, %c0_i32_0 : i32, i32
  }
  func.func @transform_3(%arg0: i32, %arg1: i32) -> (i32, i32) {
    %c0_i32 = arith.constant 0 : i32
    %c0_i32_0 = arith.constant 0 : i32
    %c0_i32_1 = arith.constant 0 : i32
    return %c0_i32, %c0_i32_0 : i32, i32
  }
  func.func @transform_4(%arg0: i32, %arg1: i32) -> (i32, i32) {
    %c0_i32 = arith.constant 0 : i32
    %c0_i32_0 = arith.constant 0 : i32
    %c0_i32_1 = arith.constant 0 : i32
    return %c0_i32, %c0_i32_0 : i32, i32
  }
  func.func @transform_5(%arg0: i32, %arg1: i32) -> (i32, i32) {
    %c0_i32 = arith.constant 0 : i32
    %c0_i32_0 = arith.constant 0 : i32
    %c0_i32_1 = arith.constant 0 : i32
    return %c0_i32, %c0_i32_0 : i32, i32
  }
  func.func @transform_6(%arg0: i32, %arg1: i32) -> (i32, i32) {
    %c0_i32 = arith.constant 0 : i32
    %c0_i32_0 = arith.constant 0 : i32
    %c0_i32_1 = arith.constant 0 : i32
    return %c0_i32, %c0_i32_0 : i32, i32
  }
  func.func @transform_7(%arg0: i32, %arg1: i32) -> (i32, i32) {
    %c0_i32 = arith.constant 0 : i32
    %c0_i32_0 = arith.constant 0 : i32
    %c0_i32_1 = arith.constant 0 : i32
    return %c0_i32, %c0_i32_0 : i32, i32
  }
  func.func @transform_8(%arg0: i32, %arg1: i32) -> (i32, i32) {
    %c0_i32 = arith.constant 0 : i32
    %c0_i32_0 = arith.constant 0 : i32
    %c0_i32_1 = arith.constant 0 : i32
    return %c0_i32, %c0_i32_0 : i32, i32
  }
  func.func @transform_9(%arg0: i32, %arg1: i32) -> (i32, i32) {
    %c0_i32 = arith.constant 0 : i32
    %c0_i32_0 = arith.constant 0 : i32
    return %arg0, %c0_i32 : i32, i32
  }
}

module attributes {stable_mosaic.version = 11 : i64} {
  func.func @kernel(%arg0: i32, %arg1: i32, %arg2: memref<8x8x8xbf16, #tpu.memory_space<vmem>>, %arg3: memref<8x8x256xbf16, #tpu.memory_space<vmem>>, %arg4: memref<8x128xbf16, #tpu.memory_space<vmem>>, %arg5: memref<256x128xbf16, #tpu.memory_space<vmem>>, %arg6: memref<1x128xf32, #tpu.memory_space<vmem>>, %arg7: memref<128x128xbf16, #tpu.memory_space<vmem>>, %arg8: memref<1x128xf32, #tpu.memory_space<vmem>>, %arg9: memref<128x256xbf16, #tpu.memory_space<vmem>>, %arg10: memref<1x256xf32, #tpu.memory_space<vmem>>, %arg11: memref<8x256xf32, #tpu.memory_space<vmem>>) attributes {dimension_semantics = [#tpu.dimension_semantics<parallel>, #tpu.dimension_semantics<arbitrary>], iteration_bounds = array<i64: 2, 1>, scalar_prefetch = 0 : i64, scratch_operands = 0 : i64, tpu.core_type = #tpu.core_type<tc>, window_params = [{transform_indices = @transform_0, window_bounds = array<i64: 8, 8, 8>}, {transform_indices = @transform_1, window_bounds = array<i64: 8, 8, 256>}, {pipeline_mode = #tpu.pipeline_mode<synchronous>, transform_indices = @transform_2, window_bounds = array<i64: 8, 128>}, {pipeline_mode = #tpu.pipeline_mode<synchronous>, transform_indices = @transform_3, window_bounds = array<i64: 256, 128>}, {pipeline_mode = #tpu.pipeline_mode<synchronous>, transform_indices = @transform_4, window_bounds = array<i64: 1, 128>}, {pipeline_mode = #tpu.pipeline_mode<synchronous>, transform_indices = @transform_5, window_bounds = array<i64: 128, 128>}, {pipeline_mode = #tpu.pipeline_mode<synchronous>, transform_indices = @transform_6, window_bounds = array<i64: 1, 128>}, {pipeline_mode = #tpu.pipeline_mode<synchronous>, transform_indices = @transform_7, window_bounds = array<i64: 128, 256>}, {pipeline_mode = #tpu.pipeline_mode<synchronous>, transform_indices = @transform_8, window_bounds = array<i64: 1, 256>}, {transform_indices = @transform_9, window_bounds = array<i64: 8, 256>}]} {
    %c0_i32 = arith.constant 0 : i32
    %0 = arith.cmpi eq, %arg1, %c0_i32 : i32
    %1 = arith.extui %0 : i1 to i32
    %c0_i32_0 = arith.constant 0 : i32
    %2 = arith.cmpi ne, %1, %c0_i32_0 : i32
    scf.if %2 {
      %cst_31 = arith.constant 0.000000e+00 : f32
      %38 = vector.broadcast %cst_31 : f32 to vector<8x256xf32>
      %c0_32 = arith.constant 0 : index
      %c0_33 = arith.constant 0 : index
      %39 = vector.load %arg11[%c0_32, %c0_33] : memref<8x256xf32, #tpu.memory_space<vmem>>, vector<8x256xf32>
      tpu.vector_store %arg11[%c0_32, %c0_33], %38 {strides = array<i32>} : memref<8x256xf32, #tpu.memory_space<vmem>>, vector<8x256xf32>,
    } else {
    }
    %c0 = arith.constant 0 : index
    %c0_1 = arith.constant 0 : index
    %c0_2 = arith.constant 0 : index
    %3 = vector.load %arg2[%c0, %c0_1, %c0_2] : memref<8x8x8xbf16, #tpu.memory_space<vmem>>, vector<8x8x8xbf16>
    %4 = vector.shape_cast %3 : vector<8x8x8xbf16> to vector<64x8xbf16>
    %c0_3 = arith.constant 0 : index
    %c0_4 = arith.constant 0 : index
    %5 = vector.load %arg4[%c0_3, %c0_4] : memref<8x128xbf16, #tpu.memory_space<vmem>>, vector<8x128xbf16>
    %cst = arith.constant dense<0.000000e+00> : vector<64x128xf32>
    %6 = tpu.matmul %4, %5, %cst {dimension_numbers = #tpu.dot_dimension_numbers<[1], [0], [0], [1], [0, 0, 1, 1], [], []>} : vector<64x8xbf16>, vector<8x128xbf16>, vector<64x128xf32> -> vector<64x128xf32>
    %c0_5 = arith.constant 0 : index
    %c0_6 = arith.constant 0 : index
    %c0_7 = arith.constant 0 : index
    %7 = vector.load %arg3[%c0_5, %c0_6, %c0_7] : memref<8x8x256xbf16, #tpu.memory_space<vmem>>, vector<8x8x256xbf16>
    %8 = vector.shape_cast %7 : vector<8x8x256xbf16> to vector<64x256xbf16>
    %c0_8 = arith.constant 0 : index
    %c0_9 = arith.constant 0 : index
    %9 = vector.load %arg5[%c0_8, %c0_9] : memref<256x128xbf16, #tpu.memory_space<vmem>>, vector<256x128xbf16>
    %cst_10 = arith.constant dense<0.000000e+00> : vector<64x128xf32>
    %10 = tpu.matmul %8, %9, %cst_10 {dimension_numbers = #tpu.dot_dimension_numbers<[1], [0], [0], [1], [0, 0, 1, 1], [], []>} : vector<64x256xbf16>, vector<256x128xbf16>, vector<64x128xf32> -> vector<64x128xf32>
    %11 = arith.addf %6, %10 : vector<64x128xf32>
    %c0_11 = arith.constant 0 : index
    %c0_12 = arith.constant 0 : index
    %12 = vector.load %arg6[%c0_11, %c0_12] : memref<1x128xf32, #tpu.memory_space<vmem>>, vector<1x128xf32>
    %13 = vector.broadcast %12 : vector<1x128xf32> to vector<64x128xf32>
    %14 = arith.addf %11, %13 : vector<64x128xf32>
    %cst_13 = arith.constant 0.000000e+00 : f32
    %15 = vector.broadcast %cst_13 : f32 to vector<64x128xf32>
    %16 = arith.maximumf %14, %15 : vector<64x128xf32>
    %17 = arith.truncf %16 : vector<64x128xf32> to vector<64x128xbf16>
    %c0_14 = arith.constant 0 : index
    %c0_15 = arith.constant 0 : index
    %18 = vector.load %arg7[%c0_14, %c0_15] : memref<128x128xbf16, #tpu.memory_space<vmem>>, vector<128x128xbf16>
    %cst_16 = arith.constant dense<0.000000e+00> : vector<64x128xf32>
    %19 = tpu.matmul %17, %18, %cst_16 {dimension_numbers = #tpu.dot_dimension_numbers<[1], [0], [0], [1], [0, 0, 1, 1], [], []>} : vector<64x128xbf16>, vector<128x128xbf16>, vector<64x128xf32> -> vector<64x128xf32>
    %c0_17 = arith.constant 0 : index
    %c0_18 = arith.constant 0 : index
    %20 = vector.load %arg8[%c0_17, %c0_18] : memref<1x128xf32, #tpu.memory_space<vmem>>, vector<1x128xf32>
    %21 = vector.broadcast %20 : vector<1x128xf32> to vector<64x128xf32>
    %22 = arith.addf %19, %21 : vector<64x128xf32>
    %cst_19 = arith.constant 0.000000e+00 : f32
    %23 = vector.broadcast %cst_19 : f32 to vector<64x128xf32>
    %24 = arith.maximumf %22, %23 : vector<64x128xf32>
    %25 = arith.truncf %24 : vector<64x128xf32> to vector<64x128xbf16>
    %c0_20 = arith.constant 0 : index
    %c0_21 = arith.constant 0 : index
    %26 = vector.load %arg9[%c0_20, %c0_21] : memref<128x256xbf16, #tpu.memory_space<vmem>>, vector<128x256xbf16>
    %cst_22 = arith.constant dense<0.000000e+00> : vector<64x256xf32>
    %27 = tpu.matmul %25, %26, %cst_22 {dimension_numbers = #tpu.dot_dimension_numbers<[1], [0], [0], [1], [0, 0, 1, 1], [], []>} : vector<64x128xbf16>, vector<128x256xbf16>, vector<64x256xf32> -> vector<64x256xf32>
    %c0_23 = arith.constant 0 : index
    %c0_24 = arith.constant 0 : index
    %28 = vector.load %arg10[%c0_23, %c0_24] : memref<1x256xf32, #tpu.memory_space<vmem>>, vector<1x256xf32>
    %29 = vector.broadcast %28 : vector<1x256xf32> to vector<64x256xf32>
    %30 = arith.addf %27, %29 : vector<64x256xf32>
    %cst_25 = arith.constant 0.000000e+00 : f32
    %31 = vector.broadcast %cst_25 : f32 to vector<64x256xf32>
    %32 = arith.maximumf %30, %31 : vector<64x256xf32>
    %c0_26 = arith.constant 0 : index
    %c0_27 = arith.constant 0 : index
    %33 = vector.load %arg11[%c0_26, %c0_27] : memref<8x256xf32, #tpu.memory_space<vmem>>, vector<8x256xf32>
    %34 = vector.shape_cast %32 : vector<64x256xf32> to vector<8x8x256xf32>
    %cst_28 = arith.constant dense<0xFF800000> : vector<8x256xf32>
    %35 = vector.multi_reduction <maximumf>, %34, %cst_28 [1] : vector<8x8x256xf32> to vector<8x256xf32>
    %36 = arith.maximumf %33, %35 : vector<8x256xf32>
    %c0_29 = arith.constant 0 : index
    %c0_30 = arith.constant 0 : index
    %37 = vector.load %arg11[%c0_29, %c0_30] : memref<8x256xf32, #tpu.memory_space<vmem>>, vector<8x256xf32>
    tpu.vector_store %arg11[%c0_29, %c0_30], %36 {strides = array<i32>} : memref<8x256xf32, #tpu.memory_space<vmem>>, vector<8x256xf32>,
    return
  }
  func.func @transform_0(%arg0: i32, %arg1: i32) -> (i32, i32, i32) {
    %c0_i32 = arith.constant 0 : i32
    %c0_i32_0 = arith.constant 0 : i32
    return %arg0, %arg1, %c0_i32 : i32, i32, i32
  }
  func.func @transform_1(%arg0: i32, %arg1: i32) -> (i32, i32, i32) {
    %c0_i32 = arith.constant 0 : i32
    %c0_i32_0 = arith.constant 0 : i32
    return %arg0, %arg1, %c0_i32 : i32, i32, i32
  }
  func.func @transform_2(%arg0: i32, %arg1: i32) -> (i32, i32) {
    %c0_i32 = arith.constant 0 : i32
    %c0_i32_0 = arith.constant 0 : i32
    %c0_i32_1 = arith.constant 0 : i32
    return %c0_i32, %c0_i32_0 : i32, i32
  }
  func.func @transform_3(%arg0: i32, %arg1: i32) -> (i32, i32) {
    %c0_i32 = arith.constant 0 : i32
    %c0_i32_0 = arith.constant 0 : i32
    %c0_i32_1 = arith.constant 0 : i32
    return %c0_i32, %c0_i32_0 : i32, i32
  }
  func.func @transform_4(%arg0: i32, %arg1: i32) -> (i32, i32) {
    %c0_i32 = arith.constant 0 : i32
    %c0_i32_0 = arith.constant 0 : i32
    %c0_i32_1 = arith.constant 0 : i32
    return %c0_i32, %c0_i32_0 : i32, i32
  }
  func.func @transform_5(%arg0: i32, %arg1: i32) -> (i32, i32) {
    %c0_i32 = arith.constant 0 : i32
    %c0_i32_0 = arith.constant 0 : i32
    %c0_i32_1 = arith.constant 0 : i32
    return %c0_i32, %c0_i32_0 : i32, i32
  }
  func.func @transform_6(%arg0: i32, %arg1: i32) -> (i32, i32) {
    %c0_i32 = arith.constant 0 : i32
    %c0_i32_0 = arith.constant 0 : i32
    %c0_i32_1 = arith.constant 0 : i32
    return %c0_i32, %c0_i32_0 : i32, i32
  }
  func.func @transform_7(%arg0: i32, %arg1: i32) -> (i32, i32) {
    %c0_i32 = arith.constant 0 : i32
    %c0_i32_0 = arith.constant 0 : i32
    %c0_i32_1 = arith.constant 0 : i32
    return %c0_i32, %c0_i32_0 : i32, i32
  }
  func.func @transform_8(%arg0: i32, %arg1: i32) -> (i32, i32) {
    %c0_i32 = arith.constant 0 : i32
    %c0_i32_0 = arith.constant 0 : i32
    %c0_i32_1 = arith.constant 0 : i32
    return %c0_i32, %c0_i32_0 : i32, i32
  }
  func.func @transform_9(%arg0: i32, %arg1: i32) -> (i32, i32) {
    %c0_i32 = arith.constant 0 : i32
    %c0_i32_0 = arith.constant 0 : i32
    return %arg0, %c0_i32 : i32, i32
  }
}

module attributes {stable_mosaic.version = 11 : i64} {
  func.func @kernel(%arg0: i32, %arg1: memref<16x512xbf16, #tpu.memory_space<vmem>>, %arg2: memref<512x256xbf16, #tpu.memory_space<vmem>>, %arg3: memref<1x256xf32, #tpu.memory_space<vmem>>, %arg4: memref<256x256xbf16, #tpu.memory_space<vmem>>, %arg5: memref<1x256xf32, #tpu.memory_space<vmem>>, %arg6: memref<16x256xf32, #tpu.memory_space<vmem>>) attributes {dimension_semantics = [#tpu.dimension_semantics<parallel>], iteration_bounds = array<i64: 2>, scalar_prefetch = 0 : i64, scratch_operands = 0 : i64, tpu.core_type = #tpu.core_type<tc>, window_params = [{transform_indices = @transform_0, window_bounds = array<i64: 16, 512>}, {pipeline_mode = #tpu.pipeline_mode<synchronous>, transform_indices = @transform_1, window_bounds = array<i64: 512, 256>}, {pipeline_mode = #tpu.pipeline_mode<synchronous>, transform_indices = @transform_2, window_bounds = array<i64: 1, 256>}, {pipeline_mode = #tpu.pipeline_mode<synchronous>, transform_indices = @transform_3, window_bounds = array<i64: 256, 256>}, {pipeline_mode = #tpu.pipeline_mode<synchronous>, transform_indices = @transform_4, window_bounds = array<i64: 1, 256>}, {transform_indices = @transform_5, window_bounds = array<i64: 16, 256>}]} {
    %c0 = arith.constant 0 : index
    %c0_0 = arith.constant 0 : index
    %0 = vector.load %arg1[%c0, %c0_0] : memref<16x512xbf16, #tpu.memory_space<vmem>>, vector<16x512xbf16>
    %c0_1 = arith.constant 0 : index
    %c0_2 = arith.constant 0 : index
    %1 = vector.load %arg2[%c0_1, %c0_2] : memref<512x256xbf16, #tpu.memory_space<vmem>>, vector<512x256xbf16>
    %cst = arith.constant dense<0.000000e+00> : vector<16x256xf32>
    %2 = tpu.matmul %0, %1, %cst {dimension_numbers = #tpu.dot_dimension_numbers<[1], [0], [0], [1], [0, 0, 1, 1], [], []>} : vector<16x512xbf16>, vector<512x256xbf16>, vector<16x256xf32> -> vector<16x256xf32>
    %c0_3 = arith.constant 0 : index
    %c0_4 = arith.constant 0 : index
    %3 = vector.load %arg3[%c0_3, %c0_4] : memref<1x256xf32, #tpu.memory_space<vmem>>, vector<1x256xf32>
    %4 = vector.broadcast %3 : vector<1x256xf32> to vector<16x256xf32>
    %5 = arith.addf %2, %4 : vector<16x256xf32>
    %cst_5 = arith.constant 0.000000e+00 : f32
    %6 = vector.broadcast %cst_5 : f32 to vector<16x256xf32>
    %7 = arith.maximumf %5, %6 : vector<16x256xf32>
    %8 = arith.truncf %7 : vector<16x256xf32> to vector<16x256xbf16>
    %c0_6 = arith.constant 0 : index
    %c0_7 = arith.constant 0 : index
    %9 = vector.load %arg4[%c0_6, %c0_7] : memref<256x256xbf16, #tpu.memory_space<vmem>>, vector<256x256xbf16>
    %cst_8 = arith.constant dense<0.000000e+00> : vector<16x256xf32>
    %10 = tpu.matmul %8, %9, %cst_8 {dimension_numbers = #tpu.dot_dimension_numbers<[1], [0], [0], [1], [0, 0, 1, 1], [], []>} : vector<16x256xbf16>, vector<256x256xbf16>, vector<16x256xf32> -> vector<16x256xf32>
    %c0_9 = arith.constant 0 : index
    %c0_10 = arith.constant 0 : index
    %11 = vector.load %arg5[%c0_9, %c0_10] : memref<1x256xf32, #tpu.memory_space<vmem>>, vector<1x256xf32>
    %12 = vector.broadcast %11 : vector<1x256xf32> to vector<16x256xf32>
    %13 = arith.addf %10, %12 : vector<16x256xf32>
    %cst_11 = arith.constant 0.000000e+00 : f32
    %14 = vector.broadcast %cst_11 : f32 to vector<16x256xf32>
    %15 = arith.maximumf %13, %14 : vector<16x256xf32>
    %c0_12 = arith.constant 0 : index
    %c0_13 = arith.constant 0 : index
    %16 = vector.load %arg6[%c0_12, %c0_13] : memref<16x256xf32, #tpu.memory_space<vmem>>, vector<16x256xf32>
    tpu.vector_store %arg6[%c0_12, %c0_13], %15 {strides = array<i32>} : memref<16x256xf32, #tpu.memory_space<vmem>>, vector<16x256xf32>,
    return
  }
  func.func @transform_0(%arg0: i32) -> (i32, i32) {
    %c0_i32 = arith.constant 0 : i32
    %c0_i32_0 = arith.constant 0 : i32
    return %arg0, %c0_i32 : i32, i32
  }
  func.func @transform_1(%arg0: i32) -> (i32, i32) {
    %c0_i32 = arith.constant 0 : i32
    %c0_i32_0 = arith.constant 0 : i32
    %c0_i32_1 = arith.constant 0 : i32
    return %c0_i32, %c0_i32_0 : i32, i32
  }
  func.func @transform_2(%arg0: i32) -> (i32, i32) {
    %c0_i32 = arith.constant 0 : i32
    %c0_i32_0 = arith.constant 0 : i32
    %c0_i32_1 = arith.constant 0 : i32
    return %c0_i32, %c0_i32_0 : i32, i32
  }
  func.func @transform_3(%arg0: i32) -> (i32, i32) {
    %c0_i32 = arith.constant 0 : i32
    %c0_i32_0 = arith.constant 0 : i32
    %c0_i32_1 = arith.constant 0 : i32
    return %c0_i32, %c0_i32_0 : i32, i32
  }
  func.func @transform_4(%arg0: i32) -> (i32, i32) {
    %c0_i32 = arith.constant 0 : i32
    %c0_i32_0 = arith.constant 0 : i32
    %c0_i32_1 = arith.constant 0 : i32
    return %c0_i32, %c0_i32_0 : i32, i32
  }
  func.func @transform_5(%arg0: i32) -> (i32, i32) {
    %c0_i32 = arith.constant 0 : i32
    %c0_i32_0 = arith.constant 0 : i32
    return %arg0, %c0_i32 : i32, i32
  }
}

module attributes {stable_mosaic.version = 11 : i64} {
  func.func @kernel(%arg0: i32, %arg1: memref<32x512xbf16, #tpu.memory_space<vmem>>, %arg2: memref<512x256xbf16, #tpu.memory_space<vmem>>, %arg3: memref<1x256xf32, #tpu.memory_space<vmem>>, %arg4: memref<256x256xbf16, #tpu.memory_space<vmem>>, %arg5: memref<1x256xf32, #tpu.memory_space<vmem>>, %arg6: memref<32x256xf32, #tpu.memory_space<vmem>>) attributes {dimension_semantics = [#tpu.dimension_semantics<parallel>], iteration_bounds = array<i64: 2>, scalar_prefetch = 0 : i64, scratch_operands = 0 : i64, tpu.core_type = #tpu.core_type<tc>, window_params = [{transform_indices = @transform_0, window_bounds = array<i64: 32, 512>}, {pipeline_mode = #tpu.pipeline_mode<synchronous>, transform_indices = @transform_1, window_bounds = array<i64: 512, 256>}, {pipeline_mode = #tpu.pipeline_mode<synchronous>, transform_indices = @transform_2, window_bounds = array<i64: 1, 256>}, {pipeline_mode = #tpu.pipeline_mode<synchronous>, transform_indices = @transform_3, window_bounds = array<i64: 256, 256>}, {pipeline_mode = #tpu.pipeline_mode<synchronous>, transform_indices = @transform_4, window_bounds = array<i64: 1, 256>}, {transform_indices = @transform_5, window_bounds = array<i64: 32, 256>}]} {
    %c0 = arith.constant 0 : index
    %c0_0 = arith.constant 0 : index
    %0 = vector.load %arg1[%c0, %c0_0] : memref<32x512xbf16, #tpu.memory_space<vmem>>, vector<32x512xbf16>
    %c0_1 = arith.constant 0 : index
    %c0_2 = arith.constant 0 : index
    %1 = vector.load %arg2[%c0_1, %c0_2] : memref<512x256xbf16, #tpu.memory_space<vmem>>, vector<512x256xbf16>
    %cst = arith.constant dense<0.000000e+00> : vector<32x256xf32>
    %2 = tpu.matmul %0, %1, %cst {dimension_numbers = #tpu.dot_dimension_numbers<[1], [0], [0], [1], [0, 0, 1, 1], [], []>} : vector<32x512xbf16>, vector<512x256xbf16>, vector<32x256xf32> -> vector<32x256xf32>
    %c0_3 = arith.constant 0 : index
    %c0_4 = arith.constant 0 : index
    %3 = vector.load %arg3[%c0_3, %c0_4] : memref<1x256xf32, #tpu.memory_space<vmem>>, vector<1x256xf32>
    %4 = vector.broadcast %3 : vector<1x256xf32> to vector<32x256xf32>
    %5 = arith.addf %2, %4 : vector<32x256xf32>
    %cst_5 = arith.constant 0.000000e+00 : f32
    %6 = vector.broadcast %cst_5 : f32 to vector<32x256xf32>
    %7 = arith.maximumf %5, %6 : vector<32x256xf32>
    %8 = arith.truncf %7 : vector<32x256xf32> to vector<32x256xbf16>
    %c0_6 = arith.constant 0 : index
    %c0_7 = arith.constant 0 : index
    %9 = vector.load %arg4[%c0_6, %c0_7] : memref<256x256xbf16, #tpu.memory_space<vmem>>, vector<256x256xbf16>
    %cst_8 = arith.constant dense<0.000000e+00> : vector<32x256xf32>
    %10 = tpu.matmul %8, %9, %cst_8 {dimension_numbers = #tpu.dot_dimension_numbers<[1], [0], [0], [1], [0, 0, 1, 1], [], []>} : vector<32x256xbf16>, vector<256x256xbf16>, vector<32x256xf32> -> vector<32x256xf32>
    %c0_9 = arith.constant 0 : index
    %c0_10 = arith.constant 0 : index
    %11 = vector.load %arg5[%c0_9, %c0_10] : memref<1x256xf32, #tpu.memory_space<vmem>>, vector<1x256xf32>
    %12 = vector.broadcast %11 : vector<1x256xf32> to vector<32x256xf32>
    %13 = arith.addf %10, %12 : vector<32x256xf32>
    %cst_11 = arith.constant 0.000000e+00 : f32
    %14 = vector.broadcast %cst_11 : f32 to vector<32x256xf32>
    %15 = arith.maximumf %13, %14 : vector<32x256xf32>
    %c0_12 = arith.constant 0 : index
    %c0_13 = arith.constant 0 : index
    %16 = vector.load %arg6[%c0_12, %c0_13] : memref<32x256xf32, #tpu.memory_space<vmem>>, vector<32x256xf32>
    tpu.vector_store %arg6[%c0_12, %c0_13], %15 {strides = array<i32>} : memref<32x256xf32, #tpu.memory_space<vmem>>, vector<32x256xf32>,
    return
  }
  func.func @transform_0(%arg0: i32) -> (i32, i32) {
    %c0_i32 = arith.constant 0 : i32
    %c0_i32_0 = arith.constant 0 : i32
    return %arg0, %c0_i32 : i32, i32
  }
  func.func @transform_1(%arg0: i32) -> (i32, i32) {
    %c0_i32 = arith.constant 0 : i32
    %c0_i32_0 = arith.constant 0 : i32
    %c0_i32_1 = arith.constant 0 : i32
    return %c0_i32, %c0_i32_0 : i32, i32
  }
  func.func @transform_2(%arg0: i32) -> (i32, i32) {
    %c0_i32 = arith.constant 0 : i32
    %c0_i32_0 = arith.constant 0 : i32
    %c0_i32_1 = arith.constant 0 : i32
    return %c0_i32, %c0_i32_0 : i32, i32
  }
  func.func @transform_3(%arg0: i32) -> (i32, i32) {
    %c0_i32 = arith.constant 0 : i32
    %c0_i32_0 = arith.constant 0 : i32
    %c0_i32_1 = arith.constant 0 : i32
    return %c0_i32, %c0_i32_0 : i32, i32
  }
  func.func @transform_4(%arg0: i32) -> (i32, i32) {
    %c0_i32 = arith.constant 0 : i32
    %c0_i32_0 = arith.constant 0 : i32
    %c0_i32_1 = arith.constant 0 : i32
    return %c0_i32, %c0_i32_0 : i32, i32
  }
  func.func @transform_5(%arg0: i32) -> (i32, i32) {
    %c0_i32 = arith.constant 0 : i32
    %c0_i32_0 = arith.constant 0 : i32
    return %arg0, %c0_i32 : i32, i32
  }
}

</mosaic_0001>

<bundles_post_ra>
// kernel: custom-call.34
= control target key start
LH: loop header
LB: loop body
LE: loop exit
PB: predicated region body
PF: predicated region fallthrough
CT: control target
= control target key end

     0   :  { %s6_s0 = inlined_call_operand.vmem [shape: f32[2,128], index: 0, kind: output, shape index: {}]  }

// kernel: custom-call.35
= control target key start
LH: loop header
LB: loop body
LE: loop exit
PB: predicated region body
PF: predicated region fallthrough
CT: control target
= control target key end

     0   :  { %s6_s0 = inlined_call_operand.vmem [shape: f32[2,64], index: 0, kind: output, shape index: {}]  }

// kernel: custom-call.36
= control target key start
LH: loop header
LB: loop body
LE: loop exit
PB: predicated region body
PF: predicated region fallthrough
CT: control target
= control target key end

     0   :  { %s6_s0 = inlined_call_operand.vmem [shape: f32[2,32], index: 0, kind: output, shape index: {}]  }

// kernel: custom-call.37
= control target key start
LH: loop header
LB: loop body
LE: loop exit
PB: predicated region body
PF: predicated region fallthrough
CT: control target
= control target key end

     0   :  { %s6_s0 = inlined_call_operand.vmem [shape: f32[2,16], index: 0, kind: output, shape index: {}]  }

// kernel: _lambda_.6
= control target key start
LH: loop header
LB: loop body
LE: loop exit
PB: predicated region body
PF: predicated region fallthrough
CT: control target
= control target key end

     0   :  { %s5318_s24 = smov 0   ;;  %s5320_s25 = smov 0   ;;  %s6325_s0 = inlined_call_operand.vmem [shape: bf16[128,16,8], index: 0, kind: input, shape index: {}]   ;;  %s6326_s1 = inlined_call_operand.vmem [shape: bf16[8,64], index: 1, kind: input, shape index: {}]   ;;  %s6327_s2 = inlined_call_operand.vmem [shape: f32[1,64], index: 2, kind: input, shape index: {}]   ;;  %s6328_s3 = inlined_call_operand.vmem [shape: bf16[64,64], index: 3, kind: input, shape index: {}]   ;;  %s6329_s4 = inlined_call_operand.vmem [shape: f32[1,64], index: 4, kind: input, shape index: {}]   ;;  %s6330_s5 = inlined_call_operand.vmem [shape: bf16[64,128], index: 5, kind: input, shape index: {}]   ;;  %s6331_s6 = inlined_call_operand.vmem [shape: f32[1,128], index: 6, kind: input, shape index: {}]   ;;  %s6332_s7 = inlined_call_operand.vmem [shape: f32[128,128], index: 7, kind: output, shape index: {}]  }
   0x1   :  { %s5322_s26 = smov 0  }
   0x2 LB: > { %s29_s27 = sadd.s32 1, %s5272_s25  ;;  %p4271_p0 = scmp.ge.s32.totalorder %s5276_s26, 1  ;;  %s5276_s26 = sphi %s5322_s26, %s17_s26   ;;  %s5272_s25 = sphi %s5320_s25, %s6335_s25   ;;  %s5268_s24 = sphi %s5318_s24, %s6334_s24  }
   0x3   : > { %p31_p1 = scmp.ge.s32.totalorder %s29_s27, 2  ;;  %p258_p2 = scmp.lt.s32.totalorder %s5276_s26, 3 }
   0x5   : > { %s6337_s27 = smov (%p31_p1, %s29_s27), 0  ;;  %p259_p3 = pnand %p4271_p0, %p258_p2 }
   0x6   : > { %s4272_s30 = sshll.u32 (!%p259_p3), %s5268_s24, 6  ;;  %s4275_s19 = sshll.u32 (!%p259_p3), %s5268_s24, 3 }
   0x7   : > { %262 = sbr.rel (%p259_p3) target bundleno = 899 (0x383), region = 48  ;;  %p297_p4 = scmp.lt.s32.totalorder (!%p259_p3), %s4272_s30, 127 }
   0x8   : > { %p6111_p5 = scmp.lt.s32.totalorder (!%p259_p3), %s4275_s19, 15 }
   0xc   : > { %v454_v0 = vld [vmem:[%s6326_s1] sm:$0xf]  ;;  %vm975_vm0 = vcmask 1043456   ;;  %v5201_v1 = vld [vmem:[%s6328_s3 + $0x18] sm:$0xff]   ;;  %s6339_s30 = smov (!%p297_p4, %s4272_s30), 127  ;;  %vm782_vm1 = vcmask 64512  }
   0xd   : > { %5152 = vmatprep.subr.msk.bf16.mxu0 %vm975_vm0, %v454_v0  ;;  %v977_v2 = vsel %vm975_vm0, %v454_v0, 0  ;;  %5153 = vmatprep.subr.msk.bf16.mxu1 %vm975_vm0, %v454_v0  ;;  %s4546_s10 = sshll.u32 %s6339_s30, 3  ;;  %v5218_v11 = vld [vmem:[%s6328_s3 + $0x10] sm:$0xff]   ;;  %v5231_v16 = vld [vmem:[%s6328_s3 + $0x8] sm:$0xff]   ;;  %v5240_v19 = vld [vmem:[%s6328_s3] sm:$0xff]   ;;  %vm1755_vm2 = vcmask 523264  }
   0xe   : > { %4749 = vmatpush3.bf16.msra.mxu0 %v977_v2  ;;  %5151 = vmatpush3.bf16.msra.mxu1 %v977_v2  ;;  %s5348_s13 = scalar_lea.vmem %s6325_s0, %s4546_s10  ;;  %vm4109_vm3 = vcmask 1041409   ;;  %vm4111_vm4 = vcmask 1042434   ;;  %vm4113_vm5 = vcmask 1043459   ;;  %vm4115_vm6 = vcmask 1044484   ;;  %s6341_s19 = smov (!%p6111_p5, %s4275_s19), 15 }
   0xf   : > { %4878 = vmatprep.subr.bf16.mxu1 %v5201_v1  ;;  %v5179_v3 = vld [vmem:[%s5348_s13] sm:$0xff]   ;;  %v5180_v4 = vld [vmem:[%s5348_s13 + $0x8] sm:$0xff]   ;;  %v5181_v5 = vld [vmem:[%s5348_s13 + $0x10] sm:$0xff]   ;;  %vm4117_vm7 = vcmask 1045509   ;;  %vm4119_vm8 = vcmask 1046534   ;;  %vm4121_vm9 = vcmask 1047559  }
  0x10   : > { %4750 = vmatprep.mubr.msk.bf16.mxu0 %vm782_vm1, %v5179_v3  ;;  %v5182_v6 = vld [vmem:[%s5348_s13 + $0x18] sm:$0xff]   ;;  %v5183_v7 = vld [vmem:[%s5348_s13 + $0x20] sm:$0xff]   ;;  %v5184_v8 = vld [vmem:[%s5348_s13 + $0x28] sm:$0xff]   ;;  %s4276_s24 = sshll.u32 %s6341_s19, 3 }
  0x11   : > { %4751 = vmatmul.mubr.msk.bf16.vlgmr.msra.gmra.mxu0 %vm782_vm1, %v5180_v4  ;;  %v5185_v9 = vld [vmem:[%s5348_s13 + $0x30] sm:$0xff]   ;;  %v5198_v10 = vld [vmem:[%s5348_s13 + $0x100] sm:$0xff]   ;;  %v5200_v12 = vld [vmem:[%s5348_s13 + $0x108] sm:$0xff]   ;;  %s6145_s23 = scalar_lea.vmem %s6332_s7, %s4276_s24 }
  0x12   : > { %4754 = vmatprep.mubr.msk.bf16.mxu0 %vm782_vm1, %v5181_v5  ;;  %4814 = vmatprep.mubr.msk.bf16.mxu1 %vm782_vm1, %v5198_v10  ;;  %v5186_v13 = vld [vmem:[%s5348_s13 + $0x38] sm:$0xff]   ;;  %v5203_v14 = vld [vmem:[%s5348_s13 + $0x110] sm:$0xff]   ;;  %v5187_v15 = vld [vmem:[%s5348_s13 + $0x40] sm:$0xff]  }
  0x13   : > { %4815 = vmatmul.mubr.msk.bf16.vlgmr.msra.gmra.mxu1 %vm782_vm1, %v5200_v12  ;;  %v5205_v17 = vld [vmem:[%s5348_s13 + $0x118] sm:$0xff]   ;;  %v5207_v18 = vld [vmem:[%s5348_s13 + $0x120] sm:$0xff]   ;;  %v5188_v20 = vld [vmem:[%s5348_s13 + $0x48] sm:$0xff]  }
  0x14   : > { %4879 = vmatpush3.bf16.msra.mxu1 %v5201_v1  ;;  %4818 = vmatprep.mubr.msk.bf16.mxu1 %vm782_vm1, %v5203_v14  ;;  %v5189_v21 = vld [vmem:[%s5348_s13 + $0x50] sm:$0xff]   ;;  %v5209_v22 = vld [vmem:[%s5348_s13 + $0x128] sm:$0xff]   ;;  %v5190_v24 = vld [vmem:[%s5348_s13 + $0x58] sm:$0xff]  }
  0x15   : > { %4880 = vmatprep.subr.bf16.mxu1 %v5218_v11  ;;  %v5211_v23 = vld [vmem:[%s5348_s13 + $0x130] sm:$0xff]   ;;  %v5191_v25 = vld [vmem:[%s5348_s13 + $0x60] sm:$0xff]   ;;  %v5213_v26 = vld [vmem:[%s5348_s13 + $0x138] sm:$0xff]  }
  0x16   : > { %v5215_v27 = vld [vmem:[%s5348_s13 + $0x140] sm:$0xff]   ;;  %v5192_v28 = vld [vmem:[%s5348_s13 + $0x68] sm:$0xff]   ;;  %v5193_v29 = vld [vmem:[%s5348_s13 + $0x70] sm:$0xff]  }
  0x17   : > { %v5217_v30 = vld [vmem:[%s5348_s13 + $0x148] sm:$0xff]   ;;  %v5220_v31 = vld [vmem:[%s5348_s13 + $0x150] sm:$0xff]   ;;  %v5194_v32 = vld [vmem:[%s5348_s13 + $0x78] sm:$0xff]  }
  0x18   : > { %4881 = vmatpush3.bf16.msra.mxu1 %v5218_v11  ;;  %v5195_v33 = vld [vmem:[%s5348_s13 + $0x80] sm:$0xff]   ;;  %v5222_v34 = vld [vmem:[%s5348_s13 + $0x158] sm:$0xff]   ;;  %v5196_v36 = vld [vmem:[%s5348_s13 + $0x88] sm:$0xff]  }
  0x19   : > { %4755 = vmatmul.mubr.msk.bf16.gmra.mxu0 %vm782_vm1, %v5182_v6  ;;  %4882 = vmatprep.subr.bf16.mxu1 %v5231_v16  ;;  %v5224_v35 = vld [vmem:[%s5348_s13 + $0x160] sm:$0xff]   ;;  %v5197_v37 = vld [vmem:[%s5348_s13 + $0x90] sm:$0xff]   ;;  %v5226_v38 = vld [vmem:[%s5348_s13 + $0x168] sm:$0xff]  }
  0x1a   : > { %4758 = vmatprep.mubr.msk.bf16.mxu0 %vm782_vm1, %v5183_v7  ;;  %v5227_v39 = vld [vmem:[%s5348_s13 + $0x170] sm:$0xff]   ;;  %v5199_v40 = vld [vmem:[%s5348_s13 + $0x98] sm:$0xff]   ;;  %v5202_v41 = vld [vmem:[%s5348_s13 + $0xa0] sm:$0xff]  }
  0x1b   : > { %4819 = vmatmul.mubr.msk.bf16.gmra.mxu1 %vm782_vm1, %v5205_v17  ;;  %v5228_v42 = vld [vmem:[%s5348_s13 + $0x178] sm:$0xff]   ;;  %v5229_v43 = vld [vmem:[%s5348_s13 + $0x180] sm:$0xff]   ;;  %v5204_v44 = vld [vmem:[%s5348_s13 + $0xa8] sm:$0xff]  }
  0x1c   : > { %4822 = vmatprep.mubr.msk.bf16.mxu1 %vm782_vm1, %v5207_v18  ;;  %4883 = vmatpush3.bf16.msra.mxu1 %v5231_v16  ;;  %v5206_v45 = vld [vmem:[%s5348_s13 + $0xb0] sm:$0xff]   ;;  %v5230_v46 = vld [vmem:[%s5348_s13 + $0x188] sm:$0xff]   ;;  %v5208_v48 = vld [vmem:[%s5348_s13 + $0xb8] sm:$0xff]  }
  0x1d   : > { %4884 = vmatprep.subr.bf16.mxu1 %v5240_v19  ;;  %v5232_v47 = vld [vmem:[%s5348_s13 + $0x190] sm:$0xff]   ;;  %v5210_v49 = vld [vmem:[%s5348_s13 + $0xc0] sm:$0xff]   ;;  %v5233_v50 = vld [vmem:[%s5348_s13 + $0x198] sm:$0xff]  }
  0x1e   : > { %v5234_v51 = vld [vmem:[%s5348_s13 + $0x1a0] sm:$0xff]   ;;  %v5212_v52 = vld [vmem:[%s5348_s13 + $0xc8] sm:$0xff]   ;;  %v5214_v53 = vld [vmem:[%s5348_s13 + $0xd0] sm:$0xff]  }
  0x1f   : > { %v5235_v54 = vld [vmem:[%s5348_s13 + $0x1a8] sm:$0xff]   ;;  %v5236_v55 = vld [vmem:[%s5348_s13 + $0x1b0] sm:$0xff]   ;;  %v5216_v56 = vld [vmem:[%s5348_s13 + $0xd8] sm:$0xff]  }
  0x20   : > { %4885 = vmatpush3.bf16.msra.mxu1 %v5240_v19  ;;  %v5219_v57 = vld [vmem:[%s5348_s13 + $0xe0] sm:$0xff]   ;;  %v5237_v58 = vld [vmem:[%s5348_s13 + $0x1b8] sm:$0xff]   ;;  %v5221_v60 = vld [vmem:[%s5348_s13 + $0xe8] sm:$0xff]  }
  0x21   : > { %4759 = vmatmul.mubr.msk.bf16.gmra.mxu0 %vm782_vm1, %v5184_v8  ;;  %v5238_v59 = vld [vmem:[%s5348_s13 + $0x1c0] sm:$0xff]   ;;  %v5223_v61 = vld [vmem:[%s5348_s13 + $0xf0] sm:$0xff]   ;;  %v5239_v62 = vld [vmem:[%s5348_s13 + $0x1c8] sm:$0xff]  }
  0x22   : > { %4762 = vmatprep.mubr.msk.bf16.mxu0 %vm782_vm1, %v5185_v9  ;;  %v5241_v63 = vld [vmem:[%s5348_s13 + $0x1d0] sm:$0xff]   ;;  %v5225_v0 = vld [vmem:[%s5348_s13 + $0xf8] sm:$0xff]   ;;  %v5243_v2 = vld [vmem:[%s5348_s13 + $0x1e0] sm:$0xff]  }
  0x23   : > { %4823 = vmatmul.mubr.msk.bf16.gmra.mxu1 %vm782_vm1, %v5209_v22  ;;  %v5242_v1 = vld [vmem:[%s5348_s13 + $0x1d8] sm:$0xff]   ;;  %v5244_v3 = vld [vmem:[%s5348_s13 + $0x1e8] sm:$0xff]   ;;  %v5245_v4 = vld [vmem:[%s5348_s13 + $0x1f0] sm:$0xff]  }
  0x24   : > { %4826 = vmatprep.mubr.msk.bf16.mxu1 %vm782_vm1, %v5211_v23  ;;  %v5246_v5 = vld [vmem:[%s5348_s13 + $0x1f8] sm:$0xff]   ;;  %v5248_v7 = vld [vmem:[%s6330_s5 + $0x10] sm:$0xff]   ;;  %v5496_v10 = vld [vmem:[%s6327_s2] ss:$0 sm:$0xff] }
  0x25   : > { %v5247_v6 = vld [vmem:[%s6330_s5 + $0x18] sm:$0xff]  }
  0x26   : > { %5014 = vmatprep.subr.bf16.mxu0 %v5247_v6 }
  0x27   : > { %5015 = vmatpush3.bf16.msra.mxu0 %v5247_v6 }
  0x28   : > { %5016 = vmatprep.subr.bf16.mxu0 %v5248_v7 }
  0x29   : > { %4763 = vmatmul.mubr.msk.bf16.gmra.mxu0 %vm782_vm1, %v5186_v13 }
  0x2a   : > { %4766 = vmatprep.mubr.msk.bf16.mxu0 %vm782_vm1, %v5187_v15 }
  0x2b   : > { %4827 = vmatmul.mubr.msk.bf16.gmra.mxu1 %vm782_vm1, %v5213_v26  ;;  %5017 = vmatpush3.bf16.msra.mxu0 %v5248_v7 }
  0x2c   : > { %4830 = vmatprep.mubr.msk.bf16.mxu1 %vm782_vm1, %v5215_v27 }
  0x31   : > { %4767 = vmatmul.mubr.msk.bf16.gmra.mxu0 %vm782_vm1, %v5188_v20 }
  0x32   : > { %4770 = vmatprep.mubr.msk.bf16.mxu0 %vm782_vm1, %v5189_v21 }
  0x33   : > { %4831 = vmatmul.mubr.msk.bf16.gmra.mxu1 %vm782_vm1, %v5217_v30 }
  0x34   : > { %4834 = vmatprep.mubr.msk.bf16.mxu1 %vm782_vm1, %v5220_v31 }
  0x39   : > { %4771 = vmatmul.mubr.msk.bf16.gmra.mxu0 %vm782_vm1, %v5190_v24 }
  0x3a   : > { %4774 = vmatprep.mubr.msk.bf16.mxu0 %vm782_vm1, %v5191_v25 }
  0x3b   : > { %4835 = vmatmul.mubr.msk.bf16.gmra.mxu1 %vm782_vm1, %v5222_v34 }
  0x3c   : > { %4838 = vmatprep.mubr.msk.bf16.mxu1 %vm782_vm1, %v5224_v35 }
  0x41   : > { %4775 = vmatmul.mubr.msk.bf16.gmra.mxu0 %vm782_vm1, %v5192_v28 }
  0x42   : > { %4778 = vmatprep.mubr.msk.bf16.mxu0 %vm782_vm1, %v5193_v29 }
  0x43   : > { %4839 = vmatmul.mubr.msk.bf16.gmra.mxu1 %vm782_vm1, %v5226_v38 }
  0x44   : > { %4842 = vmatprep.mubr.msk.bf16.mxu1 %vm782_vm1, %v5227_v39 }
  0x49   : > { %4779 = vmatmul.mubr.msk.bf16.gmra.mxu0 %vm782_vm1, %v5194_v32 }
  0x4a   : > { %4782 = vmatprep.mubr.msk.bf16.mxu0 %vm782_vm1, %v5195_v33 }
  0x4b   : > { %4843 = vmatmul.mubr.msk.bf16.gmra.mxu1 %vm782_vm1, %v5228_v42 }
  0x4c   : > { %4846 = vmatprep.mubr.msk.bf16.mxu1 %vm782_vm1, %v5229_v43 }
  0x51   : > { %4783 = vmatmul.mubr.msk.bf16.gmra.mxu0 %vm782_vm1, %v5196_v36 }
  0x52   : > { %4786 = vmatprep.mubr.msk.bf16.mxu0 %vm782_vm1, %v5197_v37 }
  0x53   : > { %4847 = vmatmul.mubr.msk.bf16.gmra.mxu1 %vm782_vm1, %v5230_v46 }
  0x54   : > { %4850 = vmatprep.mubr.msk.bf16.mxu1 %vm782_vm1, %v5232_v47  ;;  %v5249_v47 = vld [vmem:[%s6330_s5 + $0x8] sm:$0xff]  }
  0x55   : > { %5018 = vmatprep.subr.bf16.mxu0 %v5249_v47 }
  0x56   : > { %5019 = vmatpush3.bf16.msra.mxu0 %v5249_v47 }
  0x59   : > { %4787 = vmatmul.mubr.msk.bf16.gmra.mxu0 %vm782_vm1, %v5199_v40 }
  0x5a   : > { %4790 = vmatprep.mubr.msk.bf16.mxu0 %vm782_vm1, %v5202_v41 }
  0x5b   : > { %4851 = vmatmul.mubr.msk.bf16.gmra.mxu1 %vm782_vm1, %v5233_v50 }
  0x5c   : > { %4854 = vmatprep.mubr.msk.bf16.mxu1 %vm782_vm1, %v5234_v51 }
  0x61   : > { %4791 = vmatmul.mubr.msk.bf16.gmra.mxu0 %vm782_vm1, %v5204_v44 }
  0x62   : > { %4794 = vmatprep.mubr.msk.bf16.mxu0 %vm782_vm1, %v5206_v45 }
  0x63   : > { %4855 = vmatmul.mubr.msk.bf16.gmra.mxu1 %vm782_vm1, %v5235_v54 }
  0x64   : > { %4858 = vmatprep.mubr.msk.bf16.mxu1 %vm782_vm1, %v5236_v55 }
  0x69   : > { %4795 = vmatmul.mubr.msk.bf16.gmra.mxu0 %vm782_vm1, %v5208_v48 }
  0x6a   : > { %4798 = vmatprep.mubr.msk.bf16.mxu0 %vm782_vm1, %v5210_v49 }
  0x6b   : > { %4859 = vmatmul.mubr.msk.bf16.gmra.mxu1 %vm782_vm1, %v5237_v58 }
  0x6c   : > { %4862 = vmatprep.mubr.msk.bf16.mxu1 %vm782_vm1, %v5238_v59 }
  0x71   : > { %4799 = vmatmul.mubr.msk.bf16.gmra.mxu0 %vm782_vm1, %v5212_v52 }
  0x72   : > { %4802 = vmatprep.mubr.msk.bf16.mxu0 %vm782_vm1, %v5214_v53 }
  0x73   : > { %4863 = vmatmul.mubr.msk.bf16.gmra.mxu1 %vm782_vm1, %v5239_v62 }
  0x74   : > { %4866 = vmatprep.mubr.msk.bf16.mxu1 %vm782_vm1, %v5241_v63 }
  0x79   : > { %4803 = vmatmul.mubr.msk.bf16.gmra.mxu0 %vm782_vm1, %v5216_v56 }
  0x7a   : > { %4806 = vmatprep.mubr.msk.bf16.mxu0 %vm782_vm1, %v5219_v57 }
  0x7b   : > { %4867 = vmatmul.mubr.msk.bf16.gmra.mxu1 %vm782_vm1, %v5242_v1 }
  0x7c   : > { %4870 = vmatprep.mubr.msk.bf16.mxu1 %vm782_vm1, %v5243_v2 }
  0x81   : > { %4807 = vmatmul.mubr.msk.bf16.gmra.mxu0 %vm782_vm1, %v5221_v60 }
  0x82   : > { %4810 = vmatprep.mubr.msk.bf16.mxu0 %vm782_vm1, %v5223_v61 }
  0x83   : > { %4871 = vmatmul.mubr.msk.bf16.gmra.mxu1 %vm782_vm1, %v5244_v3 }
  0x84   : > { %4874 = vmatprep.mubr.msk.bf16.mxu1 %vm782_vm1, %v5245_v4 }
  0x89   : > { %4811 = vmatmul.mubr.msk.bf16.gmra.mxu0 %vm782_vm1, %v5225_v0 }
  0x8b   : > { %4875 = vmatmul.mubr.msk.bf16.gmra.mxu1 %vm782_vm1, %v5246_v5 }
  0xd1   : > { %v4752_v8 = vpop.f32.mrf.mxu0 }
  0xd2   : > { %v1022_v14 = vadd.f32 %v4752_v8, %v5496_v10 }
  0xd3   : > { %v1013_v9 = vpop.f32.mrf.mxu0  ;;  %v5508_v40 = vpop.f32.mrf.mxu1 }
  0xd4   : > { %v1014_v12 = vadd.f32 %v5496_v10, %v1013_v9  ;;  %v1526_v21 = vmax.f32 %v1022_v14, 0.0 }
  0xd5   : > { %v4753_v11 = vpop.f32.mrf.mxu0  ;;  %v5515_v45 = vpop.f32.mrf.mxu1 }
  0xd6   : > { %v1025_v13 = vadd.f32 %v4753_v11, %v5496_v10  ;;  %v1524_v19 = vmax.f32 %v1014_v12, 0.0 }
  0xd7   : > { %v1016_v15 = vpop.f32.mrf.mxu0  ;;  %v5521_v50 = vpop.f32.mrf.mxu1 }
  0xd8   : > { %v1017_v16 = vadd.f32 %v5496_v10, %v1016_v15  ;;  %v1527_v17 = vmax.f32 %v1025_v13, 0.0 }
  0xd9   : > { %v4756_v18 = vpop.f32.mrf.mxu0  ;;  %v5523_v55 = vpop.f32.mrf.mxu1 }
  0xda   : > { %v1525_v20 = vmax.f32 %v1017_v16, 0.0  ;;  %v1653_v24 = vpack.c.bf16 %v1527_v17, %v1526_v21  ;;  %v1038_v28 = vadd.f32 %v4756_v18, %v5496_v10 }
  0xdb   : > { %v1029_v22 = vpop.f32.mrf.mxu0  ;;  %v5525_v59 = vpop.f32.mrf.mxu1 }
  0xdc   : > { %v1652_v23 = vpack.c.bf16 %v1525_v20, %v1524_v19  ;;  %v1030_v26 = vadd.f32 %v5496_v10, %v1029_v22  ;;  %v1530_v35 = vmax.f32 %v1038_v28, 0.0 }
  0xdd   : > { %v4757_v25 = vpop.f32.mrf.mxu0  ;;  %v5532_v0 = vpop.f32.mrf.mxu1 }
  0xde   : > { %v1041_v27 = vadd.f32 %v4757_v25, %v5496_v10  ;;  %4886 = vmatprep.mubr.msk.bf16.mxu1 %vm1755_vm2, %v1652_v23  ;;  %v1528_v33 = vmax.f32 %v1030_v26, 0.0 }
  0xdf   : > { %v1032_v29 = vpop.f32.mrf.mxu0  ;;  %4887 = vmatmul.mubr.msk.bf16.vlgmr.msra.gmra.mxu1 %vm1755_vm2, %v1653_v24  ;;  %v5535_v4 = vpop.f32.mrf.mxu1 }
  0xe0   : > { %v1033_v30 = vadd.f32 %v5496_v10, %v1032_v29  ;;  %v1531_v31 = vmax.f32 %v1041_v27, 0.0 }
  0xe1   : > { %v4760_v32 = vpop.f32.mrf.mxu0  ;;  %v5537_v9 = vpop.f32.mrf.mxu1 }
  0xe2   : > { %v1529_v34 = vmax.f32 %v1033_v30, 0.0  ;;  %v1655_v38 = vpack.c.bf16 %v1531_v31, %v1530_v35  ;;  %v1054_v43 = vadd.f32 %v4760_v32, %v5496_v10 }
  0xe3   : > { %v1045_v36 = vpop.f32.mrf.mxu0  ;;  %v5539_v14 = vpop.f32.mrf.mxu1 }
  0xe4   : > { %v1654_v37 = vpack.c.bf16 %v1529_v34, %v1528_v33  ;;  %v1046_v41 = vadd.f32 %v5496_v10, %v1045_v36  ;;  %v1534_v53 = vmax.f32 %v1054_v43, 0.0 }
  0xe5   : > { %v4761_v39 = vpop.f32.mrf.mxu0  ;;  %v5546_v19 = vpop.f32.mrf.mxu1 }
  0xe6   : > { %v1057_v42 = vadd.f32 %v4761_v39, %v5496_v10  ;;  %4890 = vmatprep.mubr.msk.bf16.mxu1 %vm1755_vm2, %v1654_v37  ;;  %v1532_v51 = vmax.f32 %v1046_v41, 0.0 }
  0xe7   : > { %v1048_v44 = vpop.f32.mrf.mxu0  ;;  %4891 = vmatmul.mubr.msk.bf16.gmra.mxu1 %vm1755_vm2, %v1655_v38  ;;  %v5549_v23 = vpop.f32.mrf.mxu1 }
  0xe8   : > { %v1049_v46 = vadd.f32 %v5496_v10, %v1048_v44  ;;  %v1535_v48 = vmax.f32 %v1057_v42, 0.0 }
  0xe9   : > { %v4764_v49 = vpop.f32.mrf.mxu0  ;;  %v5551_v28 = vpop.f32.mrf.mxu1 }
  0xea   : > { %v1533_v52 = vmax.f32 %v1049_v46, 0.0  ;;  %v1657_v57 = vpack.c.bf16 %v1535_v48, %v1534_v53  ;;  %v1070_v62 = vadd.f32 %v4764_v49, %v5496_v10 }
  0xeb   : > { %v1061_v54 = vpop.f32.mrf.mxu0  ;;  %v5553_v32 = vpop.f32.mrf.mxu1 }
  0xec   : > { %v1656_v56 = vpack.c.bf16 %v1533_v52, %v1532_v51  ;;  %v1062_v60 = vadd.f32 %v5496_v10, %v1061_v54  ;;  %v1538_v7 = vmax.f32 %v1070_v62, 0.0  ;;  %v5250_v62 = vld [vmem:[%s6330_s5] sm:$0xff]  }
  0xed   : > { %v4765_v58 = vpop.f32.mrf.mxu0  ;;  %v5560_v37 = vpop.f32.mrf.mxu1  ;;  %5020 = vmatprep.subr.bf16.mxu0 %v5250_v62 }
  0xee   : > { %v1073_v61 = vadd.f32 %v4765_v58, %v5496_v10  ;;  %4894 = vmatprep.mubr.msk.bf16.mxu1 %vm1755_vm2, %v1656_v56  ;;  %v1536_v5 = vmax.f32 %v1062_v60, 0.0  ;;  %5021 = vmatpush3.bf16.msra.mxu0 %v5250_v62 }
  0xef   : > { %v1064_v63 = vpop.f32.mrf.mxu0  ;;  %4895 = vmatmul.mubr.msk.bf16.gmra.mxu1 %vm1755_vm2, %v1657_v57  ;;  %v5563_v42 = vpop.f32.mrf.mxu1 }
  0xf0   : > { %v1065_v1 = vadd.f32 %v5496_v10, %v1064_v63  ;;  %v1539_v2 = vmax.f32 %v1073_v61, 0.0 }
  0xf1   : > { %v4768_v3 = vpop.f32.mrf.mxu0  ;;  %v5565_v48 = vpop.f32.mrf.mxu1 }
  0xf2   : > { %v1537_v6 = vmax.f32 %v1065_v1, 0.0  ;;  %v1659_v12 = vpack.c.bf16 %v1539_v2, %v1538_v7  ;;  %v1086_v17 = vadd.f32 %v4768_v3, %v5496_v10 }
  0xf3   : > { %v1077_v8 = vpop.f32.mrf.mxu0  ;;  %v5567_v53 = vpop.f32.mrf.mxu1 }
  0xf4   : > { %v1658_v11 = vpack.c.bf16 %v1537_v6, %v1536_v5  ;;  %v1078_v15 = vadd.f32 %v5496_v10, %v1077_v8  ;;  %v1542_v26 = vmax.f32 %v1086_v17, 0.0 }
  0xf5   : > { %v4769_v13 = vpop.f32.mrf.mxu0  ;;  %v5574_v60 = vpop.f32.mrf.mxu1 }
  0xf6   : > { %v1089_v16 = vadd.f32 %v4769_v13, %v5496_v10  ;;  %4898 = vmatprep.mubr.msk.bf16.mxu1 %vm1755_vm2, %v1658_v11  ;;  %v1540_v24 = vmax.f32 %v1078_v15, 0.0 }
  0xf7   : > { %v1080_v18 = vpop.f32.mrf.mxu0  ;;  %4899 = vmatmul.mubr.msk.bf16.gmra.mxu1 %vm1755_vm2, %v1659_v12  ;;  %v5580_v2 = vpop.f32.mrf.mxu1 }
  0xf8   : > { %v1081_v20 = vadd.f32 %v5496_v10, %v1080_v18  ;;  %v1543_v21 = vmax.f32 %v1089_v16, 0.0 }
  0xf9   : > { %v4772_v22 = vpop.f32.mrf.mxu0  ;;  %v5582_v8 = vpop.f32.mrf.mxu1 }
  0xfa   : > { %v1541_v25 = vmax.f32 %v1081_v20, 0.0  ;;  %v1661_v30 = vpack.c.bf16 %v1543_v21, %v1542_v26  ;;  %v1102_v35 = vadd.f32 %v4772_v22, %v5496_v10 }
  0xfb   : > { %v1093_v27 = vpop.f32.mrf.mxu0  ;;  %v5584_v15 = vpop.f32.mrf.mxu1 }
  0xfc   : > { %v1660_v29 = vpack.c.bf16 %v1541_v25, %v1540_v24  ;;  %v1094_v33 = vadd.f32 %v5496_v10, %v1093_v27  ;;  %v1546_v46 = vmax.f32 %v1102_v35, 0.0 }
  0xfd   : > { %v4773_v31 = vpop.f32.mrf.mxu0  ;;  %v5591_v21 = vpop.f32.mrf.mxu1 }
  0xfe   : > { %v1105_v34 = vadd.f32 %v4773_v31, %v5496_v10  ;;  %4902 = vmatprep.mubr.msk.bf16.mxu1 %vm1755_vm2, %v1660_v29  ;;  %v1544_v43 = vmax.f32 %v1094_v33, 0.0 }
  0xff   : > { %v1096_v36 = vpop.f32.mrf.mxu0  ;;  %4903 = vmatmul.mubr.msk.bf16.gmra.mxu1 %vm1755_vm2, %v1661_v30  ;;  %v5594_v26 = vpop.f32.mrf.mxu1 }
 0x100   : > { %v1097_v38 = vadd.f32 %v5496_v10, %v1096_v36  ;;  %v1547_v39 = vmax.f32 %v1105_v34, 0.0 }
 0x101   : > { %v4776_v41 = vpop.f32.mrf.mxu0  ;;  %v5596_v33 = vpop.f32.mrf.mxu1 }
 0x102   : > { %v1545_v44 = vmax.f32 %v1097_v38, 0.0  ;;  %v1663_v51 = vpack.c.bf16 %v1547_v39, %v1546_v46  ;;  %v1118_v57 = vadd.f32 %v4776_v41, %v5496_v10 }
 0x103   : > { %v1109_v47 = vpop.f32.mrf.mxu0  ;;  %v5598_v38 = vpop.f32.mrf.mxu1 }
 0x104   : > { %v1662_v49 = vpack.c.bf16 %v1545_v44, %v1544_v43  ;;  %v1110_v54 = vadd.f32 %v5496_v10, %v1109_v47  ;;  %v1550_v6 = vmax.f32 %v1118_v57, 0.0 }
 0x105   : > { %v4777_v52 = vpop.f32.mrf.mxu0  ;;  %v5605_v46 = vpop.f32.mrf.mxu1 }
 0x106   : > { %v1121_v56 = vadd.f32 %v4777_v52, %v5496_v10  ;;  %4906 = vmatprep.mubr.msk.bf16.mxu1 %vm1755_vm2, %v1662_v49  ;;  %v1548_v3 = vmax.f32 %v1110_v54, 0.0 }
 0x107   : > { %v1112_v58 = vpop.f32.mrf.mxu0  ;;  %4907 = vmatmul.mubr.msk.bf16.gmra.mxu1 %vm1755_vm2, %v1663_v51  ;;  %v5608_v52 = vpop.f32.mrf.mxu1 }
 0x108   : > { %v1113_v61 = vadd.f32 %v5496_v10, %v1112_v58  ;;  %v1551_v63 = vmax.f32 %v1121_v56, 0.0 }
 0x109   : > { %v4780_v1 = vpop.f32.mrf.mxu0 }
 0x10a   : > { %v1549_v5 = vmax.f32 %v1113_v61, 0.0  ;;  %v1665_v12 = vpack.c.bf16 %v1551_v63, %v1550_v6  ;;  %v1134_v18 = vadd.f32 %v4780_v1, %v5496_v10  ;;  %v5610_v61 = vpop.f32.mrf.mxu1 }
 0x10b   : > { %v1125_v7 = vpop.f32.mrf.mxu0 }
 0x10c   : > { %v1664_v11 = vpack.c.bf16 %v1549_v5, %v1548_v3  ;;  %v1126_v16 = vadd.f32 %v5496_v10, %v1125_v7  ;;  %v1554_v30 = vmax.f32 %v1134_v18, 0.0  ;;  %v5612_v3 = vpop.f32.mrf.mxu1 }
 0x10d   : > { %v4781_v13 = vpop.f32.mrf.mxu0 }
 0x10e   : > { %v1137_v17 = vadd.f32 %v4781_v13, %v5496_v10  ;;  %4910 = vmatprep.mubr.msk.bf16.mxu1 %vm1755_vm2, %v1664_v11  ;;  %v1552_v27 = vmax.f32 %v1126_v16, 0.0 }
 0x10f   : > { %v1128_v20 = vpop.f32.mrf.mxu0  ;;  %4911 = vmatmul.mubr.msk.bf16.gmra.mxu1 %vm1755_vm2, %v1665_v12  ;;  %v5619_v12 = vpop.f32.mrf.mxu1 }
 0x110   : > { %v1129_v22 = vadd.f32 %v5496_v10, %v1128_v20  ;;  %v1555_v24 = vmax.f32 %v1137_v17, 0.0 }
 0x111   : > { %v4784_v25 = vpop.f32.mrf.mxu0  ;;  %v5622_v18 = vpop.f32.mrf.mxu1 }
 0x112   : > { %v1553_v29 = vmax.f32 %v1129_v22, 0.0  ;;  %v1667_v35 = vpack.c.bf16 %v1555_v24, %v1554_v30  ;;  %v1150_v43 = vadd.f32 %v4784_v25, %v5496_v10 }
 0x113   : > { %v1141_v31 = vpop.f32.mrf.mxu0 }
 0x114   : > { %v1666_v34 = vpack.c.bf16 %v1553_v29, %v1552_v27  ;;  %v1142_v39 = vadd.f32 %v5496_v10, %v1141_v31  ;;  %v1558_v57 = vmax.f32 %v1150_v43, 0.0  ;;  %v5624_v27 = vpop.f32.mrf.mxu1 }
 0x115   : > { %v4785_v36 = vpop.f32.mrf.mxu0 }
 0x116   : > { %v1153_v41 = vadd.f32 %v4785_v36, %v5496_v10  ;;  %4914 = vmatprep.mubr.msk.bf16.mxu1 %vm1755_vm2, %v1666_v34  ;;  %v1556_v54 = vmax.f32 %v1142_v39, 0.0  ;;  %v5626_v34 = vpop.f32.mrf.mxu1 }
 0x117   : > { %v1144_v44 = vpop.f32.mrf.mxu0  ;;  %4915 = vmatmul.mubr.msk.bf16.gmra.mxu1 %vm1755_vm2, %v1667_v35 }
 0x118   : > { %v1145_v47 = vadd.f32 %v5496_v10, %v1144_v44  ;;  %v1559_v49 = vmax.f32 %v1153_v41, 0.0  ;;  %v5633_v43 = vpop.f32.mrf.mxu1 }
 0x119   : > { %v4788_v51 = vpop.f32.mrf.mxu0 }
 0x11a   : > { %v1557_v56 = vmax.f32 %v1145_v47, 0.0  ;;  %v1669_v63 = vpack.c.bf16 %v1559_v49, %v1558_v57  ;;  %v1166_v7 = vadd.f32 %v4788_v51, %v5496_v10  ;;  %v5636_v51 = vpop.f32.mrf.mxu1 }
 0x11b   : > { %v1157_v58 = vpop.f32.mrf.mxu0 }
 0x11c   : > { %v1668_v62 = vpack.c.bf16 %v1557_v56, %v1556_v54  ;;  %v1158_v5 = vadd.f32 %v5496_v10, %v1157_v58  ;;  %v1562_v24 = vmax.f32 %v1166_v7, 0.0 }
 0x11d   : > { %v4789_v1 = vpop.f32.mrf.mxu0 }
 0x11e   : > { %v1169_v6 = vadd.f32 %v4789_v1, %v5496_v10  ;;  %4918 = vmatprep.mubr.msk.bf16.mxu1 %vm1755_vm2, %v1668_v62  ;;  %v1560_v20 = vmax.f32 %v1158_v5, 0.0  ;;  %v5638_v5 = vpop.f32.mrf.mxu1 }
 0x11f   : > { %v1160_v11 = vpop.f32.mrf.mxu0  ;;  %4919 = vmatmul.mubr.msk.bf16.gmra.mxu1 %vm1755_vm2, %v1669_v63 }
 0x120   : > { %v1161_v13 = vadd.f32 %v5496_v10, %v1160_v11  ;;  %v1563_v16 = vmax.f32 %v1169_v6, 0.0 }
 0x121   : > { %v4792_v17 = vpop.f32.mrf.mxu0 }
 0x122   : > { %v1561_v22 = vmax.f32 %v1161_v13, 0.0  ;;  %v1671_v30 = vpack.c.bf16 %v1563_v16, %v1562_v24  ;;  %v1182_v39 = vadd.f32 %v4792_v17, %v5496_v10 }
 0x123   : > { %v1173_v25 = vpop.f32.mrf.mxu0 }
 0x124   : > { %v1670_v29 = vpack.c.bf16 %v1561_v22, %v1560_v20  ;;  %v1174_v35 = vadd.f32 %v5496_v10, %v1173_v25  ;;  %v1566_v57 = vmax.f32 %v1182_v39, 0.0  ;;  %v5646_v22 = vpop.f32.mrf.mxu1 }
 0x125   : > { %v4793_v31 = vpop.f32.mrf.mxu0 }
 0x126   : > { %v1185_v36 = vadd.f32 %v4793_v31, %v5496_v10  ;;  %4922 = vmatprep.mubr.msk.bf16.mxu1 %vm1755_vm2, %v1670_v29  ;;  %v1564_v54 = vmax.f32 %v1174_v35, 0.0  ;;  %v5648_v39 = vpop.f32.mrf.mxu1 }
 0x127   : > { %v1176_v41 = vpop.f32.mrf.mxu0  ;;  %4923 = vmatmul.mubr.msk.bf16.gmra.mxu1 %vm1755_vm2, %v1671_v30 }
 0x128   : > { %v1177_v44 = vadd.f32 %v5496_v10, %v1176_v41  ;;  %v1567_v47 = vmax.f32 %v1185_v36, 0.0 }
 0x129   : > { %v4796_v49 = vpop.f32.mrf.mxu0 }
 0x12a   : > { %v1565_v56 = vmax.f32 %v1177_v44, 0.0  ;;  %v1673_v63 = vpack.c.bf16 %v1567_v47, %v1566_v57  ;;  %v1198_v11 = vadd.f32 %v4796_v49, %v5496_v10 }
 0x12b   : > { %v1189_v58 = vpop.f32.mrf.mxu0 }
 0x12c   : > { %v1672_v62 = vpack.c.bf16 %v1565_v56, %v1564_v54  ;;  %v1190_v6 = vadd.f32 %v5496_v10, %v1189_v58  ;;  %v1570_v29 = vmax.f32 %v1198_v11, 0.0  ;;  %v5656_v58 = vpop.f32.mrf.mxu1 }
 0x12d   : > { %v4797_v1 = vpop.f32.mrf.mxu0 }
 0x12e   : > { %v1201_v7 = vadd.f32 %v4797_v1, %v5496_v10  ;;  %4926 = vmatprep.mubr.msk.bf16.mxu1 %vm1755_vm2, %v1672_v62  ;;  %v1568_v24 = vmax.f32 %v1190_v6, 0.0 }
 0x12f   : > { %v1192_v13 = vpop.f32.mrf.mxu0  ;;  %4927 = vmatmul.mubr.msk.bf16.gmra.mxu1 %vm1755_vm2, %v1673_v63 }
 0x130   : > { %v1193_v16 = vadd.f32 %v5496_v10, %v1192_v13  ;;  %v1571_v17 = vmax.f32 %v1201_v7, 0.0 }
 0x131   : > { %v4800_v20 = vpop.f32.mrf.mxu0 }
 0x132   : > { %v1569_v25 = vmax.f32 %v1193_v16, 0.0  ;;  %v1675_v35 = vpack.c.bf16 %v1571_v17, %v1570_v29  ;;  %v1214_v47 = vadd.f32 %v4800_v20, %v5496_v10  ;;  %v5658_v16 = vpop.f32.mrf.mxu1 }
 0x133   : > { %v1205_v30 = vpop.f32.mrf.mxu0 }
 0x134   : > { %v1674_v31 = vpack.c.bf16 %v1569_v25, %v1568_v24  ;;  %v1206_v41 = vadd.f32 %v5496_v10, %v1205_v30  ;;  %v1574_v1 = vmax.f32 %v1214_v47, 0.0 }
 0x135   : > { %v4801_v36 = vpop.f32.mrf.mxu0 }
 0x136   : > { %v1217_v44 = vadd.f32 %v4801_v36, %v5496_v10  ;;  %4930 = vmatprep.mubr.msk.bf16.mxu1 %vm1755_vm2, %v1674_v31  ;;  %v1572_v62 = vmax.f32 %v1206_v41, 0.0 }
 0x137   : > { %v1208_v49 = vpop.f32.mrf.mxu0  ;;  %4931 = vmatmul.mubr.msk.bf16.gmra.mxu1 %vm1755_vm2, %v1675_v35  ;;  %v5666_v35 = vpop.f32.mrf.mxu1 }
 0x138   : > { %v1209_v54 = vadd.f32 %v5496_v10, %v1208_v49  ;;  %v1575_v56 = vmax.f32 %v1217_v44, 0.0 }
 0x139   : > { %v4804_v57 = vpop.f32.mrf.mxu0 }
 0x13a   : > { %v1573_v63 = vmax.f32 %v1209_v54, 0.0  ;;  %v1677_v11 = vpack.c.bf16 %v1575_v56, %v1574_v1  ;;  %v1230_v24 = vadd.f32 %v4804_v57, %v5496_v10 }
 0x13b   : > { %v1221_v6 = vpop.f32.mrf.mxu0 }
 0x13c   : > { %v1676_v7 = vpack.c.bf16 %v1573_v63, %v1572_v62  ;;  %v1222_v17 = vadd.f32 %v5496_v10, %v1221_v6  ;;  %v1578_v44 = vmax.f32 %v1230_v24, 0.0  ;;  %v5668_v62 = vpop.f32.mrf.mxu1 }
 0x13d   : > { %v4805_v13 = vpop.f32.mrf.mxu0 }
 0x13e   : > { %v1233_v20 = vadd.f32 %v4805_v13, %v5496_v10  ;;  %4934 = vmatprep.mubr.msk.bf16.mxu1 %vm1755_vm2, %v1676_v7  ;;  %v1576_v36 = vmax.f32 %v1222_v17, 0.0  ;;  %v5676_v17 = vpop.f32.mrf.mxu1 }
 0x13f   : > { %v1224_v25 = vpop.f32.mrf.mxu0  ;;  %4935 = vmatmul.mubr.msk.bf16.gmra.mxu1 %vm1755_vm2, %v1677_v11 }
 0x140   : > { %v1225_v29 = vadd.f32 %v5496_v10, %v1224_v25  ;;  %v1579_v30 = vmax.f32 %v1233_v20, 0.0 }
 0x141   : > { %v4808_v31 = vpop.f32.mrf.mxu0 }
 0x142   : > { %v1577_v41 = vmax.f32 %v1225_v29, 0.0  ;;  %v1679_v54 = vpack.c.bf16 %v1579_v30, %v1578_v44  ;;  %v1246_v1 = vadd.f32 %v4808_v31, %v5496_v10  ;;  %v5678_v44 = vpop.f32.mrf.mxu1  ;;  %v1270_v31 = vadd.f32 %v5496_v10, %v5515_v45 }
 0x143   : > { %v1237_v47 = vpop.f32.mrf.mxu0 }
 0x144   : > { %v1678_v49 = vpack.c.bf16 %v1577_v41, %v1576_v36  ;;  %v1238_v57 = vadd.f32 %v5496_v10, %v1237_v47  ;;  %v1582_v25 = vmax.f32 %v1246_v1, 0.0  ;;  %v1273_v47 = vadd.f32 %v5496_v10, %v5523_v55 }
 0x145   : > { %v4809_v56 = vpop.f32.mrf.mxu0  ;;  %v1588_v45 = vmax.f32 %v1270_v31, 0.0  ;;  %v1289_v31 = vadd.f32 %v5496_v10, %v5537_v9 }
 0x146   : > { %v1249_v63 = vadd.f32 %v4809_v56, %v5496_v10  ;;  %4938 = vmatprep.mubr.msk.bf16.mxu1 %vm1755_vm2, %v1678_v49  ;;  %v1580_v20 = vmax.f32 %v1238_v57, 0.0 }
 0x147   : > { %v1240_v6 = vpop.f32.mrf.mxu0  ;;  %4939 = vmatmul.mubr.msk.bf16.gmra.mxu1 %vm1755_vm2, %v1679_v54 }
 0x148   : > { %v1241_v7 = vadd.f32 %v5496_v10, %v1240_v6  ;;  %v1583_v11 = vmax.f32 %v1249_v63, 0.0  ;;  %v5690_v6 = vpop.f32.mrf.mxu1 }
 0x149   : > { %v4812_v13 = vpop.f32.mrf.mxu0 }
 0x14a   : > { %v1581_v24 = vmax.f32 %v1241_v7, 0.0  ;;  %v1681_v36 = vpack.c.bf16 %v1583_v11, %v1582_v25  ;;  %v1262_v56 = vadd.f32 %v4812_v13, %v5496_v10  ;;  %v1589_v7 = vmax.f32 %v1273_v47, 0.0 }
 0x14b   : > { %v1253_v29 = vpop.f32.mrf.mxu0  ;;  %v1278_v25 = vadd.f32 %v5508_v40, %v5496_v10  ;;  %v1281_v13 = vadd.f32 %v5521_v50, %v5496_v10 }
 0x14c   : > { %v1680_v30 = vpack.c.bf16 %v1581_v24, %v1580_v20  ;;  %v1254_v49 = vadd.f32 %v5496_v10, %v1253_v29  ;;  %v1586_v20 = vmax.f32 %v1262_v56, 0.0 }
 0x14d   : > { %v4813_v41 = vpop.f32.mrf.mxu0  ;;  %v1590_v40 = vmax.f32 %v1278_v25, 0.0  ;;  %v1591_v47 = vmax.f32 %v1281_v13, 0.0  ;;  %v1318_v13 = vadd.f32 %v5496_v10, %v5560_v37  ;;  %v1329_v37 = vadd.f32 %v5563_v42, %v5496_v10 }
 0x14e   : > { %v1265_v54 = vadd.f32 %v4813_v41, %v5496_v10  ;;  %4942 = vmatprep.mubr.msk.bf16.mxu1 %vm1755_vm2, %v1680_v30  ;;  %v1584_v11 = vmax.f32 %v1254_v49, 0.0  ;;  %v5696_v30 = vpop.f32.mrf.mxu1  ;;  %v1286_v41 = vadd.f32 %v5496_v10, %v5532_v0  ;;  %v1297_v0 = vadd.f32 %v5535_v4, %v5496_v10 }
 0x14f   : > { %v1256_v57 = vpop.f32.mrf.mxu0  ;;  %4943 = vmatmul.mubr.msk.bf16.gmra.mxu1 %vm1755_vm2, %v1681_v36  ;;  %v1684_v36 = vpack.c.bf16 %v1589_v7, %v1588_v45  ;;  %v1685_v56 = vpack.c.bf16 %v1591_v47, %v1590_v40  ;;  %v1305_v45 = vadd.f32 %v5496_v10, %v5551_v28  ;;  %v1326_v47 = vadd.f32 %v5553_v32, %v5496_v10 }
 0x150   : > { %v1257_v63 = vadd.f32 %v5496_v10, %v1256_v57  ;;  %v1587_v1 = vmax.f32 %v1265_v54, 0.0  ;;  %v5705_v49 = vpop.f32.mrf.mxu1  ;;  %v1592_v50 = vmax.f32 %v1286_v41, 0.0  ;;  %v1593_v54 = vmax.f32 %v1289_v31, 0.0 }
 0x151   : > { %v1294_v57 = vadd.f32 %v5525_v59, %v5496_v10 }
 0x152   : > { %v1585_v55 = vmax.f32 %v1257_v63, 0.0  ;;  %v1683_v29 = vpack.c.bf16 %v1587_v1, %v1586_v20  ;;  %v5711_v9 = vpop.f32.mrf.mxu1  ;;  %v1686_v63 = vpack.c.bf16 %v1593_v54, %v1592_v50  ;;  %v1302_v1 = vadd.f32 %v5496_v10, %v5546_v19 }
 0x153   : > { %v1594_v7 = vmax.f32 %v1294_v57, 0.0  ;;  %v1597_v20 = vmax.f32 %v1305_v45, 0.0  ;;  %v1313_v19 = vadd.f32 %v5549_v23, %v5496_v10  ;;  %v1334_v54 = vadd.f32 %v5496_v10, %v5574_v60 }
 0x154   : > { %v1682_v24 = vpack.c.bf16 %v1585_v55, %v1584_v11  ;;  %v1595_v11 = vmax.f32 %v1297_v0, 0.0  ;;  %v5719_v55 = vpop.f32.mrf.mxu1  ;;  %v1596_v59 = vmax.f32 %v1302_v1, 0.0  ;;  %v1602_v57 = vmax.f32 %v1326_v47, 0.0 }
 0x155   : > { %v1599_v41 = vmax.f32 %v1313_v19, 0.0  ;;  %v1603_v0 = vmax.f32 %v1329_v37, 0.0  ;;  %v1604_v32 = vmax.f32 %v1334_v54, 0.0  ;;  %v1342_v45 = vadd.f32 %v5567_v53, %v5496_v10 }
 0x156   : > { %4946 = vmatprep.mubr.msk.bf16.mxu1 %vm1755_vm2, %v1682_v24  ;;  %v1687_v4 = vpack.c.bf16 %v1595_v11, %v1594_v7  ;;  %v1310_v24 = vadd.f32 %v5539_v14, %v5496_v10  ;;  %v5725_v25 = vpop.f32.mrf.mxu1  ;;  %v1688_v28 = vpack.c.bf16 %v1597_v20, %v1596_v59  ;;  %v1600_v14 = vmax.f32 %v1318_v13, 0.0 }
 0x157   : > { %4947 = vmatmul.mubr.msk.bf16.gmra.mxu1 %vm1755_vm2, %v1683_v29  ;;  %v1321_v29 = vadd.f32 %v5496_v10, %v5565_v48  ;;  %v1691_v42 = vpack.c.bf16 %v1603_v0, %v1602_v57  ;;  %v1345_v60 = vadd.f32 %v5580_v2, %v5496_v10  ;;  %v1350_v11 = vadd.f32 %v5496_v10, %v5591_v21 }
 0x158   : > { %4950 = vmatprep.mubr.msk.bf16.mxu1 %vm1755_vm2, %v1684_v36  ;;  %v1598_v36 = vmax.f32 %v1310_v24, 0.0  ;;  %v5733_v31 = vpop.f32.mrf.mxu1  ;;  %v1353_v59 = vadd.f32 %v5496_v10, %v5596_v33  ;;  %v1606_v20 = vmax.f32 %v1342_v45, 0.0  ;;  %v1361_v21 = vadd.f32 %v5594_v26, %v5496_v10 }
 0x159   : > { %v1601_v40 = vmax.f32 %v1321_v29, 0.0  ;;  %v1608_v53 = vmax.f32 %v1350_v11, 0.0  ;;  %v1366_v29 = vadd.f32 %v5496_v10, %v5605_v46  ;;  %v1374_v47 = vadd.f32 %v5598_v38, %v5496_v10 }
 0x15a   : > { %v1689_v23 = vpack.c.bf16 %v1599_v41, %v1598_v36  ;;  %v5739_v50 = vpop.f32.mrf.mxu1  ;;  %v1609_v19 = vmax.f32 %v1353_v59, 0.0  ;;  %v1369_v36 = vadd.f32 %v5496_v10, %v5610_v61  ;;  %v1377_v46 = vadd.f32 %v5608_v52, %v5496_v10 }
 0x15b   : > { %v1690_v48 = vpack.c.bf16 %v1601_v40, %v1600_v14  ;;  %v1611_v14 = vmax.f32 %v1361_v21, 0.0  ;;  %v1385_v54 = vadd.f32 %v5496_v10, %v5624_v27  ;;  %v1398_v45 = vadd.f32 %v5496_v10, %v5633_v43 }
 0x15c   : > { %v1694_v33 = vpack.c.bf16 %v1609_v19, %v1608_v53  ;;  %v1615_v57 = vmax.f32 %v1377_v46, 0.0  ;;  %v1409_v43 = vadd.f32 %v5636_v51, %v5496_v10  ;;  %v1414_v19 = vadd.f32 %v5496_v10, %v5648_v39 }
 0x15d   : > { %v1425_v39 = vadd.f32 %v5656_v58, %v5496_v10  ;;  %v5834_v58 = vld [vmem:[%s6329_s4] ss:$0 sm:$0xff] }
 0x15e   : > { %v1623_v21 = vmax.f32 %v1409_v43, 0.0 }
 0x15f   : > { %4951 = vmatmul.mubr.msk.bf16.gmra.mxu1 %vm1755_vm2, %v1685_v56  ;;  %v1337_v56 = vadd.f32 %v5496_v10, %v5582_v8 }
 0x160   : > { %4954 = vmatprep.mubr.msk.bf16.mxu1 %vm1755_vm2, %v1686_v63  ;;  %v5747_v63 = vpop.f32.mrf.mxu1 }
 0x161   : > { %v1605_v1 = vmax.f32 %v1337_v56, 0.0  ;;  %v1614_v56 = vmax.f32 %v1374_v47, 0.0  ;;  %v1627_v47 = vmax.f32 %v1425_v39, 0.0  ;;  %v1465_v39 = vadd.f32 %v5496_v10, %v5739_v50 }
 0x162   : > { %v5753_v7 = vpop.f32.mrf.mxu1 }
 0x163   : > { %v1692_v8 = vpack.c.bf16 %v1605_v1, %v1604_v32  ;;  %v1617_v32 = vmax.f32 %v1385_v54, 0.0  ;;  %v1697_v52 = vpack.c.bf16 %v1615_v57, %v1614_v56  ;;  %v1390_v1 = vadd.f32 %v5612_v3, %v5496_v10 }
 0x164   : > { %v5761_v24 = vpop.f32.mrf.mxu1  ;;  %v1620_v3 = vmax.f32 %v1398_v45, 0.0  ;;  %v1438_v56 = vadd.f32 %v5666_v35, %v5496_v10  ;;  %v1441_v57 = vadd.f32 %v5676_v17, %v5496_v10 }
 0x166   : > { %v5767_v13 = vpop.f32.mrf.mxu1  ;;  %v1630_v17 = vmax.f32 %v1438_v56, 0.0  ;;  %v1470_v56 = vadd.f32 %v5719_v55, %v5496_v10 }
 0x167   : > { %4955 = vmatmul.mubr.msk.bf16.gmra.mxu1 %vm1755_vm2, %v1687_v4  ;;  %v1607_v4 = vmax.f32 %v1345_v60, 0.0  ;;  %v1401_v60 = vadd.f32 %v5496_v10, %v5638_v5 }
 0x168   : > { %4958 = vmatprep.mubr.msk.bf16.mxu1 %vm1755_vm2, %v1688_v28  ;;  %v1358_v28 = vadd.f32 %v5584_v15, %v5496_v10  ;;  %v5775_v40 = vpop.f32.mrf.mxu1  ;;  %v1612_v15 = vmax.f32 %v1366_v29, 0.0 }
 0x169   : > { %v1693_v2 = vpack.c.bf16 %v1607_v4, %v1606_v20  ;;  %v1621_v20 = vmax.f32 %v1401_v60, 0.0  ;;  %v1406_v4 = vadd.f32 %v5626_v34, %v5496_v10  ;;  %v1624_v34 = vmax.f32 %v1414_v19, 0.0 }
 0x16a   : > { %v1610_v41 = vmax.f32 %v1358_v28, 0.0  ;;  %v5781_v37 = vpop.f32.mrf.mxu1 }
 0x16b   : > { %v1700_v5 = vpack.c.bf16 %v1621_v20, %v1620_v3  ;;  %v1622_v28 = vmax.f32 %v1406_v4, 0.0 }
 0x16c   : > { %v1695_v26 = vpack.c.bf16 %v1611_v14, %v1610_v41  ;;  %v5789_v0 = vpop.f32.mrf.mxu1  ;;  %v1430_v14 = vadd.f32 %v5496_v10, %v5668_v62 }
 0x16d   : > { %v1701_v51 = vpack.c.bf16 %v1623_v21, %v1622_v28  ;;  %v1454_v28 = vadd.f32 %v5690_v6, %v5496_v10  ;;  %v1457_v21 = vadd.f32 %v5705_v49, %v5496_v10 }
 0x16e   : > { %v1628_v46 = vmax.f32 %v1430_v14, 0.0 }
 0x16f   : > { %4959 = vmatmul.mubr.msk.bf16.gmra.mxu1 %vm1755_vm2, %v1689_v23  ;;  %v1613_v23 = vmax.f32 %v1369_v36, 0.0  ;;  %v1422_v36 = vadd.f32 %v5646_v22, %v5496_v10 }
 0x170   : > { %4962 = vmatprep.mubr.msk.bf16.mxu1 %vm1755_vm2, %v1690_v48  ;;  %v1382_v48 = vadd.f32 %v5496_v10, %v5619_v12  ;;  %v1393_v12 = vadd.f32 %v5622_v18, %v5496_v10 }
 0x171   : > { %v1696_v61 = vpack.c.bf16 %v1613_v23, %v1612_v15  ;;  %v1433_v15 = vadd.f32 %v5496_v10, %v5678_v44 }
 0x172   : > { %v1616_v38 = vmax.f32 %v1382_v48, 0.0  ;;  %v1619_v11 = vmax.f32 %v1393_v12, 0.0  ;;  %v1449_v12 = vadd.f32 %v5496_v10, %v5711_v9 }
 0x174   : > { %v1698_v27 = vpack.c.bf16 %v1617_v32, %v1616_v38  ;;  %v1633_v4 = vmax.f32 %v1449_v12, 0.0 }
 0x177   : > { %4963 = vmatmul.mubr.msk.bf16.gmra.mxu1 %vm1755_vm2, %v1691_v42  ;;  %v5795_v42 = vpop.f32.mrf.mxu1 }
 0x178   : > { %4966 = vmatprep.mubr.msk.bf16.mxu1 %vm1755_vm2, %v1692_v8  ;;  %v1618_v8 = vmax.f32 %v1390_v1, 0.0  ;;  %v1446_v1 = vadd.f32 %v5496_v10, %v5696_v30 }
 0x179   : > { %v5803_v59 = vpop.f32.mrf.mxu1 }
 0x17a   : > { %v1699_v18 = vpack.c.bf16 %v1619_v11, %v1618_v8  ;;  %v1631_v11 = vmax.f32 %v1441_v57, 0.0  ;;  %v1473_v57 = vadd.f32 %v5733_v31, %v5496_v10 }
 0x17b   : > { %v5809_v53 = vpop.f32.mrf.mxu1 }
 0x17f   : > { %4967 = vmatmul.mubr.msk.bf16.gmra.mxu1 %vm1755_vm2, %v1693_v2  ;;  %v1417_v2 = vadd.f32 %v5496_v10, %v5658_v16 }
 0x180   : > { %4970 = vmatprep.mubr.msk.bf16.mxu1 %vm1755_vm2, %v1694_v33  ;;  %v5817_v33 = vpop.f32.mrf.mxu1 }
 0x181   : > { %v1625_v29 = vmax.f32 %v1417_v2, 0.0  ;;  %v1705_v2 = vpack.c.bf16 %v1631_v11, %v1630_v17 }
 0x182   : > { %v5823_v41 = vpop.f32.mrf.mxu1 }
 0x183   : > { %v1702_v16 = vpack.c.bf16 %v1625_v29, %v1624_v34 }
 0x187   : > { %4971 = vmatmul.mubr.msk.bf16.gmra.mxu1 %vm1755_vm2, %v1695_v26  ;;  %v1626_v26 = vmax.f32 %v1422_v36, 0.0  ;;  %v1462_v36 = vadd.f32 %v5496_v10, %v5725_v25 }
 0x188   : > { %4974 = vmatprep.mubr.msk.bf16.mxu1 %vm1755_vm2, %v1696_v61  ;;  %v1629_v61 = vmax.f32 %v1433_v15, 0.0 }
 0x189   : > { %v1703_v54 = vpack.c.bf16 %v1627_v47, %v1626_v26  ;;  %v1635_v26 = vmax.f32 %v1457_v21, 0.0 }
 0x18f   : > { %4975 = vmatmul.mubr.msk.bf16.gmra.mxu1 %vm1755_vm2, %v1697_v52  ;;  %v1704_v52 = vpack.c.bf16 %v1629_v61, %v1628_v46  ;;  %v1636_v46 = vmax.f32 %v1462_v36, 0.0  ;;  %v1637_v61 = vmax.f32 %v1465_v39, 0.0 }
 0x190   : > { %4978 = vmatprep.mubr.msk.bf16.mxu1 %vm1755_vm2, %v1698_v27 }
 0x197   : > { %4979 = vmatmul.mubr.msk.bf16.gmra.mxu1 %vm1755_vm2, %v1699_v18  ;;  %v1632_v18 = vmax.f32 %v1446_v1, 0.0  ;;  %v5878_v1 = vld [vmem:[%s6327_s2] ss:$0 sm:$0xff] }
 0x198   : > { %4982 = vmatprep.mubr.msk.bf16.mxu1 %vm1755_vm2, %v1700_v5  ;;  %v1478_v12 = vadd.f32 %v5878_v1, %v5753_v7  ;;  %v1481_v55 = vadd.f32 %v5878_v1, %v5767_v13  ;;  %v1494_v21 = vadd.f32 %v5878_v1, %v5781_v37 }
 0x19f   : > { %v4888_v23 = vpop.f32.mrf.mxu1  ;;  %4983 = vmatmul.mubr.msk.bf16.gmra.mxu1 %vm1755_vm2, %v1701_v51  ;;  %v1706_v51 = vpack.c.bf16 %v1633_v4, %v1632_v18 }
 0x1a0   : > { %4986 = vmatprep.mubr.msk.bf16.mxu1 %vm1755_vm2, %v1702_v16  ;;  %v1991_v38 = vadd.f32 %v4888_v23, %v5834_v58  ;;  %v1634_v23 = vmax.f32 %v1454_v28, 0.0 }
 0x1a1   : > { %v1982_v22 = vpop.f32.mrf.mxu1 }
 0x1a2   : > { %v1983_v62 = vadd.f32 %v5834_v58, %v1982_v22  ;;  %v2495_v3 = vmax.f32 %v1991_v38, 0.0 }
 0x1a3   : > { %v4889_v48 = vpop.f32.mrf.mxu1 }
 0x1a4   : > { %v1994_v44 = vadd.f32 %v4889_v48, %v5834_v58  ;;  %v2493_v35 = vmax.f32 %v1983_v62, 0.0 }
 0x1a5   : > { %v1985_v32 = vpop.f32.mrf.mxu1 }
 0x1a6   : > { %v1986_v27 = vadd.f32 %v5834_v58, %v1985_v32  ;;  %v2496_v45 = vmax.f32 %v1994_v44, 0.0 }
 0x1a7   : > { %v4892_v60 = vpop.f32.mrf.mxu1  ;;  %4987 = vmatmul.mubr.msk.bf16.gmra.mxu1 %vm1755_vm2, %v1703_v54  ;;  %v1707_v54 = vpack.c.bf16 %v1635_v26, %v1634_v23 }
 0x1a8   : > { %v2494_v8 = vmax.f32 %v1986_v27, 0.0  ;;  %4990 = vmatprep.mubr.msk.bf16.mxu1 %vm1755_vm2, %v1704_v52  ;;  %v2622_v43 = vpack.c.bf16 %v2496_v45, %v2495_v3  ;;  %v2007_v34 = vadd.f32 %v4892_v60, %v5834_v58  ;;  %v1708_v52 = vpack.c.bf16 %v1637_v61, %v1636_v46 }
 0x1a9   : > { %v1998_v20 = vpop.f32.mrf.mxu1  ;;  %v1640_v3 = vmax.f32 %v1478_v12, 0.0  ;;  %v1502_v46 = vadd.f32 %v5878_v1, %v5775_v40  ;;  %v1505_v61 = vadd.f32 %v5878_v1, %v5789_v0 }
 0x1aa   : > { %v2621_v30 = vpack.c.bf16 %v2494_v8, %v2493_v35  ;;  %v1999_v9 = vadd.f32 %v5834_v58, %v1998_v20  ;;  %v2499_v47 = vmax.f32 %v2007_v34, 0.0  ;;  %v1638_v35 = vmax.f32 %v1470_v56, 0.0 }
 0x1ab   : > { %v4893_v5 = vpop.f32.mrf.mxu1  ;;  %v1639_v8 = vmax.f32 %v1473_v57, 0.0  ;;  %v1641_v20 = vmax.f32 %v1481_v55, 0.0  ;;  %v1497_v34 = vadd.f32 %v5878_v1, %v5795_v42 }
 0x1ac   : > { %v2010_v19 = vadd.f32 %v4893_v5, %v5834_v58  ;;  %5022 = vmatprep.mubr.msk.bf16.mxu0 %vm1755_vm2, %v2621_v30  ;;  %v2497_v6 = vmax.f32 %v1999_v9, 0.0  ;;  %v1486_v5 = vadd.f32 %v5878_v1, %v5747_v63  ;;  %v1489_v9 = vadd.f32 %v5878_v1, %v5761_v24 }
 0x1ad   : > { %v2001_v29 = vpop.f32.mrf.mxu1  ;;  %5023 = vmatmul.mubr.msk.bf16.vlgmr.msra.gmra.mxu0 %vm1755_vm2, %v2622_v43  ;;  %v1709_v43 = vpack.c.bf16 %v1639_v8, %v1638_v35  ;;  %v1710_v28 = vpack.c.bf16 %v1641_v20, %v1640_v3  ;;  %v1518_v35 = vadd.f32 %v5878_v1, %v5803_v59  ;;  %v1521_v8 = vadd.f32 %v5878_v1, %v5817_v33 }
 0x1ae   : > { %v2002_v16 = vadd.f32 %v5834_v58, %v2001_v29  ;;  %v2500_v14 = vmax.f32 %v2010_v19, 0.0  ;;  %v1642_v39 = vmax.f32 %v1486_v5, 0.0 }
 0x1af   : > { %v4896_v15 = vpop.f32.mrf.mxu1  ;;  %4991 = vmatmul.mubr.msk.bf16.gmra.mxu1 %vm1755_vm2, %v1705_v2  ;;  %v1650_v59 = vmax.f32 %v1518_v35, 0.0 }
 0x1b0   : > { %v2498_v49 = vmax.f32 %v2002_v16, 0.0  ;;  %4994 = vmatprep.mubr.msk.bf16.mxu1 %vm1755_vm2, %v1706_v51  ;;  %v2624_v48 = vpack.c.bf16 %v2500_v14, %v2499_v47  ;;  %v2023_v38 = vadd.f32 %v4896_v15, %v5834_v58  ;;  %v1643_v16 = vmax.f32 %v1489_v9, 0.0 }
 0x1b1   : > { %v2014_v22 = vpop.f32.mrf.mxu1 }
 0x1b2   : > { %v2623_v25 = vpack.c.bf16 %v2498_v49, %v2497_v6  ;;  %v2015_v50 = vadd.f32 %v5834_v58, %v2014_v22  ;;  %v2503_v17 = vmax.f32 %v2023_v38, 0.0  ;;  %v1644_v6 = vmax.f32 %v1494_v21, 0.0 }
 0x1b3   : > { %v4897_v62 = vpop.f32.mrf.mxu1  ;;  %v1645_v49 = vmax.f32 %v1497_v34, 0.0  ;;  %v1711_v22 = vpack.c.bf16 %v1643_v16, %v1642_v39  ;;  %v1646_v38 = vmax.f32 %v1502_v46, 0.0 }
 0x1b4   : > { %v2026_v44 = vadd.f32 %v4897_v62, %v5834_v58  ;;  %5026 = vmatprep.mubr.msk.bf16.mxu0 %vm1755_vm2, %v2623_v25  ;;  %v2501_v45 = vmax.f32 %v2015_v50, 0.0  ;;  %v1510_v50 = vadd.f32 %v5878_v1, %v5809_v53 }
 0x1b5   : > { %v2017_v32 = vpop.f32.mrf.mxu1  ;;  %5027 = vmatmul.mubr.msk.bf16.gmra.mxu0 %vm1755_vm2, %v2624_v48  ;;  %v1712_v62 = vpack.c.bf16 %v1645_v49, %v1644_v6 }
 0x1b6   : > { %v2018_v27 = vadd.f32 %v5834_v58, %v2017_v32  ;;  %v2504_v10 = vmax.f32 %v2026_v44, 0.0  ;;  %v1513_v44 = vadd.f32 %v5878_v1, %v5823_v41  ;;  %v1647_v32 = vmax.f32 %v1505_v61, 0.0 }
 0x1b7   : > { %v4900_v31 = vpop.f32.mrf.mxu1  ;;  %4995 = vmatmul.mubr.msk.bf16.gmra.mxu1 %vm1755_vm2, %v1707_v54  ;;  %v1648_v55 = vmax.f32 %v1510_v50, 0.0 }
 0x1b8   : > { %v2502_v60 = vmax.f32 %v2018_v27, 0.0  ;;  %4998 = vmatprep.mubr.msk.bf16.mxu1 %vm1755_vm2, %v1708_v52  ;;  %v2626_v18 = vpack.c.bf16 %v2504_v10, %v2503_v17  ;;  %v2039_v19 = vadd.f32 %v4900_v31, %v5834_v58  ;;  %v1649_v27 = vmax.f32 %v1513_v44, 0.0 }
 0x1b9   : > { %v2030_v11 = vpop.f32.mrf.mxu1 }
 0x1ba   : > { %v2625_v7 = vpack.c.bf16 %v2502_v60, %v2501_v45  ;;  %v2031_v13 = vadd.f32 %v5834_v58, %v2030_v11  ;;  %v2507_v14 = vmax.f32 %v2039_v19, 0.0  ;;  %v1713_v60 = vpack.c.bf16 %v1647_v32, %v1646_v38 }
 0x1bb   : > { %v4901_v4 = vpop.f32.mrf.mxu1  ;;  %v1714_v3 = vpack.c.bf16 %v1649_v27, %v1648_v55 }
 0x1bc   : > { %v2042_v30 = vadd.f32 %v4901_v4, %v5834_v58  ;;  %5030 = vmatprep.mubr.msk.bf16.mxu0 %vm1755_vm2, %v2625_v7  ;;  %v2505_v63 = vmax.f32 %v2031_v13, 0.0 }
 0x1bd   : > { %v2033_v2 = vpop.f32.mrf.mxu1  ;;  %5031 = vmatmul.mubr.msk.bf16.gmra.mxu0 %vm1755_vm2, %v2626_v18 }
 0x1be   : > { %v2034_v29 = vadd.f32 %v5834_v58, %v2033_v2  ;;  %v2508_v51 = vmax.f32 %v2042_v30, 0.0  ;;  %v1651_v30 = vmax.f32 %v1521_v8, 0.0 }
 0x1bf   : > { %v4904_v36 = vpop.f32.mrf.mxu1  ;;  %4999 = vmatmul.mubr.msk.bf16.gmra.mxu1 %vm1755_vm2, %v1709_v43 }
 0x1c0   : > { %v2506_v24 = vmax.f32 %v2034_v29, 0.0  ;;  %5002 = vmatprep.mubr.msk.bf16.mxu1 %vm1755_vm2, %v1710_v28  ;;  %v2628_v23 = vpack.c.bf16 %v2508_v51, %v2507_v14  ;;  %v2055_v25 = vadd.f32 %v4904_v36, %v5834_v58  ;;  %v1715_v28 = vpack.c.bf16 %v1651_v30, %v1650_v59 }
 0x1c1   : > { %v2046_v15 = vpop.f32.mrf.mxu1 }
 0x1c2   : > { %v2627_v37 = vpack.c.bf16 %v2506_v24, %v2505_v63  ;;  %v2047_v42 = vadd.f32 %v5834_v58, %v2046_v15  ;;  %v2511_v52 = vmax.f32 %v2055_v25, 0.0 }
 0x1c3   : > { %v4905_v26 = vpop.f32.mrf.mxu1 }
 0x1c4   : > { %v2058_v47 = vadd.f32 %v4905_v26, %v5834_v58  ;;  %5034 = vmatprep.mubr.msk.bf16.mxu0 %vm1755_vm2, %v2627_v37  ;;  %v2509_v40 = vmax.f32 %v2047_v42, 0.0 }
 0x1c5   : > { %v2049_v48 = vpop.f32.mrf.mxu1  ;;  %5035 = vmatmul.mubr.msk.bf16.gmra.mxu0 %vm1755_vm2, %v2628_v23 }
 0x1c6   : > { %v2050_v54 = vadd.f32 %v5834_v58, %v2049_v48  ;;  %v2512_v56 = vmax.f32 %v2058_v47, 0.0 }
 0x1c7   : > { %v4908_v57 = vpop.f32.mrf.mxu1  ;;  %5003 = vmatmul.mubr.msk.bf16.gmra.mxu1 %vm1755_vm2, %v1711_v22 }
 0x1c8   : > { %v2510_v0 = vmax.f32 %v2050_v54, 0.0  ;;  %5006 = vmatprep.mubr.msk.bf16.mxu1 %vm1755_vm2, %v1712_v62  ;;  %v2630_v10 = vpack.c.bf16 %v2512_v56, %v2511_v52  ;;  %v2071_v17 = vadd.f32 %v4908_v57, %v5834_v58 }
 0x1c9   : > { %v2062_v12 = vpop.f32.mrf.mxu1 }
 0x1ca   : > { %v2629_v53 = vpack.c.bf16 %v2510_v0, %v2509_v40  ;;  %v2063_v41 = vadd.f32 %v5834_v58, %v2062_v12  ;;  %v2515_v43 = vmax.f32 %v2071_v17, 0.0 }
 0x1cb   : > { %v4909_v31 = vpop.f32.mrf.mxu1 }
 0x1cc   : > { %v2074_v45 = vadd.f32 %v4909_v31, %v5834_v58  ;;  %5038 = vmatprep.mubr.msk.bf16.mxu0 %vm1755_vm2, %v2629_v53  ;;  %v2513_v4 = vmax.f32 %v2063_v41, 0.0 }
 0x1cd   : > { %v2065_v11 = vpop.f32.mrf.mxu1  ;;  %5039 = vmatmul.mubr.msk.bf16.gmra.mxu0 %vm1755_vm2, %v2630_v10 }
 0x1ce   : > { %v2066_v20 = vadd.f32 %v5834_v58, %v2065_v11  ;;  %v2516_v7 = vmax.f32 %v2074_v45, 0.0 }
 0x1cf   : > { %v4912_v18 = vpop.f32.mrf.mxu1  ;;  %5007 = vmatmul.mubr.msk.bf16.gmra.mxu1 %vm1755_vm2, %v1713_v60 }
 0x1d0   : > { %v2514_v13 = vmax.f32 %v2066_v20, 0.0  ;;  %5010 = vmatprep.mubr.msk.bf16.mxu1 %vm1755_vm2, %v1714_v3  ;;  %v2632_v5 = vpack.c.bf16 %v2516_v7, %v2515_v43  ;;  %v2087_v21 = vadd.f32 %v4912_v18, %v5834_v58 }
 0x1d1   : > { %v2078_v33 = vpop.f32.mrf.mxu1 }
 0x1d2   : > { %v2631_v1 = vpack.c.bf16 %v2514_v13, %v2513_v4  ;;  %v2079_v19 = vadd.f32 %v5834_v58, %v2078_v33  ;;  %v2519_v39 = vmax.f32 %v2087_v21, 0.0 }
 0x1d3   : > { %v4913_v9 = vpop.f32.mrf.mxu1 }
 0x1d4   : > { %v2090_v2 = vadd.f32 %v4913_v9, %v5834_v58  ;;  %5042 = vmatprep.mubr.msk.bf16.mxu0 %vm1755_vm2, %v2631_v1  ;;  %v2517_v63 = vmax.f32 %v2079_v19, 0.0 }
 0x1d5   : > { %v2081_v34 = vpop.f32.mrf.mxu1  ;;  %5043 = vmatmul.mubr.msk.bf16.gmra.mxu0 %vm1755_vm2, %v2632_v5 }
 0x1d6   : > { %v2082_v29 = vadd.f32 %v5834_v58, %v2081_v34  ;;  %v2520_v51 = vmax.f32 %v2090_v2, 0.0 }
 0x1d7   : > { %v4916_v36 = vpop.f32.mrf.mxu1  ;;  %5011 = vmatmul.mubr.msk.bf16.gmra.mxu1 %vm1755_vm2, %v1715_v28 }
 0x1d8   : > { %v2518_v24 = vmax.f32 %v2082_v29, 0.0  ;;  %v2634_v15 = vpack.c.bf16 %v2520_v51, %v2519_v39  ;;  %v2103_v23 = vadd.f32 %v4916_v36, %v5834_v58 }
 0x1d9   : > { %v2094_v16 = vpop.f32.mrf.mxu1 }
 0x1da   : > { %v2633_v14 = vpack.c.bf16 %v2518_v24, %v2517_v63  ;;  %v2095_v49 = vadd.f32 %v5834_v58, %v2094_v16  ;;  %v2523_v25 = vmax.f32 %v2103_v23, 0.0 }
 0x1db   : > { %v4917_v6 = vpop.f32.mrf.mxu1 }
 0x1dc   : > { %v2106_v37 = vadd.f32 %v4917_v6, %v5834_v58  ;;  %5046 = vmatprep.mubr.msk.bf16.mxu0 %vm1755_vm2, %v2633_v14  ;;  %v2521_v46 = vmax.f32 %v2095_v49, 0.0 }
 0x1dd   : > { %v2097_v26 = vpop.f32.mrf.mxu1  ;;  %5047 = vmatmul.mubr.msk.bf16.gmra.mxu0 %vm1755_vm2, %v2634_v15 }
 0x1de   : > { %v2098_v42 = vadd.f32 %v5834_v58, %v2097_v26  ;;  %v2524_v47 = vmax.f32 %v2106_v37, 0.0 }
 0x1df   : > { %v4920_v22 = vpop.f32.mrf.mxu1 }
 0x1e0   : > { %v2522_v61 = vmax.f32 %v2098_v42, 0.0  ;;  %v2636_v50 = vpack.c.bf16 %v2524_v47, %v2523_v25  ;;  %v2119_v57 = vadd.f32 %v4920_v22, %v5834_v58 }
 0x1e1   : > { %v2110_v48 = vpop.f32.mrf.mxu1 }
 0x1e2   : > { %v2635_v62 = vpack.c.bf16 %v2522_v61, %v2521_v46  ;;  %v2111_v54 = vadd.f32 %v5834_v58, %v2110_v48  ;;  %v2527_v55 = vmax.f32 %v2119_v57, 0.0 }
 0x1e3   : > { %v4921_v44 = vpop.f32.mrf.mxu1 }
 0x1e4   : > { %v2122_v56 = vadd.f32 %v4921_v44, %v5834_v58  ;;  %5050 = vmatprep.mubr.msk.bf16.mxu0 %vm1755_vm2, %v2635_v62  ;;  %v2525_v52 = vmax.f32 %v2111_v54, 0.0 }
 0x1e5   : > { %v2113_v40 = vpop.f32.mrf.mxu1  ;;  %5051 = vmatmul.mubr.msk.bf16.gmra.mxu0 %vm1755_vm2, %v2636_v50 }
 0x1e6   : > { %v2114_v0 = vadd.f32 %v5834_v58, %v2113_v40  ;;  %v2528_v38 = vmax.f32 %v2122_v56, 0.0 }
 0x1e7   : > { %v4924_v32 = vpop.f32.mrf.mxu1 }
 0x1e8   : > { %v2526_v12 = vmax.f32 %v2114_v0, 0.0  ;;  %v2638_v10 = vpack.c.bf16 %v2528_v38, %v2527_v55  ;;  %v2135_v60 = vadd.f32 %v4924_v32, %v5834_v58 }
 0x1e9   : > { %v2126_v27 = vpop.f32.mrf.mxu1 }
 0x1ea   : > { %v2637_v53 = vpack.c.bf16 %v2526_v12, %v2525_v52  ;;  %v2127_v41 = vadd.f32 %v5834_v58, %v2126_v27  ;;  %v2531_v7 = vmax.f32 %v2135_v60, 0.0 }
 0x1eb   : > { %v4925_v31 = vpop.f32.mrf.mxu1 }
 0x1ec   : > { %v2138_v45 = vadd.f32 %v4925_v31, %v5834_v58  ;;  %5054 = vmatprep.mubr.msk.bf16.mxu0 %vm1755_vm2, %v2637_v53  ;;  %v2529_v3 = vmax.f32 %v2127_v41, 0.0 }
 0x1ed   : > { %v2129_v35 = vpop.f32.mrf.mxu1  ;;  %5055 = vmatmul.mubr.msk.bf16.gmra.mxu0 %vm1755_vm2, %v2638_v10 }
 0x1ee   : > { %v2130_v8 = vadd.f32 %v5834_v58, %v2129_v35  ;;  %v2532_v17 = vmax.f32 %v2138_v45, 0.0 }
 0x1ef   : > { %v4928_v11 = vpop.f32.mrf.mxu1 }
 0x1f0   : > { %v2530_v20 = vmax.f32 %v2130_v8, 0.0  ;;  %v2640_v13 = vpack.c.bf16 %v2532_v17, %v2531_v7  ;;  %v2151_v33 = vadd.f32 %v4928_v11, %v5834_v58 }
 0x1f1   : > { %v2142_v18 = vpop.f32.mrf.mxu1 }
 0x1f2   : > { %v2639_v4 = vpack.c.bf16 %v2530_v20, %v2529_v3  ;;  %v2143_v30 = vadd.f32 %v5834_v58, %v2142_v18  ;;  %v2535_v21 = vmax.f32 %v2151_v33, 0.0 }
 0x1f3   : > { %v4929_v59 = vpop.f32.mrf.mxu1 }
 0x1f4   : > { %v2154_v43 = vadd.f32 %v4929_v59, %v5834_v58  ;;  %5058 = vmatprep.mubr.msk.bf16.mxu0 %vm1755_vm2, %v2639_v4  ;;  %v2533_v2 = vmax.f32 %v2143_v30, 0.0 }
 0x1f5   : > { %v2145_v1 = vpop.f32.mrf.mxu1  ;;  %5059 = vmatmul.mubr.msk.bf16.gmra.mxu0 %vm1755_vm2, %v2640_v13 }
 0x1f6   : > { %v2146_v5 = vadd.f32 %v5834_v58, %v2145_v1  ;;  %v2536_v9 = vmax.f32 %v2154_v43, 0.0 }
 0x1f7   : > { %v4932_v19 = vpop.f32.mrf.mxu1 }
 0x1f8   : > { %v2534_v28 = vmax.f32 %v2146_v5, 0.0  ;;  %v2642_v51 = vpack.c.bf16 %v2536_v9, %v2535_v21  ;;  %v2167_v39 = vadd.f32 %v4932_v19, %v5834_v58 }
 0x1f9   : > { %v2158_v34 = vpop.f32.mrf.mxu1 }
 0x1fa   : > { %v2641_v29 = vpack.c.bf16 %v2534_v28, %v2533_v2  ;;  %v2159_v63 = vadd.f32 %v5834_v58, %v2158_v34  ;;  %v2539_v23 = vmax.f32 %v2167_v39, 0.0 }
 0x1fb   : > { %v4933_v36 = vpop.f32.mrf.mxu1 }
 0x1fc   : > { %v2170_v24 = vadd.f32 %v4933_v36, %v5834_v58  ;;  %5062 = vmatprep.mubr.msk.bf16.mxu0 %vm1755_vm2, %v2641_v29  ;;  %v2537_v49 = vmax.f32 %v2159_v63, 0.0 }
 0x1fd   : > { %v2161_v16 = vpop.f32.mrf.mxu1  ;;  %5063 = vmatmul.mubr.msk.bf16.gmra.mxu0 %vm1755_vm2, %v2642_v51 }
 0x1fe   : > { %v2162_v14 = vadd.f32 %v5834_v58, %v2161_v16  ;;  %v2540_v15 = vmax.f32 %v2170_v24, 0.0 }
 0x1ff   : > { %v4936_v6 = vpop.f32.mrf.mxu1 }
 0x200   : > { %v2538_v37 = vmax.f32 %v2162_v14, 0.0  ;;  %v2644_v47 = vpack.c.bf16 %v2540_v15, %v2539_v23  ;;  %v2183_v25 = vadd.f32 %v4936_v6, %v5834_v58 }
 0x201   : > { %v2174_v26 = vpop.f32.mrf.mxu1 }
 0x202   : > { %v2643_v42 = vpack.c.bf16 %v2538_v37, %v2537_v49  ;;  %v2175_v46 = vadd.f32 %v5834_v58, %v2174_v26  ;;  %v2543_v57 = vmax.f32 %v2183_v25, 0.0 }
 0x203   : > { %v4937_v22 = vpop.f32.mrf.mxu1 }
 0x204   : > { %v2186_v61 = vadd.f32 %v4937_v22, %v5834_v58  ;;  %5066 = vmatprep.mubr.msk.bf16.mxu0 %vm1755_vm2, %v2643_v42  ;;  %v2541_v54 = vmax.f32 %v2175_v46, 0.0 }
 0x205   : > { %v2177_v48 = vpop.f32.mrf.mxu1  ;;  %5067 = vmatmul.mubr.msk.bf16.gmra.mxu0 %vm1755_vm2, %v2644_v47 }
 0x206   : > { %v2178_v62 = vadd.f32 %v5834_v58, %v2177_v48  ;;  %v2544_v50 = vmax.f32 %v2186_v61, 0.0 }
 0x207   : > { %v4940_v44 = vpop.f32.mrf.mxu1 }
 0x208   : > { %v2542_v56 = vmax.f32 %v2178_v62, 0.0  ;;  %v2646_v38 = vpack.c.bf16 %v2544_v50, %v2543_v57  ;;  %v2199_v55 = vadd.f32 %v4940_v44, %v5834_v58 }
 0x209   : > { %v2190_v40 = vpop.f32.mrf.mxu1 }
 0x20a   : > { %v2645_v0 = vpack.c.bf16 %v2542_v56, %v2541_v54  ;;  %v2191_v52 = vadd.f32 %v5834_v58, %v2190_v40  ;;  %v2547_v60 = vmax.f32 %v2199_v55, 0.0 }
 0x20b   : > { %v4941_v32 = vpop.f32.mrf.mxu1 }
 0x20c   : > { %v2202_v12 = vadd.f32 %v4941_v32, %v5834_v58  ;;  %5070 = vmatprep.mubr.msk.bf16.mxu0 %vm1755_vm2, %v2645_v0  ;;  %v2545_v41 = vmax.f32 %v2191_v52, 0.0 }
 0x20d   : > { %v2193_v27 = vpop.f32.mrf.mxu1  ;;  %5071 = vmatmul.mubr.msk.bf16.gmra.mxu0 %vm1755_vm2, %v2646_v38 }
 0x20e   : > { %v2194_v53 = vadd.f32 %v5834_v58, %v2193_v27  ;;  %v2548_v10 = vmax.f32 %v2202_v12, 0.0 }
 0x20f   : > { %v4944_v31 = vpop.f32.mrf.mxu1 }
 0x210   : > { %v2546_v45 = vmax.f32 %v2194_v53, 0.0  ;;  %v2648_v17 = vpack.c.bf16 %v2548_v10, %v2547_v60  ;;  %v2215_v7 = vadd.f32 %v4944_v31, %v5834_v58 }
 0x211   : > { %v2206_v35 = vpop.f32.mrf.mxu1 }
 0x212   : > { %v2647_v8 = vpack.c.bf16 %v2546_v45, %v2545_v41  ;;  %v2207_v3 = vadd.f32 %v5834_v58, %v2206_v35  ;;  %v2551_v33 = vmax.f32 %v2215_v7, 0.0 }
 0x213   : > { %v4945_v11 = vpop.f32.mrf.mxu1 }
 0x214   : > { %v2218_v20 = vadd.f32 %v4945_v11, %v5834_v58  ;;  %5074 = vmatprep.mubr.msk.bf16.mxu0 %vm1755_vm2, %v2647_v8  ;;  %v2549_v30 = vmax.f32 %v2207_v3, 0.0 }
 0x215   : > { %v2209_v18 = vpop.f32.mrf.mxu1  ;;  %5075 = vmatmul.mubr.msk.bf16.gmra.mxu0 %vm1755_vm2, %v2648_v17 }
 0x216   : > { %v2210_v4 = vadd.f32 %v5834_v58, %v2209_v18  ;;  %v2552_v13 = vmax.f32 %v2218_v20, 0.0 }
 0x217   : > { %v4948_v59 = vpop.f32.mrf.mxu1 }
 0x218   : > { %v2550_v43 = vmax.f32 %v2210_v4, 0.0  ;;  %v2650_v9 = vpack.c.bf16 %v2552_v13, %v2551_v33  ;;  %v2231_v21 = vadd.f32 %v4948_v59, %v5834_v58 }
 0x219   : > { %v2222_v1 = vpop.f32.mrf.mxu1 }
 0x21a   : > { %v2649_v5 = vpack.c.bf16 %v2550_v43, %v2549_v30  ;;  %v2223_v2 = vadd.f32 %v5834_v58, %v2222_v1  ;;  %v2555_v39 = vmax.f32 %v2231_v21, 0.0 }
 0x21b   : > { %v4949_v19 = vpop.f32.mrf.mxu1 }
 0x21c   : > { %v2234_v28 = vadd.f32 %v4949_v19, %v5834_v58  ;;  %5078 = vmatprep.mubr.msk.bf16.mxu0 %vm1755_vm2, %v2649_v5  ;;  %v2553_v63 = vmax.f32 %v2223_v2, 0.0 }
 0x21d   : > { %v2225_v34 = vpop.f32.mrf.mxu1  ;;  %5079 = vmatmul.mubr.msk.bf16.gmra.mxu0 %vm1755_vm2, %v2650_v9 }
 0x21e   : > { %v2226_v29 = vadd.f32 %v5834_v58, %v2225_v34  ;;  %v2556_v51 = vmax.f32 %v2234_v28, 0.0 }
 0x21f   : > { %v4952_v36 = vpop.f32.mrf.mxu1 }
 0x220   : > { %v2554_v24 = vmax.f32 %v2226_v29, 0.0  ;;  %v2652_v15 = vpack.c.bf16 %v2556_v51, %v2555_v39  ;;  %v2247_v23 = vadd.f32 %v4952_v36, %v5834_v58 }
 0x221   : > { %v2238_v16 = vpop.f32.mrf.mxu1 }
 0x222   : > { %v2651_v14 = vpack.c.bf16 %v2554_v24, %v2553_v63  ;;  %v2239_v49 = vadd.f32 %v5834_v58, %v2238_v16  ;;  %v2559_v25 = vmax.f32 %v2247_v23, 0.0 }
 0x223   : > { %v4953_v6 = vpop.f32.mrf.mxu1 }
 0x224   : > { %v2250_v37 = vadd.f32 %v4953_v6, %v5834_v58  ;;  %5082 = vmatprep.mubr.msk.bf16.mxu0 %vm1755_vm2, %v2651_v14  ;;  %v2557_v46 = vmax.f32 %v2239_v49, 0.0 }
 0x225   : > { %v2241_v26 = vpop.f32.mrf.mxu1  ;;  %5083 = vmatmul.mubr.msk.bf16.gmra.mxu0 %vm1755_vm2, %v2652_v15 }
 0x226   : > { %v2242_v42 = vadd.f32 %v5834_v58, %v2241_v26  ;;  %v2560_v47 = vmax.f32 %v2250_v37, 0.0 }
 0x227   : > { %v4956_v22 = vpop.f32.mrf.mxu1 }
 0x228   : > { %v2558_v61 = vmax.f32 %v2242_v42, 0.0  ;;  %v2654_v50 = vpack.c.bf16 %v2560_v47, %v2559_v25  ;;  %v2263_v57 = vadd.f32 %v4956_v22, %v5834_v58 }
 0x229   : > { %v2254_v48 = vpop.f32.mrf.mxu1 }
 0x22a   : > { %v2653_v62 = vpack.c.bf16 %v2558_v61, %v2557_v46  ;;  %v2255_v54 = vadd.f32 %v5834_v58, %v2254_v48  ;;  %v2563_v55 = vmax.f32 %v2263_v57, 0.0 }
 0x22b   : > { %v4957_v44 = vpop.f32.mrf.mxu1 }
 0x22c   : > { %v2266_v56 = vadd.f32 %v4957_v44, %v5834_v58  ;;  %5086 = vmatprep.mubr.msk.bf16.mxu0 %vm1755_vm2, %v2653_v62  ;;  %v2561_v52 = vmax.f32 %v2255_v54, 0.0 }
 0x22d   : > { %v2257_v40 = vpop.f32.mrf.mxu1  ;;  %5087 = vmatmul.mubr.msk.bf16.gmra.mxu0 %vm1755_vm2, %v2654_v50 }
 0x22e   : > { %v2258_v0 = vadd.f32 %v5834_v58, %v2257_v40  ;;  %v2564_v38 = vmax.f32 %v2266_v56, 0.0 }
 0x22f   : > { %v4960_v32 = vpop.f32.mrf.mxu1 }
 0x230   : > { %v2562_v12 = vmax.f32 %v2258_v0, 0.0  ;;  %v2656_v10 = vpack.c.bf16 %v2564_v38, %v2563_v55  ;;  %v2279_v60 = vadd.f32 %v4960_v32, %v5834_v58 }
 0x231   : > { %v2270_v27 = vpop.f32.mrf.mxu1 }
 0x232   : > { %v2655_v53 = vpack.c.bf16 %v2562_v12, %v2561_v52  ;;  %v2271_v41 = vadd.f32 %v5834_v58, %v2270_v27  ;;  %v2567_v7 = vmax.f32 %v2279_v60, 0.0 }
 0x233   : > { %v4961_v31 = vpop.f32.mrf.mxu1 }
 0x234   : > { %v2282_v45 = vadd.f32 %v4961_v31, %v5834_v58  ;;  %5090 = vmatprep.mubr.msk.bf16.mxu0 %vm1755_vm2, %v2655_v53  ;;  %v2565_v3 = vmax.f32 %v2271_v41, 0.0 }
 0x235   : > { %v2273_v35 = vpop.f32.mrf.mxu1  ;;  %5091 = vmatmul.mubr.msk.bf16.gmra.mxu0 %vm1755_vm2, %v2656_v10 }
 0x236   : > { %v2274_v8 = vadd.f32 %v5834_v58, %v2273_v35  ;;  %v2568_v17 = vmax.f32 %v2282_v45, 0.0 }
 0x237   : > { %v4964_v11 = vpop.f32.mrf.mxu1 }
 0x238   : > { %v2566_v20 = vmax.f32 %v2274_v8, 0.0  ;;  %v2658_v13 = vpack.c.bf16 %v2568_v17, %v2567_v7  ;;  %v2295_v33 = vadd.f32 %v4964_v11, %v5834_v58 }
 0x239   : > { %v2286_v18 = vpop.f32.mrf.mxu1 }
 0x23a   : > { %v2657_v4 = vpack.c.bf16 %v2566_v20, %v2565_v3  ;;  %v2287_v30 = vadd.f32 %v5834_v58, %v2286_v18  ;;  %v2571_v21 = vmax.f32 %v2295_v33, 0.0 }
 0x23b   : > { %v4965_v59 = vpop.f32.mrf.mxu1 }
 0x23c   : > { %v2298_v43 = vadd.f32 %v4965_v59, %v5834_v58  ;;  %5094 = vmatprep.mubr.msk.bf16.mxu0 %vm1755_vm2, %v2657_v4  ;;  %v2569_v2 = vmax.f32 %v2287_v30, 0.0 }
 0x23d   : > { %v2289_v1 = vpop.f32.mrf.mxu1  ;;  %5095 = vmatmul.mubr.msk.bf16.gmra.mxu0 %vm1755_vm2, %v2658_v13 }
 0x23e   : > { %v2290_v5 = vadd.f32 %v5834_v58, %v2289_v1  ;;  %v2572_v9 = vmax.f32 %v2298_v43, 0.0 }
 0x23f   : > { %v4968_v19 = vpop.f32.mrf.mxu1 }
 0x240   : > { %v2570_v28 = vmax.f32 %v2290_v5, 0.0  ;;  %v2660_v51 = vpack.c.bf16 %v2572_v9, %v2571_v21  ;;  %v2311_v39 = vadd.f32 %v4968_v19, %v5834_v58 }
 0x241   : > { %v2302_v34 = vpop.f32.mrf.mxu1 }
 0x242   : > { %v2659_v29 = vpack.c.bf16 %v2570_v28, %v2569_v2  ;;  %v2303_v63 = vadd.f32 %v5834_v58, %v2302_v34  ;;  %v2575_v23 = vmax.f32 %v2311_v39, 0.0 }
 0x243   : > { %v4969_v36 = vpop.f32.mrf.mxu1 }
 0x244   : > { %v2314_v24 = vadd.f32 %v4969_v36, %v5834_v58  ;;  %5098 = vmatprep.mubr.msk.bf16.mxu0 %vm1755_vm2, %v2659_v29  ;;  %v2573_v49 = vmax.f32 %v2303_v63, 0.0 }
 0x245   : > { %v2305_v16 = vpop.f32.mrf.mxu1  ;;  %5099 = vmatmul.mubr.msk.bf16.gmra.mxu0 %vm1755_vm2, %v2660_v51 }
 0x246   : > { %v2306_v14 = vadd.f32 %v5834_v58, %v2305_v16  ;;  %v2576_v15 = vmax.f32 %v2314_v24, 0.0 }
 0x247   : > { %v4972_v6 = vpop.f32.mrf.mxu1 }
 0x248   : > { %v2574_v37 = vmax.f32 %v2306_v14, 0.0  ;;  %v2662_v47 = vpack.c.bf16 %v2576_v15, %v2575_v23  ;;  %v2327_v25 = vadd.f32 %v4972_v6, %v5834_v58  ;;  %v6052_v23 = vld [vmem:[%s6331_s6] ss:$0 sm:$0xff] }
 0x249   : > { %v2318_v26 = vpop.f32.mrf.mxu1 }
 0x24a   : > { %v2661_v42 = vpack.c.bf16 %v2574_v37, %v2573_v49  ;;  %v2319_v46 = vadd.f32 %v5834_v58, %v2318_v26  ;;  %v2579_v57 = vmax.f32 %v2327_v25, 0.0 }
 0x24b   : > { %v4973_v22 = vpop.f32.mrf.mxu1 }
 0x24c   : > { %v2330_v61 = vadd.f32 %v4973_v22, %v5834_v58  ;;  %5102 = vmatprep.mubr.msk.bf16.mxu0 %vm1755_vm2, %v2661_v42  ;;  %v2577_v54 = vmax.f32 %v2319_v46, 0.0 }
 0x24d   : > { %v2321_v48 = vpop.f32.mrf.mxu1  ;;  %5103 = vmatmul.mubr.msk.bf16.gmra.mxu0 %vm1755_vm2, %v2662_v47 }
 0x24e   : > { %v2322_v62 = vadd.f32 %v5834_v58, %v2321_v48  ;;  %v2580_v50 = vmax.f32 %v2330_v61, 0.0 }
 0x24f   : > { %v4976_v44 = vpop.f32.mrf.mxu1 }
 0x250   : > { %v2578_v56 = vmax.f32 %v2322_v62, 0.0  ;;  %v2664_v38 = vpack.c.bf16 %v2580_v50, %v2579_v57  ;;  %v2343_v55 = vadd.f32 %v4976_v44, %v5834_v58 }
 0x251   : > { %v2334_v40 = vpop.f32.mrf.mxu1 }
 0x252   : > { %v2663_v0 = vpack.c.bf16 %v2578_v56, %v2577_v54  ;;  %v2335_v52 = vadd.f32 %v5834_v58, %v2334_v40  ;;  %v2583_v60 = vmax.f32 %v2343_v55, 0.0 }
 0x253   : > { %v4977_v32 = vpop.f32.mrf.mxu1 }
 0x254   : > { %v2346_v12 = vadd.f32 %v4977_v32, %v5834_v58  ;;  %5106 = vmatprep.mubr.msk.bf16.mxu0 %vm1755_vm2, %v2663_v0  ;;  %v2581_v41 = vmax.f32 %v2335_v52, 0.0 }
 0x255   : > { %v2337_v27 = vpop.f32.mrf.mxu1  ;;  %5107 = vmatmul.mubr.msk.bf16.gmra.mxu0 %vm1755_vm2, %v2664_v38 }
 0x256   : > { %v2338_v53 = vadd.f32 %v5834_v58, %v2337_v27  ;;  %v2584_v10 = vmax.f32 %v2346_v12, 0.0 }
 0x257   : > { %v4980_v31 = vpop.f32.mrf.mxu1 }
 0x258   : > { %v2582_v45 = vmax.f32 %v2338_v53, 0.0  ;;  %v2666_v17 = vpack.c.bf16 %v2584_v10, %v2583_v60  ;;  %v2359_v7 = vadd.f32 %v4980_v31, %v5834_v58 }
 0x259   : > { %v2350_v35 = vpop.f32.mrf.mxu1 }
 0x25a   : > { %v2665_v8 = vpack.c.bf16 %v2582_v45, %v2581_v41  ;;  %v2351_v3 = vadd.f32 %v5834_v58, %v2350_v35  ;;  %v2587_v33 = vmax.f32 %v2359_v7, 0.0 }
 0x25b   : > { %v4981_v11 = vpop.f32.mrf.mxu1 }
 0x25c   : > { %v2362_v20 = vadd.f32 %v4981_v11, %v5834_v58  ;;  %5110 = vmatprep.mubr.msk.bf16.mxu0 %vm1755_vm2, %v2665_v8  ;;  %v2585_v30 = vmax.f32 %v2351_v3, 0.0 }
 0x25d   : > { %v2353_v18 = vpop.f32.mrf.mxu1  ;;  %5111 = vmatmul.mubr.msk.bf16.gmra.mxu0 %vm1755_vm2, %v2666_v17 }
 0x25e   : > { %v2354_v4 = vadd.f32 %v5834_v58, %v2353_v18  ;;  %v2588_v13 = vmax.f32 %v2362_v20, 0.0 }
 0x25f   : > { %v4984_v59 = vpop.f32.mrf.mxu1 }
 0x260   : > { %v2586_v43 = vmax.f32 %v2354_v4, 0.0  ;;  %v2668_v9 = vpack.c.bf16 %v2588_v13, %v2587_v33  ;;  %v2375_v21 = vadd.f32 %v4984_v59, %v5834_v58 }
 0x261   : > { %v2366_v1 = vpop.f32.mrf.mxu1 }
 0x262   : > { %v2667_v5 = vpack.c.bf16 %v2586_v43, %v2585_v30  ;;  %v2367_v2 = vadd.f32 %v5834_v58, %v2366_v1  ;;  %v2591_v39 = vmax.f32 %v2375_v21, 0.0  ;;  %v6071_v43 = vld [vmem:[%s6329_s4] ss:$0 sm:$0xff] }
 0x263   : > { %v4985_v19 = vpop.f32.mrf.mxu1 }
 0x264   : > { %v2378_v28 = vadd.f32 %v4985_v19, %v5834_v58  ;;  %5114 = vmatprep.mubr.msk.bf16.mxu0 %vm1755_vm2, %v2667_v5  ;;  %v2589_v63 = vmax.f32 %v2367_v2, 0.0 }
 0x265   : > { %v2369_v34 = vpop.f32.mrf.mxu1  ;;  %5115 = vmatmul.mubr.msk.bf16.gmra.mxu0 %vm1755_vm2, %v2668_v9 }
 0x266   : > { %v2370_v29 = vadd.f32 %v5834_v58, %v2369_v34  ;;  %v2592_v51 = vmax.f32 %v2378_v28, 0.0 }
 0x267   : > { %v4988_v36 = vpop.f32.mrf.mxu1 }
 0x268   : > { %v2590_v24 = vmax.f32 %v2370_v29, 0.0  ;;  %v2670_v15 = vpack.c.bf16 %v2592_v51, %v2591_v39  ;;  %v2391_v26 = vadd.f32 %v4988_v36, %v5834_v58 }
 0x269   : > { %v2382_v16 = vpop.f32.mrf.mxu1 }
 0x26a   : > { %v2669_v14 = vpack.c.bf16 %v2590_v24, %v2589_v63  ;;  %v2383_v49 = vadd.f32 %v5834_v58, %v2382_v16  ;;  %v2595_v44 = vmax.f32 %v2391_v26, 0.0 }
 0x26b   : > { %v4989_v6 = vpop.f32.mrf.mxu1 }
 0x26c   : > { %v2394_v37 = vadd.f32 %v4989_v6, %v5834_v58  ;;  %5118 = vmatprep.mubr.msk.bf16.mxu0 %vm1755_vm2, %v2669_v14  ;;  %v2593_v62 = vmax.f32 %v2383_v49, 0.0 }
 0x26d   : > { %v2385_v42 = vpop.f32.mrf.mxu1  ;;  %v5024_v47 = vpop.f32.mrf.mxu0  ;;  %5119 = vmatmul.mubr.msk.bf16.gmra.mxu0 %vm1755_vm2, %v2670_v15 }
 0x26e   : > { %v2386_v22 = vadd.f32 %v5834_v58, %v2385_v42  ;;  %v2596_v46 = vmax.f32 %v2394_v37, 0.0  ;;  %v2959_v61 = vadd.f32 %v5024_v47, %v6052_v23 }
 0x26f   : > { %v4992_v25 = vpop.f32.mrf.mxu1  ;;  %v2950_v48 = vpop.f32.mrf.mxu0 }
 0x270   : > { %v2594_v50 = vmax.f32 %v2386_v22, 0.0  ;;  %v2951_v40 = vadd.f32 %v6052_v23, %v2950_v48  ;;  %v2672_v38 = vpack.c.bf16 %v2596_v46, %v2595_v44  ;;  %v3463_v32 = vmax.f32 %v2959_v61, 0.0 }
 0x271   : > { %v2398_v54 = vpop.f32.mrf.mxu1  ;;  %v5025_v56 = vpop.f32.mrf.mxu0  ;;  %v2407_v31 = vadd.f32 %v4992_v25, %v5834_v58 }
 0x272   : > { %v2671_v57 = vpack.c.bf16 %v2594_v50, %v2593_v62  ;;  %v2962_v0 = vadd.f32 %v5025_v56, %v6052_v23  ;;  %v2399_v55 = vadd.f32 %v5834_v58, %v2398_v54  ;;  %v3461_v60 = vmax.f32 %v2951_v40, 0.0 }
 0x273   : > { %v4993_v52 = vpop.f32.mrf.mxu1  ;;  %v2953_v12 = vpop.f32.mrf.mxu0  ;;  %v2599_v59 = vmax.f32 %v2407_v31, 0.0 }
 0x274   : > { %v3464_v27 = vmax.f32 %v2962_v0, 0.0  ;;  %v2410_v53 = vadd.f32 %v4993_v52, %v5834_v58  ;;  %v2954_v10 = vadd.f32 %v6052_v23, %v2953_v12  ;;  %5122 = vmatprep.mubr.msk.bf16.mxu0 %vm1755_vm2, %v2671_v57  ;;  %v2597_v7 = vmax.f32 %v2399_v55, 0.0 }
 0x275   : > { %v2401_v41 = vpop.f32.mrf.mxu1  ;;  %v5028_v45 = vpop.f32.mrf.mxu0  ;;  %5123 = vmatmul.mubr.msk.bf16.gmra.mxu0 %vm1755_vm2, %v2672_v38 }
 0x276   : > { %v3604_v35 = vmax.f32 %v3463_v32, %v3464_v27  ;;  %v3462_v8 = vmax.f32 %v2954_v10, 0.0  ;;  %v2402_v17 = vadd.f32 %v5834_v58, %v2401_v41  ;;  %v2600_v11 = vmax.f32 %v2410_v53, 0.0 }
 0x277   : > { %v4996_v3 = vpop.f32.mrf.mxu1  ;;  %v2966_v20 = vpop.f32.mrf.mxu0  ;;  %v2975_v30 = vadd.f32 %v5028_v45, %v6052_v23 }
 0x278   : > { %v3605_v18 = vrot.slane %v3604_v35, 4  ;;  %v3597_v4 = vmax.f32 %v3461_v60, %v3462_v8  ;;  %v2598_v13 = vmax.f32 %v2402_v17, 0.0  ;;  %v2423_v33 = vadd.f32 %v6071_v43, %v4996_v3 }
 0x279   : > { %v2414_v1 = vpop.f32.mrf.mxu1  ;;  %v5029_v5 = vpop.f32.mrf.mxu0  ;;  %v2674_v2 = vpack.c.bf16 %v2600_v11, %v2599_v59  ;;  %v2967_v28 = vadd.f32 %v6052_v23, %v2966_v20  ;;  %v3467_v39 = vmax.f32 %v2975_v30, 0.0 }
 0x27a   : > { %v3606_v58 = vmax.f32 %v3604_v35, %v3605_v18  ;;  %v3598_v9 = vrot.slane %v3597_v4, 4  ;;  %v2673_v19 = vpack.c.bf16 %v2598_v13, %v2597_v7  ;;  %v2978_v21 = vadd.f32 %v5029_v5, %v6052_v23 }
 0x27b   : > { %v4997_v34 = vpop.f32.mrf.mxu1  ;;  %v2969_v29 = vpop.f32.mrf.mxu0  ;;  %v2415_v63 = vadd.f32 %v6071_v43, %v2414_v1  ;;  %v2603_v16 = vmax.f32 %v2423_v33, 0.0  ;;  %v3465_v22 = vmax.f32 %v2967_v28, 0.0 }
 0x27c   : > { %v3607_v51 = vrot.slane %v3606_v58, 2  ;;  %v3599_v36 = vmax.f32 %v3597_v4, %v3598_v9  ;;  %v2426_v24 = vadd.f32 %v6071_v43, %v4997_v34  ;;  %5126 = vmatprep.mubr.msk.bf16.mxu0 %vm1755_vm2, %v2673_v19  ;;  %v3468_v14 = vmax.f32 %v2978_v21, 0.0 }
 0x27d   : > { %v2970_v15 = vadd.f32 %v6052_v23, %v2969_v29  ;;  %v2417_v6 = vpop.f32.mrf.mxu1  ;;  %v5032_v49 = vpop.f32.mrf.mxu0  ;;  %5127 = vmatmul.mubr.msk.bf16.gmra.mxu0 %vm1755_vm2, %v2674_v2  ;;  %v2601_v54 = vmax.f32 %v2415_v63, 0.0 }
 0x27e   : > { %v3608_v37 = vmax.f32 %v3606_v58, %v3607_v51  ;;  %v3600_v26 = vrot.slane %v3599_v36, 2  ;;  %v2604_v42 = vmax.f32 %v2426_v24, 0.0  ;;  %v2418_v47 = vadd.f32 %v6071_v43, %v2417_v6 }
 0x27f   : > { %v3618_v46 = vmax.f32 %v3467_v39, %v3468_v14  ;;  %v3466_v61 = vmax.f32 %v2970_v15, 0.0  ;;  %v2991_v25 = vadd.f32 %v5032_v49, %v6052_v23  ;;  %v5000_v48 = vpop.f32.mrf.mxu1  ;;  %v2982_v62 = vpop.f32.mrf.mxu0 }
 0x280   : > { %v3609_v50 = vrot.slane %v3608_v37, 1  ;;  %v3601_v44 = vmax.f32 %v3599_v36, %v3600_v26  ;;  %v2602_v56 = vmax.f32 %v2418_v47, 0.0  ;;  %v2676_v52 = vpack.c.bf16 %v2604_v42, %v2603_v16 }
 0x281   : > { %v3619_v57 = vrot.slane %v3618_v46, 4  ;;  %v3611_v40 = vmax.f32 %v3465_v22, %v3466_v61  ;;  %v2430_v0 = vpop.f32.mrf.mxu1  ;;  %v5033_v38 = vpop.f32.mrf.mxu0  ;;  %v2439_v55 = vadd.f32 %v6071_v43, %v5000_v48  ;;  %v3471_v10 = vmax.f32 %v2991_v25, 0.0 }
 0x282   : > { %v3602_v32 = vrot.slane %v3601_v44, 1  ;;  %v2675_v12 = vpack.c.bf16 %v2602_v56, %v2601_v54  ;;  %v2983_v31 = vadd.f32 %v6052_v23, %v2982_v62  ;;  %v3610_v60 = vmax.f32 %v3608_v37, %v3609_v50 }
 0x283   : > { %v3620_v27 = vmax.f32 %v3618_v46, %v3619_v57  ;;  %v3612_v53 = vrot.slane %v3611_v40, 4  ;;  %v5001_v41 = vpop.f32.mrf.mxu1  ;;  %v2985_v45 = vpop.f32.mrf.mxu0  ;;  %v2431_v35 = vadd.f32 %v6071_v43, %v2430_v0  ;;  %v2994_v8 = vadd.f32 %v5033_v38, %v6052_v23 }
 0x284   : > { %v2442_v17 = vadd.f32 %v6071_v43, %v5001_v41  ;;  %5130 = vmatprep.mubr.msk.bf16.mxu0 %vm1755_vm2, %v2675_v12  ;;  %v3603_v11 = vmax.f32 %v3601_v44, %v3602_v32  ;;  %v2986_v7 = vadd.f32 %v6052_v23, %v2985_v45  ;;  %v2607_v13 = vmax.f32 %v2439_v55, 0.0 }
 0x285   : > { %v3621_v3 = vrot.slane %v3620_v27, 2  ;;  %v3613_v20 = vmax.f32 %v3611_v40, %v3612_v53  ;;  %v2433_v18 = vpop.f32.mrf.mxu1  ;;  %v5036_v4 = vpop.f32.mrf.mxu0  ;;  %5131 = vmatmul.mubr.msk.bf16.gmra.mxu0 %vm1755_vm2, %v2676_v52  ;;  %v3472_v59 = vmax.f32 %v2994_v8, 0.0  ;;  %v3469_v58 = vmax.f32 %v2983_v31, 0.0 }
 0x286   : > { %v2608_v30 = vmax.f32 %v2442_v17, 0.0  ;;  %v2434_v33 = vadd.f32 %v6071_v43, %v2433_v18  ;;  %v3470_v9 = vmax.f32 %v2986_v7, 0.0  ;;  %v2605_v28 = vmax.f32 %v2431_v35, 0.0 }
 0x287   : > { %v3622_v1 = vmax.f32 %v3620_v27, %v3621_v3  ;;  %v3614_v5 = vrot.slane %v3613_v20, 2  ;;  %v5004_v19 = vpop.f32.mrf.mxu1  ;;  %v2998_v2 = vpop.f32.mrf.mxu0  ;;  %v3632_v21 = vmax.f32 %v3471_v10, %v3472_v59  ;;  %v3007_v29 = vadd.f32 %v5036_v4, %v6052_v23 }
 0x288   : > { %v2606_v34 = vmax.f32 %v2434_v33, 0.0  ;;  %v4110_v51 = vsel %vm4109_vm3, %v3610_v60, %v3603_v11  ;;  %v3625_v63 = vmax.f32 %v3469_v58, %v3470_v9  ;;  %v2678_v15 = vpack.c.bf16 %v2608_v30, %v2607_v13 }
 0x289   : > { %v3615_v36 = vmax.f32 %v3613_v20, %v3614_v5  ;;  %v2446_v24 = vpop.f32.mrf.mxu1  ;;  %v5037_v39 = vpop.f32.mrf.mxu0  ;;  %v3623_v16 = vrot.slane %v3622_v1, 1  ;;  %v3633_v14 = vrot.slane %v3632_v21, 4  ;;  %v2455_v26 = vadd.f32 %v6071_v43, %v5004_v19 }
 0x28a   : > { %v2677_v6 = vpack.c.bf16 %v2606_v34, %v2605_v28  ;;  %v3626_v37 = vrot.slane %v3625_v63, 4  ;;  %v2999_v42 = vadd.f32 %v6052_v23, %v2998_v2  ;;  %v3475_v61 = vmax.f32 %v3007_v29, 0.0 }
 0x28b   : > { %v3616_v49 = vrot.slane %v3615_v36, 1  ;;  %v5005_v47 = vpop.f32.mrf.mxu1  ;;  %v3001_v22 = vpop.f32.mrf.mxu0  ;;  %v3634_v46 = vmax.f32 %v3632_v21, %v3633_v14  ;;  %v3010_v25 = vadd.f32 %v5037_v39, %v6052_v23  ;;  %v2447_v44 = vadd.f32 %v6071_v43, %v2446_v24 }
 0x28c   : > { %v2458_v48 = vadd.f32 %v6071_v43, %v5005_v47  ;;  %5134 = vmatprep.mubr.msk.bf16.mxu0 %vm1755_vm2, %v2677_v6  ;;  %v3627_v50 = vmax.f32 %v3625_v63, %v3626_v37  ;;  %v3002_v54 = vadd.f32 %v6052_v23, %v3001_v22  ;;  %v3624_v40 = vmax.f32 %v3622_v1, %v3623_v16 }
 0x28d   : > { %v3617_v62 = vmax.f32 %v3615_v36, %v3616_v49  ;;  %v2449_v56 = vpop.f32.mrf.mxu1  ;;  %v5040_v57 = vpop.f32.mrf.mxu0  ;;  %5135 = vmatmul.mubr.msk.bf16.gmra.mxu0 %vm1755_vm2, %v2678_v15  ;;  %v3635_v0 = vrot.slane %v3634_v46, 2  ;;  %v3476_v38 = vmax.f32 %v3010_v25, 0.0  ;;  %v3473_v55 = vmax.f32 %v2999_v42, 0.0 }
 0x28e   : > { %v2450_v32 = vadd.f32 %v6071_v43, %v2449_v56  ;;  %v3628_v12 = vrot.slane %v3627_v50, 2  ;;  %v3474_v27 = vmax.f32 %v3002_v54, 0.0  ;;  %v2612_v45 = vmax.f32 %v2458_v48, 0.0 }
 0x28f   : > { %v4112_v52 = vsel %vm4111_vm4, %v3617_v62, %v4110_v51  ;;  %v5008_v53 = vpop.f32.mrf.mxu1  ;;  %v3014_v10 = vpop.f32.mrf.mxu0  ;;  %v3636_v31 = vmax.f32 %v3634_v46, %v3635_v0  ;;  %v3646_v41 = vmax.f32 %v3475_v61, %v3476_v38  ;;  %v3023_v60 = vadd.f32 %v5040_v57, %v6052_v23 }
 0x290   : > { %v3629_v35 = vmax.f32 %v3627_v50, %v3628_v12  ;;  %v2609_v8 = vmax.f32 %v2447_v44, 0.0  ;;  %v3639_v17 = vmax.f32 %v3473_v55, %v3474_v27  ;;  %v2610_v11 = vmax.f32 %v2450_v32, 0.0 }
 0x291   : > { %v2462_v3 = vpop.f32.mrf.mxu1  ;;  %v5041_v20 = vpop.f32.mrf.mxu0  ;;  %v4114_v7 = vsel %vm4113_vm5, %v3624_v40, %v4112_v52  ;;  %v2611_v18 = vmax.f32 %v2455_v26, 0.0  ;;  %v3647_v4 = vrot.slane %v3646_v41, 4  ;;  %v3015_v13 = vadd.f32 %v6052_v23, %v3014_v10 }
 0x292   : > { %v3630_v59 = vrot.slane %v3629_v35, 1  ;;  %v3640_v30 = vrot.slane %v3639_v17, 4  ;;  %v2679_v33 = vpack.c.bf16 %v2610_v11, %v2609_v8  ;;  %v2463_v1 = vadd.f32 %v6071_v43, %v2462_v3 }
 0x293   : > { %v5009_v5 = vpop.f32.mrf.mxu1  ;;  %v3017_v58 = vpop.f32.mrf.mxu0  ;;  %v3637_v9 = vrot.slane %v3636_v31, 1  ;;  %v3648_v19 = vmax.f32 %v3646_v41, %v3647_v4  ;;  %v2680_v2 = vpack.c.bf16 %v2612_v45, %v2611_v18  ;;  %v3479_v28 = vmax.f32 %v3023_v60, 0.0 }
 0x294   : > { %v3631_v21 = vmax.f32 %v3629_v35, %v3630_v59  ;;  %v3641_v34 = vmax.f32 %v3639_v17, %v3640_v30  ;;  %v2471_v29 = vadd.f32 %v6071_v43, %v5008_v53  ;;  %v3026_v51 = vadd.f32 %v5041_v20, %v6052_v23  ;;  %5138 = vmatprep.mubr.msk.bf16.mxu0 %vm1755_vm2, %v2679_v33 }
 0x295   : > { %v2465_v36 = vpop.f32.mrf.mxu1  ;;  %v5044_v63 = vpop.f32.mrf.mxu0  ;;  %v3649_v24 = vrot.slane %v3648_v19, 2  ;;  %v2474_v39 = vadd.f32 %v6071_v43, %v5009_v5  ;;  %v3018_v16 = vadd.f32 %v6052_v23, %v3017_v58  ;;  %5139 = vmatmul.mubr.msk.bf16.gmra.mxu0 %vm1755_vm2, %v2680_v2  ;;  %v3477_v6 = vmax.f32 %v3015_v13, 0.0 }
 0x296   : > { %v2466_v14 = vadd.f32 %v6071_v43, %v2465_v36  ;;  %v3642_v15 = vrot.slane %v3641_v34, 2  ;;  %v2613_v49 = vmax.f32 %v2463_v1, 0.0  ;;  %v3480_v37 = vmax.f32 %v3026_v51, 0.0 }
 0x297   : > { %v5012_v26 = vpop.f32.mrf.mxu1  ;;  %v3030_v42 = vpop.f32.mrf.mxu0  ;;  %v3650_v47 = vmax.f32 %v3648_v19, %v3649_v24  ;;  %v2616_v22 = vmax.f32 %v2474_v39, 0.0  ;;  %v3478_v46 = vmax.f32 %v3018_v16, 0.0  ;;  %v3039_v61 = vadd.f32 %v5044_v63, %v6052_v23 }
 0x298   : > { %v4116_v25 = vsel %vm4115_vm6, %v3631_v21, %v4114_v7  ;;  %v3643_v48 = vmax.f32 %v3641_v34, %v3642_v15  ;;  %v3660_v62 = vmax.f32 %v3479_v28, %v3480_v37  ;;  %v2614_v50 = vmax.f32 %v2466_v14, 0.0 }
 0x299   : > { %v2478_v44 = vpop.f32.mrf.mxu1  ;;  %v5045_v54 = vpop.f32.mrf.mxu0  ;;  %v3638_v56 = vmax.f32 %v3636_v31, %v3637_v9  ;;  %v3651_v57 = vrot.slane %v3650_v47, 1  ;;  %v2615_v40 = vmax.f32 %v2471_v29, 0.0  ;;  %v3653_v0 = vmax.f32 %v3477_v6, %v3478_v46 }
 0x29a   : > { %v3644_v38 = vrot.slane %v3643_v48, 1  ;;  %v3661_v32 = vrot.slane %v3660_v62, 4  ;;  %v2681_v52 = vpack.c.bf16 %v2614_v50, %v2613_v49  ;;  %v3031_v12 = vadd.f32 %v6052_v23, %v3030_v42 }
 0x29b   : > { %v5013_v55 = vpop.f32.mrf.mxu1  ;;  %v3033_v27 = vpop.f32.mrf.mxu0  ;;  %v4118_v53 = vsel %vm4117_vm7, %v3638_v56, %v4116_v25  ;;  %v2682_v10 = vpack.c.bf16 %v2616_v22, %v2615_v40  ;;  %v3654_v41 = vrot.slane %v3653_v0, 4  ;;  %v3483_v45 = vmax.f32 %v3039_v61, 0.0 }
 0x29c   : > { %v3645_v60 = vmax.f32 %v3643_v48, %v3644_v38  ;;  %v2487_v35 = vadd.f32 %v6071_v43, %v5012_v26  ;;  %v2479_v31 = vadd.f32 %v6071_v43, %v2478_v44  ;;  %v3042_v8 = vadd.f32 %v5045_v54, %v6052_v23  ;;  %5142 = vmatprep.mubr.msk.bf16.mxu0 %vm1755_vm2, %v2681_v52 }
 0x29d   : > { %v2481_v17 = vpop.f32.mrf.mxu1  ;;  %v5048_v11 = vpop.f32.mrf.mxu0  ;;  %v3652_v3 = vmax.f32 %v3650_v47, %v3651_v57  ;;  %v3662_v20 = vmax.f32 %v3660_v62, %v3661_v32  ;;  %v2490_v7 = vadd.f32 %v6071_v43, %v5013_v55  ;;  %v3034_v18 = vadd.f32 %v6052_v23, %v3033_v27  ;;  %5143 = vmatmul.mubr.msk.bf16.gmra.mxu0 %vm1755_vm2, %v2682_v10 }
 0x29e   : > { %v4120_v4 = vsel %vm4119_vm8, %v3645_v60, %v4118_v53  ;;  %v3481_v13 = vmax.f32 %v3031_v12, 0.0  ;;  %v3484_v59 = vmax.f32 %v3042_v8, 0.0  ;;  %v2482_v30 = vadd.f32 %v6071_v43, %v2481_v17 }
 0x29f   : > { %v3046_v33 = vpop.f32.mrf.mxu0  ;;  %v4122_v1 = vsel %vm4121_vm9, %v3652_v3, %v4120_v4  ;;  %v3655_v5 = vmax.f32 %v3653_v0, %v3654_v41  ;;  %v2620_v58 = vmax.f32 %v2490_v7, 0.0  ;;  %v3482_v9 = vmax.f32 %v3034_v18, 0.0 }
 0x2a0   : > { %v4180_v19 = vmax.f32 %v4122_v1, 0.0  ;;  %v2617_v2 = vmax.f32 %v2479_v31, 0.0  ;;  %v3674_v28 = vmax.f32 %v3483_v45, %v3484_v59  ;;  %v2618_v21 = vmax.f32 %v2482_v30, 0.0 }
 0x2a1   : > { %v5049_v34 = vpop.f32.mrf.mxu0  ;;  %v2619_v29 = vmax.f32 %v2487_v35, 0.0  ;;  %v3667_v51 = vmax.f32 %v3481_v13, %v3482_v9  ;;  %v3055_v43 = vadd.f32 %v5048_v11, %v6052_v23  ;;  %v3047_v24 = vadd.f32 %v6052_v23, %v3046_v33 }
 0x2a2   : > { %4188 = vst [vmem:[%s6145_s23] sm:$0xff] %v4180_v19  ;;  %v3675_v36 = vrot.slane %v3674_v28, 4  ;;  %v2683_v63 = vpack.c.bf16 %v2618_v21, %v2617_v2  ;;  %v3058_v15 = vadd.f32 %v5049_v34, %v6052_v23  ;;  %v3663_v6 = vrot.slane %v3662_v20, 2 }
 0x2a3   : > { %v3049_v39 = vpop.f32.mrf.mxu0  ;;  %v2684_v16 = vpack.c.bf16 %v2620_v58, %v2619_v29  ;;  %v3668_v14 = vrot.slane %v3667_v51, 4  ;;  %v3656_v49 = vrot.slane %v3655_v5, 2  ;;  %v3487_v22 = vmax.f32 %v3055_v43, 0.0 }
 0x2a4   : > { %v3676_v37 = vmax.f32 %v3674_v28, %v3675_v36  ;;  %v3050_v26 = vadd.f32 %v6052_v23, %v3049_v39  ;;  %5146 = vmatprep.mubr.msk.bf16.mxu0 %vm1755_vm2, %v2683_v63  ;;  %v3488_v46 = vmax.f32 %v3058_v15, 0.0  ;;  %v3485_v61 = vmax.f32 %v3047_v24, 0.0 }
 0x2a5   : > { %v5052_v42 = vpop.f32.mrf.mxu0  ;;  %v3669_v47 = vmax.f32 %v3667_v51, %v3668_v14  ;;  %5147 = vmatmul.mubr.msk.bf16.gmra.mxu0 %vm1755_vm2, %v2684_v16  ;;  %v3664_v54 = vmax.f32 %v3662_v20, %v3663_v6  ;;  %v3657_v56 = vmax.f32 %v3655_v5, %v3656_v49 }
 0x2a6   : > { %v3486_v25 = vmax.f32 %v3050_v26, 0.0  ;;  %v3688_v50 = vmax.f32 %v3487_v22, %v3488_v46  ;;  %v3071_v44 = vadd.f32 %v5052_v42, %v6052_v23  ;;  %v3677_v57 = vrot.slane %v3676_v37, 2 }
 0x2a7   : > { %v3062_v48 = vpop.f32.mrf.mxu0  ;;  %v3670_v62 = vrot.slane %v3669_v47, 2  ;;  %v3665_v60 = vrot.slane %v3664_v54, 1  ;;  %v3658_v35 = vrot.slane %v3657_v56, 1 }
 0x2a8   : > { %v3681_v40 = vmax.f32 %v3485_v61, %v3486_v25  ;;  %v3689_v32 = vrot.slane %v3688_v50, 4  ;;  %v3063_v52 = vadd.f32 %v6052_v23, %v3062_v48  ;;  %v3491_v10 = vmax.f32 %v3071_v44, 0.0 }
 0x2a9   : > { %v5053_v0 = vpop.f32.mrf.mxu0  ;;  %v3671_v38 = vmax.f32 %v3669_v47, %v3670_v62  ;;  %v3678_v31 = vmax.f32 %v3676_v37, %v3677_v57  ;;  %v3666_v33 = vmax.f32 %v3664_v54, %v3665_v60  ;;  %v3659_v1 = vmax.f32 %v3657_v56, %v3658_v35 }
 0x2aa   : > { %v3074_v12 = vadd.f32 %v5053_v0, %v6052_v23  ;;  %v3682_v55 = vrot.slane %v3681_v40, 4  ;;  %v3690_v53 = vmax.f32 %v3688_v50, %v3689_v32  ;;  %v3489_v3 = vmax.f32 %v3063_v52, 0.0 }
 0x2ab   : > { %v3065_v27 = vpop.f32.mrf.mxu0  ;;  %v3672_v11 = vrot.slane %v3671_v38, 1  ;;  %v3679_v5 = vrot.slane %v3678_v31, 1  ;;  %v4123_v39 = vsel %vm4109_vm3, %v3666_v33, %v3659_v1 }
 0x2ac   : > { %v3492_v41 = vmax.f32 %v3074_v12, 0.0  ;;  %v3066_v45 = vadd.f32 %v6052_v23, %v3065_v27  ;;  %v3683_v8 = vmax.f32 %v3681_v40, %v3682_v55  ;;  %v3691_v18 = vrot.slane %v3690_v53, 2 }
 0x2ad   : > { %v5056_v17 = vpop.f32.mrf.mxu0  ;;  %v3673_v19 = vmax.f32 %v3671_v38, %v3672_v11  ;;  %v3680_v16 = vmax.f32 %v3678_v31, %v3679_v5 }
 0x2ae   : > { %v3702_v20 = vmax.f32 %v3491_v10, %v3492_v41  ;;  %v3490_v7 = vmax.f32 %v3066_v45, 0.0  ;;  %v3684_v4 = vrot.slane %v3683_v8, 2  ;;  %v3692_v34 = vmax.f32 %v3690_v53, %v3691_v18 }
 0x2af   : > { %v3078_v13 = vpop.f32.mrf.mxu0  ;;  %v3087_v51 = vadd.f32 %v5056_v17, %v6052_v23  ;;  %v4124_v49 = vsel %vm4111_vm4, %v3673_v19, %v4123_v39 }
 0x2b0   : > { %v3703_v59 = vrot.slane %v3702_v20, 4  ;;  %v3695_v30 = vmax.f32 %v3489_v3, %v3490_v7  ;;  %v3685_v58 = vmax.f32 %v3683_v8, %v3684_v4  ;;  %v3079_v43 = vadd.f32 %v6052_v23, %v3078_v13 }
 0x2b1   : > { %v5057_v9 = vpop.f32.mrf.mxu0  ;;  %v3693_v47 = vrot.slane %v3692_v34, 1  ;;  %v3495_v22 = vmax.f32 %v3087_v51, 0.0  ;;  %v4125_v50 = vsel %vm4113_vm5, %v3680_v16, %v4124_v49 }
 0x2b2   : > { %v3704_v2 = vmax.f32 %v3702_v20, %v3703_v59  ;;  %v3696_v28 = vrot.slane %v3695_v30, 4  ;;  %v3090_v21 = vadd.f32 %v5057_v9, %v6052_v23  ;;  %v3686_v29 = vrot.slane %v3685_v58, 1 }
 0x2b3   : > { %v3081_v36 = vpop.f32.mrf.mxu0  ;;  %v3493_v46 = vmax.f32 %v3079_v43, 0.0  ;;  %v3694_v52 = vmax.f32 %v3692_v34, %v3693_v47 }
 0x2b4   : > { %v3705_v63 = vrot.slane %v3704_v2, 2  ;;  %v3697_v24 = vmax.f32 %v3695_v30, %v3696_v28  ;;  %v3496_v14 = vmax.f32 %v3090_v21, 0.0  ;;  %v3082_v15 = vadd.f32 %v6052_v23, %v3081_v36 }
 0x2b5   : > { %v5060_v6 = vpop.f32.mrf.mxu0  ;;  %v3687_v37 = vmax.f32 %v3685_v58, %v3686_v29 }
 0x2b6   : > { %v3706_v26 = vmax.f32 %v3704_v2, %v3705_v63  ;;  %v3698_v42 = vrot.slane %v3697_v24, 2  ;;  %v3494_v61 = vmax.f32 %v3082_v15, 0.0  ;;  %v3103_v62 = vadd.f32 %v5060_v6, %v6052_v23 }
 0x2b7   : > { %v3094_v25 = vpop.f32.mrf.mxu0  ;;  %v3716_v54 = vmax.f32 %v3495_v22, %v3496_v14  ;;  %v4126_v40 = vsel %vm4115_vm6, %v3687_v37, %v4125_v50 }
 0x2b8   : > { %v3699_v48 = vmax.f32 %v3697_v24, %v3698_v42  ;;  %v3707_v44 = vrot.slane %v3706_v26, 1  ;;  %v3709_v56 = vmax.f32 %v3493_v46, %v3494_v61  ;;  %v3095_v38 = vadd.f32 %v6052_v23, %v3094_v25 }
 0x2b9   : > { %v5061_v57 = vpop.f32.mrf.mxu0  ;;  %v3499_v53 = vmax.f32 %v3103_v62, 0.0  ;;  %v4127_v60 = vsel %vm4117_vm7, %v3694_v52, %v4126_v40  ;;  %v3717_v35 = vrot.slane %v3716_v54, 4 }
 0x2ba   : > { %v3700_v0 = vrot.slane %v3699_v48, 1  ;;  %v3106_v32 = vadd.f32 %v5061_v57, %v6052_v23  ;;  %v3710_v12 = vrot.slane %v3709_v56, 4  ;;  %v3708_v45 = vmax.f32 %v3706_v26, %v3707_v44 }
 0x2bb   : > { %v3097_v55 = vpop.f32.mrf.mxu0  ;;  %v3497_v17 = vmax.f32 %v3095_v38, 0.0  ;;  %v3718_v33 = vmax.f32 %v3716_v54, %v3717_v35 }
 0x2bc   : > { %v3701_v27 = vmax.f32 %v3699_v48, %v3700_v0  ;;  %v3500_v10 = vmax.f32 %v3106_v32, 0.0  ;;  %v3098_v41 = vadd.f32 %v6052_v23, %v3097_v55  ;;  %v3711_v7 = vmax.f32 %v3709_v56, %v3710_v12 }
 0x2bd   : > { %v5064_v31 = vpop.f32.mrf.mxu0  ;;  %v3719_v43 = vrot.slane %v3718_v33, 2 }
 0x2be   : > { %v4128_v8 = vsel %vm4119_vm8, %v3701_v27, %v4127_v60  ;;  %v3730_v11 = vmax.f32 %v3499_v53, %v3500_v10  ;;  %v3498_v3 = vmax.f32 %v3098_v41, 0.0  ;;  %v3119_v18 = vadd.f32 %v5064_v31, %v6052_v23 }
 0x2bf   : > { %v4129_v20 = vsel %vm4121_vm9, %v3708_v45, %v4128_v8  ;;  %v3110_v4 = vpop.f32.mrf.mxu0  ;;  %v3712_v19 = vrot.slane %v3711_v7, 2  ;;  %v3720_v26 = vmax.f32 %v3718_v33, %v3719_v43 }
 0x2c0   : > { %v4181_v13 = vmax.f32 %v4129_v20, 0.0  ;;  %v3731_v59 = vrot.slane %v3730_v11, 4  ;;  %v3723_v30 = vmax.f32 %v3497_v17, %v3498_v3  ;;  %v3111_v58 = vadd.f32 %v6052_v23, %v3110_v4 }
 0x2c1   : > { %v5065_v1 = vpop.f32.mrf.mxu0  ;;  %v3503_v2 = vmax.f32 %v3119_v18, 0.0  ;;  %v3713_v15 = vmax.f32 %v3711_v7, %v3712_v19  ;;  %v3721_v57 = vrot.slane %v3720_v26, 1 }
 0x2c2   : > { %4189 = vst [vmem:[%s6145_s23 + $0x8] sm:$0xff] %v4181_v13  ;;  %v3724_v5 = vrot.slane %v3723_v30, 4  ;;  %v3122_v9 = vadd.f32 %v5065_v1, %v6052_v23  ;;  %v3732_v21 = vmax.f32 %v3730_v11, %v3731_v59  ;;  %v3501_v24 = vmax.f32 %v3111_v58, 0.0 }
 0x2c3   : > { %v3113_v28 = vpop.f32.mrf.mxu0  ;;  %v3714_v50 = vrot.slane %v3713_v15, 1  ;;  %v3722_v31 = vmax.f32 %v3720_v26, %v3721_v57 }
 0x2c4   : > { %v3725_v34 = vmax.f32 %v3723_v30, %v3724_v5  ;;  %v3504_v29 = vmax.f32 %v3122_v9, 0.0  ;;  %v3114_v51 = vadd.f32 %v6052_v23, %v3113_v28  ;;  %v3733_v6 = vrot.slane %v3732_v21, 2 }
 0x2c5   : > { %v5068_v36 = vpop.f32.mrf.mxu0  ;;  %v3715_v41 = vmax.f32 %v3713_v15, %v3714_v50 }
 0x2c6   : > { %v3726_v63 = vrot.slane %v3725_v34, 2  ;;  %v3744_v39 = vmax.f32 %v3503_v2, %v3504_v29  ;;  %v3502_v16 = vmax.f32 %v3114_v51, 0.0  ;;  %v3135_v47 = vadd.f32 %v5068_v36, %v6052_v23 }
 0x2c7   : > { %v3126_v14 = vpop.f32.mrf.mxu0  ;;  %v3734_v44 = vmax.f32 %v3732_v21, %v3733_v6  ;;  %v4130_v33 = vsel %vm4109_vm3, %v3722_v31, %v3715_v41 }
 0x2c8   : > { %v3745_v49 = vrot.slane %v3744_v39, 4  ;;  %v3737_v37 = vmax.f32 %v3501_v24, %v3502_v16  ;;  %v3727_v42 = vmax.f32 %v3725_v34, %v3726_v63  ;;  %v3127_v61 = vadd.f32 %v6052_v23, %v3126_v14 }
 0x2c9   : > { %v5069_v22 = vpop.f32.mrf.mxu0  ;;  %v3507_v0 = vmax.f32 %v3135_v47, 0.0  ;;  %v3735_v45 = vrot.slane %v3734_v44, 1 }
 0x2ca   : > { %v3738_v46 = vrot.slane %v3737_v37, 4  ;;  %v3746_v25 = vmax.f32 %v3744_v39, %v3745_v49  ;;  %v3138_v48 = vadd.f32 %v5069_v22, %v6052_v23  ;;  %v3728_v40 = vrot.slane %v3727_v42, 1 }
 0x2cb   : > { %v3129_v62 = vpop.f32.mrf.mxu0  ;;  %v3505_v12 = vmax.f32 %v3127_v61, 0.0  ;;  %v3736_v1 = vmax.f32 %v3734_v44, %v3735_v45 }
 0x2cc   : > { %v3739_v54 = vmax.f32 %v3737_v37, %v3738_v46  ;;  %v3130_v56 = vadd.f32 %v6052_v23, %v3129_v62  ;;  %v3508_v38 = vmax.f32 %v3138_v48, 0.0  ;;  %v3747_v27 = vrot.slane %v3746_v25, 2 }
 0x2cd   : > { %v5072_v32 = vpop.f32.mrf.mxu0  ;;  %v3729_v8 = vmax.f32 %v3727_v42, %v3728_v40 }
 0x2ce   : > { %v3740_v52 = vrot.slane %v3739_v54, 2  ;;  %v3506_v55 = vmax.f32 %v3130_v56, 0.0  ;;  %v3758_v53 = vmax.f32 %v3507_v0, %v3508_v38  ;;  %v3151_v7 = vadd.f32 %v5072_v32, %v6052_v23 }
 0x2cf   : > { %v3142_v10 = vpop.f32.mrf.mxu0  ;;  %v3748_v4 = vmax.f32 %v3746_v25, %v3747_v27  ;;  %v4131_v9 = vsel %vm4111_vm4, %v3729_v8, %v4130_v33 }
 0x2d0   : > { %v3741_v60 = vmax.f32 %v3739_v54, %v3740_v52  ;;  %v3751_v35 = vmax.f32 %v3505_v12, %v3506_v55  ;;  %v3759_v17 = vrot.slane %v3758_v53, 4  ;;  %v3143_v18 = vadd.f32 %v6052_v23, %v3142_v10 }
 0x2d1   : > { %v5073_v11 = vpop.f32.mrf.mxu0  ;;  %v3511_v29 = vmax.f32 %v3151_v7, 0.0  ;;  %v3749_v36 = vrot.slane %v3748_v4, 1  ;;  %v4132_v39 = vsel %vm4113_vm5, %v3736_v1, %v4131_v9 }
 0x2d2   : > { %v3742_v3 = vrot.slane %v3741_v60, 1  ;;  %v3752_v20 = vrot.slane %v3751_v35, 4  ;;  %v3760_v13 = vmax.f32 %v3758_v53, %v3759_v17  ;;  %v3154_v59 = vadd.f32 %v5073_v11, %v6052_v23 }
 0x2d3   : > { %v3145_v30 = vpop.f32.mrf.mxu0  ;;  %v3509_v51 = vmax.f32 %v3143_v18, 0.0  ;;  %v3750_v61 = vmax.f32 %v3748_v4, %v3749_v36 }
 0x2d4   : > { %v3753_v5 = vmax.f32 %v3751_v35, %v3752_v20  ;;  %v3146_v58 = vadd.f32 %v6052_v23, %v3145_v30  ;;  %v3743_v19 = vmax.f32 %v3741_v60, %v3742_v3  ;;  %v3761_v2 = vrot.slane %v3760_v13, 2 }
 0x2d5   : > { %v3512_v28 = vmax.f32 %v3154_v59, 0.0  ;;  %v5076_v21 = vpop.f32.mrf.mxu0 }
 0x2d6   : > { %v3754_v34 = vrot.slane %v3753_v5, 2  ;;  %v3510_v43 = vmax.f32 %v3146_v58, 0.0  ;;  %v3762_v63 = vmax.f32 %v3760_v13, %v3761_v2  ;;  %v4133_v6 = vsel %vm4115_vm6, %v3743_v19, %v4132_v39 }
 0x2d7   : > { %v3158_v24 = vpop.f32.mrf.mxu0  ;;  %v3772_v14 = vmax.f32 %v3511_v29, %v3512_v28  ;;  %v3167_v37 = vadd.f32 %v5076_v21, %v6052_v23  ;;  %v4134_v56 = vsel %vm4117_vm7, %v3750_v61, %v4133_v6  ;;  %v6206_v29 = vld [vmem:[%s6331_s6] ss:$0 sm:$0xff] }
 0x2d8   : > { %v3755_v16 = vmax.f32 %v3753_v5, %v3754_v34  ;;  %v3765_v15 = vmax.f32 %v3509_v51, %v3510_v43  ;;  %v3763_v49 = vrot.slane %v3762_v63, 1  ;;  %v3159_v22 = vadd.f32 %v6052_v23, %v3158_v24 }
 0x2d9   : > { %v5077_v26 = vpop.f32.mrf.mxu0  ;;  %v3773_v62 = vrot.slane %v3772_v14, 4  ;;  %v3515_v57 = vmax.f32 %v3167_v37, 0.0 }
 0x2da   : > { %v3756_v42 = vrot.slane %v3755_v16, 1  ;;  %v3766_v47 = vrot.slane %v3765_v15, 4  ;;  %v3170_v46 = vadd.f32 %v5077_v26, %v6052_v23  ;;  %v3764_v54 = vmax.f32 %v3762_v63, %v3763_v49 }
 0x2db   : > { %v3161_v25 = vpop.f32.mrf.mxu0  ;;  %v3513_v32 = vmax.f32 %v3159_v22, 0.0  ;;  %v3774_v10 = vmax.f32 %v3772_v14, %v3773_v62 }
 0x2dc   : > { %v3757_v48 = vmax.f32 %v3755_v16, %v3756_v42  ;;  %v3516_v50 = vmax.f32 %v3170_v46, 0.0  ;;  %v3162_v44 = vadd.f32 %v6052_v23, %v3161_v25  ;;  %v3767_v38 = vmax.f32 %v3765_v15, %v3766_v47 }
 0x2dd   : > { %v5080_v40 = vpop.f32.mrf.mxu0  ;;  %v3775_v20 = vrot.slane %v3774_v10, 2 }
 0x2de   : > { %v4135_v0 = vsel %vm4119_vm8, %v3757_v48, %v4134_v56  ;;  %v3514_v52 = vmax.f32 %v3162_v44, 0.0  ;;  %v3786_v55 = vmax.f32 %v3515_v57, %v3516_v50  ;;  %v3183_v45 = vadd.f32 %v5080_v40, %v6052_v23 }
 0x2df   : > { %v4136_v12 = vsel %vm4121_vm9, %v3764_v54, %v4135_v0  ;;  %v3174_v27 = vpop.f32.mrf.mxu0  ;;  %v3768_v35 = vrot.slane %v3767_v38, 2  ;;  %v3776_v2 = vmax.f32 %v3774_v10, %v3775_v20 }
 0x2e0   : > { %v4182_v53 = vmax.f32 %v4136_v12, 0.0  ;;  %v3779_v41 = vmax.f32 %v3513_v32, %v3514_v52  ;;  %v3787_v17 = vrot.slane %v3786_v55, 4  ;;  %v3175_v11 = vadd.f32 %v6052_v23, %v3174_v27 }
 0x2e1   : > { %v5081_v60 = vpop.f32.mrf.mxu0  ;;  %v3519_v18 = vmax.f32 %v3183_v45, 0.0  ;;  %v3769_v30 = vmax.f32 %v3767_v38, %v3768_v35  ;;  %v3777_v15 = vrot.slane %v3776_v2, 1 }
 0x2e2   : > { %4190 = vst [vmem:[%s6145_s23 + $0x10] sm:$0xff] %v4182_v53  ;;  %v3780_v31 = vrot.slane %v3779_v41, 4  ;;  %v3186_v8 = vadd.f32 %v5081_v60, %v6052_v23  ;;  %v3788_v5 = vmax.f32 %v3786_v55, %v3787_v17  ;;  %v3517_v58 = vmax.f32 %v3175_v11, 0.0 }
 0x2e3   : > { %v3177_v3 = vpop.f32.mrf.mxu0  ;;  %v3770_v43 = vrot.slane %v3769_v30, 1  ;;  %v3778_v54 = vmax.f32 %v3776_v2, %v3777_v15 }
 0x2e4   : > { %v3781_v7 = vmax.f32 %v3779_v41, %v3780_v31  ;;  %v3520_v4 = vmax.f32 %v3186_v8, 0.0  ;;  %v3178_v13 = vadd.f32 %v6052_v23, %v3177_v3  ;;  %v3789_v63 = vrot.slane %v3788_v5, 2 }
 0x2e5   : > { %v5084_v59 = vpop.f32.mrf.mxu0  ;;  %v3771_v22 = vmax.f32 %v3769_v30, %v3770_v43 }
 0x2e6   : > { %v3782_v33 = vrot.slane %v3781_v7, 2  ;;  %v3800_v1 = vmax.f32 %v3519_v18, %v3520_v4  ;;  %v3518_v9 = vmax.f32 %v3178_v13, 0.0  ;;  %v3199_v51 = vadd.f32 %v6206_v29, %v5084_v59 }
 0x2e7   : > { %v3190_v19 = vpop.f32.mrf.mxu0  ;;  %v3790_v25 = vmax.f32 %v3788_v5, %v3789_v63  ;;  %v4137_v12 = vsel %vm4109_vm3, %v3778_v54, %v3771_v22 }
 0x2e8   : > { %v3801_v28 = vrot.slane %v3800_v1, 4  ;;  %v3783_v21 = vmax.f32 %v3781_v7, %v3782_v33  ;;  %v3793_v34 = vmax.f32 %v3517_v58, %v3518_v9  ;;  %v3191_v36 = vadd.f32 %v6206_v29, %v3190_v19 }
 0x2e9   : > { %v5085_v23 = vpop.f32.mrf.mxu0  ;;  %v3523_v26 = vmax.f32 %v3199_v51, 0.0  ;;  %v3791_v53 = vrot.slane %v3790_v25, 1 }
 0x2ea   : > { %v3802_v24 = vmax.f32 %v3800_v1, %v3801_v28  ;;  %v3794_v39 = vrot.slane %v3793_v34, 4  ;;  %v3202_v16 = vadd.f32 %v6206_v29, %v5085_v23  ;;  %v3784_v49 = vrot.slane %v3783_v21, 1 }
 0x2eb   : > { %v3193_v14 = vpop.f32.mrf.mxu0  ;;  %v3521_v46 = vmax.f32 %v3191_v36, 0.0  ;;  %v3792_v30 = vmax.f32 %v3790_v25, %v3791_v53 }
 0x2ec   : > { %v3194_v6 = vadd.f32 %v6206_v29, %v3193_v14  ;;  %v3795_v37 = vmax.f32 %v3793_v34, %v3794_v39  ;;  %v3524_v42 = vmax.f32 %v3202_v16, 0.0  ;;  %v3803_v48 = vrot.slane %v3802_v24, 2 }
 0x2ed   : > { %v5088_v47 = vpop.f32.mrf.mxu0  ;;  %v3785_v40 = vmax.f32 %v3783_v21, %v3784_v49 }
 0x2ee   : > { %v3522_v61 = vmax.f32 %v3194_v6, 0.0  ;;  %v3796_v62 = vrot.slane %v3795_v37, 2  ;;  %v3814_v50 = vmax.f32 %v3523_v26, %v3524_v42  ;;  %v3215_v57 = vadd.f32 %v6206_v29, %v5088_v47 }
 0x2ef   : > { %v3206_v44 = vpop.f32.mrf.mxu0  ;;  %v3804_v10 = vmax.f32 %v3802_v24, %v3803_v48  ;;  %v4138_v11 = vsel %vm4111_vm4, %v3785_v40, %v4137_v12 }
 0x2f0   : > { %v3807_v56 = vmax.f32 %v3521_v46, %v3522_v61  ;;  %v3797_v0 = vmax.f32 %v3795_v37, %v3796_v62  ;;  %v3815_v38 = vrot.slane %v3814_v50, 4  ;;  %v3207_v32 = vadd.f32 %v6206_v29, %v3206_v44 }
 0x2f1   : > { %v5089_v52 = vpop.f32.mrf.mxu0  ;;  %v3527_v31 = vmax.f32 %v3215_v57, 0.0  ;;  %v3805_v33 = vrot.slane %v3804_v10, 1  ;;  %v4139_v2 = vsel %vm4113_vm5, %v3792_v30, %v4138_v11 }
 0x2f2   : > { %v3808_v55 = vrot.slane %v3807_v56, 4  ;;  %v3218_v27 = vadd.f32 %v6206_v29, %v5089_v52  ;;  %v3798_v41 = vrot.slane %v3797_v0, 1  ;;  %v3816_v45 = vmax.f32 %v3814_v50, %v3815_v38 }
 0x2f3   : > { %v3209_v60 = vpop.f32.mrf.mxu0  ;;  %v3525_v20 = vmax.f32 %v3207_v32, 0.0  ;;  %v3806_v36 = vmax.f32 %v3804_v10, %v3805_v33 }
 0x2f4   : > { %v3809_v35 = vmax.f32 %v3807_v56, %v3808_v55  ;;  %v3528_v8 = vmax.f32 %v3218_v27, 0.0  ;;  %v3210_v17 = vadd.f32 %v6206_v29, %v3209_v60  ;;  %v3817_v3 = vrot.slane %v3816_v45, 2 }
 0x2f5   : > { %v5092_v7 = vpop.f32.mrf.mxu0  ;;  %v3799_v18 = vmax.f32 %v3797_v0, %v3798_v41 }
 0x2f6   : > { %v3810_v4 = vrot.slane %v3809_v35, 2  ;;  %v3828_v13 = vmax.f32 %v3527_v31, %v3528_v8  ;;  %v3526_v59 = vmax.f32 %v3210_v17, 0.0  ;;  %v3818_v1 = vmax.f32 %v3816_v45, %v3817_v3 }
 0x2f7   : > { %v3222_v5 = vpop.f32.mrf.mxu0  ;;  %v3231_v19 = vadd.f32 %v6206_v29, %v5092_v7  ;;  %v4140_v34 = vsel %vm4115_vm6, %v3799_v18, %v4139_v2 }
 0x2f8   : > { %v3811_v58 = vmax.f32 %v3809_v35, %v3810_v4  ;;  %v3821_v9 = vmax.f32 %v3525_v20, %v3526_v59  ;;  %v3819_v28 = vrot.slane %v3818_v1, 1  ;;  %v3829_v23 = vrot.slane %v3828_v13, 4 }
 0x2f9   : > { %v5093_v21 = vpop.f32.mrf.mxu0  ;;  %v3223_v24 = vadd.f32 %v6206_v29, %v3222_v5  ;;  %v3531_v14 = vmax.f32 %v3231_v19, 0.0  ;;  %v4141_v49 = vsel %vm4117_vm7, %v3806_v36, %v4140_v34 }
 0x2fa   : > { %v3812_v51 = vrot.slane %v3811_v58, 1  ;;  %v3234_v43 = vadd.f32 %v6206_v29, %v5093_v21  ;;  %v3822_v63 = vrot.slane %v3821_v9, 4  ;;  %v3820_v6 = vmax.f32 %v3818_v1, %v3819_v28 }
 0x2fb   : > { %v3225_v39 = vpop.f32.mrf.mxu0  ;;  %v3830_v47 = vmax.f32 %v3828_v13, %v3829_v23  ;;  %v3529_v25 = vmax.f32 %v3223_v24, 0.0 }
 0x2fc   : > { %v3813_v16 = vmax.f32 %v3811_v58, %v3812_v51  ;;  %v3532_v15 = vmax.f32 %v3234_v43, 0.0  ;;  %v3226_v37 = vadd.f32 %v6206_v29, %v3225_v39  ;;  %v3823_v61 = vmax.f32 %v3821_v9, %v3822_v63 }
 0x2fd   : > { %v5096_v26 = vpop.f32.mrf.mxu0  ;;  %v3831_v38 = vrot.slane %v3830_v47, 2 }
 0x2fe   : > { %v4142_v42 = vsel %vm4119_vm8, %v3813_v16, %v4141_v49  ;;  %v3842_v22 = vmax.f32 %v3531_v14, %v3532_v15  ;;  %v3530_v48 = vmax.f32 %v3226_v37, 0.0  ;;  %v3247_v54 = vadd.f32 %v6206_v29, %v5096_v26 }
 0x2ff   : > { %v4143_v46 = vsel %vm4121_vm9, %v3820_v6, %v4142_v42  ;;  %v3238_v62 = vpop.f32.mrf.mxu0  ;;  %v3824_v32 = vrot.slane %v3823_v61, 2  ;;  %v3832_v8 = vmax.f32 %v3830_v47, %v3831_v38 }
 0x300   : > { %v4183_v50 = vmax.f32 %v4143_v46, 0.0  ;;  %v3843_v44 = vrot.slane %v3842_v22, 4  ;;  %v3835_v56 = vmax.f32 %v3529_v25, %v3530_v48  ;;  %v3239_v40 = vadd.f32 %v6206_v29, %v3238_v62 }
 0x301   : > { %v5097_v57 = vpop.f32.mrf.mxu0  ;;  %v3535_v27 = vmax.f32 %v3247_v54, 0.0  ;;  %v3825_v3 = vmax.f32 %v3823_v61, %v3824_v32  ;;  %v3833_v5 = vrot.slane %v3832_v8, 1 }
 0x302   : > { %4191 = vst [vmem:[%s6145_s23 + $0x18] sm:$0xff] %v4183_v50  ;;  %v3250_v0 = vadd.f32 %v6206_v29, %v5097_v57  ;;  %v3836_v52 = vrot.slane %v3835_v56, 4  ;;  %v3844_v55 = vmax.f32 %v3842_v22, %v3843_v44  ;;  %v3533_v60 = vmax.f32 %v3239_v40, 0.0 }
 0x303   : > { %v3241_v12 = vpop.f32.mrf.mxu0  ;;  %v3826_v19 = vrot.slane %v3825_v3, 1  ;;  %v3834_v26 = vmax.f32 %v3832_v8, %v3833_v5 }
 0x304   : > { %v3536_v53 = vmax.f32 %v3250_v0, 0.0  ;;  %v3242_v10 = vadd.f32 %v6206_v29, %v3241_v12  ;;  %v3837_v41 = vmax.f32 %v3835_v56, %v3836_v52  ;;  %v3845_v20 = vrot.slane %v3844_v55, 2 }
 0x305   : > { %v5100_v45 = vpop.f32.mrf.mxu0  ;;  %v3827_v15 = vmax.f32 %v3825_v3, %v3826_v19 }
 0x306   : > { %v3856_v35 = vmax.f32 %v3535_v27, %v3536_v53  ;;  %v3534_v31 = vmax.f32 %v3242_v10, 0.0  ;;  %v3838_v17 = vrot.slane %v3837_v41, 2  ;;  %v3263_v13 = vadd.f32 %v6206_v29, %v5100_v45 }
 0x307   : > { %v3254_v11 = vpop.f32.mrf.mxu0  ;;  %v3846_v2 = vmax.f32 %v3844_v55, %v3845_v20  ;;  %v4144_v56 = vsel %vm4109_vm3, %v3834_v26, %v3827_v15 }
 0x308   : > { %v3857_v7 = vrot.slane %v3856_v35, 4  ;;  %v3849_v18 = vmax.f32 %v3533_v60, %v3534_v31  ;;  %v3839_v4 = vmax.f32 %v3837_v41, %v3838_v17  ;;  %v3255_v1 = vadd.f32 %v6206_v29, %v3254_v11 }
 0x309   : > { %v5101_v59 = vpop.f32.mrf.mxu0  ;;  %v3539_v23 = vmax.f32 %v3263_v13, 0.0  ;;  %v3847_v6 = vrot.slane %v3846_v2, 1 }
 0x30a   : > { %v3858_v30 = vmax.f32 %v3856_v35, %v3857_v7  ;;  %v3850_v33 = vrot.slane %v3849_v18, 4  ;;  %v3266_v58 = vadd.f32 %v6206_v29, %v5101_v59  ;;  %v3840_v34 = vrot.slane %v3839_v4, 1 }
 0x30b   : > { %v3257_v9 = vpop.f32.mrf.mxu0  ;;  %v3537_v24 = vmax.f32 %v3255_v1, 0.0  ;;  %v3848_v57 = vmax.f32 %v3846_v2, %v3847_v6 }
 0x30c   : > { %v3851_v28 = vmax.f32 %v3849_v18, %v3850_v33  ;;  %v3258_v21 = vadd.f32 %v6206_v29, %v3257_v9  ;;  %v3859_v51 = vrot.slane %v3858_v30, 2  ;;  %v3540_v43 = vmax.f32 %v3266_v58, 0.0 }
 0x30d   : > { %v5104_v36 = vpop.f32.mrf.mxu0  ;;  %v3841_v42 = vmax.f32 %v3839_v4, %v3840_v34 }
 0x30e   : > { %v3852_v63 = vrot.slane %v3851_v28, 2  ;;  %v3538_v39 = vmax.f32 %v3258_v21, 0.0  ;;  %v3870_v16 = vmax.f32 %v3539_v23, %v3540_v43  ;;  %v3860_v47 = vmax.f32 %v3858_v30, %v3859_v51 }
 0x30f   : > { %v3270_v14 = vpop.f32.mrf.mxu0  ;;  %v3279_v44 = vadd.f32 %v6206_v29, %v5104_v36  ;;  %v4145_v38 = vsel %vm4111_vm4, %v3841_v42, %v4144_v56 }
 0x310   : > { %v3853_v49 = vmax.f32 %v3851_v28, %v3852_v63  ;;  %v3863_v37 = vmax.f32 %v3537_v24, %v3538_v39  ;;  %v3871_v22 = vrot.slane %v3870_v16, 4  ;;  %v3271_v48 = vadd.f32 %v6206_v29, %v3270_v14 }
 0x311   : > { %v5105_v46 = vpop.f32.mrf.mxu0  ;;  %v3861_v27 = vrot.slane %v3860_v47, 1  ;;  %v3543_v60 = vmax.f32 %v3279_v44, 0.0  ;;  %v4146_v31 = vsel %vm4113_vm5, %v3848_v57, %v4145_v38 }
 0x312   : > { %v3854_v61 = vrot.slane %v3853_v49, 1  ;;  %v3864_v25 = vrot.slane %v3863_v37, 4  ;;  %v3282_v62 = vadd.f32 %v6206_v29, %v5105_v46  ;;  %v3872_v50 = vmax.f32 %v3870_v16, %v3871_v22 }
 0x313   : > { %v3273_v54 = vpop.f32.mrf.mxu0  ;;  %v3541_v10 = vmax.f32 %v3271_v48, 0.0  ;;  %v3862_v4 = vmax.f32 %v3860_v47, %v3861_v27 }
 0x314   : > { %v3865_v40 = vmax.f32 %v3863_v37, %v3864_v25  ;;  %v3274_v0 = vadd.f32 %v6206_v29, %v3273_v54  ;;  %v3855_v32 = vmax.f32 %v3853_v49, %v3854_v61  ;;  %v3873_v52 = vrot.slane %v3872_v50, 2 }
 0x315   : > { %v3544_v12 = vmax.f32 %v3282_v62, 0.0  ;;  %v5108_v55 = vpop.f32.mrf.mxu0 }
 0x316   : > { %v3866_v53 = vrot.slane %v3865_v40, 2  ;;  %v3542_v41 = vmax.f32 %v3274_v0, 0.0  ;;  %v3874_v45 = vmax.f32 %v3872_v50, %v3873_v52  ;;  %v4147_v11 = vsel %vm4115_vm6, %v3855_v32, %v4146_v31 }
 0x317   : > { %v3286_v35 = vpop.f32.mrf.mxu0  ;;  %v3884_v20 = vmax.f32 %v3543_v60, %v3544_v12  ;;  %v3295_v7 = vadd.f32 %v6206_v29, %v5108_v55  ;;  %v4148_v58 = vsel %vm4117_vm7, %v3862_v4, %v4147_v11 }
 0x318   : > { %v3867_v8 = vmax.f32 %v3865_v40, %v3866_v53  ;;  %v3877_v17 = vmax.f32 %v3541_v10, %v3542_v41  ;;  %v3875_v3 = vrot.slane %v3874_v45, 1  ;;  %v3287_v59 = vadd.f32 %v6206_v29, %v3286_v35 }
 0x319   : > { %v5109_v18 = vpop.f32.mrf.mxu0  ;;  %v3885_v2 = vrot.slane %v3884_v20, 4  ;;  %v3547_v28 = vmax.f32 %v3295_v7, 0.0 }
 0x31a   : > { %v3868_v13 = vrot.slane %v3867_v8, 1  ;;  %v3878_v30 = vrot.slane %v3877_v17, 4  ;;  %v3298_v33 = vadd.f32 %v6206_v29, %v5109_v18  ;;  %v3876_v19 = vmax.f32 %v3874_v45, %v3875_v3 }
 0x31b   : > { %v3289_v1 = vpop.f32.mrf.mxu0  ;;  %v3545_v23 = vmax.f32 %v3287_v59, 0.0  ;;  %v3886_v6 = vmax.f32 %v3884_v20, %v3885_v2 }
 0x31c   : > { %v3869_v5 = vmax.f32 %v3867_v8, %v3868_v13  ;;  %v3290_v9 = vadd.f32 %v6206_v29, %v3289_v1  ;;  %v3548_v21 = vmax.f32 %v3298_v33, 0.0  ;;  %v3879_v63 = vmax.f32 %v3877_v17, %v3878_v30 }
 0x31d   : > { %v5112_v34 = vpop.f32.mrf.mxu0  ;;  %v3887_v50 = vrot.slane %v3886_v6, 2 }
 0x31e   : > { %v4149_v51 = vsel %vm4119_vm8, %v3869_v5, %v4148_v58  ;;  %v3546_v43 = vmax.f32 %v3290_v9, 0.0  ;;  %v3898_v24 = vmax.f32 %v3547_v28, %v3548_v21  ;;  %v3311_v15 = vadd.f32 %v6206_v29, %v5112_v34 }
 0x31f   : > { %v4150_v36 = vsel %vm4121_vm9, %v3876_v19, %v4149_v51  ;;  %v3302_v39 = vpop.f32.mrf.mxu0  ;;  %v3880_v22 = vrot.slane %v3879_v63, 2  ;;  %v3888_v55 = vmax.f32 %v3886_v6, %v3887_v50 }
 0x320   : > { %v4184_v16 = vmax.f32 %v4150_v36, 0.0  ;;  %v3891_v14 = vmax.f32 %v3545_v23, %v3546_v43  ;;  %v3899_v49 = vrot.slane %v3898_v24, 4  ;;  %v3303_v42 = vadd.f32 %v6206_v29, %v3302_v39 }
 0x321   : > { %v5113_v37 = vpop.f32.mrf.mxu0  ;;  %v3551_v25 = vmax.f32 %v3311_v15, 0.0  ;;  %v3881_v32 = vmax.f32 %v3879_v63, %v3880_v22  ;;  %v3889_v20 = vrot.slane %v3888_v55, 1 }
 0x322   : > { %4192 = vst [vmem:[%s6145_s23 + $0x20] sm:$0xff] %v4184_v16  ;;  %v3892_v26 = vrot.slane %v3891_v14, 4  ;;  %v3314_v47 = vadd.f32 %v6206_v29, %v5113_v37  ;;  %v3900_v44 = vmax.f32 %v3898_v24, %v3899_v49  ;;  %v3549_v57 = vmax.f32 %v3303_v42, 0.0 }
 0x323   : > { %v3305_v46 = vpop.f32.mrf.mxu0  ;;  %v3882_v17 = vrot.slane %v3881_v32, 1  ;;  %v3890_v23 = vmax.f32 %v3888_v55, %v3889_v20 }
 0x324   : > { %v3893_v61 = vmax.f32 %v3891_v14, %v3892_v26  ;;  %v3552_v48 = vmax.f32 %v3314_v47, 0.0  ;;  %v3306_v62 = vadd.f32 %v6206_v29, %v3305_v46  ;;  %v3901_v41 = vrot.slane %v3900_v44, 2 }
 0x325   : > { %v5116_v54 = vpop.f32.mrf.mxu0  ;;  %v3883_v19 = vmax.f32 %v3881_v32, %v3882_v17 }
 0x326   : > { %v3894_v56 = vrot.slane %v3893_v61, 2  ;;  %v3912_v40 = vmax.f32 %v3551_v25, %v3552_v48  ;;  %v3550_v0 = vmax.f32 %v3306_v62, 0.0  ;;  %v3327_v53 = vadd.f32 %v6206_v29, %v5116_v54 }
 0x327   : > { %v3318_v38 = vpop.f32.mrf.mxu0  ;;  %v3902_v59 = vmax.f32 %v3900_v44, %v3901_v41  ;;  %v4151_v6 = vsel %vm4109_vm3, %v3890_v23, %v3883_v19 }
 0x328   : > { %v3913_v52 = vrot.slane %v3912_v40, 4  ;;  %v3905_v12 = vmax.f32 %v3549_v57, %v3550_v0  ;;  %v3895_v27 = vmax.f32 %v3893_v61, %v3894_v56  ;;  %v3319_v60 = vadd.f32 %v6206_v29, %v3318_v38 }
 0x329   : > { %v5117_v10 = vpop.f32.mrf.mxu0  ;;  %v3555_v18 = vmax.f32 %v3327_v53, 0.0  ;;  %v3903_v43 = vrot.slane %v3902_v59, 1 }
 0x32a   : > { %v3906_v45 = vrot.slane %v3905_v12, 4  ;;  %v3914_v35 = vmax.f32 %v3912_v40, %v3913_v52  ;;  %v3330_v31 = vadd.f32 %v6206_v29, %v5117_v10  ;;  %v3896_v7 = vrot.slane %v3895_v27, 1 }
 0x32b   : > { %v3321_v8 = vpop.f32.mrf.mxu0  ;;  %v3553_v33 = vmax.f32 %v3319_v60, 0.0  ;;  %v3904_v61 = vmax.f32 %v3902_v59, %v3903_v43 }
 0x32c   : > { %v3907_v11 = vmax.f32 %v3905_v12, %v3906_v45  ;;  %v3322_v3 = vadd.f32 %v6206_v29, %v3321_v8  ;;  %v3556_v4 = vmax.f32 %v3330_v31, 0.0  ;;  %v3915_v5 = vrot.slane %v3914_v35, 2 }
 0x32d   : > { %v5120_v13 = vpop.f32.mrf.mxu0  ;;  %v3897_v21 = vmax.f32 %v3895_v27, %v3896_v7 }
 0x32e   : > { %v3908_v30 = vrot.slane %v3907_v11, 2  ;;  %v3554_v1 = vmax.f32 %v3322_v3, 0.0  ;;  %v3926_v58 = vmax.f32 %v3555_v18, %v3556_v4  ;;  %v3916_v24 = vmax.f32 %v3914_v35, %v3915_v5 }
 0x32f   : > { %v3334_v9 = vpop.f32.mrf.mxu0  ;;  %v3343_v37 = vadd.f32 %v6206_v29, %v5120_v13  ;;  %v4152_v42 = vsel %vm4111_vm4, %v3897_v21, %v4151_v6 }
 0x330   : > { %v3909_v2 = vmax.f32 %v3907_v11, %v3908_v30  ;;  %v3919_v28 = vmax.f32 %v3553_v33, %v3554_v1  ;;  %v3927_v34 = vrot.slane %v3926_v58, 4  ;;  %v3335_v16 = vadd.f32 %v6206_v29, %v3334_v9 }
 0x331   : > { %v5121_v51 = vpop.f32.mrf.mxu0  ;;  %v3917_v50 = vrot.slane %v3916_v24, 1  ;;  %v4153_v57 = vsel %vm4113_vm5, %v3904_v61, %v4152_v42  ;;  %v3559_v0 = vmax.f32 %v3343_v37, 0.0 }
 0x332   : > { %v3910_v36 = vrot.slane %v3909_v2, 1  ;;  %v3920_v63 = vrot.slane %v3919_v28, 4  ;;  %v3928_v39 = vmax.f32 %v3926_v58, %v3927_v34  ;;  %v3346_v14 = vadd.f32 %v6206_v29, %v5121_v51 }
 0x333   : > { %v3337_v15 = vpop.f32.mrf.mxu0  ;;  %v3557_v54 = vmax.f32 %v3335_v16, 0.0  ;;  %v3918_v45 = vmax.f32 %v3916_v24, %v3917_v50 }
 0x334   : > { %v3921_v49 = vmax.f32 %v3919_v28, %v3920_v63  ;;  %v3338_v26 = vadd.f32 %v6206_v29, %v3337_v15  ;;  %v3911_v47 = vmax.f32 %v3909_v2, %v3910_v36  ;;  %v3929_v22 = vrot.slane %v3928_v39, 2 }
 0x335   : > { %v5124_v46 = vpop.f32.mrf.mxu0  ;;  %v3560_v48 = vmax.f32 %v3346_v14, 0.0 }
 0x336   : > { %v3922_v25 = vrot.slane %v3921_v49, 2  ;;  %v3558_v62 = vmax.f32 %v3338_v26, 0.0  ;;  %v3930_v44 = vmax.f32 %v3928_v39, %v3929_v22  ;;  %v4154_v38 = vsel %vm4115_vm6, %v3911_v47, %v4153_v57 }
 0x337   : > { %v3350_v56 = vpop.f32.mrf.mxu0  ;;  %v3359_v12 = vadd.f32 %v6206_v29, %v5124_v46  ;;  %v3940_v53 = vmax.f32 %v3559_v0, %v3560_v48  ;;  %v4155_v11 = vsel %vm4117_vm7, %v3918_v45, %v4154_v38 }
 0x338   : > { %v3923_v40 = vmax.f32 %v3921_v49, %v3922_v25  ;;  %v3931_v32 = vrot.slane %v3930_v44, 1  ;;  %v3933_v52 = vmax.f32 %v3557_v54, %v3558_v62  ;;  %v3351_v10 = vadd.f32 %v6206_v29, %v3350_v56 }
 0x339   : > { %v5125_v55 = vpop.f32.mrf.mxu0  ;;  %v3563_v20 = vmax.f32 %v3359_v12, 0.0  ;;  %v3941_v4 = vrot.slane %v3940_v53, 4 }
 0x33a   : > { %v3924_v27 = vrot.slane %v3923_v40, 1  ;;  %v3362_v41 = vadd.f32 %v6206_v29, %v5125_v55  ;;  %v3932_v17 = vmax.f32 %v3930_v44, %v3931_v32  ;;  %v3934_v3 = vrot.slane %v3933_v52, 4 }
 0x33b   : > { %v3353_v60 = vpop.f32.mrf.mxu0  ;;  %v3561_v13 = vmax.f32 %v3351_v10, 0.0  ;;  %v3942_v28 = vmax.f32 %v3940_v53, %v3941_v4 }
 0x33c   : > { %v3925_v35 = vmax.f32 %v3923_v40, %v3924_v27  ;;  %v3564_v31 = vmax.f32 %v3362_v41, 0.0  ;;  %v3354_v8 = vadd.f32 %v6206_v29, %v3353_v60  ;;  %v3935_v19 = vmax.f32 %v3933_v52, %v3934_v3 }
 0x33d   : > { %v5128_v7 = vpop.f32.mrf.mxu0  ;;  %v3943_v15 = vrot.slane %v3942_v28, 2 }
 0x33e   : > { %v4156_v18 = vsel %vm4119_vm8, %v3925_v35, %v4155_v11  ;;  %v3562_v59 = vmax.f32 %v3354_v8, 0.0  ;;  %v3954_v33 = vmax.f32 %v3563_v20, %v3564_v31  ;;  %v3375_v9 = vadd.f32 %v6206_v29, %v5128_v7 }
 0x33f   : > { %v4157_v30 = vsel %vm4121_vm9, %v3932_v17, %v4156_v18  ;;  %v3366_v1 = vpop.f32.mrf.mxu0  ;;  %v3936_v39 = vrot.slane %v3935_v19, 2  ;;  %v3944_v62 = vmax.f32 %v3942_v28, %v3943_v15 }
 0x340   : > { %v4185_v5 = vmax.f32 %v4157_v30, 0.0  ;;  %v3947_v58 = vmax.f32 %v3561_v13, %v3562_v59  ;;  %v3955_v51 = vrot.slane %v3954_v33, 4  ;;  %v3367_v23 = vadd.f32 %v6206_v29, %v3366_v1 }
 0x341   : > { %v5129_v2 = vpop.f32.mrf.mxu0  ;;  %v3567_v63 = vmax.f32 %v3375_v9, 0.0  ;;  %v3937_v46 = vmax.f32 %v3935_v19, %v3936_v39  ;;  %v3945_v53 = vrot.slane %v3944_v62, 1 }
 0x342   : > { %4193 = vst [vmem:[%s6145_s23 + $0x28] sm:$0xff] %v4185_v5  ;;  %v3948_v21 = vrot.slane %v3947_v58, 4  ;;  %v3378_v34 = vadd.f32 %v6206_v29, %v5129_v2  ;;  %v3956_v37 = vmax.f32 %v3954_v33, %v3955_v51  ;;  %v3565_v26 = vmax.f32 %v3367_v23, 0.0 }
 0x343   : > { %v3369_v43 = vpop.f32.mrf.mxu0  ;;  %v3938_v32 = vrot.slane %v3937_v46, 1  ;;  %v3946_v4 = vmax.f32 %v3944_v62, %v3945_v53 }
 0x344   : > { %v3949_v36 = vmax.f32 %v3947_v58, %v3948_v21  ;;  %v3568_v24 = vmax.f32 %v3378_v34, 0.0  ;;  %v3370_v16 = vadd.f32 %v6206_v29, %v3369_v43  ;;  %v3957_v54 = vrot.slane %v3956_v37, 2 }
 0x345   : > { %v5132_v14 = vpop.f32.mrf.mxu0  ;;  %v3939_v3 = vmax.f32 %v3937_v46, %v3938_v32 }
 0x346   : > { %v3950_v6 = vrot.slane %v3949_v36, 2  ;;  %v3968_v49 = vmax.f32 %v3567_v63, %v3568_v24  ;;  %v3566_v42 = vmax.f32 %v3370_v16, 0.0  ;;  %v3391_v25 = vadd.f32 %v6206_v29, %v5132_v14 }
 0x347   : > { %v3382_v47 = vpop.f32.mrf.mxu0  ;;  %v3958_v60 = vmax.f32 %v3956_v37, %v3957_v54  ;;  %v4158_v21 = vsel %vm4109_vm3, %v3946_v4, %v3939_v3 }
 0x348   : > { %v3969_v22 = vrot.slane %v3968_v49, 4  ;;  %v3961_v61 = vmax.f32 %v3565_v26, %v3566_v42  ;;  %v3951_v50 = vmax.f32 %v3949_v36, %v3950_v6  ;;  %v3383_v44 = vadd.f32 %v6206_v29, %v3382_v47 }
 0x349   : > { %v5133_v48 = vpop.f32.mrf.mxu0  ;;  %v3571_v12 = vmax.f32 %v3391_v25, 0.0  ;;  %v3959_v30 = vrot.slane %v3958_v60, 1 }
 0x34a   : > { %v3970_v56 = vmax.f32 %v3968_v49, %v3969_v22  ;;  %v3962_v57 = vrot.slane %v3961_v61, 4  ;;  %v3394_v40 = vadd.f32 %v6206_v29, %v5133_v48  ;;  %v3952_v10 = vrot.slane %v3951_v50, 1 }
 0x34b   : > { %v3385_v0 = vpop.f32.mrf.mxu0  ;;  %v3569_v41 = vmax.f32 %v3383_v44, 0.0  ;;  %v3960_v39 = vmax.f32 %v3958_v60, %v3959_v30 }
 0x34c   : > { %v3386_v38 = vadd.f32 %v6206_v29, %v3385_v0  ;;  %v3963_v52 = vmax.f32 %v3961_v61, %v3962_v57  ;;  %v3572_v55 = vmax.f32 %v3394_v40, 0.0  ;;  %v3971_v35 = vrot.slane %v3970_v56, 2 }
 0x34d   : > { %v5136_v27 = vpop.f32.mrf.mxu0  ;;  %v3953_v13 = vmax.f32 %v3951_v50, %v3952_v10 }
 0x34e   : > { %v3570_v45 = vmax.f32 %v3386_v38, 0.0  ;;  %v3964_v31 = vrot.slane %v3963_v52, 2  ;;  %v3982_v8 = vmax.f32 %v3571_v12, %v3572_v55  ;;  %v3972_v33 = vmax.f32 %v3970_v56, %v3971_v35 }
 0x34f   : > { %v3398_v17 = vpop.f32.mrf.mxu0  ;;  %v3407_v51 = vadd.f32 %v6206_v29, %v5136_v27  ;;  %v4159_v23 = vsel %vm4111_vm4, %v3953_v13, %v4158_v21 }
 0x350   : > { %v3975_v11 = vmax.f32 %v3569_v41, %v3570_v45  ;;  %v3965_v20 = vmax.f32 %v3963_v52, %v3964_v31  ;;  %v3983_v7 = vrot.slane %v3982_v8, 4  ;;  %v3399_v19 = vadd.f32 %v6206_v29, %v3398_v17 }
 0x351   : > { %v5137_v18 = vpop.f32.mrf.mxu0  ;;  %v3973_v16 = vrot.slane %v3972_v33, 1  ;;  %v4160_v26 = vsel %vm4113_vm5, %v3960_v39, %v4159_v23  ;;  %v3575_v47 = vmax.f32 %v3407_v51, 0.0 }
 0x352   : > { %v3976_v59 = vrot.slane %v3975_v11, 4  ;;  %v3966_v1 = vrot.slane %v3965_v20, 1  ;;  %v3984_v5 = vmax.f32 %v3982_v8, %v3983_v7  ;;  %v3410_v2 = vadd.f32 %v6206_v29, %v5137_v18 }
 0x353   : > { %v3401_v58 = vpop.f32.mrf.mxu0  ;;  %v3573_v6 = vmax.f32 %v3399_v19, 0.0  ;;  %v3974_v62 = vmax.f32 %v3972_v33, %v3973_v16 }
 0x354   : > { %v3977_v9 = vmax.f32 %v3975_v11, %v3976_v59  ;;  %v3402_v28 = vadd.f32 %v6206_v29, %v3401_v58  ;;  %v3985_v34 = vrot.slane %v3984_v5, 2  ;;  %v3967_v43 = vmax.f32 %v3965_v20, %v3966_v1 }
 0x355   : > { %v5140_v24 = vpop.f32.mrf.mxu0  ;;  %v3576_v49 = vmax.f32 %v3410_v2, 0.0 }
 0x356   : > { %v3978_v36 = vrot.slane %v3977_v9, 2  ;;  %v3574_v63 = vmax.f32 %v3402_v28, 0.0  ;;  %v3986_v14 = vmax.f32 %v3984_v5, %v3985_v34  ;;  %v4161_v22 = vsel %vm4115_vm6, %v3967_v43, %v4160_v26 }
 0x357   : > { %v3414_v37 = vpop.f32.mrf.mxu0  ;;  %v3423_v25 = vadd.f32 %v6206_v29, %v5140_v24  ;;  %v3996_v56 = vmax.f32 %v3575_v47, %v3576_v49  ;;  %v4162_v0 = vsel %vm4117_vm7, %v3974_v62, %v4161_v22 }
 0x358   : > { %v3979_v15 = vmax.f32 %v3977_v9, %v3978_v36  ;;  %v3987_v42 = vrot.slane %v3986_v14, 1  ;;  %v3989_v61 = vmax.f32 %v3573_v6, %v3574_v63  ;;  %v3415_v50 = vadd.f32 %v6206_v29, %v3414_v37 }
 0x359   : > { %v5141_v48 = vpop.f32.mrf.mxu0  ;;  %v3579_v55 = vmax.f32 %v3423_v25, 0.0  ;;  %v3997_v60 = vrot.slane %v3996_v56, 4 }
 0x35a   : > { %v3980_v46 = vrot.slane %v3979_v15, 1  ;;  %v3426_v44 = vadd.f32 %v6206_v29, %v5141_v48  ;;  %v3988_v40 = vmax.f32 %v3986_v14, %v3987_v42  ;;  %v3990_v12 = vrot.slane %v3989_v61, 4 }
 0x35b   : > { %v3417_v57 = vpop.f32.mrf.mxu0  ;;  %v3577_v10 = vmax.f32 %v3415_v50, 0.0  ;;  %v3998_v4 = vmax.f32 %v3996_v56, %v3997_v60 }
 0x35c   : > { %v3981_v54 = vmax.f32 %v3979_v15, %v3980_v46  ;;  %v3580_v38 = vmax.f32 %v3426_v44, 0.0  ;;  %v3418_v32 = vadd.f32 %v6206_v29, %v3417_v57  ;;  %v3991_v11 = vmax.f32 %v3989_v61, %v3990_v12 }
 0x35d   : > { %v5144_v27 = vpop.f32.mrf.mxu0  ;;  %v3999_v34 = vrot.slane %v3998_v4, 2 }
 0x35e   : > { %v4163_v52 = vsel %vm4119_vm8, %v3981_v54, %v4162_v0  ;;  %v3578_v41 = vmax.f32 %v3418_v32, 0.0  ;;  %v4010_v35 = vmax.f32 %v3579_v55, %v3580_v38  ;;  %v3439_v17 = vadd.f32 %v6206_v29, %v5144_v27 }
 0x35f   : > { %v4164_v53 = vsel %vm4121_vm9, %v3988_v40, %v4163_v52  ;;  %v3430_v31 = vpop.f32.mrf.mxu0  ;;  %v3992_v58 = vrot.slane %v3991_v11, 2  ;;  %v4000_v6 = vmax.f32 %v3998_v4, %v3999_v34 }
 0x360   : > { %v4186_v45 = vmax.f32 %v4164_v53, 0.0  ;;  %v4003_v8 = vmax.f32 %v3577_v10, %v3578_v41  ;;  %v3431_v7 = vadd.f32 %v6206_v29, %v3430_v31  ;;  %v4011_v13 = vrot.slane %v4010_v35, 4 }
 0x361   : > { %v5145_v3 = vpop.f32.mrf.mxu0  ;;  %v3583_v33 = vmax.f32 %v3439_v17, 0.0  ;;  %v3993_v63 = vmax.f32 %v3991_v11, %v3992_v58  ;;  %v4001_v54 = vrot.slane %v4000_v6, 1 }
 0x362   : > { %4194 = vst [vmem:[%s6145_s23 + $0x30] sm:$0xff] %v4186_v45  ;;  %v4004_v20 = vrot.slane %v4003_v8, 4  ;;  %v3442_v18 = vadd.f32 %v6206_v29, %v5145_v3  ;;  %v3581_v2 = vmax.f32 %v3431_v7, 0.0  ;;  %v4012_v51 = vmax.f32 %v4010_v35, %v4011_v13 }
 0x363   : > { %v3433_v59 = vpop.f32.mrf.mxu0  ;;  %v3994_v46 = vrot.slane %v3993_v63, 1  ;;  %v4002_v53 = vmax.f32 %v4000_v6, %v4001_v54 }
 0x364   : > { %v4005_v30 = vmax.f32 %v4003_v8, %v4004_v20  ;;  %v3584_v1 = vmax.f32 %v3442_v18, 0.0  ;;  %v3434_v5 = vadd.f32 %v6206_v29, %v3433_v59  ;;  %v4013_v49 = vrot.slane %v4012_v51, 2 }
 0x365   : > { %v5148_v9 = vpop.f32.mrf.mxu0  ;;  %v3995_v32 = vmax.f32 %v3993_v63, %v3994_v46 }
 0x366   : > { %v4006_v19 = vrot.slane %v4005_v30, 2  ;;  %v4024_v28 = vmax.f32 %v3583_v33, %v3584_v1  ;;  %v3582_v21 = vmax.f32 %v3434_v5, 0.0  ;;  %v3455_v24 = vadd.f32 %v6206_v29, %v5148_v9 }
 0x367   : > { %v3446_v23 = vpop.f32.mrf.mxu0  ;;  %v4014_v56 = vmax.f32 %v4012_v51, %v4013_v49  ;;  %v4165_v60 = vsel %vm4109_vm3, %v4002_v53, %v3995_v32 }
 0x368   : > { %v4025_v43 = vrot.slane %v4024_v28, 4  ;;  %v4017_v36 = vmax.f32 %v3581_v2, %v3582_v21  ;;  %v4007_v16 = vmax.f32 %v4005_v30, %v4006_v19  ;;  %v3447_v15 = vadd.f32 %v6206_v29, %v3446_v23 }
 0x369   : > { %v5149_v39 = vpop.f32.mrf.mxu0  ;;  %v3587_v61 = vmax.f32 %v3455_v24, 0.0 }
 0x36a   : > { %v4018_v14 = vrot.slane %v4017_v36, 4  ;;  %v4026_v37 = vmax.f32 %v4024_v28, %v4025_v43  ;;  %v3458_v26 = vadd.f32 %v6206_v29, %v5149_v39  ;;  %v4008_v48 = vrot.slane %v4007_v16, 1 }
 0x36b   : > { %v3449_v42 = vpop.f32.mrf.mxu0  ;;  %v3585_v50 = vmax.f32 %v3447_v15, 0.0 }
 0x36c   : > { %v4019_v47 = vmax.f32 %v4017_v36, %v4018_v14  ;;  %v3450_v22 = vadd.f32 %v6206_v29, %v3449_v42  ;;  %v3588_v25 = vmax.f32 %v3458_v26, 0.0  ;;  %v4027_v57 = vrot.slane %v4026_v37, 2 }
 0x36d   : > { %v4009_v12 = vmax.f32 %v4007_v16, %v4008_v48  ;;  %v4015_v29 = vrot.slane %v4014_v56, 1 }
 0x36e   : > { %v4020_v62 = vrot.slane %v4019_v47, 2  ;;  %v3586_v44 = vmax.f32 %v3450_v22, 0.0  ;;  %v4038_v40 = vmax.f32 %v3587_v61, %v3588_v25  ;;  %v4028_v10 = vmax.f32 %v4026_v37, %v4027_v57 }
 0x36f   : > { %v4166_v31 = vsel %vm4111_vm4, %v4009_v12, %v4165_v60  ;;  %v4016_v11 = vmax.f32 %v4014_v56, %v4015_v29 }
 0x370   : > { %v4021_v0 = vmax.f32 %v4019_v47, %v4020_v62  ;;  %v4031_v38 = vmax.f32 %v3585_v50, %v3586_v44  ;;  %v4039_v52 = vrot.slane %v4038_v40, 4  ;;  %v4029_v3 = vrot.slane %v4028_v10, 1 }
 0x371   : > { %v4167_v18 = vsel %vm4113_vm5, %v4016_v11, %v4166_v31 }
 0x372   : > { %v4022_v55 = vrot.slane %v4021_v0, 1  ;;  %v4032_v27 = vrot.slane %v4031_v38, 4  ;;  %v4040_v41 = vmax.f32 %v4038_v40, %v4039_v52  ;;  %v4030_v30 = vmax.f32 %v4028_v10, %v4029_v3 }
 0x374   : > { %v4033_v45 = vmax.f32 %v4031_v38, %v4032_v27  ;;  %v4041_v35 = vrot.slane %v4040_v41, 2  ;;  %v4023_v8 = vmax.f32 %v4021_v0, %v4022_v55 }
 0x376   : > { %v4034_v17 = vrot.slane %v4033_v45, 2  ;;  %v4042_v20 = vmax.f32 %v4040_v41, %v4041_v35  ;;  %v4168_v13 = vsel %vm4115_vm6, %v4023_v8, %v4167_v18 }
 0x377   : > { %v4169_v5 = vsel %vm4117_vm7, %v4030_v30, %v4168_v13 }
 0x378   : > { %v4035_v7 = vmax.f32 %v4033_v45, %v4034_v17  ;;  %v4043_v4 = vrot.slane %v4042_v20, 1 }
 0x37a   : > { %v4036_v59 = vrot.slane %v4035_v7, 1  ;;  %v4044_v1 = vmax.f32 %v4042_v20, %v4043_v4 }
 0x37c   : > { %v4037_v33 = vmax.f32 %v4035_v7, %v4036_v59 }
 0x37e   : > { %v4170_v58 = vsel %vm4119_vm8, %v4037_v33, %v4169_v5 }
 0x37f   : > { %v4171_v9 = vsel %vm4121_vm9, %v4044_v1, %v4170_v58 }
 0x380   : > { %v4187_v19 = vmax.f32 %v4171_v9, 0.0 }
 0x382   : > { %4195 = vst [vmem:[%s6145_s23 + $0x38] sm:$0xff] %v4187_v19 }
 0x383 PF: > { %s17_s26 = sadd.s32 1, %s5276_s26   ;;  %s6334_s24 = smov %s5272_s25 }
 0x384   : > { %p14_p6 = scmp.ge.s32.totalorder %s17_s26, 4   ;;  %s6335_s25 = smov %s6337_s27 }
 0x386   :  { %16 = sbr.rel (!%p14_p6) target bundleno = 2 (0x2), region = 82 }

// kernel: _lambda_.7
= control target key start
LH: loop header
LB: loop body
LE: loop exit
PB: predicated region body
PF: predicated region fallthrough
CT: control target
= control target key end

     0   :  { %s2930_s30 = smov 0   ;;  %s2932_s10 = smov 0   ;;  %s3526_s0 = inlined_call_operand.vmem [shape: bf16[64,8,8], index: 0, kind: input, shape index: {}]   ;;  %s3527_s1 = inlined_call_operand.vmem [shape: bf16[64,8,128], index: 1, kind: input, shape index: {}]   ;;  %s3528_s2 = inlined_call_operand.vmem [shape: bf16[8,128], index: 2, kind: input, shape index: {}]   ;;  %s3529_s3 = inlined_call_operand.vmem [shape: bf16[128,128], index: 3, kind: input, shape index: {}]   ;;  %s3530_s4 = inlined_call_operand.vmem [shape: f32[1,128], index: 4, kind: input, shape index: {}]   ;;  %s3531_s5 = inlined_call_operand.vmem [shape: bf16[128,128], index: 5, kind: input, shape index: {}]   ;;  %s3532_s6 = inlined_call_operand.vmem [shape: f32[1,128], index: 6, kind: input, shape index: {}]   ;;  %s3533_s7 = inlined_call_operand.vmem [shape: bf16[128,256], index: 7, kind: input, shape index: {}]   ;;  %s3534_s8 = inlined_call_operand.vmem [shape: f32[1,256], index: 8, kind: input, shape index: {}]   ;;  %s3535_s9 = inlined_call_operand.vmem [shape: f32[64,256], index: 9, kind: output, shape index: {}]  }
   0x1   :  { %s2934_s11 = smov 0  }
   0x2 LB: > { %s31_s12 = sadd.s32 1, %s2872_s10  ;;  %p2451_p0 = scmp.ge.s32.totalorder %s2876_s11, 1  ;;  %s2876_s11 = sphi %s2934_s11, %s19_s11   ;;  %s2872_s10 = sphi %s2932_s10, %s3537_s10   ;;  %s2868_s30 = sphi %s2930_s30, %s3536_s30  }
   0x3   : > { %p33_p1 = scmp.ge.s32.totalorder %s31_s12, 2  ;;  %p321_p2 = scmp.lt.s32.totalorder %s2876_s11, 3 }
   0x5   : > { %s3539_s12 = smov (%p33_p1, %s31_s12), 0  ;;  %p322_p3 = pnand %p2451_p0, %p321_p2 }
   0x6   : > { %s2452_s17 = sshll.u32 (!%p322_p3), %s2868_s30, 5 }
   0x7   : > { %325 = sbr.rel (%p322_p3) target bundleno = 806 (0x326), region = 56  ;;  %p370_p4 = scmp.lt.s32.totalorder (!%p322_p3), %s2452_s17, 63 }
   0xc   : > { %v2782_v0 = vld [vmem:[%s3529_s3 + $0x38] sm:$0xff]   ;;  %v2783_v1 = vld [vmem:[%s3529_s3 + $0x30] sm:$0xff]   ;;  %vm922_vm0 = vcmask 1043456   ;;  %v2784_v2 = vld [vmem:[%s3529_s3 + $0x28] sm:$0xff]   ;;  %s3541_s17 = smov (!%p370_p4, %s2452_s17), 63  ;;  %vm873_vm1 = vcmask 64512  }
   0xd   : > { %2609 = vmatprep.subr.bf16.mxu0 %v2782_v0  ;;  %v439_v3 = vld [vmem:[%s3528_s2] sm:$0xf]  ;;  %s2453_s24 = sshll.u32 %s3541_s17, 2  ;;  %v2786_v9 = vld [vmem:[%s3529_s3 + $0x18] sm:$0xff]   ;;  %v2787_v11 = vld [vmem:[%s3529_s3 + $0x10] sm:$0xff]   ;;  %vm2275_vm2 = vcmask 1041409  }
   0xe   : > { %2610 = vmatpush3.bf16.msra.mxu0 %v2782_v0  ;;  %v2785_v4 = vld [vmem:[%s3529_s3 + $0x20] sm:$0xff]   ;;  %2755 = vmatprep.subr.msk.bf16.mxu1 %vm922_vm0, %v439_v3  ;;  %v924_v5 = vsel %vm922_vm0, %v439_v3, 0  ;;  %s2969_s27 = scalar_lea.vmem %s3526_s0, %s2453_s24  ;;  %s2974_s13 = scalar_lea.vmem %s3527_s1, %s2453_s24  ;;  %v2788_v14 = vld [vmem:[%s3529_s3 + $0x8] sm:$0xff]   ;;  %v2822_v26 = vld [vmem:[%s3531_s5 + $0x38] sm:$0xff]   ;;  %vm2277_vm3 = vcmask 1042434   ;;  %vm2279_vm4 = vcmask 1043459  }
   0xf   : > { %2611 = vmatprep.subr.bf16.mxu0 %v2783_v1  ;;  %2658 = vmatpush3.bf16.msra.mxu1 %v924_v5  ;;  %v2789_v6 = vld [vmem:[%s2969_s27] sm:$0xff]   ;;  %v2790_v7 = vld [vmem:[%s2969_s27 + $0x8] sm:$0xff]   ;;  %v2795_v10 = vld [vmem:[%s2969_s27 + $0x10] sm:$0xff]   ;;  %s2456_s24 = sshll.u32 %s2868_s30, 2  ;;  %vm2281_vm5 = vcmask 1044484   ;;  %vm2283_vm6 = vcmask 1045509  }
  0x10   : > { %2659 = vmatprep.mubr.msk.bf16.mxu1 %vm873_vm1, %v2789_v6  ;;  %v2792_v8 = vld [vmem:[%s2974_s13] sm:$0xff]   ;;  %v2797_v12 = vld [vmem:[%s2969_s27 + $0x18] sm:$0xff]   ;;  %v2801_v16 = vld [vmem:[%s2969_s27 + $0x28] sm:$0xff]   ;;  %2691 = vmatprep.subr.bf16.mxu1 %v2822_v26  ;;  %p388_p5 = scmp.lt.s32.totalorder %s2456_s24, 7  ;;  %vm2285_vm7 = vcmask 1046534   ;;  %vm2287_vm8 = vcmask 1047559  }
  0x11   : > { %2625 = vmatprep.mubr.bf16.mxu0 %v2792_v8  ;;  %v2799_v13 = vld [vmem:[%s2969_s27 + $0x20] sm:$0xff]   ;;  %v2803_v17 = vld [vmem:[%s2969_s27 + $0x30] sm:$0xff]   ;;  %v2793_v18 = vld [vmem:[%s2974_s13 + $0x8] sm:$0xff]  }
  0x12   : > { %2612 = vmatpush3.bf16.msra.mxu0 %v2783_v1  ;;  %2660 = vmatmul.mubr.msk.bf16.vlgmr.msra.gmra.mxu1 %vm873_vm1, %v2790_v7  ;;  %v2791_v15 = vld [vmem:[%s3529_s3] sm:$0xff]   ;;  %v2794_v19 = vld [vmem:[%s2974_s13 + $0x10] sm:$0xff]   ;;  %v2805_v20 = vld [vmem:[%s2969_s27 + $0x38] sm:$0xff]   ;;  %s3543_s24 = smov (!%p388_p5, %s2456_s24), 7 }
  0x13   : > { %2613 = vmatprep.subr.bf16.mxu0 %v2784_v2  ;;  %2663 = vmatprep.mubr.msk.bf16.mxu1 %vm873_vm1, %v2795_v10  ;;  %v2807_v21 = vld [vmem:[%s2969_s27 + $0x40] sm:$0xff]   ;;  %v2796_v22 = vld [vmem:[%s2974_s13 + $0x18] sm:$0xff]   ;;  %v2809_v24 = vld [vmem:[%s2969_s27 + $0x48] sm:$0xff]   ;;  %s2543_s25 = sshll.u32 %s3543_s24, 4 }
  0x14   : > { %v2798_v23 = vld [vmem:[%s2974_s13 + $0x20] sm:$0xff]   ;;  %v2811_v25 = vld [vmem:[%s2969_s27 + $0x50] sm:$0xff]   ;;  %v2800_v28 = vld [vmem:[%s2974_s13 + $0x28] sm:$0xff]   ;;  %2692 = vmatpush3.bf16.msra.mxu1 %v2822_v26 }
  0x15   : > { %v2823_v27 = vld [vmem:[%s3531_s5 + $0x30] sm:$0xff]   ;;  %v2813_v30 = vld [vmem:[%s2969_s27 + $0x58] sm:$0xff]   ;;  %v2824_v31 = vld [vmem:[%s3531_s5 + $0x28] sm:$0xff]  }
  0x16   : > { %2614 = vmatpush3.bf16.msra.mxu0 %v2784_v2  ;;  %v2802_v29 = vld [vmem:[%s2974_s13 + $0x30] sm:$0xff]   ;;  %2693 = vmatprep.subr.bf16.mxu1 %v2823_v27  ;;  %v2815_v32 = vld [vmem:[%s2969_s27 + $0x60] sm:$0xff]   ;;  %v2804_v34 = vld [vmem:[%s2974_s13 + $0x38] sm:$0xff]  }
  0x17   : > { %2615 = vmatprep.subr.bf16.mxu0 %v2785_v4  ;;  %v2825_v33 = vld [vmem:[%s3531_s5 + $0x20] sm:$0xff]   ;;  %v2826_v35 = vld [vmem:[%s3531_s5 + $0x18] sm:$0xff]   ;;  %v2817_v37 = vld [vmem:[%s2969_s27 + $0x68] sm:$0xff]  }
  0x18   : > { %2694 = vmatpush3.bf16.msra.mxu1 %v2823_v27  ;;  %v2806_v36 = vld [vmem:[%s2974_s13 + $0x40] sm:$0xff]   ;;  %v2819_v38 = vld [vmem:[%s2969_s27 + $0x70] sm:$0xff]   ;;  %v2808_v40 = vld [vmem:[%s2974_s13 + $0x48] sm:$0xff]  }
  0x19   : > { %2695 = vmatprep.subr.bf16.mxu1 %v2824_v31  ;;  %v2827_v39 = vld [vmem:[%s3531_s5 + $0x10] sm:$0xff]   ;;  %v2821_v42 = vld [vmem:[%s2969_s27 + $0x78] sm:$0xff]   ;;  %v2814_v44 = vld [vmem:[%s2974_s13 + $0x60] sm:$0xff]  }
  0x1a   : > { %2616 = vmatpush3.bf16.msra.mxu0 %v2785_v4  ;;  %2664 = vmatmul.mubr.msk.bf16.gmra.mxu1 %vm873_vm1, %v2797_v12  ;;  %v2810_v41 = vld [vmem:[%s2974_s13 + $0x50] sm:$0xff]   ;;  %v2812_v43 = vld [vmem:[%s2974_s13 + $0x58] sm:$0xff]   ;;  %v2816_v45 = vld [vmem:[%s2974_s13 + $0x68] sm:$0xff]  }
  0x1b   : > { %2617 = vmatprep.subr.bf16.mxu0 %v2786_v9  ;;  %2667 = vmatprep.mubr.msk.bf16.mxu1 %vm873_vm1, %v2799_v13  ;;  %v2818_v46 = vld [vmem:[%s2974_s13 + $0x70] sm:$0xff]   ;;  %v2828_v47 = vld [vmem:[%s3531_s5 + $0x8] sm:$0xff]   ;;  %v2820_v48 = vld [vmem:[%s2974_s13 + $0x78] sm:$0xff]   ;;  %s3302_s13 = scalar_lea.vmem %s3535_s9, %s2543_s25 }
  0x1c   : > { %2696 = vmatpush3.bf16.msra.mxu1 %v2824_v31  ;;  %v2829_v49 = vld [vmem:[%s3531_s5] sm:$0xff]   ;;  %v3063_v50 = vld [vmem:[%s3533_s7 + $0x70] ss:$8 sps:$4 sm:$0xff]   ;;  %v2832_v51 = vld [vmem:[%s3533_s7 + $0x74] ss:$8 sps:$4 sm:$0xff]  }
  0x1d   : > { %2697 = vmatprep.subr.bf16.mxu1 %v2825_v33  ;;  %v3071_v52 = vld [vmem:[%s3533_s7 + $0x64] ss:$8 sps:$4 sm:$0xff]   ;;  %v3077_v53 = vld [vmem:[%s3533_s7 + $0x60] ss:$8 sps:$4 sm:$0xff]   ;;  %v3083_v54 = vld [vmem:[%s3533_s7 + $0x54] ss:$8 sps:$4 sm:$0xff]  }
  0x1e   : > { %2618 = vmatpush3.bf16.msra.mxu0 %v2786_v9  ;;  %v3089_v55 = vld [vmem:[%s3533_s7 + $0x50] ss:$8 sps:$4 sm:$0xff]   ;;  %v3095_v56 = vld [vmem:[%s3533_s7 + $0x44] ss:$8 sps:$4 sm:$0xff]   ;;  %v3101_v57 = vld [vmem:[%s3533_s7 + $0x40] ss:$8 sps:$4 sm:$0xff]  }
  0x1f   : > { %2619 = vmatprep.subr.bf16.mxu0 %v2787_v11  ;;  %v3107_v58 = vld [vmem:[%s3533_s7 + $0x34] ss:$8 sps:$4 sm:$0xff]   ;;  %v3113_v59 = vld [vmem:[%s3533_s7 + $0x30] ss:$8 sps:$4 sm:$0xff]   ;;  %v3119_v60 = vld [vmem:[%s3533_s7 + $0x24] ss:$8 sps:$4 sm:$0xff]  }
  0x20   : > { %2698 = vmatpush3.bf16.msra.mxu1 %v2825_v33  ;;  %v3125_v61 = vld [vmem:[%s3533_s7 + $0x20] ss:$8 sps:$4 sm:$0xff]   ;;  %v3131_v62 = vld [vmem:[%s3533_s7 + $0x14] ss:$8 sps:$4 sm:$0xff]   ;;  %v3137_v63 = vld [vmem:[%s3533_s7 + $0x10] ss:$8 sps:$4 sm:$0xff]  }
  0x21   : > { %2699 = vmatprep.subr.bf16.mxu1 %v2826_v35 }
  0x22   : > { %2620 = vmatpush3.bf16.msra.mxu0 %v2787_v11  ;;  %2668 = vmatmul.mubr.msk.bf16.gmra.mxu1 %vm873_vm1, %v2801_v16 }
  0x23   : > { %2621 = vmatprep.subr.bf16.mxu0 %v2788_v14  ;;  %2671 = vmatprep.mubr.msk.bf16.mxu1 %vm873_vm1, %v2803_v17 }
  0x24   : > { %2700 = vmatpush3.bf16.msra.mxu1 %v2826_v35 }
  0x25   : > { %2701 = vmatprep.subr.bf16.mxu1 %v2827_v39 }
  0x26   : > { %2622 = vmatpush3.bf16.msra.mxu0 %v2788_v14 }
  0x27   : > { %2623 = vmatprep.subr.bf16.mxu0 %v2791_v15 }
  0x28   : > { %2702 = vmatpush3.bf16.msra.mxu1 %v2827_v39 }
  0x29   : > { %2703 = vmatprep.subr.bf16.mxu1 %v2828_v47 }
  0x2a   : > { %2624 = vmatpush3.bf16.msra.mxu0 %v2791_v15  ;;  %2672 = vmatmul.mubr.msk.bf16.gmra.mxu1 %vm873_vm1, %v2805_v20 }
  0x2b   : > { %2675 = vmatprep.mubr.msk.bf16.mxu1 %vm873_vm1, %v2807_v21  ;;  %1562 = vmatprep.subr.bf16.mxu0 %v2832_v51 }
  0x2c   : > { %2704 = vmatpush3.bf16.msra.mxu1 %v2828_v47 }
  0x2d   : > { %2626 = vmatmul.mubr.bf16.vlgmr.msra.gmra.mxu0 %v2793_v18  ;;  %2705 = vmatprep.subr.bf16.mxu1 %v2829_v49 }
  0x2e   : > { %2629 = vmatprep.mubr.bf16.mxu0 %v2794_v19  ;;  %1563 = vmatpush1.bf16.msra.mxu0 %v3063_v50  ;;  %v3150_v19 = vld [vmem:[%s3530_s4] ss:$0 sm:$0xff] }
  0x2f   : > { %1564 = vmatprep.subr.bf16.mxu0 %v3071_v52 }
  0x30   : > { %2706 = vmatpush3.bf16.msra.mxu1 %v2829_v49 }
  0x31   : > { %2739 = vmatprep.subr.bf16.mxu1 %v2832_v51 }
  0x32   : > { %2676 = vmatmul.mubr.msk.bf16.gmra.mxu1 %vm873_vm1, %v2809_v24  ;;  %1565 = vmatpush1.bf16.msra.mxu0 %v3077_v53 }
  0x33   : > { %2679 = vmatprep.mubr.msk.bf16.mxu1 %vm873_vm1, %v2811_v25  ;;  %1566 = vmatprep.subr.bf16.mxu0 %v3083_v54 }
  0x35   : > { %2630 = vmatmul.mubr.bf16.gmra.mxu0 %v2796_v22 }
  0x36   : > { %2633 = vmatprep.mubr.bf16.mxu0 %v2798_v23  ;;  %1567 = vmatpush1.bf16.msra.mxu0 %v3089_v55 }
  0x37   : > { %1568 = vmatprep.subr.bf16.mxu0 %v3095_v56 }
  0x3a   : > { %2680 = vmatmul.mubr.msk.bf16.gmra.mxu1 %vm873_vm1, %v2813_v30  ;;  %1569 = vmatpush1.bf16.msra.mxu0 %v3101_v57 }
  0x3b   : > { %2683 = vmatprep.mubr.msk.bf16.mxu1 %vm873_vm1, %v2815_v32  ;;  %1570 = vmatprep.subr.bf16.mxu0 %v3107_v58 }
  0x3d   : > { %2634 = vmatmul.mubr.bf16.gmra.mxu0 %v2800_v28 }
  0x3e   : > { %2637 = vmatprep.mubr.bf16.mxu0 %v2802_v29  ;;  %1571 = vmatpush1.bf16.msra.mxu0 %v3113_v59 }
  0x3f   : > { %1572 = vmatprep.subr.bf16.mxu0 %v3119_v60 }
  0x42   : > { %2684 = vmatmul.mubr.msk.bf16.gmra.mxu1 %vm873_vm1, %v2817_v37  ;;  %1573 = vmatpush1.bf16.msra.mxu0 %v3125_v61 }
  0x43   : > { %2687 = vmatprep.mubr.msk.bf16.mxu1 %vm873_vm1, %v2819_v38  ;;  %1574 = vmatprep.subr.bf16.mxu0 %v3131_v62 }
  0x45   : > { %2638 = vmatmul.mubr.bf16.gmra.mxu0 %v2804_v34 }
  0x46   : > { %2641 = vmatprep.mubr.bf16.mxu0 %v2806_v36  ;;  %1575 = vmatpush1.bf16.msra.mxu0 %v3137_v63 }
  0x4a   : > { %2688 = vmatmul.mubr.msk.bf16.gmra.mxu1 %vm873_vm1, %v2821_v42 }
  0x4d   : > { %2642 = vmatmul.mubr.bf16.gmra.mxu0 %v2808_v40 }
  0x4e   : > { %2645 = vmatprep.mubr.bf16.mxu0 %v2810_v41 }
  0x55   : > { %2646 = vmatmul.mubr.bf16.gmra.mxu0 %v2812_v43 }
  0x56   : > { %2649 = vmatprep.mubr.bf16.mxu0 %v2814_v44 }
  0x5d   : > { %2650 = vmatmul.mubr.bf16.gmra.mxu0 %v2816_v45 }
  0x5e   : > { %2653 = vmatprep.mubr.bf16.mxu0 %v2818_v46 }
  0x65   : > { %2654 = vmatmul.mubr.bf16.gmra.mxu0 %v2820_v48 }
  0xd2   : > { %v2661_v0 = vpop.f32.mrf.mxu1 }
  0xd4   : > { %v960_v1 = vpop.f32.mrf.mxu1 }
  0xd6   : > { %v2662_v2 = vpop.f32.mrf.mxu1 }
  0xd8   : > { %v963_v3 = vpop.f32.mrf.mxu1 }
  0xda   : > { %v2665_v4 = vpop.f32.mrf.mxu1 }
  0xdc   : > { %v976_v5 = vpop.f32.mrf.mxu1 }
  0xde   : > { %v2666_v6 = vpop.f32.mrf.mxu1 }
  0xe0   : > { %v979_v7 = vpop.f32.mrf.mxu1 }
  0xe2   : > { %v2669_v8 = vpop.f32.mrf.mxu1 }
  0xe4   : > { %v992_v9 = vpop.f32.mrf.mxu1 }
  0xe6   : > { %v2670_v10 = vpop.f32.mrf.mxu1 }
  0xe8   : > { %v3141_v12 = vpop.f32.mrf.mxu1 }
  0xea   : > { %v3143_v14 = vpop.f32.mrf.mxu1 }
  0xec   : > { %v3145_v18 = vpop.f32.mrf.mxu1 }
  0xed   : > { %v2627_v11 = vpop.f32.mrf.mxu0 }
  0xee   : > { %v969_v16 = vadd.f32 %v2661_v0, %v2627_v11  ;;  %v3152_v22 = vpop.f32.mrf.mxu1 }
  0xef   : > { %v666_v13 = vpop.f32.mrf.mxu0 }
  0xf0   : > { %v961_v15 = vadd.f32 %v960_v1, %v666_v13  ;;  %v1096_v26 = vadd.f32 %v3150_v19, %v969_v16  ;;  %v3157_v28 = vpop.f32.mrf.mxu1 }
  0xf1   : > { %v2628_v17 = vpop.f32.mrf.mxu0 }
  0xf2   : > { %v972_v20 = vadd.f32 %v2662_v2, %v2628_v17  ;;  %v1094_v23 = vadd.f32 %v3150_v19, %v961_v15  ;;  %v3160_v33 = vpop.f32.mrf.mxu1  ;;  %v1128_v37 = vmax.f32 %v1096_v26, 0.0 }
  0xf3   : > { %v669_v21 = vpop.f32.mrf.mxu0 }
  0xf4   : > { %v1097_v24 = vadd.f32 %v3150_v19, %v972_v20  ;;  %v964_v25 = vadd.f32 %v963_v3, %v669_v21  ;;  %v1126_v34 = vmax.f32 %v1094_v23, 0.0  ;;  %v3163_v40 = vpop.f32.mrf.mxu1 }
  0xf5   : > { %v2631_v27 = vpop.f32.mrf.mxu0 }
  0xf6   : > { %v1095_v29 = vadd.f32 %v3150_v19, %v964_v25  ;;  %v985_v30 = vadd.f32 %v2665_v4, %v2631_v27  ;;  %v1129_v31 = vmax.f32 %v1097_v24, 0.0  ;;  %v3166_v46 = vpop.f32.mrf.mxu1 }
  0xf7   : > { %v682_v32 = vpop.f32.mrf.mxu0 }
  0xf8   : > { %v1127_v35 = vmax.f32 %v1095_v29, 0.0  ;;  %v977_v36 = vadd.f32 %v976_v5, %v682_v32  ;;  %v1100_v38 = vadd.f32 %v3150_v19, %v985_v30  ;;  %v1159_v44 = vpack.c.bf16 %v1129_v31, %v1128_v37  ;;  %v3169_v0 = vpop.f32.mrf.mxu1 }
  0xf9   : > { %v2632_v39 = vpop.f32.mrf.mxu0 }
  0xfa   : > { %v1098_v41 = vadd.f32 %v3150_v19, %v977_v36  ;;  %v988_v42 = vadd.f32 %v2666_v6, %v2632_v39  ;;  %v1158_v43 = vpack.c.bf16 %v1127_v35, %v1126_v34  ;;  %v1132_v49 = vmax.f32 %v1100_v38, 0.0  ;;  %v3173_v6 = vpop.f32.mrf.mxu1 }
  0xfb   : > { %v685_v45 = vpop.f32.mrf.mxu0 }
  0xfc   : > { %v1101_v47 = vadd.f32 %v3150_v19, %v988_v42  ;;  %v980_v48 = vadd.f32 %v979_v7, %v685_v45  ;;  %2707 = vmatprep.mubr.bf16.mxu1 %v1158_v43  ;;  %v1130_v1 = vmax.f32 %v1098_v41, 0.0  ;;  %v3179_v23 = vpop.f32.mrf.mxu1 }
  0xfd   : > { %v2635_v51 = vpop.f32.mrf.mxu0  ;;  %2708 = vmatmul.mubr.bf16.vlgmr.msra.gmra.mxu1 %v1159_v44 }
  0xfe   : > { %v1133_v2 = vmax.f32 %v1101_v47, 0.0  ;;  %v1099_v3 = vadd.f32 %v3150_v19, %v980_v48  ;;  %v1001_v4 = vadd.f32 %v2669_v8, %v2635_v51  ;;  %2747 = vmatpush1.bf16.msra.mxu1 %v3063_v50  ;;  %v2682_v29 = vpop.f32.mrf.mxu1 }
  0xff   : > { %v698_v5 = vpop.f32.mrf.mxu0  ;;  %2740 = vmatprep.subr.bf16.mxu1 %v3071_v52 }
 0x100   : > { %v1131_v11 = vmax.f32 %v1099_v3, 0.0  ;;  %v993_v7 = vadd.f32 %v992_v9, %v698_v5  ;;  %v1104_v13 = vadd.f32 %v3150_v19, %v1001_v4  ;;  %v1161_v16 = vpack.c.bf16 %v1133_v2, %v1132_v49 }
 0x101   : > { %v2636_v15 = vpop.f32.mrf.mxu0 }
 0x102   : > { %v1102_v17 = vadd.f32 %v3150_v19, %v993_v7  ;;  %v1004_v20 = vadd.f32 %v2670_v10, %v2636_v15  ;;  %v1160_v21 = vpack.c.bf16 %v1131_v11, %v1130_v1  ;;  %2748 = vmatpush1.bf16.msra.mxu1 %v3077_v53  ;;  %v1136_v9 = vmax.f32 %v1104_v13, 0.0 }
 0x103   : > { %v701_v8 = vpop.f32.mrf.mxu0  ;;  %2741 = vmatprep.subr.bf16.mxu1 %v3083_v54 }
 0x104   : > { %v1105_v50 = vadd.f32 %v3150_v19, %v1004_v20  ;;  %v996_v52 = vadd.f32 %v3141_v12, %v701_v8  ;;  %2711 = vmatprep.mubr.bf16.mxu1 %v1160_v21  ;;  %v1134_v25 = vmax.f32 %v1102_v17, 0.0 }
 0x105   : > { %v2639_v24 = vpop.f32.mrf.mxu0  ;;  %2712 = vmatmul.mubr.bf16.gmra.mxu1 %v1161_v16 }
 0x106   : > { %v1137_v26 = vmax.f32 %v1105_v50, 0.0  ;;  %v1103_v10 = vadd.f32 %v3150_v19, %v996_v52  ;;  %v1017_v27 = vadd.f32 %v3143_v14, %v2639_v24  ;;  %2749 = vmatpush1.bf16.msra.mxu1 %v3089_v55  ;;  %v1043_v55 = vpop.f32.mrf.mxu1 }
 0x107   : > { %v714_v53 = vpop.f32.mrf.mxu0  ;;  %2742 = vmatprep.subr.bf16.mxu1 %v3095_v56 }
 0x108   : > { %v1135_v54 = vmax.f32 %v1103_v10, 0.0  ;;  %v1009_v30 = vadd.f32 %v3145_v18, %v714_v53  ;;  %v1108_v12 = vadd.f32 %v3150_v19, %v1017_v27  ;;  %v1163_v32 = vpack.c.bf16 %v1137_v26, %v1136_v9  ;;  %v2685_v43 = vpop.f32.mrf.mxu1 }
 0x109   : > { %v2640_v31 = vpop.f32.mrf.mxu0 }
 0x10a   : > { %v1106_v34 = vadd.f32 %v3150_v19, %v1009_v30  ;;  %v1020_v35 = vadd.f32 %v3152_v22, %v2640_v31  ;;  %v1162_v36 = vpack.c.bf16 %v1135_v54, %v1134_v25  ;;  %2750 = vmatpush1.bf16.msra.mxu1 %v3101_v57  ;;  %v1140_v18 = vmax.f32 %v1108_v12, 0.0 }
 0x10b   : > { %v717_v14 = vpop.f32.mrf.mxu0  ;;  %2743 = vmatprep.subr.bf16.mxu1 %v3107_v58 }
 0x10c   : > { %v1109_v56 = vadd.f32 %v3150_v19, %v1020_v35  ;;  %v1012_v37 = vadd.f32 %v3157_v28, %v717_v14  ;;  %2715 = vmatprep.mubr.bf16.mxu1 %v1162_v36  ;;  %v1138_v39 = vmax.f32 %v1106_v34, 0.0 }
 0x10d   : > { %v2643_v38 = vpop.f32.mrf.mxu0  ;;  %2716 = vmatmul.mubr.bf16.gmra.mxu1 %v1163_v32 }
 0x10e   : > { %v1141_v41 = vmax.f32 %v1109_v56, 0.0  ;;  %v1107_v42 = vadd.f32 %v3150_v19, %v1012_v37  ;;  %v1033_v22 = vadd.f32 %v3160_v33, %v2643_v38  ;;  %2751 = vmatpush1.bf16.msra.mxu1 %v3113_v59  ;;  %v1056_v59 = vpop.f32.mrf.mxu1 }
 0x10f   : > { %v730_v57 = vpop.f32.mrf.mxu0  ;;  %2744 = vmatprep.subr.bf16.mxu1 %v3119_v60 }
 0x110   : > { %v1139_v58 = vmax.f32 %v1107_v42, 0.0  ;;  %v1025_v44 = vadd.f32 %v3163_v40, %v730_v57  ;;  %v1112_v28 = vadd.f32 %v3150_v19, %v1033_v22  ;;  %v1165_v47 = vpack.c.bf16 %v1141_v41, %v1140_v18  ;;  %v2686_v11 = vpop.f32.mrf.mxu1 }
 0x111   : > { %v2644_v45 = vpop.f32.mrf.mxu0 }
 0x112   : > { %v1110_v48 = vadd.f32 %v3150_v19, %v1025_v44  ;;  %v1036_v49 = vadd.f32 %v3166_v46, %v2644_v45  ;;  %v1164_v51 = vpack.c.bf16 %v1139_v58, %v1138_v39  ;;  %2752 = vmatpush1.bf16.msra.mxu1 %v3125_v61  ;;  %v1144_v40 = vmax.f32 %v1112_v28, 0.0  ;;  %v1059_v8 = vpop.f32.mrf.mxu1 }
 0x113   : > { %v733_v33 = vpop.f32.mrf.mxu0  ;;  %2745 = vmatprep.subr.bf16.mxu1 %v3131_v62 }
 0x114   : > { %v1113_v60 = vadd.f32 %v3150_v19, %v1036_v49  ;;  %v1028_v1 = vadd.f32 %v3169_v0, %v733_v33  ;;  %2719 = vmatprep.mubr.bf16.mxu1 %v1164_v51  ;;  %v1142_v3 = vmax.f32 %v1110_v48, 0.0  ;;  %v2689_v9 = vpop.f32.mrf.mxu1 }
 0x115   : > { %v2647_v2 = vpop.f32.mrf.mxu0  ;;  %2720 = vmatmul.mubr.bf16.gmra.mxu1 %v1165_v47 }
 0x116   : > { %v1145_v4 = vmax.f32 %v1113_v60, 0.0  ;;  %v1111_v5 = vadd.f32 %v3150_v19, %v1028_v1  ;;  %v1049_v46 = vadd.f32 %v3173_v6, %v2647_v2  ;;  %2753 = vmatpush1.bf16.msra.mxu1 %v3137_v63  ;;  %v1072_v12 = vpop.f32.mrf.mxu1 }
 0x117   : > { %v746_v61 = vpop.f32.mrf.mxu0 }
 0x118   : > { %v1143_v7 = vmax.f32 %v1111_v5, 0.0  ;;  %v1041_v62 = vadd.f32 %v3179_v23, %v746_v61  ;;  %v1116_v13 = vadd.f32 %v3150_v19, %v1049_v46  ;;  %v1167_v15 = vpack.c.bf16 %v1145_v4, %v1144_v40  ;;  %v2690_v37 = vpop.f32.mrf.mxu1  ;;  %v2853_v5 = vld [vmem:[%s3533_s7 + $0x4] ss:$8 sps:$4 sm:$0xff]   ;;  %v2851_v46 = vld [vmem:[%s3533_s7] ss:$8 sps:$4 sm:$0xff]  }
 0x119   : > { %v2648_v0 = vpop.f32.mrf.mxu0  ;;  %1576 = vmatprep.subr.bf16.mxu0 %v2853_v5  ;;  %2746 = vmatprep.subr.bf16.mxu1 %v2853_v5  ;;  %v2878_v61 = vmov 0  }
 0x11a   : > { %v1114_v16 = vadd.f32 %v3150_v19, %v1041_v62  ;;  %v1052_v17 = vadd.f32 %v2682_v29, %v2648_v0  ;;  %v1166_v20 = vpack.c.bf16 %v1143_v7, %v1142_v3  ;;  %v1148_v63 = vmax.f32 %v1116_v13, 0.0  ;;  %v1075_v28 = vpop.f32.mrf.mxu1  ;;  %1577 = vmatpush1.bf16.msra.mxu0 %v2851_v46  ;;  %2754 = vmatpush1.bf16.msra.mxu1 %v2851_v46  ;;  %v3235_v7 = vld [vmem:[%s3532_s6] ss:$0 sm:$0xff] }
 0x11b   : > { %v749_v21 = vpop.f32.mrf.mxu0  ;;  %1594 = vmatprep.mubr.bf16.mxu0 %v2878_v61 }
 0x11c   : > { %v1117_v50 = vadd.f32 %v3150_v19, %v1052_v17  ;;  %v1044_v6 = vadd.f32 %v1043_v55, %v749_v21  ;;  %2723 = vmatprep.mubr.bf16.mxu1 %v1166_v20  ;;  %v1146_v24 = vmax.f32 %v1114_v16, 0.0 }
 0x11d   : > { %v2651_v52 = vpop.f32.mrf.mxu0  ;;  %2724 = vmatmul.mubr.bf16.gmra.mxu1 %v1167_v15 }
 0x11e   : > { %v1149_v23 = vmax.f32 %v1117_v50, 0.0  ;;  %v1115_v25 = vadd.f32 %v3150_v19, %v1044_v6  ;;  %v1065_v26 = vadd.f32 %v2685_v43, %v2651_v52 }
 0x11f   : > { %v762_v10 = vpop.f32.mrf.mxu0 }
 0x120   : > { %v1147_v27 = vmax.f32 %v1115_v25, 0.0  ;;  %v1057_v53 = vadd.f32 %v1056_v59, %v762_v10  ;;  %v1120_v29 = vadd.f32 %v3150_v19, %v1065_v26  ;;  %v1169_v30 = vpack.c.bf16 %v1149_v23, %v1148_v63 }
 0x121   : > { %v2652_v54 = vpop.f32.mrf.mxu0 }
 0x122   : > { %v1118_v31 = vadd.f32 %v3150_v19, %v1057_v53  ;;  %v1068_v32 = vadd.f32 %v2686_v11, %v2652_v54  ;;  %v1168_v34 = vpack.c.bf16 %v1147_v27, %v1146_v24  ;;  %v1152_v55 = vmax.f32 %v1120_v29, 0.0 }
 0x123   : > { %v765_v35 = vpop.f32.mrf.mxu0 }
 0x124   : > { %v1121_v36 = vadd.f32 %v3150_v19, %v1068_v32  ;;  %v1060_v14 = vadd.f32 %v1059_v8, %v765_v35  ;;  %2727 = vmatprep.mubr.bf16.mxu1 %v1168_v34  ;;  %v1150_v18 = vmax.f32 %v1118_v31, 0.0 }
 0x125   : > { %2728 = vmatmul.mubr.bf16.gmra.mxu1 %v1169_v30  ;;  %v2655_v56 = vpop.f32.mrf.mxu0 }
 0x126   : > { %v1153_v38 = vmax.f32 %v1121_v36, 0.0  ;;  %v1119_v39 = vadd.f32 %v3150_v19, %v1060_v14  ;;  %v1081_v41 = vadd.f32 %v2689_v9, %v2655_v56 }
 0x127   : > { %v778_v42 = vpop.f32.mrf.mxu0 }
 0x128   : > { %v1151_v22 = vmax.f32 %v1119_v39, 0.0  ;;  %v1073_v57 = vadd.f32 %v1072_v12, %v778_v42  ;;  %v1124_v43 = vadd.f32 %v3150_v19, %v1081_v41  ;;  %v1171_v58 = vpack.c.bf16 %v1153_v38, %v1152_v55 }
 0x129   : > { %v2656_v44 = vpop.f32.mrf.mxu0 }
 0x12a   : > { %v1170_v45 = vpack.c.bf16 %v1151_v22, %v1150_v18  ;;  %v1122_v47 = vadd.f32 %v3150_v19, %v1073_v57  ;;  %v1084_v48 = vadd.f32 %v2690_v37, %v2656_v44  ;;  %v1156_v59 = vmax.f32 %v1124_v43, 0.0 }
 0x12b   : > { %v781_v49 = vpop.f32.mrf.mxu0 }
 0x12c   : > { %2731 = vmatprep.mubr.bf16.mxu1 %v1170_v45  ;;  %v1125_v51 = vadd.f32 %v3150_v19, %v1084_v48  ;;  %v1076_v33 = vadd.f32 %v1075_v28, %v781_v49  ;;  %v1154_v60 = vmax.f32 %v1122_v47, 0.0 }
 0x12d   : > { %2732 = vmatmul.mubr.bf16.gmra.mxu1 %v1171_v58 }
 0x12e   : > { %v1157_v1 = vmax.f32 %v1125_v51, 0.0  ;;  %v1123_v40 = vadd.f32 %v3150_v19, %v1076_v33 }
 0x130   : > { %v1155_v2 = vmax.f32 %v1123_v40, 0.0  ;;  %v1173_v3 = vpack.c.bf16 %v1157_v1, %v1156_v59 }
 0x132   : > { %v1172_v4 = vpack.c.bf16 %v1155_v2, %v1154_v60 }
 0x134   : > { %2735 = vmatprep.mubr.bf16.mxu1 %v1172_v4 }
 0x135   : > { %2736 = vmatmul.mubr.bf16.gmra.mxu1 %v1173_v3 }
 0x136   : > { %1704 = vmatprep.mubr.bf16.mxu1 %v2878_v61 }
 0x1bd   : > { %v2709_v19 = vpop.f32.mrf.mxu1 }
 0x1be   : > { %v1288_v63 = vadd.f32 %v2709_v19, %v3235_v7 }
 0x1bf   : > { %v1279_v11 = vpop.f32.mrf.mxu1 }
 0x1c0   : > { %v1280_v13 = vadd.f32 %v3235_v7, %v1279_v11  ;;  %v1408_v23 = vmax.f32 %v1288_v63, 0.0 }
 0x1c1   : > { %v2710_v62 = vpop.f32.mrf.mxu1 }
 0x1c2   : > { %v1406_v17 = vmax.f32 %v1280_v13, 0.0  ;;  %v1291_v8 = vadd.f32 %v2710_v62, %v3235_v7 }
 0x1c3   : > { %v1282_v0 = vpop.f32.mrf.mxu1 }
 0x1c4   : > { %v1283_v15 = vadd.f32 %v3235_v7, %v1282_v0  ;;  %v1409_v9 = vmax.f32 %v1291_v8, 0.0 }
 0x1c5   : > { %v2713_v16 = vpop.f32.mrf.mxu1 }
 0x1c6   : > { %v1407_v20 = vmax.f32 %v1283_v15, 0.0  ;;  %v1439_v26 = vpack.c.bf16 %v1409_v9, %v1408_v23  ;;  %v1304_v36 = vadd.f32 %v2713_v16, %v3235_v7 }
 0x1c7   : > { %v1295_v21 = vpop.f32.mrf.mxu1 }
 0x1c8   : > { %v1438_v50 = vpack.c.bf16 %v1407_v20, %v1406_v17  ;;  %v1296_v53 = vadd.f32 %v3235_v7, %v1295_v21  ;;  %v1412_v37 = vmax.f32 %v1304_v36, 0.0 }
 0x1c9   : > { %v2714_v6 = vpop.f32.mrf.mxu1 }
 0x1ca   : > { %1595 = vmatmul.mubr.bf16.vlgmr.msra.gmra.mxu0 %v1438_v50  ;;  %v1410_v12 = vmax.f32 %v1296_v53, 0.0  ;;  %v1307_v32 = vadd.f32 %v2714_v6, %v3235_v7 }
 0x1cb   : > { %v1298_v52 = vpop.f32.mrf.mxu1  ;;  %1604 = vmatprep.mubr.bf16.mxu0 %v2878_v61 }
 0x1cc   : > { %v1299_v10 = vadd.f32 %v3235_v7, %v1298_v52  ;;  %v1413_v55 = vmax.f32 %v1307_v32, 0.0 }
 0x1cd   : > { %v2717_v24 = vpop.f32.mrf.mxu1 }
 0x1ce   : > { %v1411_v54 = vmax.f32 %v1299_v10, 0.0  ;;  %v1441_v38 = vpack.c.bf16 %v1413_v55, %v1412_v37  ;;  %v1320_v45 = vadd.f32 %v2717_v24, %v3235_v7 }
 0x1cf   : > { %v1311_v25 = vpop.f32.mrf.mxu1 }
 0x1d0   : > { %v1440_v34 = vpack.c.bf16 %v1411_v54, %v1410_v12  ;;  %v1312_v42 = vadd.f32 %v3235_v7, %v1311_v25  ;;  %v1416_v60 = vmax.f32 %v1320_v45, 0.0 }
 0x1d1   : > { %v2718_v27 = vpop.f32.mrf.mxu1 }
 0x1d2   : > { %1605 = vmatmul.mubr.bf16.gmra.mxu0 %v1439_v26  ;;  %v1414_v58 = vmax.f32 %v1312_v42, 0.0  ;;  %v1323_v47 = vadd.f32 %v2718_v27, %v3235_v7 }
 0x1d3   : > { %v1314_v29 = vpop.f32.mrf.mxu1  ;;  %1614 = vmatprep.mubr.bf16.mxu0 %v2878_v61 }
 0x1d4   : > { %v1315_v39 = vadd.f32 %v3235_v7, %v1314_v29  ;;  %v1417_v1 = vmax.f32 %v1323_v47, 0.0 }
 0x1d5   : > { %v2721_v30 = vpop.f32.mrf.mxu1 }
 0x1d6   : > { %v1415_v57 = vmax.f32 %v1315_v39, 0.0  ;;  %v1443_v5 = vpack.c.bf16 %v1417_v1, %v1416_v60  ;;  %v1336_v8 = vadd.f32 %v2721_v30, %v3235_v7 }
 0x1d7   : > { %v1327_v31 = vpop.f32.mrf.mxu1 }
 0x1d8   : > { %v1442_v48 = vpack.c.bf16 %v1415_v57, %v1414_v58  ;;  %v1328_v11 = vadd.f32 %v3235_v7, %v1327_v31  ;;  %v1420_v25 = vmax.f32 %v1336_v8, 0.0 }
 0x1d9   : > { %v2722_v35 = vpop.f32.mrf.mxu1 }
 0x1da   : > { %1615 = vmatmul.mubr.bf16.gmra.mxu0 %v1440_v34  ;;  %v1418_v17 = vmax.f32 %v1328_v11, 0.0  ;;  %v1339_v50 = vadd.f32 %v2722_v35, %v3235_v7 }
 0x1db   : > { %v1330_v14 = vpop.f32.mrf.mxu1  ;;  %1624 = vmatprep.mubr.bf16.mxu0 %v2878_v61 }
 0x1dc   : > { %v1331_v46 = vadd.f32 %v3235_v7, %v1330_v14  ;;  %v1421_v26 = vmax.f32 %v1339_v50, 0.0 }
 0x1dd   : > { %v3248_v56 = vpop.f32.mrf.mxu1 }
 0x1de   : > { %v1419_v0 = vmax.f32 %v1331_v46, 0.0  ;;  %v1445_v29 = vpack.c.bf16 %v1421_v26, %v1420_v25  ;;  %v1352_v55 = vadd.f32 %v3248_v56, %v3235_v7 }
 0x1df   : > { %v3250_v18 = vpop.f32.mrf.mxu1 }
 0x1e0   : > { %v1444_v63 = vpack.c.bf16 %v1419_v0, %v1418_v17  ;;  %v1344_v32 = vadd.f32 %v3235_v7, %v3250_v18 }
 0x1e1   : > { %v3253_v41 = vpop.f32.mrf.mxu1 }
 0x1e2   : > { %1625 = vmatmul.mubr.bf16.gmra.mxu0 %v1441_v38  ;;  %v1422_v14 = vmax.f32 %v1344_v32, 0.0  ;;  %v1355_v37 = vadd.f32 %v3253_v41, %v3235_v7 }
 0x1e3   : > { %v1346_v22 = vpop.f32.mrf.mxu1  ;;  %1634 = vmatprep.mubr.bf16.mxu0 %v2878_v61 }
 0x1e4   : > { %v1347_v54 = vadd.f32 %v3235_v7, %v1346_v22  ;;  %v1424_v22 = vmax.f32 %v1352_v55, 0.0  ;;  %v1425_v57 = vmax.f32 %v1355_v37, 0.0 }
 0x1e5   : > { %v2729_v43 = vpop.f32.mrf.mxu1 }
 0x1e6   : > { %v1368_v44 = vadd.f32 %v2729_v43, %v3235_v7  ;;  %v1423_v34 = vmax.f32 %v1347_v54, 0.0  ;;  %v1447_v58 = vpack.c.bf16 %v1425_v57, %v1424_v22 }
 0x1e7   : > { %v3258_v28 = vpop.f32.mrf.mxu1 }
 0x1e8   : > { %v1428_v51 = vmax.f32 %v1368_v44, 0.0  ;;  %v1446_v38 = vpack.c.bf16 %v1423_v34, %v1422_v14  ;;  %v1360_v45 = vadd.f32 %v3235_v7, %v3258_v28 }
 0x1e9   : > { %v2730_v49 = vpop.f32.mrf.mxu1 }
 0x1ea   : > { %v1371_v33 = vadd.f32 %v2730_v49, %v3235_v7  ;;  %1635 = vmatmul.mubr.bf16.gmra.mxu0 %v1442_v48  ;;  %v1426_v48 = vmax.f32 %v1360_v45, 0.0 }
 0x1eb   : > { %v3263_v59 = vpop.f32.mrf.mxu1  ;;  %1644 = vmatprep.mubr.bf16.mxu0 %v2878_v61 }
 0x1ec   : > { %v1429_v40 = vmax.f32 %v1371_v33, 0.0  ;;  %v1363_v41 = vadd.f32 %v3235_v7, %v3263_v59  ;;  %v1470_v33 = vld [vmem:[%s3534_s8] sm:$0x3] }
 0x1ed   : > { %v2733_v2 = vpop.f32.mrf.mxu1 }
 0x1ee   : > { %v1449_v3 = vpack.c.bf16 %v1429_v40, %v1428_v51  ;;  %v1384_v52 = vadd.f32 %v2733_v2, %v3235_v7  ;;  %v1427_v47 = vmax.f32 %v1363_v41, 0.0 }
 0x1ef   : > { %v1375_v4 = vpop.f32.mrf.mxu1 }
 0x1f0   : > { %1705 = vmatmul.mubr.bf16.vlgmr.msra.gmra.mxu1 %v1449_v3  ;;  %v1376_v62 = vadd.f32 %v3235_v7, %v1375_v4  ;;  %v1432_v10 = vmax.f32 %v1384_v52, 0.0  ;;  %v1448_v49 = vpack.c.bf16 %v1427_v47, %v1426_v48 }
 0x1f1   : > { %v2734_v19 = vpop.f32.mrf.mxu1  ;;  %1714 = vmatprep.mubr.bf16.mxu1 %v2878_v61 }
 0x1f2   : > { %1645 = vmatmul.mubr.bf16.gmra.mxu0 %v1443_v5  ;;  %v1430_v20 = vmax.f32 %v1376_v62, 0.0  ;;  %v1387_v9 = vadd.f32 %v2734_v19, %v3235_v7 }
 0x1f3   : > { %v1378_v13 = vpop.f32.mrf.mxu1  ;;  %1654 = vmatprep.mubr.bf16.mxu0 %v2878_v61 }
 0x1f4   : > { %v1379_v15 = vadd.f32 %v3235_v7, %v1378_v13  ;;  %v1433_v27 = vmax.f32 %v1387_v9, 0.0 }
 0x1f5   : > { %v2737_v16 = vpop.f32.mrf.mxu1 }
 0x1f6   : > { %v1431_v21 = vmax.f32 %v1379_v15, 0.0  ;;  %v1451_v30 = vpack.c.bf16 %v1433_v27, %v1432_v10  ;;  %v1400_v39 = vadd.f32 %v2737_v16, %v3235_v7 }
 0x1f7   : > { %v1391_v6 = vpop.f32.mrf.mxu1 }
 0x1f8   : > { %v1450_v24 = vpack.c.bf16 %v1431_v21, %v1430_v20  ;;  %v1392_v12 = vadd.f32 %v3235_v7, %v1391_v6  ;;  %v1436_v43 = vmax.f32 %v1400_v39, 0.0 }
 0x1f9   : > { %v2738_v23 = vpop.f32.mrf.mxu1 }
 0x1fa   : > { %1655 = vmatmul.mubr.bf16.gmra.mxu0 %v1444_v63  ;;  %1715 = vmatmul.mubr.bf16.gmra.mxu1 %v1450_v24  ;;  %v1434_v35 = vmax.f32 %v1392_v12, 0.0  ;;  %v1403_v18 = vadd.f32 %v2738_v23, %v3235_v7 }
 0x1fb   : > { %1664 = vmatprep.mubr.bf16.mxu0 %v2878_v61  ;;  %1724 = vmatprep.mubr.bf16.mxu1 %v2878_v61  ;;  %v1394_v53 = vpop.f32.mrf.mxu1 }
 0x1fc   : > { %v1395_v31 = vadd.f32 %v3235_v7, %v1394_v53  ;;  %v1437_v56 = vmax.f32 %v1403_v18, 0.0  ;;  %v1472_v7 = vlaneseq }
 0x1fe   : > { %v1435_v36 = vmax.f32 %v1395_v31, 0.0  ;;  %v1453_v44 = vpack.c.bf16 %v1437_v56, %v1436_v43  ;;  %v1473_v28 = vshrl.u32 %v1472_v7, 7 }
 0x200   : > { %v1452_v42 = vpack.c.bf16 %v1435_v36, %v1434_v35  ;;  %v1474_v51 = vsub.s32 0, %v1473_v28  ;;  %v1478_v59 = vsub.s32 1, %v1473_v28 }
 0x202   : > { %1665 = vmatmul.mubr.bf16.gmra.mxu0 %v1445_v29  ;;  %1725 = vmatmul.mubr.bf16.gmra.mxu1 %v1451_v30  ;;  %v3315_v60 = vrot.slane %v1470_v33, %v1474_v51  ;;  %v3317_v1 = vrot.slane %v1470_v33, %v1478_v59 }
 0x203   : > { %1674 = vmatprep.mubr.bf16.mxu0 %v2878_v61  ;;  %1734 = vmatprep.mubr.bf16.mxu1 %v2878_v61 }
 0x20a   : > { %1675 = vmatmul.mubr.bf16.gmra.mxu0 %v1446_v38  ;;  %1735 = vmatmul.mubr.bf16.gmra.mxu1 %v1452_v42 }
 0x20b   : > { %1684 = vmatprep.mubr.bf16.mxu0 %v2878_v61  ;;  %1744 = vmatprep.mubr.bf16.mxu1 %v2878_v61 }
 0x212   : > { %1685 = vmatmul.mubr.bf16.gmra.mxu0 %v1447_v58  ;;  %1745 = vmatmul.mubr.bf16.gmra.mxu1 %v1453_v44 }
 0x213   : > { %1694 = vmatprep.mubr.bf16.mxu0 %v2878_v61  ;;  %v2879_v61 = vmov 0.0  }
 0x214   : > { %399 = vst [vmem:[%s3302_s13] sm:$0xff] %v2879_v61  ;;  %400 = vst [vmem:[%s3302_s13 + $0x8] sm:$0xff] %v2879_v61 }
 0x215   : > { %401 = vst [vmem:[%s3302_s13 + $0x10] sm:$0xff] %v2879_v61  ;;  %402 = vst [vmem:[%s3302_s13 + $0x18] sm:$0xff] %v2879_v61 }
 0x216   : > { %403 = vst [vmem:[%s3302_s13 + $0x20] sm:$0xff] %v2879_v61  ;;  %404 = vst [vmem:[%s3302_s13 + $0x28] sm:$0xff] %v2879_v61 }
 0x217   : > { %405 = vst [vmem:[%s3302_s13 + $0x30] sm:$0xff] %v2879_v61  ;;  %406 = vst [vmem:[%s3302_s13 + $0x38] sm:$0xff] %v2879_v61 }
 0x21a   : > { %1695 = vmatmul.mubr.bf16.gmra.mxu0 %v1448_v49 }
 0x28a   : > { %v1596_v40 = vpop.f32.mrf.mxu0 }
 0x28b   : > { %v1597_v2 = vadd.f32 %v1596_v40, %v3315_v60 }
 0x28c   : > { %v1598_v3 = vpop.f32.mrf.mxu0 }
 0x28d   : > { %v1755_v4 = vmax.f32 %v1597_v2, 0.0  ;;  %v1599_v5 = vadd.f32 %v1598_v3, %v3317_v1 }
 0x28e   : > { %v1600_v46 = vpop.f32.mrf.mxu0 }
 0x28f   : > { %v1827_v19 = vrot.slane %v1755_v4, 4  ;;  %v1756_v11 = vmax.f32 %v1599_v5, 0.0  ;;  %v1601_v62 = vadd.f32 %v1600_v46, %v3315_v60 }
 0x290   : > { %v1602_v13 = vpop.f32.mrf.mxu0 }
 0x291   : > { %v1833_v0 = vrot.slane %v1756_v11, 4  ;;  %v1757_v15 = vmax.f32 %v1601_v62, 0.0  ;;  %v1603_v16 = vadd.f32 %v1602_v13, %v3317_v1  ;;  %v1828_v20 = vmax.f32 %v1755_v4, %v1827_v19 }
 0x292   : > { %v1606_v17 = vpop.f32.mrf.mxu0 }
 0x293   : > { %v1839_v21 = vrot.slane %v1757_v15, 4  ;;  %v1758_v8 = vmax.f32 %v1603_v16, 0.0  ;;  %v1607_v50 = vadd.f32 %v1606_v17, %v3315_v60  ;;  %v1834_v63 = vmax.f32 %v1756_v11, %v1833_v0 }
 0x294   : > { %v1608_v6 = vpop.f32.mrf.mxu0  ;;  %v1829_v26 = vrot.slane %v1828_v20, 2 }
 0x295   : > { %v1840_v52 = vmax.f32 %v1757_v15, %v1839_v21  ;;  %v1845_v9 = vrot.slane %v1758_v8, 4  ;;  %v1759_v24 = vmax.f32 %v1607_v50, 0.0  ;;  %v1609_v23 = vadd.f32 %v1608_v6, %v3317_v1 }
 0x296   : > { %v1610_v25 = vpop.f32.mrf.mxu0  ;;  %v1835_v12 = vrot.slane %v1834_v63, 2  ;;  %v1830_v37 = vmax.f32 %v1828_v20, %v1829_v26 }
 0x297   : > { %v1841_v10 = vrot.slane %v1840_v52, 2  ;;  %v1846_v27 = vmax.f32 %v1758_v8, %v1845_v9  ;;  %v1851_v53 = vrot.slane %v1759_v24, 4  ;;  %v1760_v29 = vmax.f32 %v1609_v23, 0.0 }
 0x298   : > { %v1611_v54 = vadd.f32 %v1610_v25, %v3315_v60  ;;  %v1612_v30 = vpop.f32.mrf.mxu0  ;;  %v1836_v56 = vmax.f32 %v1834_v63, %v1835_v12  ;;  %v1831_v7 = vrot.slane %v1830_v37, 1 }
 0x299   : > { %v1842_v31 = vmax.f32 %v1840_v52, %v1841_v10  ;;  %v1847_v32 = vrot.slane %v1846_v27, 2  ;;  %v1852_v34 = vmax.f32 %v1759_v24, %v1851_v53  ;;  %v1857_v35 = vrot.slane %v1760_v29, 4 }
 0x29a   : > { %v1761_v36 = vmax.f32 %v1611_v54, 0.0  ;;  %v1613_v14 = vadd.f32 %v1612_v30, %v3317_v1  ;;  %v1616_v55 = vpop.f32.mrf.mxu0  ;;  %v1837_v19 = vrot.slane %v1836_v56, 1  ;;  %v1832_v20 = vmax.f32 %v1830_v37, %v1831_v7 }
 0x29b   : > { %v1848_v38 = vmax.f32 %v1846_v27, %v1847_v32  ;;  %v1617_v39 = vadd.f32 %v1616_v55, %v3315_v60  ;;  %v1853_v18 = vrot.slane %v1852_v34, 2  ;;  %v1858_v42 = vmax.f32 %v1760_v29, %v1857_v35 }
 0x29c   : > { %v1863_v22 = vrot.slane %v1761_v36, 4  ;;  %v1762_v57 = vmax.f32 %v1613_v14, 0.0  ;;  %v1618_v43 = vpop.f32.mrf.mxu0  ;;  %v1843_v58 = vrot.slane %v1842_v31, 1  ;;  %v1838_v24 = vmax.f32 %v1836_v56, %v1837_v19 }
 0x29d   : > { %v1763_v41 = vmax.f32 %v1617_v39, 0.0  ;;  %v1619_v44 = vadd.f32 %v1618_v43, %v3317_v1  ;;  %v1854_v45 = vmax.f32 %v1852_v34, %v1853_v18  ;;  %v1859_v47 = vrot.slane %v1858_v42, 2 }
 0x29e   : > { %v1864_v48 = vmax.f32 %v1761_v36, %v1863_v22  ;;  %v1869_v49 = vrot.slane %v1762_v57, 4  ;;  %v1620_v61 = vpop.f32.mrf.mxu0  ;;  %v1849_v33 = vrot.slane %v1848_v38, 1  ;;  %v1844_v11 = vmax.f32 %v1842_v31, %v1843_v58 }
 0x29f   : > { %v1875_v28 = vrot.slane %v1763_v41, 4  ;;  %v1764_v51 = vmax.f32 %v1619_v44, 0.0  ;;  %v1860_v59 = vmax.f32 %v1858_v42, %v1859_v47  ;;  %v1621_v46 = vadd.f32 %v1620_v61, %v3315_v60 }
 0x2a0   : > { %v1865_v40 = vrot.slane %v1864_v48, 2  ;;  %v1870_v2 = vmax.f32 %v1762_v57, %v1869_v49  ;;  %v1622_v3 = vpop.f32.mrf.mxu0  ;;  %v1855_v62 = vrot.slane %v1854_v45, 1  ;;  %v1850_v21 = vmax.f32 %v1848_v38, %v1849_v33 }
 0x2a1   : > { %v1876_v4 = vmax.f32 %v1763_v41, %v1875_v28  ;;  %v1881_v5 = vrot.slane %v1764_v51, 4  ;;  %v1861_v0 = vrot.slane %v1860_v59, 1  ;;  %v1765_v16 = vmax.f32 %v1621_v46, 0.0 }
 0x2a2   : > { %v1626_v13 = vpop.f32.mrf.mxu0  ;;  %v1871_v15 = vrot.slane %v1870_v2, 2  ;;  %v1623_v17 = vadd.f32 %v1622_v3, %v3317_v1  ;;  %v1866_v8 = vmax.f32 %v1864_v48, %v1865_v40  ;;  %v2276_v23 = vsel %vm2275_vm2, %v1844_v11, %v1832_v20 }
 0x2a3   : > { %v1877_v6 = vrot.slane %v1876_v4, 2  ;;  %v1882_v63 = vmax.f32 %v1764_v51, %v1881_v5  ;;  %v1887_v52 = vrot.slane %v1765_v16, 4  ;;  %v1856_v25 = vmax.f32 %v1854_v45, %v1855_v62 }
 0x2a4   : > { %v1628_v50 = vpop.f32.mrf.mxu0  ;;  %v1766_v9 = vmax.f32 %v1623_v17, 0.0  ;;  %v1627_v26 = vadd.f32 %v1626_v13, %v3315_v60  ;;  %v1862_v27 = vmax.f32 %v1860_v59, %v1861_v0  ;;  %v1872_v53 = vmax.f32 %v1870_v2, %v1871_v15 }
 0x2a5   : > { %v1888_v29 = vmax.f32 %v1765_v16, %v1887_v52  ;;  %v2289_v30 = vsel %vm2275_vm2, %v1850_v21, %v1838_v24  ;;  %v1867_v12 = vrot.slane %v1866_v8, 1  ;;  %v1629_v32 = vadd.f32 %v1628_v50, %v3317_v1 }
 0x2a6   : > { %v1630_v10 = vpop.f32.mrf.mxu0  ;;  %v1893_v54 = vrot.slane %v1766_v9, 4  ;;  %v1767_v31 = vmax.f32 %v1627_v26, 0.0  ;;  %v1878_v35 = vmax.f32 %v1876_v4, %v1877_v6  ;;  %v1883_v36 = vrot.slane %v1882_v63, 2 }
 0x2a7   : > { %v1889_v14 = vrot.slane %v1888_v29, 2  ;;  %v2278_v37 = vsel %vm2277_vm3, %v1856_v25, %v2276_v23  ;;  %v1768_v39 = vmax.f32 %v1629_v32, 0.0  ;;  %v1631_v18 = vadd.f32 %v1630_v10, %v3315_v60 }
 0x2a8   : > { %v1632_v34 = vpop.f32.mrf.mxu0  ;;  %v1894_v55 = vmax.f32 %v1766_v9, %v1893_v54  ;;  %v1899_v38 = vrot.slane %v1767_v31, 4  ;;  %v2290_v22 = vsel %vm2277_vm3, %v1862_v27, %v2289_v30  ;;  %v1873_v57 = vrot.slane %v1872_v53, 1 }
 0x2a9   : > { %v1890_v43 = vmax.f32 %v1888_v29, %v1889_v14  ;;  %v1905_v41 = vrot.slane %v1768_v39, 4  ;;  %v1769_v44 = vmax.f32 %v1631_v18, 0.0  ;;  %v1633_v45 = vadd.f32 %v1632_v34, %v3317_v1 }
 0x2aa   : > { %v1636_v42 = vpop.f32.mrf.mxu0  ;;  %v1895_v56 = vrot.slane %v1894_v55, 2  ;;  %v1900_v58 = vmax.f32 %v1767_v31, %v1899_v38  ;;  %v1868_v48 = vmax.f32 %v1866_v8, %v1867_v12  ;;  %v1879_v49 = vrot.slane %v1878_v35, 1 }
 0x2ab   : > { %v1884_v61 = vmax.f32 %v1882_v63, %v1883_v36  ;;  %v1906_v51 = vmax.f32 %v1768_v39, %v1905_v41  ;;  %v1911_v33 = vrot.slane %v1769_v44, 4  ;;  %v1770_v59 = vmax.f32 %v1633_v45, 0.0 }
 0x2ac   : > { %v1638_v47 = vpop.f32.mrf.mxu0  ;;  %v1896_v7 = vmax.f32 %v1894_v55, %v1895_v56  ;;  %v1901_v28 = vrot.slane %v1900_v58, 2  ;;  %v1874_v2 = vmax.f32 %v1872_v53, %v1873_v57  ;;  %v1891_v3 = vrot.slane %v1890_v43, 1 }
 0x2ad   : > { %v1637_v4 = vadd.f32 %v1636_v42, %v3315_v60  ;;  %v1639_v5 = vadd.f32 %v1638_v47, %v3317_v1  ;;  %v1907_v19 = vrot.slane %v1906_v51, 2  ;;  %v1912_v11 = vmax.f32 %v1769_v44, %v1911_v33  ;;  %v1820_v47 = vld [vmem:[%s3302_s13 + $0x8] sm:$0xff] }
 0x2ae   : > { %v1640_v40 = vpop.f32.mrf.mxu0  ;;  %v1902_v46 = vmax.f32 %v1900_v58, %v1901_v28  ;;  %v1917_v62 = vrot.slane %v1770_v59, 4  ;;  %v2280_v0 = vsel %vm2279_vm4, %v1868_v48, %v2278_v37  ;;  %v1880_v15 = vmax.f32 %v1878_v35, %v1879_v49  ;;  %v1819_v37 = vld [vmem:[%s3302_s13] sm:$0xff] }
 0x2af   : > { %v1885_v16 = vrot.slane %v1884_v61, 1  ;;  %v1897_v17 = vrot.slane %v1896_v7, 1  ;;  %v1908_v21 = vmax.f32 %v1906_v51, %v1907_v19  ;;  %v1913_v8 = vrot.slane %v1912_v11, 2 }
 0x2b0   : > { %v1642_v13 = vpop.f32.mrf.mxu0  ;;  %v1903_v20 = vrot.slane %v1902_v46, 1  ;;  %v1918_v50 = vmax.f32 %v1770_v59, %v1917_v62  ;;  %v2291_v6 = vsel %vm2279_vm4, %v1874_v2, %v2290_v22  ;;  %v1892_v63 = vmax.f32 %v1890_v43, %v1891_v3  ;;  %v1706_v10 = vpop.f32.mrf.mxu1 }
 0x2b1   : > { %v1771_v52 = vmax.f32 %v1637_v4, 0.0  ;;  %v1641_v9 = vadd.f32 %v1640_v40, %v3315_v60  ;;  %v1909_v24 = vrot.slane %v1908_v21, 1  ;;  %v1914_v23 = vmax.f32 %v1912_v11, %v1913_v8 }
 0x2b2   : > { %v1919_v25 = vrot.slane %v1918_v50, 2  ;;  %v1772_v26 = vmax.f32 %v1639_v5, 0.0  ;;  %v1646_v27 = vpop.f32.mrf.mxu0  ;;  %v1886_v53 = vmax.f32 %v1884_v61, %v1885_v16  ;;  %v1904_v29 = vmax.f32 %v1902_v46, %v1903_v20  ;;  %v1708_v22 = vpop.f32.mrf.mxu1  ;;  %v3356_v61 = vld [vmem:[%s3302_s13 + $0x10] sm:$0xff]  ;;  %v3364_v5 = vld [vmem:[%s3302_s13 + $0x18] sm:$0xff]  ;;  %v3367_v46 = vld [vmem:[%s3302_s13 + $0x28] sm:$0xff] }
 0x2b3   : > { %v1773_v54 = vmax.f32 %v1641_v9, 0.0  ;;  %v1643_v30 = vadd.f32 %v1642_v13, %v3317_v1  ;;  %v2282_v12 = vsel %vm2281_vm5, %v1880_v15, %v2280_v0  ;;  %v1898_v31 = vmax.f32 %v1896_v7, %v1897_v17  ;;  %v3359_v7 = vld [vmem:[%s3302_s13 + $0x20] sm:$0xff] }
 0x2b4   : > { %v1915_v32 = vrot.slane %v1914_v23, 1  ;;  %v1920_v34 = vmax.f32 %v1918_v50, %v1919_v25  ;;  %v2284_v35 = vsel %vm2283_vm6, %v1892_v63, %v2282_v12  ;;  %v1910_v36 = vmax.f32 %v1908_v21, %v1909_v24  ;;  %v1648_v57 = vpop.f32.mrf.mxu0  ;;  %v1710_v3 = vpop.f32.mrf.mxu1 }
 0x2b5   : > { %v1923_v14 = vrot.slane %v1771_v52, 4  ;;  %v1935_v55 = vrot.slane %v1773_v54, 4  ;;  %v1929_v18 = vrot.slane %v1772_v26, 4  ;;  %v1774_v42 = vmax.f32 %v1643_v30, 0.0 }
 0x2b6   : > { %v1916_v38 = vmax.f32 %v1914_v23, %v1915_v32  ;;  %v1921_v39 = vrot.slane %v1920_v34, 1  ;;  %v2292_v43 = vsel %vm2281_vm5, %v1886_v53, %v2291_v6  ;;  %v2286_v56 = vsel %vm2285_vm7, %v1904_v29, %v2284_v35  ;;  %v1650_v4 = vpop.f32.mrf.mxu0 }
 0x2b7   : > { %v1936_v58 = vmax.f32 %v1773_v54, %v1935_v55  ;;  %v1707_v41 = vadd.f32 %v1706_v10, %v3315_v60  ;;  %v2293_v44 = vsel %vm2283_vm6, %v1898_v31, %v2292_v43  ;;  %v1647_v49 = vadd.f32 %v1646_v27, %v3315_v60  ;;  %v1712_v27 = vpop.f32.mrf.mxu1 }
 0x2b8   : > { %v2288_v45 = vsel %vm2287_vm8, %v1916_v38, %v2286_v56  ;;  %v1922_v48 = vmax.f32 %v1920_v34, %v1921_v39  ;;  %v2294_v28 = vsel %vm2285_vm7, %v1910_v36, %v2293_v44  ;;  %v1924_v33 = vmax.f32 %v1771_v52, %v1923_v14  ;;  %v1652_v52 = vpop.f32.mrf.mxu0 }
 0x2b9   : > { %v2346_v51 = vmax.f32 %v1819_v37, %v2288_v45  ;;  %v1930_v40 = vmax.f32 %v1772_v26, %v1929_v18  ;;  %v1941_v2 = vrot.slane %v1774_v42, 4  ;;  %v1937_v11 = vrot.slane %v1936_v58, 2 }
 0x2ba   : > { %v2295_v59 = vsel %vm2287_vm8, %v1922_v48, %v2294_v28  ;;  %v1799_v62 = vmax.f32 %v1707_v41, 0.0  ;;  %v1775_v13 = vmax.f32 %v1647_v49, 0.0  ;;  %v1709_v0 = vadd.f32 %v1708_v22, %v3317_v1  ;;  %v1656_v12 = vpop.f32.mrf.mxu0  ;;  %v1716_v34 = vpop.f32.mrf.mxu1 }
 0x2bb   : > { %v2347_v19 = vmax.f32 %v1820_v47, %v2295_v59  ;;  %2354 = vst [vmem:[%s3302_s13] sm:$0xff] %v2346_v51  ;;  %v1649_v15 = vadd.f32 %v1648_v57, %v3317_v1  ;;  %v1925_v16 = vrot.slane %v1924_v33, 2  ;;  %v1711_v17 = vadd.f32 %v1710_v3, %v3315_v60 }
 0x2bc   : > { %v1651_v20 = vadd.f32 %v1650_v4, %v3315_v60  ;;  %v1931_v21 = vrot.slane %v1930_v40, 2  ;;  %v1938_v8 = vmax.f32 %v1936_v58, %v1937_v11  ;;  %v1942_v50 = vmax.f32 %v1774_v42, %v1941_v2  ;;  %v1658_v57 = vpop.f32.mrf.mxu0  ;;  %v1718_v44 = vpop.f32.mrf.mxu1 }
 0x2bd   : > { %2355 = vst [vmem:[%s3302_s13 + $0x8] sm:$0xff] %v2347_v19  ;;  %v2091_v6 = vrot.slane %v1799_v62, 4  ;;  %v1947_v63 = vrot.slane %v1775_v13, 4  ;;  %v1800_v9 = vmax.f32 %v1709_v0, 0.0  ;;  %v1776_v24 = vmax.f32 %v1649_v15, 0.0 }
 0x2be   : > { %v1926_v23 = vmax.f32 %v1924_v33, %v1925_v16  ;;  %v1801_v25 = vmax.f32 %v1711_v17, 0.0  ;;  %v1777_v26 = vmax.f32 %v1651_v20, 0.0  ;;  %v1932_v10 = vmax.f32 %v1930_v40, %v1931_v21  ;;  %v1660_v4 = vpop.f32.mrf.mxu0  ;;  %v1720_v0 = vpop.f32.mrf.mxu1 }
 0x2bf   : > { %v1939_v53 = vrot.slane %v1938_v8, 1  ;;  %v1943_v29 = vrot.slane %v1942_v50, 2  ;;  %v2092_v54 = vmax.f32 %v1799_v62, %v2091_v6  ;;  %v1948_v30 = vmax.f32 %v1775_v13, %v1947_v63 }
 0x2c0   : > { %v2097_v31 = vrot.slane %v1800_v9, 4  ;;  %v1953_v32 = vrot.slane %v1776_v24, 4  ;;  %v1927_v35 = vrot.slane %v1926_v23, 1  ;;  %v2103_v36 = vrot.slane %v1801_v25, 4 }
 0x2c1   : > { %v1959_v14 = vrot.slane %v1777_v26, 4  ;;  %v1933_v55 = vrot.slane %v1932_v10, 1  ;;  %v1653_v37 = vadd.f32 %v1652_v52, %v3317_v1  ;;  %v1657_v38 = vadd.f32 %v1656_v12, %v3315_v60 }
 0x2c2   : > { %v1940_v39 = vmax.f32 %v1938_v8, %v1939_v53  ;;  %v1944_v18 = vmax.f32 %v1942_v50, %v1943_v29  ;;  %v2093_v42 = vrot.slane %v2092_v54, 2  ;;  %v1949_v22 = vrot.slane %v1948_v30, 2 }
 0x2c3   : > { %v2098_v43 = vmax.f32 %v1800_v9, %v2097_v31  ;;  %v1954_v56 = vmax.f32 %v1776_v24, %v1953_v32  ;;  %v1778_v58 = vmax.f32 %v1653_v37, 0.0  ;;  %v1779_v41 = vmax.f32 %v1657_v38, 0.0  ;;  %v1722_v37 = vpop.f32.mrf.mxu1 }
 0x2c4   : > { %v1928_v45 = vmax.f32 %v1926_v23, %v1927_v35  ;;  %v2104_v47 = vmax.f32 %v1801_v25, %v2103_v36  ;;  %v1960_v48 = vmax.f32 %v1777_v26, %v1959_v14  ;;  %v1934_v49 = vmax.f32 %v1932_v10, %v1933_v55 }
 0x2c5   : > { %v1965_v28 = vrot.slane %v1778_v58, 4  ;;  %v1971_v51 = vrot.slane %v1779_v41, 4  ;;  %v1717_v33 = vadd.f32 %v1716_v34, %v3315_v60  ;;  %v1945_v59 = vrot.slane %v1944_v18, 1 }
 0x2c6   : > { %v2094_v40 = vmax.f32 %v2092_v54, %v2093_v42  ;;  %v1713_v2 = vadd.f32 %v1712_v27, %v3317_v1  ;;  %v1659_v3 = vadd.f32 %v1658_v57, %v3317_v1  ;;  %v2296_v19 = vsel %vm2275_vm2, %v1940_v39, %v1928_v45  ;;  %v1662_v27 = vpop.f32.mrf.mxu0 }
 0x2c7   : > { %v1950_v11 = vmax.f32 %v1948_v30, %v1949_v22  ;;  %v2099_v62 = vrot.slane %v2098_v43, 2  ;;  %v1955_v13 = vrot.slane %v1954_v56, 2  ;;  %v2105_v15 = vrot.slane %v2104_v47, 2 }
 0x2c8   : > { %v1961_v16 = vrot.slane %v1960_v48, 2  ;;  %v1966_v17 = vmax.f32 %v1778_v58, %v1965_v28  ;;  %v1780_v20 = vmax.f32 %v1659_v3, 0.0  ;;  %v1972_v21 = vmax.f32 %v1779_v41, %v1971_v51  ;;  %v1666_v58 = vpop.f32.mrf.mxu0 }
 0x2c9   : > { %v1803_v8 = vmax.f32 %v1717_v33, 0.0  ;;  %v1719_v50 = vadd.f32 %v1718_v44, %v3317_v1  ;;  %v1661_v6 = vadd.f32 %v1660_v4, %v3315_v60  ;;  %v1946_v63 = vmax.f32 %v1944_v18, %v1945_v59 }
 0x2ca   : > { %v1802_v52 = vmax.f32 %v1713_v2, 0.0  ;;  %v1977_v9 = vrot.slane %v1780_v20, 4  ;;  %v1721_v24 = vadd.f32 %v1720_v0, %v3315_v60  ;;  %v2095_v23 = vrot.slane %v2094_v40, 1  ;;  %v1668_v0 = vpop.f32.mrf.mxu0 }
 0x2cb   : > { %v1951_v25 = vrot.slane %v1950_v11, 1  ;;  %v1956_v26 = vmax.f32 %v1954_v56, %v1955_v13  ;;  %v1781_v10 = vmax.f32 %v1661_v6, 0.0  ;;  %v3384_v53 = vmax.f32 %v2098_v43, %v2099_v62 }
 0x2cc   : > { %v2106_v29 = vmax.f32 %v2104_v47, %v2105_v15  ;;  %v1962_v54 = vmax.f32 %v1960_v48, %v1961_v16  ;;  %v1967_v30 = vrot.slane %v1966_v17, 2  ;;  %v1973_v12 = vrot.slane %v1972_v21, 2 }
 0x2cd   : > { %v2115_v31 = vrot.slane %v1803_v8, 4  ;;  %v1804_v32 = vmax.f32 %v1719_v50, 0.0  ;;  %v1983_v34 = vrot.slane %v1781_v10, 4  ;;  %v2109_v35 = vrot.slane %v1802_v52, 4 }
 0x2ce   : > { %v1978_v36 = vmax.f32 %v1780_v20, %v1977_v9  ;;  %v1805_v14 = vmax.f32 %v1721_v24, 0.0  ;;  %v1663_v55 = vadd.f32 %v1662_v27, %v3317_v1  ;;  %v2303_v38 = vsel %vm2275_vm2, %v1946_v63, %v1934_v49  ;;  %v1726_v49 = vpop.f32.mrf.mxu1  ;;  %v1670_v27 = vpop.f32.mrf.mxu0 }
 0x2cf   : > { %v3388_v39 = vmax.f32 %v2094_v40, %v2095_v23  ;;  %v1957_v18 = vrot.slane %v1956_v26, 1  ;;  %v1984_v42 = vmax.f32 %v1781_v10, %v1983_v34  ;;  %v1952_v22 = vmax.f32 %v1950_v11, %v1951_v25 }
 0x2d0   : > { %v1963_v57 = vrot.slane %v1962_v54, 1  ;;  %v1968_v43 = vmax.f32 %v1966_v17, %v1967_v30  ;;  %v1782_v56 = vmax.f32 %v1663_v55, 0.0  ;;  %v2101_v41 = vrot.slane %v3384_v53, 1  ;;  %v1728_v63 = vpop.f32.mrf.mxu1 }
 0x2d1   : > { %v1974_v44 = vmax.f32 %v1972_v21, %v1973_v12  ;;  %v2116_v45 = vmax.f32 %v1803_v8, %v2115_v31  ;;  %v2121_v47 = vrot.slane %v1804_v32, 4  ;;  %v2107_v48 = vrot.slane %v2106_v29, 1 }
 0x2d2   : > { %v3391_v28 = vmax.f32 %v1802_v52, %v2109_v35  ;;  %v1979_v51 = vrot.slane %v1978_v36, 2  ;;  %v2127_v33 = vrot.slane %v1805_v14, 4  ;;  %v1958_v59 = vmax.f32 %v1956_v26, %v1957_v18 }
 0x2d3   : > { %v1985_v40 = vrot.slane %v1984_v42, 2  ;;  %v1989_v2 = vrot.slane %v1782_v56, 4  ;;  %v1667_v3 = vadd.f32 %v1666_v58, %v3315_v60  ;;  %v2297_v4 = vsel %vm2277_vm3, %v1952_v22, %v2296_v19 }
 0x2d4   : > { %v1964_v11 = vmax.f32 %v1962_v54, %v1963_v57  ;;  %v1969_v62 = vrot.slane %v1968_v43, 1  ;;  %v1723_v13 = vadd.f32 %v1722_v37, %v3317_v1  ;;  %v1975_v15 = vrot.slane %v1974_v44, 1 }
 0x2d5   : > { %v2117_v16 = vrot.slane %v2116_v45, 2  ;;  %v2122_v17 = vmax.f32 %v1804_v32, %v2121_v47  ;;  %v1783_v20 = vmax.f32 %v1667_v3, 0.0  ;;  %v3396_v21 = vmax.f32 %v2106_v29, %v2107_v48 }
 0x2d6   : > { %v2111_v8 = vrot.slane %v3391_v28, 2  ;;  %v1980_v50 = vmax.f32 %v1978_v36, %v1979_v51  ;;  %v2128_v6 = vmax.f32 %v1805_v14, %v2127_v33  ;;  %v2304_v52 = vsel %vm2277_vm3, %v1958_v59, %v2303_v38  ;;  %v1730_v36 = vpop.f32.mrf.mxu1 }
 0x2d7   : > { %v1986_v9 = vmax.f32 %v1984_v42, %v1985_v40  ;;  %v1990_v19 = vmax.f32 %v1782_v56, %v1989_v2  ;;  %v1995_v24 = vrot.slane %v1783_v20, 4  ;;  %v2298_v23 = vsel %vm2279_vm4, %v1964_v11, %v2297_v4 }
 0x2d8   : > { %v1970_v25 = vmax.f32 %v1968_v43, %v1969_v62  ;;  %v1806_v26 = vmax.f32 %v1723_v13, 0.0  ;;  %v1669_v10 = vadd.f32 %v1668_v0, %v3317_v1  ;;  %v1976_v54 = vmax.f32 %v1974_v44, %v1975_v15  ;;  %v1732_v3 = vpop.f32.mrf.mxu1 }
 0x2d9   : > { %v3402_v29 = vmax.f32 %v2116_v45, %v2117_v16  ;;  %v2123_v30 = vrot.slane %v2122_v17, 2  ;;  %v1996_v12 = vmax.f32 %v1783_v20, %v1995_v24  ;;  %v1981_v31 = vrot.slane %v1980_v50, 1  ;;  %v1672_v45 = vpop.f32.mrf.mxu0 }
 0x2da   : > { %v2129_v32 = vrot.slane %v2128_v6, 2  ;;  %v1727_v34 = vadd.f32 %v1726_v49, %v3315_v60  ;;  %v1784_v35 = vmax.f32 %v1669_v10, 0.0  ;;  %v1987_v14 = vrot.slane %v1986_v9, 1 }
 0x2db   : > { %v1991_v55 = vrot.slane %v1990_v19, 2  ;;  %v1997_v37 = vrot.slane %v1996_v12, 2  ;;  %v1671_v38 = vadd.f32 %v1670_v27, %v3315_v60  ;;  %v2305_v18 = vsel %vm2279_vm4, %v1970_v25, %v2304_v52  ;;  %v1676_v20 = vpop.f32.mrf.mxu0  ;;  %v1736_v25 = vpop.f32.mrf.mxu1 }
 0x2dc   : > { %v2133_v42 = vrot.slane %v1806_v26, 4  ;;  %v2001_v22 = vrot.slane %v1784_v35, 4  ;;  %v1729_v57 = vadd.f32 %v1728_v63, %v3317_v1  ;;  %v2299_v43 = vsel %vm2281_vm5, %v1976_v54, %v2298_v23 }
 0x2dd   : > { %v3409_v56 = vmax.f32 %v2122_v17, %v2123_v30  ;;  %v1785_v58 = vmax.f32 %v1671_v38, 0.0  ;;  %v1731_v44 = vadd.f32 %v1730_v36, %v3315_v60  ;;  %v1982_v47 = vmax.f32 %v1980_v50, %v1981_v31 }
 0x2de   : > { %v1998_v48 = vmax.f32 %v1996_v12, %v1997_v37  ;;  %v1807_v51 = vmax.f32 %v1727_v34, 0.0  ;;  %v2002_v33 = vmax.f32 %v1784_v35, %v2001_v22  ;;  %v1988_v49 = vmax.f32 %v1986_v9, %v1987_v14  ;;  %v1678_v34 = vpop.f32.mrf.mxu0  ;;  %v1738_v22 = vpop.f32.mrf.mxu1 }
 0x2df   : > { %v3412_v59 = vmax.f32 %v2128_v6, %v2129_v32  ;;  %v1992_v40 = vmax.f32 %v1990_v19, %v1991_v55  ;;  %v2007_v2 = vrot.slane %v1785_v58, 4  ;;  %v2134_v4 = vmax.f32 %v1806_v26, %v2133_v42 }
 0x2e0   : > { %v2003_v11 = vrot.slane %v2002_v33, 2  ;;  %v1808_v62 = vmax.f32 %v1729_v57, 0.0  ;;  %v1673_v13 = vadd.f32 %v1672_v45, %v3317_v1  ;;  %v2119_v0 = vrot.slane %v3402_v29, 1 }
 0x2e1   : > { %v2125_v15 = vrot.slane %v3409_v56, 1  ;;  %v2008_v16 = vmax.f32 %v1785_v58, %v2007_v2  ;;  %v1809_v17 = vmax.f32 %v1731_v44, 0.0  ;;  %v1999_v50 = vrot.slane %v1998_v48, 1  ;;  %v1680_v2 = vpop.f32.mrf.mxu0 }
 0x2e2   : > { %v2139_v63 = vrot.slane %v1807_v51, 4  ;;  %v2004_v52 = vmax.f32 %v2002_v33, %v2003_v11  ;;  %v1786_v6 = vmax.f32 %v1673_v13, 0.0  ;;  %v2306_v9 = vsel %vm2281_vm5, %v1982_v47, %v2305_v18 }
 0x2e3   : > { %v2300_v19 = vsel %vm2283_vm6, %v1988_v49, %v2299_v43  ;;  %v2131_v24 = vrot.slane %v3412_v59, 1  ;;  %v2009_v23 = vrot.slane %v2008_v16, 2  ;;  %v1993_v26 = vrot.slane %v1992_v40, 1 }
 0x2e4   : > { %v2135_v10 = vrot.slane %v2134_v4, 2  ;;  %v2145_v27 = vrot.slane %v1808_v62, 4  ;;  %v2013_v54 = vrot.slane %v1786_v6, 4  ;;  %v2151_v12 = vrot.slane %v1809_v17, 4 }
 0x2e5   : > { %v2010_v30 = vmax.f32 %v2008_v16, %v2009_v23  ;;  %v1733_v31 = vadd.f32 %v1732_v3, %v3317_v1  ;;  %v1677_v32 = vadd.f32 %v1676_v20, %v3315_v60  ;;  %v2000_v35 = vmax.f32 %v1998_v48, %v1999_v50 }
 0x2e6   : > { %v2140_v36 = vmax.f32 %v1807_v51, %v2139_v63  ;;  %v2005_v14 = vrot.slane %v2004_v52, 1  ;;  %v2014_v55 = vmax.f32 %v1786_v6, %v2013_v54  ;;  %v1737_v42 = vadd.f32 %v1736_v25, %v3315_v60 }
 0x2e7   : > { %v2011_v37 = vrot.slane %v2010_v30, 1  ;;  %v1810_v38 = vmax.f32 %v1733_v31, 0.0  ;;  %v1787_v18 = vmax.f32 %v1677_v32, 0.0  ;;  %v1994_v57 = vmax.f32 %v1992_v40, %v1993_v26  ;;  %v1682_v26 = vpop.f32.mrf.mxu0 }
 0x2e8   : > { %v2136_v43 = vmax.f32 %v2134_v4, %v2135_v10  ;;  %v2146_v58 = vmax.f32 %v1808_v62, %v2145_v27  ;;  %v2015_v44 = vrot.slane %v2014_v55, 2  ;;  %v2152_v47 = vmax.f32 %v1809_v17, %v2151_v12  ;;  %v1740_v4 = vpop.f32.mrf.mxu1 }
 0x2e9   : > { %v2012_v45 = vmax.f32 %v2010_v30, %v2011_v37  ;;  %v2157_v33 = vrot.slane %v1810_v38, 4  ;;  %v1811_v49 = vmax.f32 %v1737_v42, 0.0  ;;  %v2301_v48 = vsel %vm2285_vm7, %v2000_v35, %v2300_v19  ;;  %v1686_v42 = vpop.f32.mrf.mxu0 }
 0x2ea   : > { %v2016_v51 = vmax.f32 %v2014_v55, %v2015_v44  ;;  %v2019_v3 = vrot.slane %v1787_v18, 4  ;;  %v1679_v11 = vadd.f32 %v1678_v34, %v3317_v1  ;;  %v2141_v13 = vrot.slane %v2140_v36, 2 }
 0x2eb   : > { %v2006_v16 = vmax.f32 %v2004_v52, %v2005_v14  ;;  %v2302_v20 = vsel %vm2287_vm8, %v2012_v45, %v2301_v48  ;;  %v1739_v40 = vadd.f32 %v1738_v22, %v3317_v1  ;;  %v2307_v62 = vsel %vm2283_vm6, %v1994_v57, %v2306_v9 }
 0x2ec   : > { %v2147_v17 = vrot.slane %v2146_v58, 2  ;;  %v2348_v50 = vmax.f32 %v3356_v61, %v2302_v20  ;;  %v2017_v63 = vrot.slane %v2016_v51, 1  ;;  %v2153_v6 = vrot.slane %v2152_v47, 2 }
 0x2ed   : > { %v2158_v19 = vmax.f32 %v1810_v38, %v2157_v33  ;;  %v2163_v23 = vrot.slane %v1811_v49, 4  ;;  %v1788_v25 = vmax.f32 %v1679_v11, 0.0  ;;  %v2020_v27 = vmax.f32 %v1787_v18, %v2019_v3  ;;  %v1742_v18 = vpop.f32.mrf.mxu1  ;;  %v1688_v3 = vpop.f32.mrf.mxu0 }
 0x2ee   : > { %v2018_v10 = vmax.f32 %v2016_v51, %v2017_v63  ;;  %v1681_v52 = vadd.f32 %v1680_v2, %v3315_v60  ;;  %v1741_v54 = vadd.f32 %v1740_v4, %v3315_v60  ;;  %2356 = vst [vmem:[%s3302_s13 + $0x10] sm:$0xff] %v2348_v50  ;;  %v2137_v30 = vrot.slane %v2136_v43, 1 }
 0x2ef   : > { %v2142_v12 = vmax.f32 %v2140_v36, %v2141_v13  ;;  %v2308_v9 = vsel %vm2285_vm7, %v2006_v16, %v2307_v62  ;;  %v1812_v31 = vmax.f32 %v1739_v40, 0.0  ;;  %v2148_v32 = vmax.f32 %v2146_v58, %v2147_v17 }
 0x2f0   : > { %v2309_v61 = vsel %vm2287_vm8, %v2018_v10, %v2308_v9  ;;  %v1789_v34 = vmax.f32 %v1681_v52, 0.0  ;;  %v1813_v35 = vmax.f32 %v1741_v54, 0.0  ;;  %v2132_v14 = vmax.f32 %v3412_v59, %v2131_v24 }
 0x2f1   : > { %v2349_v55 = vmax.f32 %v3364_v5, %v2309_v61  ;;  %v2164_v37 = vmax.f32 %v1811_v49, %v2163_v23  ;;  %v2025_v38 = vrot.slane %v1788_v25, 4  ;;  %v2154_v22 = vmax.f32 %v2152_v47, %v2153_v6 }
 0x2f2   : > { %v2159_v57 = vrot.slane %v2158_v19, 2  ;;  %v2021_v36 = vrot.slane %v2020_v27, 2  ;;  %v2031_v44 = vrot.slane %v1789_v34, 4  ;;  %v3439_v58 = vmax.f32 %v3391_v28, %v2111_v8  ;;  %v1746_v8 = vpop.f32.mrf.mxu1 }
 0x2f3   : > { %v2169_v45 = vrot.slane %v1812_v31, 4  ;;  %v2175_v33 = vrot.slane %v1813_v35, 4  ;;  %v1683_v2 = vadd.f32 %v1682_v26, %v3317_v1  ;;  %2357 = vst [vmem:[%s3302_s13 + $0x18] sm:$0xff] %v2349_v55  ;;  %v2120_v5 = vmax.f32 %v3402_v29, %v2119_v0 }
 0x2f4   : > { %v2138_v59 = vmax.f32 %v2136_v43, %v2137_v30  ;;  %v2143_v24 = vrot.slane %v2142_v12, 1  ;;  %v2149_v47 = vrot.slane %v2148_v32, 1  ;;  %v2126_v49 = vmax.f32 %v3409_v56, %v2125_v15  ;;  %v1748_v23 = vpop.f32.mrf.mxu1 }
 0x2f5   : > { %v2165_v48 = vrot.slane %v2164_v37, 2  ;;  %v2026_v51 = vmax.f32 %v1788_v25, %v2025_v38  ;;  %v2032_v28 = vmax.f32 %v1789_v34, %v2031_v44  ;;  %v2324_v11 = vsel %vm2275_vm2, %v2132_v14, %v2120_v5  ;;  %v1690_v25 = vpop.f32.mrf.mxu0 }
 0x2f6   : > { %v2155_v13 = vrot.slane %v2154_v22, 1  ;;  %v2160_v16 = vmax.f32 %v2158_v19, %v2159_v57  ;;  %v2022_v20 = vmax.f32 %v2020_v27, %v2021_v36  ;;  %v2170_v40 = vmax.f32 %v1812_v31, %v2169_v45 }
 0x2f7   : > { %v2176_v4 = vmax.f32 %v1813_v35, %v2175_v33  ;;  %v1790_v29 = vmax.f32 %v1683_v2, 0.0  ;;  %v1687_v0 = vadd.f32 %v1686_v42, %v3315_v60  ;;  %v2331_v43 = vsel %vm2275_vm2, %v2138_v59, %v2126_v49  ;;  %v1692_v38 = vpop.f32.mrf.mxu0 }
 0x2f8   : > { %v2144_v62 = vmax.f32 %v2142_v12, %v2143_v24  ;;  %v2150_v17 = vmax.f32 %v2148_v32, %v2149_v47  ;;  %v1743_v56 = vadd.f32 %v1742_v18, %v3317_v1  ;;  %v2166_v15 = vmax.f32 %v2164_v37, %v2165_v48  ;;  %v1750_v37 = vpop.f32.mrf.mxu1 }
 0x2f9   : > { %v2027_v50 = vrot.slane %v2026_v51, 2  ;;  %v2033_v63 = vrot.slane %v2032_v28, 2  ;;  %v1791_v6 = vmax.f32 %v1687_v0, 0.0  ;;  %v2156_v26 = vmax.f32 %v2154_v22, %v2155_v13 }
 0x2fa   : > { %v2161_v19 = vrot.slane %v2160_v16, 1  ;;  %v1747_v10 = vadd.f32 %v1746_v8, %v3315_v60  ;;  %v1689_v27 = vadd.f32 %v1688_v3, %v3317_v1  ;;  %v2023_v52 = vrot.slane %v2022_v20, 1 }
 0x2fb   : > { %v2171_v54 = vrot.slane %v2170_v40, 2  ;;  %v2177_v30 = vrot.slane %v2176_v4, 2  ;;  %v2037_v9 = vrot.slane %v1790_v29, 4  ;;  %v2113_v12 = vrot.slane %v3439_v58, 1 }
 0x2fc   : > { %v2325_v31 = vsel %vm2277_vm3, %v2144_v62, %v2324_v11  ;;  %v2332_v32 = vsel %vm2277_vm3, %v2150_v17, %v2331_v43  ;;  %v1814_v61 = vmax.f32 %v1743_v56, 0.0  ;;  %v2167_v34 = vrot.slane %v2166_v15, 1  ;;  %v1752_v17 = vpop.f32.mrf.mxu1 }
 0x2fd   : > { %v2028_v35 = vmax.f32 %v2026_v51, %v2027_v50  ;;  %v2034_v14 = vmax.f32 %v2032_v28, %v2033_v63  ;;  %v2043_v55 = vrot.slane %v1791_v6, 4  ;;  %v2326_v18 = vsel %vm2279_vm4, %v2156_v26, %v2325_v31  ;;  %v1696_v28 = vpop.f32.mrf.mxu0 }
 0x2fe   : > { %v2162_v42 = vmax.f32 %v2160_v16, %v2161_v19  ;;  %v1815_v22 = vmax.f32 %v1747_v10, 0.0  ;;  %v1792_v57 = vmax.f32 %v1689_v27, 0.0  ;;  %v2024_v36 = vmax.f32 %v2022_v20, %v2023_v52 }
 0x2ff   : > { %v2172_v44 = vmax.f32 %v2170_v40, %v2171_v54  ;;  %v2178_v45 = vmax.f32 %v2176_v4, %v2177_v30  ;;  %v2038_v33 = vmax.f32 %v1790_v29, %v2037_v9  ;;  %v2181_v2 = vrot.slane %v1814_v61, 4 }
 0x300   : > { %v1749_v5 = vadd.f32 %v1748_v23, %v3317_v1  ;;  %v1691_v59 = vadd.f32 %v1690_v25, %v3315_v60  ;;  %v1751_v24 = vadd.f32 %v1750_v37, %v3315_v60  ;;  %v2168_v47 = vmax.f32 %v2166_v15, %v2167_v34 }
 0x301   : > { %v2029_v49 = vrot.slane %v2028_v35, 1  ;;  %v2035_v48 = vrot.slane %v2034_v14, 1  ;;  %v2044_v51 = vmax.f32 %v1791_v6, %v2043_v55  ;;  %v2187_v8 = vrot.slane %v1815_v22, 4  ;;  %v1698_v6 = vpop.f32.mrf.mxu0 }
 0x302   : > { %v2049_v3 = vrot.slane %v1792_v57, 4  ;;  %v1793_v11 = vmax.f32 %v1691_v59, 0.0  ;;  %v1817_v13 = vmax.f32 %v1751_v24, 0.0  ;;  %v3463_v16 = vsel %vm2279_vm4, %v2162_v42, %v2332_v32 }
 0x303   : > { %v2173_v20 = vrot.slane %v2172_v44, 1  ;;  %v2179_v40 = vrot.slane %v2178_v45, 1  ;;  %v2039_v4 = vrot.slane %v2038_v33, 2  ;;  %v2182_v29 = vmax.f32 %v1814_v61, %v2181_v2  ;;  %v1700_v55 = vpop.f32.mrf.mxu0 }
 0x304   : > { %v1816_v0 = vmax.f32 %v1749_v5, 0.0  ;;  %v2055_v43 = vrot.slane %v1793_v11, 4  ;;  %v2199_v62 = vrot.slane %v1817_v13, 4  ;;  %v2327_v56 = vsel %vm2281_vm5, %v2168_v47, %v2326_v18 }
 0x305   : > { %v3466_v15 = vmax.f32 %v2028_v35, %v2029_v49  ;;  %v2036_v50 = vmax.f32 %v2034_v14, %v2035_v48  ;;  %v1693_v63 = vadd.f32 %v1692_v38, %v3317_v1  ;;  %v2045_v23 = vrot.slane %v2044_v51, 2 }
 0x306   : > { %v2188_v25 = vmax.f32 %v1815_v22, %v2187_v8  ;;  %v2050_v26 = vmax.f32 %v1792_v57, %v2049_v3  ;;  %v2056_v19 = vmax.f32 %v1793_v11, %v2055_v43  ;;  %v3469_v10 = vmax.f32 %v2172_v44, %v2173_v20 }
 0x307   : > { %v2180_v27 = vmax.f32 %v2178_v45, %v2179_v40  ;;  %v1794_v52 = vmax.f32 %v1693_v63, 0.0  ;;  %v1753_v54 = vadd.f32 %v1752_v17, %v3317_v1  ;;  %v2040_v30 = vmax.f32 %v2038_v33, %v2039_v4 }
 0x308   : > { %v2183_v9 = vrot.slane %v2182_v29, 2  ;;  %v2193_v31 = vrot.slane %v1816_v0, 4  ;;  %v2200_v32 = vmax.f32 %v1817_v13, %v2199_v62  ;;  %v2057_v61 = vrot.slane %v2056_v19, 2 }
 0x309   : > { %v2061_v34 = vrot.slane %v1794_v52, 4  ;;  %v1818_v35 = vmax.f32 %v1753_v54, 0.0  ;;  %v1697_v14 = vadd.f32 %v1696_v28, %v3315_v60  ;;  %v2310_v37 = vsel %vm2275_vm2, %v2036_v50, %v2024_v36  ;;  %v1702_v36 = vpop.f32.mrf.mxu0 }
 0x30a   : > { %v2046_v38 = vmax.f32 %v2044_v51, %v2045_v23  ;;  %v2189_v18 = vrot.slane %v2188_v25, 2  ;;  %v2051_v42 = vrot.slane %v2050_v26, 2  ;;  %v1699_v45 = vadd.f32 %v1698_v6, %v3317_v1 }
 0x30b   : > { %v2062_v22 = vmax.f32 %v1794_v52, %v2061_v34  ;;  %v2205_v57 = vrot.slane %v1818_v35, 4  ;;  %v1795_v44 = vmax.f32 %v1697_v14, 0.0  ;;  %v3476_v33 = vsel %vm2283_vm6, %v2180_v27, %v2327_v56 }
 0x30c   : > { %v2194_v2 = vmax.f32 %v1816_v0, %v2193_v31  ;;  %v2201_v5 = vrot.slane %v2200_v32, 2  ;;  %v1701_v59 = vadd.f32 %v1700_v55, %v3315_v60  ;;  %v2058_v24 = vmax.f32 %v2056_v19, %v2057_v61 }
 0x30d   : > { %v2206_v47 = vmax.f32 %v1818_v35, %v2205_v57  ;;  %v2067_v49 = vrot.slane %v1795_v44, 4  ;;  %v1796_v48 = vmax.f32 %v1699_v45, 0.0  ;;  %v2041_v51 = vrot.slane %v2040_v30, 1 }
 0x30e   : > { %v2047_v28 = vrot.slane %v2046_v38, 1  ;;  %v2063_v8 = vrot.slane %v2062_v22, 2  ;;  %v1797_v3 = vmax.f32 %v1701_v59, 0.0  ;;  %v2190_v11 = vmax.f32 %v2188_v25, %v2189_v18 }
 0x30f   : > { %v2052_v13 = vmax.f32 %v2050_v26, %v2051_v42  ;;  %v2068_v20 = vmax.f32 %v1795_v44, %v2067_v49  ;;  %v2073_v40 = vrot.slane %v1796_v48, 4  ;;  %v2184_v4 = vmax.f32 %v2182_v29, %v2183_v9 }
 0x310   : > { %v2195_v43 = vrot.slane %v2194_v2, 2  ;;  %v2079_v62 = vrot.slane %v1797_v3, 4  ;;  %v1703_v0 = vadd.f32 %v1702_v36, %v3317_v1  ;;  %v2059_v17 = vrot.slane %v2058_v24, 1 }
 0x311   : > { %v2202_v60 = vmax.f32 %v2200_v32, %v2201_v5  ;;  %v2207_v56 = vrot.slane %v2206_v47, 2  ;;  %v2069_v50 = vrot.slane %v2068_v20, 2  ;;  %v2064_v63 = vmax.f32 %v2062_v22, %v2063_v8 }
 0x312   : > { %v2074_v6 = vmax.f32 %v1796_v48, %v2073_v40  ;;  %v2080_v23 = vmax.f32 %v1797_v3, %v2079_v62  ;;  %v1798_v19 = vmax.f32 %v1703_v0, 0.0  ;;  %v2048_v27 = vmax.f32 %v2046_v38, %v2047_v28 }
 0x313   : > { %v2191_v52 = vrot.slane %v2190_v11, 1  ;;  %v2053_v54 = vrot.slane %v2052_v13, 1  ;;  %v2070_v25 = vmax.f32 %v2068_v20, %v2069_v50  ;;  %v2196_v26 = vmax.f32 %v2194_v2, %v2195_v43 }
 0x314   : > { %v2075_v31 = vrot.slane %v2074_v6, 2  ;;  %v2081_v61 = vrot.slane %v2080_v23, 2  ;;  %v2085_v29 = vrot.slane %v1798_v19, 4  ;;  %v2060_v9 = vmax.f32 %v2058_v24, %v2059_v17 }
 0x315   : > { %v2203_v34 = vrot.slane %v2202_v60, 1  ;;  %v2208_v35 = vmax.f32 %v2206_v47, %v2207_v56  ;;  %v2071_v1 = vrot.slane %v2070_v25, 1  ;;  %v2065_v14 = vrot.slane %v2064_v63, 1 }
 0x316   : > { %v2076_v32 = vmax.f32 %v2074_v6, %v2075_v31  ;;  %v2082_v55 = vmax.f32 %v2080_v23, %v2081_v61  ;;  %v2086_v18 = vmax.f32 %v1798_v19, %v2085_v29  ;;  %v2042_v42 = vmax.f32 %v2040_v30, %v2041_v51 }
 0x317   : > { %v2185_v22 = vrot.slane %v2184_v4, 1  ;;  %v2192_v57 = vmax.f32 %v2190_v11, %v2191_v52  ;;  %v2072_v44 = vmax.f32 %v2070_v25, %v2071_v1  ;;  %v2197_v38 = vrot.slane %v2196_v26, 1 }
 0x318   : > { %v2077_v45 = vrot.slane %v2076_v32, 1  ;;  %v2083_v5 = vrot.slane %v2082_v55, 1  ;;  %v2087_v59 = vrot.slane %v2086_v18, 2  ;;  %v2311_v2 = vsel %vm2277_vm3, %v2048_v27, %v2310_v37 }
 0x319   : > { %v2054_v49 = vmax.f32 %v2052_v13, %v2053_v54  ;;  %v2204_v48 = vmax.f32 %v2202_v60, %v2203_v34  ;;  %v2209_v24 = vrot.slane %v2208_v35, 1  ;;  %v2312_v47 = vsel %vm2279_vm4, %v2060_v9, %v2311_v2 }
 0x31a   : > { %v2066_v36 = vmax.f32 %v2064_v63, %v2065_v14  ;;  %v2084_v28 = vmax.f32 %v2082_v55, %v2083_v5  ;;  %v2088_v8 = vmax.f32 %v2086_v18, %v2087_v59  ;;  %v2317_v30 = vsel %vm2275_vm2, %v2042_v42, %v3466_v15 }
 0x31b   : > { %v2186_v51 = vmax.f32 %v2184_v4, %v2185_v22  ;;  %v2313_v3 = vsel %vm2281_vm5, %v2072_v44, %v2312_v47  ;;  %v2078_v11 = vmax.f32 %v2076_v32, %v2077_v45  ;;  %v2329_v20 = vsel %vm2285_vm7, %v2192_v57, %v3476_v33 }
 0x31c   : > { %v2198_v40 = vmax.f32 %v2196_v26, %v2197_v38  ;;  %v2314_v37 = vsel %vm2283_vm6, %v2084_v28, %v2313_v3  ;;  %v2089_v13 = vrot.slane %v2088_v8, 1  ;;  %v2318_v43 = vsel %vm2277_vm3, %v2054_v49, %v2317_v30 }
 0x31d   : > { %v2330_v62 = vsel %vm2287_vm8, %v2204_v48, %v2329_v20  ;;  %v2210_v0 = vmax.f32 %v2208_v35, %v2209_v24  ;;  %v2315_v15 = vsel %vm2285_vm7, %v3388_v39, %v2314_v37  ;;  %v2334_v4 = vsel %vm2281_vm5, %v3469_v10, %v3463_v16 }
 0x31e   : > { %v2319_v33 = vsel %vm2279_vm4, %v2066_v36, %v2318_v43  ;;  %v2316_v17 = vsel %vm2287_vm8, %v3396_v21, %v2315_v15  ;;  %v2090_v60 = vmax.f32 %v2088_v8, %v2089_v13  ;;  %v2102_v56 = vmax.f32 %v3384_v53, %v2101_v41 }
 0x31f   : > { %v2335_v50 = vsel %vm2283_vm6, %v2186_v51, %v2334_v4  ;;  %v2320_v39 = vsel %vm2281_vm5, %v2078_v11, %v2319_v33  ;;  %v2350_v63 = vmax.f32 %v3359_v7, %v2316_v17  ;;  %v2114_v16 = vmax.f32 %v3439_v58, %v2113_v12 }
 0x320   : > { %v2336_v10 = vsel %vm2285_vm7, %v2198_v40, %v2335_v50  ;;  %v2352_v21 = vmax.f32 %v2330_v62, 0.0  ;;  %v2321_v6 = vsel %vm2283_vm6, %v2090_v60, %v2320_v39 }
 0x321   : > { %v2337_v23 = vsel %vm2287_vm8, %v2210_v0, %v2336_v10  ;;  %2358 = vst [vmem:[%s3302_s13 + $0x20] sm:$0xff] %v2350_v63  ;;  %v2322_v53 = vsel %vm2285_vm7, %v2102_v56, %v2321_v6 }
 0x322   : > { %2360 = vst [vmem:[%s3302_s13 + $0x30] sm:$0xff] %v2352_v21  ;;  %v2323_v41 = vsel %vm2287_vm8, %v2114_v16, %v2322_v53  ;;  %v2353_v7 = vmax.f32 %v2337_v23, 0.0 }
 0x323   : > { %v2351_v19 = vmax.f32 %v3367_v46, %v2323_v41 }
 0x324   : > { %2361 = vst [vmem:[%s3302_s13 + $0x38] sm:$0xff] %v2353_v7 }
 0x325   : > { %2359 = vst [vmem:[%s3302_s13 + $0x28] sm:$0xff] %v2351_v19 }
 0x326 PF: > { %s19_s11 = sadd.s32 1, %s2876_s11   ;;  %s3536_s30 = smov %s2872_s10 }
 0x327   : > { %p16_p6 = scmp.ge.s32.totalorder %s19_s11, 4   ;;  %s3537_s10 = smov %s3539_s12 }
 0x329   :  { %18 = sbr.rel (!%p16_p6) target bundleno = 2 (0x2), region = 93 }

// kernel: _lambda_.8
= control target key start
LH: loop header
LB: loop body
LE: loop exit
PB: predicated region body
PF: predicated region fallthrough
CT: control target
= control target key end

     0   :  { %s2200_s30 = smov 0   ;;  %s2202_s10 = smov 0   ;;  %s2546_s0 = inlined_call_operand.vmem [shape: bf16[32,8,8], index: 0, kind: input, shape index: {}]   ;;  %s2547_s1 = inlined_call_operand.vmem [shape: bf16[32,8,256], index: 1, kind: input, shape index: {}]   ;;  %s2548_s2 = inlined_call_operand.vmem [shape: bf16[8,128], index: 2, kind: input, shape index: {}]   ;;  %s2549_s3 = inlined_call_operand.vmem [shape: bf16[256,128], index: 3, kind: input, shape index: {}]   ;;  %s2550_s4 = inlined_call_operand.vmem [shape: f32[1,128], index: 4, kind: input, shape index: {}]   ;;  %s2551_s5 = inlined_call_operand.vmem [shape: bf16[128,128], index: 5, kind: input, shape index: {}]   ;;  %s2552_s6 = inlined_call_operand.vmem [shape: f32[1,128], index: 6, kind: input, shape index: {}]   ;;  %s2553_s7 = inlined_call_operand.vmem [shape: bf16[128,256], index: 7, kind: input, shape index: {}]   ;;  %s2554_s8 = inlined_call_operand.vmem [shape: f32[1,256], index: 8, kind: input, shape index: {}]   ;;  %s2555_s9 = inlined_call_operand.vmem [shape: f32[32,256], index: 9, kind: output, shape index: {}]  }
   0x1   :  { %s2204_s11 = smov 0  }
   0x2 LB: > { %s31_s12 = sadd.s32 1, %s2142_s10  ;;  %p1775_p0 = scmp.ge.s32.totalorder %s2146_s11, 1  ;;  %s2146_s11 = sphi %s2204_s11, %s19_s11   ;;  %s2142_s10 = sphi %s2202_s10, %s2557_s10   ;;  %s2138_s30 = sphi %s2200_s30, %s2556_s30  }
   0x3   : > { %p33_p1 = scmp.ge.s32.totalorder %s31_s12, 2  ;;  %p323_p2 = scmp.lt.s32.totalorder %s2146_s11, 3 }
   0x5   : > { %s2559_s12 = smov (%p33_p1, %s31_s12), 0  ;;  %p324_p3 = pnand %p1775_p0, %p323_p2 }
   0x6   : > { %s1776_s17 = sshll.u32 (!%p324_p3), %s2138_s30, 4  ;;  %s1781_s25 = sshll.u32 (!%p324_p3), %s2138_s30, 1 }
   0x7   : > { %327 = sbr.rel (%p324_p3) target bundleno = 744 (0x2e8), region = 56  ;;  %p374_p4 = scmp.lt.s32.totalorder (!%p324_p3), %s1776_s17, 31 }
   0x8   : > { %p394_p5 = scmp.lt.s32.totalorder (!%p324_p3), %s1781_s25, 3 }
   0xc   : > { %v2044_v0 = vld [vmem:[%s2549_s3 + $0x78] sm:$0xff]   ;;  %v2046_v2 = vld [vmem:[%s2549_s3 + $0x70] sm:$0xff]   ;;  %v2048_v4 = vld [vmem:[%s2549_s3 + $0x68] sm:$0xff]   ;;  %s2561_s17 = smov (!%p374_p4, %s1776_s17), 31  ;;  %vm812_vm0 = vcmask 1043456   ;;  %vm787_vm1 = vcmask 64512  }
   0xd   : > { %v2045_v1 = vld [vmem:[%s2549_s3 + $0x38] sm:$0xff]   ;;  %1862 = vmatprep.subr.bf16.mxu0 %v2044_v0  ;;  %v2047_v3 = vld [vmem:[%s2549_s3 + $0x30] sm:$0xff]   ;;  %v2049_v5 = vld [vmem:[%s2549_s3 + $0x28] sm:$0xff]   ;;  %s1860_s28 = sshll.u32 %s2561_s17, 3  ;;  %s1777_s14 = sshll.u32 %s2561_s17, 2  ;;  %vm1633_vm2 = vcmask 1041409  }
   0xe   : > { %1863 = vmatpush3.bf16.msra.mxu0 %v2045_v1  ;;  %v2050_v6 = vld [vmem:[%s2549_s3 + $0x60] sm:$0xff]   ;;  %v2052_v8 = vld [vmem:[%s2549_s3 + $0x58] sm:$0xff]   ;;  %s2254_s22 = scalar_lea.vmem %s2547_s1, %s1860_s28  ;;  %s2259_s17 = scalar_lea.vmem %s2546_s0, %s1777_s14  ;;  %v2054_v10 = vld [vmem:[%s2549_s3 + $0x50] sm:$0xff]   ;;  %vm1635_vm3 = vcmask 1042434   ;;  %vm1637_vm4 = vcmask 1043459   ;;  %vm1639_vm5 = vcmask 1044484  }
   0xf   : > { %1864 = vmatprep.subr.bf16.mxu0 %v2046_v2  ;;  %v2051_v7 = vld [vmem:[%s2549_s3 + $0x20] sm:$0xff]   ;;  %v2053_v9 = vld [vmem:[%s2549_s3 + $0x18] sm:$0xff]   ;;  %v2055_v12 = vld [vmem:[%s2549_s3 + $0x10] sm:$0xff]   ;;  %s2563_s25 = smov (!%p394_p5, %s1781_s25), 3  ;;  %vm1641_vm6 = vcmask 1045509   ;;  %vm1643_vm7 = vcmask 1046534  }
  0x10   : > { %v425_v11 = vld [vmem:[%s2548_s2] sm:$0xf]  ;;  %v2062_v13 = vld [vmem:[%s2254_s22 + $0x4] ss:$8 sps:$4 sm:$0xff]   ;;  %v2071_v19 = vld [vmem:[%s2259_s17 + $0x10] sm:$0xff]   ;;  %s1861_s26 = sshll.u32 %s2563_s25, 4 }
  0x11   : > { %2017 = vmatprep.subr.msk.bf16.mxu1 %vm812_vm0, %v425_v11  ;;  %v814_v14 = vsel %vm812_vm0, %v425_v11, 0  ;;  %v2063_v15 = vld [vmem:[%s2259_s17] sm:$0xff]   ;;  %682 = vmatprep.mubr.bf16.mxu0 %v2062_v13  ;;  %v2064_v16 = vld [vmem:[%s2259_s17 + $0x8] sm:$0xff]   ;;  %v2072_v21 = vld [vmem:[%s2259_s17 + $0x18] sm:$0xff]   ;;  %s2458_s29 = scalar_lea.vmem %s2555_s9, %s1861_s26  ;;  %vm1645_vm8 = vcmask 1047559  }
  0x12   : > { %1865 = vmatpush3.bf16.msra.mxu0 %v2047_v3  ;;  %1952 = vmatpush3.bf16.msra.mxu1 %v814_v14  ;;  %v2056_v17 = vld [vmem:[%s2549_s3 + $0x48] sm:$0xff]   ;;  %v2058_v20 = vld [vmem:[%s2549_s3 + $0x40] sm:$0xff]   ;;  %v2065_v25 = vld [vmem:[%s2254_s22 + $0x14] ss:$8 sps:$4 sm:$0xff]  }
  0x13   : > { %1866 = vmatprep.subr.bf16.mxu0 %v2048_v4  ;;  %1953 = vmatprep.mubr.msk.bf16.mxu1 %vm787_vm1, %v2063_v15  ;;  %v2057_v18 = vld [vmem:[%s2549_s3 + $0x8] sm:$0xff]   ;;  %v2059_v22 = vld [vmem:[%s2549_s3] sm:$0xff]   ;;  %v2087_v27 = vld [vmem:[%s2259_s17 + $0x30] sm:$0xff]  }
  0x14   : > { %v2079_v23 = vld [vmem:[%s2259_s17 + $0x20] sm:$0xff]   ;;  %v2080_v26 = vld [vmem:[%s2259_s17 + $0x28] sm:$0xff]   ;;  %v2092_v28 = vld [vmem:[%s2551_s5 + $0x38] sm:$0xff]  }
  0x15   : > { %1954 = vmatmul.mubr.msk.bf16.vlgmr.msra.gmra.mxu1 %vm787_vm1, %v2064_v16  ;;  %v2060_v24 = vld [vmem:[%s2254_s22] ss:$8 sps:$4 sm:$0xff]   ;;  %v2067_v29 = vld [vmem:[%s2254_s22 + $0x10] ss:$8 sps:$4 sm:$0xff]   ;;  %v2068_v31 = vld [vmem:[%s2254_s22 + $0x24] ss:$8 sps:$4 sm:$0xff]   ;;  %1969 = vmatprep.subr.bf16.mxu1 %v2092_v28 }
  0x16   : > { %1867 = vmatpush3.bf16.msra.mxu0 %v2049_v5  ;;  %1957 = vmatprep.mubr.msk.bf16.mxu1 %vm787_vm1, %v2071_v19  ;;  %v2093_v30 = vld [vmem:[%s2551_s5 + $0x30] sm:$0xff]   ;;  %v2088_v32 = vld [vmem:[%s2259_s17 + $0x38] sm:$0xff]   ;;  %v2070_v33 = vld [vmem:[%s2254_s22 + $0x20] ss:$8 sps:$4 sm:$0xff]  }
  0x17   : > { %1868 = vmatprep.subr.bf16.mxu0 %v2050_v6  ;;  %1970 = vmatpush3.bf16.msra.mxu1 %v2092_v28  ;;  %v2073_v34 = vld [vmem:[%s2254_s22 + $0x34] ss:$8 sps:$4 sm:$0xff]   ;;  %v2075_v35 = vld [vmem:[%s2254_s22 + $0x30] ss:$8 sps:$4 sm:$0xff]   ;;  %v2076_v36 = vld [vmem:[%s2254_s22 + $0x44] ss:$8 sps:$4 sm:$0xff]  }
  0x18   : > { %1971 = vmatprep.subr.bf16.mxu1 %v2093_v30  ;;  %v2078_v37 = vld [vmem:[%s2254_s22 + $0x40] ss:$8 sps:$4 sm:$0xff]   ;;  %v2081_v38 = vld [vmem:[%s2254_s22 + $0x54] ss:$8 sps:$4 sm:$0xff]   ;;  %v2083_v39 = vld [vmem:[%s2254_s22 + $0x50] ss:$8 sps:$4 sm:$0xff]  }
  0x19   : > { %v2084_v40 = vld [vmem:[%s2254_s22 + $0x64] ss:$8 sps:$4 sm:$0xff]   ;;  %v2086_v41 = vld [vmem:[%s2254_s22 + $0x60] ss:$8 sps:$4 sm:$0xff]   ;;  %v2089_v42 = vld [vmem:[%s2254_s22 + $0x74] ss:$8 sps:$4 sm:$0xff]  }
  0x1a   : > { %1869 = vmatpush3.bf16.msra.mxu0 %v2051_v7  ;;  %v2091_v43 = vld [vmem:[%s2254_s22 + $0x70] ss:$8 sps:$4 sm:$0xff]   ;;  %v2094_v44 = vld [vmem:[%s2551_s5 + $0x28] sm:$0xff]   ;;  %v2095_v45 = vld [vmem:[%s2551_s5 + $0x20] sm:$0xff]  }
  0x1b   : > { %1870 = vmatprep.subr.bf16.mxu0 %v2052_v8  ;;  %1972 = vmatpush3.bf16.msra.mxu1 %v2093_v30  ;;  %v2096_v46 = vld [vmem:[%s2551_s5 + $0x18] sm:$0xff]   ;;  %v2097_v47 = vld [vmem:[%s2551_s5 + $0x10] sm:$0xff]   ;;  %v2098_v48 = vld [vmem:[%s2551_s5 + $0x8] sm:$0xff]  }
  0x1c   : > { %1973 = vmatprep.subr.bf16.mxu1 %v2094_v44  ;;  %v2099_v49 = vld [vmem:[%s2551_s5] sm:$0xff]   ;;  %v2341_v50 = vld [vmem:[%s2553_s7 + $0x70] ss:$8 sps:$4 sm:$0xff]   ;;  %v2102_v51 = vld [vmem:[%s2553_s7 + $0x74] ss:$8 sps:$4 sm:$0xff]  }
  0x1d   : > { %1958 = vmatmul.mubr.msk.bf16.gmra.mxu1 %vm787_vm1, %v2072_v21  ;;  %v2349_v52 = vld [vmem:[%s2553_s7 + $0x64] ss:$8 sps:$4 sm:$0xff]   ;;  %v2355_v53 = vld [vmem:[%s2553_s7 + $0x60] ss:$8 sps:$4 sm:$0xff]   ;;  %v2361_v54 = vld [vmem:[%s2553_s7 + $0x54] ss:$8 sps:$4 sm:$0xff]  }
  0x1e   : > { %1871 = vmatpush3.bf16.msra.mxu0 %v2053_v9  ;;  %1961 = vmatprep.mubr.msk.bf16.mxu1 %vm787_vm1, %v2079_v23  ;;  %v2367_v55 = vld [vmem:[%s2553_s7 + $0x50] ss:$8 sps:$4 sm:$0xff]   ;;  %v2373_v56 = vld [vmem:[%s2553_s7 + $0x44] ss:$8 sps:$4 sm:$0xff]   ;;  %v2379_v57 = vld [vmem:[%s2553_s7 + $0x40] ss:$8 sps:$4 sm:$0xff]  }
  0x1f   : > { %1872 = vmatprep.subr.bf16.mxu0 %v2054_v10  ;;  %1974 = vmatpush3.bf16.msra.mxu1 %v2094_v44  ;;  %v2385_v58 = vld [vmem:[%s2553_s7 + $0x34] ss:$8 sps:$4 sm:$0xff]   ;;  %v2391_v59 = vld [vmem:[%s2553_s7 + $0x30] ss:$8 sps:$4 sm:$0xff]   ;;  %v2398_v4 = vld [vmem:[%s2550_s4] ss:$0 sm:$0xff] }
  0x20   : > { %1975 = vmatprep.subr.bf16.mxu1 %v2095_v45 }
  0x22   : > { %1873 = vmatpush3.bf16.msra.mxu0 %v2055_v12 }
  0x23   : > { %1874 = vmatprep.subr.bf16.mxu0 %v2056_v17  ;;  %1976 = vmatpush3.bf16.msra.mxu1 %v2095_v45 }
  0x24   : > { %1977 = vmatprep.subr.bf16.mxu1 %v2096_v46 }
  0x25   : > { %1962 = vmatmul.mubr.msk.bf16.gmra.mxu1 %vm787_vm1, %v2080_v26 }
  0x26   : > { %1875 = vmatpush3.bf16.msra.mxu0 %v2057_v18  ;;  %1965 = vmatprep.mubr.msk.bf16.mxu1 %vm787_vm1, %v2087_v27 }
  0x27   : > { %1876 = vmatprep.subr.bf16.mxu0 %v2058_v20  ;;  %1978 = vmatpush3.bf16.msra.mxu1 %v2096_v46 }
  0x28   : > { %1979 = vmatprep.subr.bf16.mxu1 %v2097_v47 }
  0x2a   : > { %1877 = vmatpush3.bf16.msra.mxu0 %v2059_v22 }
  0x2b   : > { %1980 = vmatpush3.bf16.msra.mxu1 %v2097_v47  ;;  %1260 = vmatprep.subr.bf16.mxu0 %v2102_v51 }
  0x2c   : > { %1981 = vmatprep.subr.bf16.mxu1 %v2098_v48 }
  0x2d   : > { %683 = vmatmul.mubr.bf16.vlgmr.msra.gmra.mxu0 %v2060_v24  ;;  %1966 = vmatmul.mubr.msk.bf16.gmra.mxu1 %vm787_vm1, %v2088_v32 }
  0x2e   : > { %690 = vmatprep.mubr.bf16.mxu0 %v2065_v25  ;;  %1261 = vmatpush1.bf16.msra.mxu0 %v2341_v50 }
  0x2f   : > { %1982 = vmatpush3.bf16.msra.mxu1 %v2098_v48  ;;  %1262 = vmatprep.subr.bf16.mxu0 %v2349_v52 }
  0x30   : > { %1983 = vmatprep.subr.bf16.mxu1 %v2099_v49 }
  0x32   : > { %1263 = vmatpush1.bf16.msra.mxu0 %v2355_v53 }
  0x33   : > { %1984 = vmatpush3.bf16.msra.mxu1 %v2099_v49  ;;  %1264 = vmatprep.subr.bf16.mxu0 %v2361_v54 }
  0x34   : > { %2001 = vmatprep.subr.bf16.mxu1 %v2102_v51 }
  0x35   : > { %691 = vmatmul.mubr.bf16.gmra.mxu0 %v2067_v29 }
  0x36   : > { %698 = vmatprep.mubr.bf16.mxu0 %v2068_v31  ;;  %1265 = vmatpush1.bf16.msra.mxu0 %v2367_v55 }
  0x37   : > { %1266 = vmatprep.subr.bf16.mxu0 %v2373_v56 }
  0x3a   : > { %1267 = vmatpush1.bf16.msra.mxu0 %v2379_v57 }
  0x3b   : > { %1268 = vmatprep.subr.bf16.mxu0 %v2385_v58 }
  0x3d   : > { %699 = vmatmul.mubr.bf16.gmra.mxu0 %v2070_v33 }
  0x3e   : > { %706 = vmatprep.mubr.bf16.mxu0 %v2073_v34  ;;  %1269 = vmatpush1.bf16.msra.mxu0 %v2391_v59 }
  0x45   : > { %707 = vmatmul.mubr.bf16.gmra.mxu0 %v2075_v35 }
  0x46   : > { %714 = vmatprep.mubr.bf16.mxu0 %v2076_v36 }
  0x4d   : > { %715 = vmatmul.mubr.bf16.gmra.mxu0 %v2078_v37 }
  0x4e   : > { %722 = vmatprep.mubr.bf16.mxu0 %v2081_v38 }
  0x55   : > { %723 = vmatmul.mubr.bf16.gmra.mxu0 %v2083_v39 }
  0x56   : > { %730 = vmatprep.mubr.bf16.mxu0 %v2084_v40 }
  0x5d   : > { %731 = vmatmul.mubr.bf16.gmra.mxu0 %v2086_v41 }
  0x5e   : > { %738 = vmatprep.mubr.bf16.mxu0 %v2089_v42 }
  0x65   : > { %739 = vmatmul.mubr.bf16.gmra.mxu0 %v2091_v43 }
  0xd5   : > { %v1955_v60 = vpop.f32.mrf.mxu1 }
  0xd7   : > { %v850_v61 = vpop.f32.mrf.mxu1 }
  0xd9   : > { %v1956_v0 = vpop.f32.mrf.mxu1 }
  0xdb   : > { %v853_v6 = vpop.f32.mrf.mxu1 }
  0xdd   : > { %v1959_v12 = vpop.f32.mrf.mxu1 }
  0xdf   : > { %v866_v20 = vpop.f32.mrf.mxu1 }
  0xe1   : > { %v1960_v27 = vpop.f32.mrf.mxu1 }
  0xe3   : > { %v869_v35 = vpop.f32.mrf.mxu1 }
  0xe5   : > { %v1963_v42 = vpop.f32.mrf.mxu1 }
  0xe7   : > { %v882_v51 = vpop.f32.mrf.mxu1 }
  0xed   : > { %v1878_v62 = vpop.f32.mrf.mxu0 }
  0xef   : > { %v1879_v63 = vpop.f32.mrf.mxu0 }
  0xf0   : > { %v1880_v1 = vadd.f32 %v1879_v63, %v1878_v62 }
  0xf1   : > { %v1881_v2 = vpop.f32.mrf.mxu0 }
  0xf2   : > { %v851_v3 = vadd.f32 %v1880_v1, %v850_v61  ;;  %v1964_v1 = vpop.f32.mrf.mxu1 }
  0xf3   : > { %v1882_v5 = vpop.f32.mrf.mxu0 }
  0xf4   : > { %v1883_v7 = vadd.f32 %v1882_v5, %v1881_v2  ;;  %v920_v9 = vadd.f32 %v2398_v4, %v851_v3 }
  0xf5   : > { %v1884_v8 = vpop.f32.mrf.mxu0 }
  0xf6   : > { %v854_v10 = vadd.f32 %v1883_v7, %v853_v6  ;;  %v936_v16 = vmax.f32 %v920_v9, 0.0 }
  0xf7   : > { %v1885_v11 = vpop.f32.mrf.mxu0 }
  0xf8   : > { %v921_v13 = vadd.f32 %v2398_v4, %v854_v10  ;;  %v1886_v14 = vadd.f32 %v1885_v11, %v1884_v8 }
  0xf9   : > { %v1887_v15 = vpop.f32.mrf.mxu0 }
  0xfa   : > { %v937_v17 = vmax.f32 %v921_v13, 0.0  ;;  %v859_v18 = vadd.f32 %v1955_v60, %v1886_v14 }
  0xfb   : > { %v1888_v19 = vpop.f32.mrf.mxu0 }
  0xfc   : > { %v1889_v21 = vadd.f32 %v1888_v19, %v1887_v15  ;;  %v952_v22 = vpack.c.bf16 %v937_v17, %v936_v16  ;;  %v922_v24 = vadd.f32 %v2398_v4, %v859_v18 }
  0xfd   : > { %v1890_v23 = vpop.f32.mrf.mxu0 }
  0xfe   : > { %v862_v25 = vadd.f32 %v1956_v0, %v1889_v21  ;;  %1985 = vmatprep.mubr.bf16.mxu1 %v952_v22  ;;  %v938_v31 = vmax.f32 %v922_v24, 0.0 }
  0xff   : > { %v1891_v26 = vpop.f32.mrf.mxu0 }
 0x100   : > { %v923_v28 = vadd.f32 %v2398_v4, %v862_v25  ;;  %v1892_v29 = vadd.f32 %v1891_v26, %v1890_v23 }
 0x101   : > { %v1893_v30 = vpop.f32.mrf.mxu0 }
 0x102   : > { %v939_v32 = vmax.f32 %v923_v28, 0.0  ;;  %v867_v33 = vadd.f32 %v1892_v29, %v866_v20 }
 0x103   : > { %v1894_v34 = vpop.f32.mrf.mxu0 }
 0x104   : > { %v953_v36 = vpack.c.bf16 %v939_v32, %v938_v31  ;;  %v1895_v37 = vadd.f32 %v1894_v34, %v1893_v30  ;;  %v924_v39 = vadd.f32 %v2398_v4, %v867_v33 }
 0x105   : > { %v1896_v38 = vpop.f32.mrf.mxu0 }
 0x106   : > { %v870_v40 = vadd.f32 %v1895_v37, %v869_v35  ;;  %1986 = vmatmul.mubr.bf16.vlgmr.msra.gmra.mxu1 %v953_v36  ;;  %v940_v46 = vmax.f32 %v924_v39, 0.0 }
 0x107   : > { %v1897_v41 = vpop.f32.mrf.mxu0  ;;  %2009 = vmatpush1.bf16.msra.mxu1 %v2341_v50 }
 0x108   : > { %v925_v43 = vadd.f32 %v2398_v4, %v870_v40  ;;  %v1898_v44 = vadd.f32 %v1897_v41, %v1896_v38  ;;  %2002 = vmatprep.subr.bf16.mxu1 %v2349_v52 }
 0x109   : > { %v1899_v45 = vpop.f32.mrf.mxu0 }
 0x10a   : > { %v941_v47 = vmax.f32 %v925_v43, 0.0  ;;  %v875_v48 = vadd.f32 %v1959_v12, %v1898_v44 }
 0x10b   : > { %v1900_v49 = vpop.f32.mrf.mxu0  ;;  %2010 = vmatpush1.bf16.msra.mxu1 %v2355_v53 }
 0x10c   : > { %v1901_v60 = vadd.f32 %v1900_v49, %v1899_v45  ;;  %v954_v61 = vpack.c.bf16 %v941_v47, %v940_v46  ;;  %2003 = vmatprep.subr.bf16.mxu1 %v2361_v54  ;;  %v926_v50 = vadd.f32 %v2398_v4, %v875_v48  ;;  %v885_v54 = vpop.f32.mrf.mxu1 }
 0x10d   : > { %v1902_v62 = vpop.f32.mrf.mxu0 }
 0x10e   : > { %v878_v63 = vadd.f32 %v1960_v27, %v1901_v60  ;;  %1989 = vmatprep.mubr.bf16.mxu1 %v954_v61  ;;  %v942_v53 = vmax.f32 %v926_v50, 0.0  ;;  %v1967_v13 = vpop.f32.mrf.mxu1  ;;  %v2117_v50 = vld [vmem:[%s2553_s7 + $0x24] ss:$8 sps:$4 sm:$0xff]  }
 0x10f   : > { %v1903_v0 = vpop.f32.mrf.mxu0  ;;  %2011 = vmatpush1.bf16.msra.mxu1 %v2367_v55  ;;  %1270 = vmatprep.subr.bf16.mxu0 %v2117_v50 }
 0x110   : > { %v927_v52 = vadd.f32 %v2398_v4, %v878_v63  ;;  %v1904_v2 = vadd.f32 %v1903_v0, %v1902_v62  ;;  %2004 = vmatprep.subr.bf16.mxu1 %v2373_v56  ;;  %v898_v19 = vpop.f32.mrf.mxu1  ;;  %v2115_v63 = vld [vmem:[%s2553_s7 + $0x20] ss:$8 sps:$4 sm:$0xff]   ;;  %v2118_v0 = vld [vmem:[%s2553_s7 + $0x10] ss:$8 sps:$4 sm:$0xff]  }
 0x111   : > { %v1905_v3 = vpop.f32.mrf.mxu0  ;;  %1271 = vmatpush1.bf16.msra.mxu0 %v2115_v63 }
 0x112   : > { %v943_v5 = vmax.f32 %v927_v52, 0.0  ;;  %v883_v6 = vadd.f32 %v1904_v2, %v882_v51  ;;  %v1968_v25 = vpop.f32.mrf.mxu1  ;;  %v2121_v52 = vld [vmem:[%s2553_s7] ss:$8 sps:$4 sm:$0xff]   ;;  %v2148_v2 = vmov 0  }
 0x113   : > { %v1906_v7 = vpop.f32.mrf.mxu0  ;;  %2012 = vmatpush1.bf16.msra.mxu1 %v2379_v57  ;;  %1292 = vmatprep.mubr.bf16.mxu0 %v2148_v2 }
 0x114   : > { %v1907_v8 = vadd.f32 %v1906_v7, %v1905_v3  ;;  %v955_v9 = vpack.c.bf16 %v943_v5, %v942_v53  ;;  %2005 = vmatprep.subr.bf16.mxu1 %v2385_v58  ;;  %v928_v55 = vadd.f32 %v2398_v4, %v883_v6  ;;  %v901_v32 = vpop.f32.mrf.mxu1  ;;  %v1833_v5 = vld [vmem:[%s2552_s6] ss:$0 sm:$0xff] }
 0x115   : > { %v1908_v10 = vpop.f32.mrf.mxu0 }
 0x116   : > { %v886_v11 = vadd.f32 %v1907_v8, %v885_v54  ;;  %1990 = vmatmul.mubr.bf16.gmra.mxu1 %v955_v9  ;;  %v944_v16 = vmax.f32 %v928_v55, 0.0 }
 0x117   : > { %v1909_v12 = vpop.f32.mrf.mxu0  ;;  %2013 = vmatpush1.bf16.msra.mxu1 %v2391_v59 }
 0x118   : > { %v929_v56 = vadd.f32 %v2398_v4, %v886_v11  ;;  %v1910_v14 = vadd.f32 %v1909_v12, %v1908_v10  ;;  %2006 = vmatprep.subr.bf16.mxu1 %v2117_v50  ;;  %v2149_v50 = vmov 0.0  }
 0x119   : > { %v1911_v15 = vpop.f32.mrf.mxu0  ;;  %405 = vst [vmem:[%s2458_s29] sm:$0xff] %v2149_v50  ;;  %406 = vst [vmem:[%s2458_s29 + $0x8] sm:$0xff] %v2149_v50 }
 0x11a   : > { %v945_v17 = vmax.f32 %v929_v56, 0.0  ;;  %v891_v57 = vadd.f32 %v1963_v42, %v1910_v14  ;;  %407 = vst [vmem:[%s2458_s29 + $0x10] sm:$0xff] %v2149_v50  ;;  %408 = vst [vmem:[%s2458_s29 + $0x18] sm:$0xff] %v2149_v50 }
 0x11b   : > { %v1912_v18 = vpop.f32.mrf.mxu0  ;;  %2014 = vmatpush1.bf16.msra.mxu1 %v2115_v63  ;;  %v1170_v63 = vlaneseq }
 0x11c   : > { %v1913_v20 = vadd.f32 %v1912_v18, %v1911_v15  ;;  %v956_v58 = vpack.c.bf16 %v945_v17, %v944_v16  ;;  %v930_v22 = vadd.f32 %v2398_v4, %v891_v57 }
 0x11d   : > { %v1914_v21 = vpop.f32.mrf.mxu0 }
 0x11e   : > { %v894_v23 = vadd.f32 %v1964_v1, %v1913_v20  ;;  %1993 = vmatprep.mubr.bf16.mxu1 %v956_v58  ;;  %v946_v28 = vmax.f32 %v930_v22, 0.0  ;;  %v2123_v1 = vld [vmem:[%s2553_s7 + $0x4] ss:$8 sps:$4 sm:$0xff]  }
 0x11f   : > { %v1915_v24 = vpop.f32.mrf.mxu0 }
 0x120   : > { %v931_v59 = vadd.f32 %v2398_v4, %v894_v23  ;;  %v1916_v26 = vadd.f32 %v1915_v24, %v1914_v21 }
 0x121   : > { %v1917_v27 = vpop.f32.mrf.mxu0 }
 0x122   : > { %v947_v29 = vmax.f32 %v931_v59, 0.0  ;;  %v899_v30 = vadd.f32 %v1916_v26, %v898_v19 }
 0x123   : > { %v1918_v31 = vpop.f32.mrf.mxu0 }
 0x124   : > { %v1919_v33 = vadd.f32 %v1918_v31, %v1917_v27  ;;  %v957_v34 = vpack.c.bf16 %v947_v29, %v946_v28  ;;  %v932_v36 = vadd.f32 %v2398_v4, %v899_v30 }
 0x125   : > { %v1920_v35 = vpop.f32.mrf.mxu0 }
 0x126   : > { %v902_v37 = vadd.f32 %v1919_v33, %v901_v32  ;;  %1994 = vmatmul.mubr.bf16.gmra.mxu1 %v957_v34  ;;  %v948_v42 = vmax.f32 %v932_v36, 0.0 }
 0x127   : > { %v1921_v38 = vpop.f32.mrf.mxu0 }
 0x128   : > { %v933_v39 = vadd.f32 %v2398_v4, %v902_v37  ;;  %v1922_v40 = vadd.f32 %v1921_v38, %v1920_v35 }
 0x129   : > { %v1923_v41 = vpop.f32.mrf.mxu0 }
 0x12a   : > { %v949_v43 = vmax.f32 %v933_v39, 0.0  ;;  %v907_v44 = vadd.f32 %v1967_v13, %v1922_v40 }
 0x12b   : > { %v1924_v45 = vpop.f32.mrf.mxu0 }
 0x12c   : > { %v1925_v46 = vadd.f32 %v1924_v45, %v1923_v41  ;;  %v958_v47 = vpack.c.bf16 %v949_v43, %v948_v42  ;;  %v934_v48 = vadd.f32 %v2398_v4, %v907_v44 }
 0x12e   : > { %v910_v49 = vadd.f32 %v1968_v25, %v1925_v46  ;;  %1997 = vmatprep.mubr.bf16.mxu1 %v958_v47  ;;  %v950_v60 = vmax.f32 %v934_v48, 0.0 }
 0x130   : > { %v935_v51 = vadd.f32 %v2398_v4, %v910_v49  ;;  %v2120_v4 = vld [vmem:[%s2553_s7 + $0x14] ss:$8 sps:$4 sm:$0xff]  }
 0x131   : > { %1272 = vmatprep.subr.bf16.mxu0 %v2120_v4  ;;  %2007 = vmatprep.subr.bf16.mxu1 %v2120_v4  ;;  %v1171_v4 = vshrl.u32 %v1170_v63, 7 }
 0x132   : > { %v951_v61 = vmax.f32 %v935_v51, 0.0  ;;  %1273 = vmatpush1.bf16.msra.mxu0 %v2118_v0  ;;  %2015 = vmatpush1.bf16.msra.mxu1 %v2118_v0 }
 0x133   : > { %1274 = vmatprep.subr.bf16.mxu0 %v2123_v1  ;;  %2008 = vmatprep.subr.bf16.mxu1 %v2123_v1  ;;  %v1172_v0 = vsub.s32 0, %v1171_v4  ;;  %v1168_v1 = vld [vmem:[%s2554_s8] sm:$0x3] }
 0x134   : > { %v959_v62 = vpack.c.bf16 %v951_v61, %v950_v60 }
 0x136   : > { %1998 = vmatmul.mubr.bf16.gmra.mxu1 %v959_v62  ;;  %1275 = vmatpush1.bf16.msra.mxu0 %v2121_v52 }
 0x137   : > { %2016 = vmatpush1.bf16.msra.mxu1 %v2121_v52  ;;  %1312 = vmatprep.mubr.bf16.mxu1 %v2148_v2  ;;  %v1176_v52 = vsub.s32 1, %v1171_v4 }
 0x1c6   : > { %v1987_v3 = vpop.f32.mrf.mxu1 }
 0x1c7   : > { %v1074_v12 = vadd.f32 %v1987_v3, %v1833_v5  ;;  %v2469_v3 = vrot.slane %v1168_v1, %v1176_v52 }
 0x1c8   : > { %v1065_v53 = vpop.f32.mrf.mxu1 }
 0x1c9   : > { %v1066_v7 = vadd.f32 %v1833_v5, %v1065_v53  ;;  %v1130_v14 = vmax.f32 %v1074_v12, 0.0 }
 0x1ca   : > { %v1988_v6 = vpop.f32.mrf.mxu1 }
 0x1cb   : > { %v1128_v9 = vmax.f32 %v1066_v7, 0.0  ;;  %v1077_v55 = vadd.f32 %v1988_v6, %v1833_v5 }
 0x1cc   : > { %v1068_v54 = vpop.f32.mrf.mxu1 }
 0x1cd   : > { %v1069_v8 = vadd.f32 %v1833_v5, %v1068_v54  ;;  %v1131_v13 = vmax.f32 %v1077_v55, 0.0 }
 0x1cf   : > { %v1129_v10 = vmax.f32 %v1069_v8, 0.0  ;;  %v1145_v16 = vpack.c.bf16 %v1131_v13, %v1130_v14 }
 0x1d1   : > { %v1144_v11 = vpack.c.bf16 %v1129_v10, %v1128_v9 }
 0x1d3   : > { %1293 = vmatmul.mubr.bf16.vlgmr.msra.gmra.mxu0 %v1144_v11 }
 0x1d4   : > { %1302 = vmatprep.mubr.bf16.mxu0 %v2148_v2 }
 0x1d6   : > { %v1991_v56 = vpop.f32.mrf.mxu1 }
 0x1d7   : > { %v1090_v23 = vadd.f32 %v1991_v56, %v1833_v5 }
 0x1d8   : > { %v1081_v15 = vpop.f32.mrf.mxu1 }
 0x1d9   : > { %v1082_v57 = vadd.f32 %v1833_v5, %v1081_v15  ;;  %v1134_v59 = vmax.f32 %v1090_v23, 0.0 }
 0x1da   : > { %v1992_v17 = vpop.f32.mrf.mxu1 }
 0x1db   : > { %1303 = vmatmul.mubr.bf16.gmra.mxu0 %v1145_v16  ;;  %v1132_v20 = vmax.f32 %v1082_v57, 0.0  ;;  %v1093_v21 = vadd.f32 %v1992_v17, %v1833_v5 }
 0x1dc   : > { %v1084_v18 = vpop.f32.mrf.mxu1 }
 0x1dd   : > { %v1085_v19 = vadd.f32 %v1833_v5, %v1084_v18  ;;  %v1135_v24 = vmax.f32 %v1093_v21, 0.0 }
 0x1df   : > { %v1133_v58 = vmax.f32 %v1085_v19, 0.0  ;;  %v1147_v27 = vpack.c.bf16 %v1135_v24, %v1134_v59 }
 0x1e1   : > { %v1146_v22 = vpack.c.bf16 %v1133_v58, %v1132_v20 }
 0x1e3   : > { %1313 = vmatmul.mubr.bf16.vlgmr.msra.gmra.mxu1 %v1146_v22 }
 0x1e4   : > { %1322 = vmatprep.mubr.bf16.mxu1 %v2148_v2 }
 0x1e6   : > { %v1995_v25 = vpop.f32.mrf.mxu1 }
 0x1e7   : > { %v1106_v36 = vadd.f32 %v1995_v25, %v1833_v5 }
 0x1e8   : > { %v1097_v26 = vpop.f32.mrf.mxu1 }
 0x1e9   : > { %v1098_v29 = vadd.f32 %v1833_v5, %v1097_v26  ;;  %v1138_v39 = vmax.f32 %v1106_v36, 0.0 }
 0x1ea   : > { %v1996_v28 = vpop.f32.mrf.mxu1 }
 0x1eb   : > { %1323 = vmatmul.mubr.bf16.gmra.mxu1 %v1147_v27  ;;  %v1136_v32 = vmax.f32 %v1098_v29, 0.0  ;;  %v1109_v34 = vadd.f32 %v1996_v28, %v1833_v5 }
 0x1ec   : > { %v1100_v30 = vpop.f32.mrf.mxu1  ;;  %1332 = vmatprep.mubr.bf16.mxu1 %v2148_v2 }
 0x1ed   : > { %v1101_v31 = vadd.f32 %v1833_v5, %v1100_v30  ;;  %v1139_v37 = vmax.f32 %v1109_v34, 0.0 }
 0x1ef   : > { %v1137_v33 = vmax.f32 %v1101_v31, 0.0  ;;  %v1149_v41 = vpack.c.bf16 %v1139_v37, %v1138_v39 }
 0x1f1   : > { %v1148_v35 = vpack.c.bf16 %v1137_v33, %v1136_v32 }
 0x1f3   : > { %1333 = vmatmul.mubr.bf16.gmra.mxu1 %v1148_v35 }
 0x1f4   : > { %1342 = vmatprep.mubr.bf16.mxu1 %v2148_v2 }
 0x1f6   : > { %v1999_v38 = vpop.f32.mrf.mxu1 }
 0x1f7   : > { %v1122_v51 = vadd.f32 %v1999_v38, %v1833_v5 }
 0x1f8   : > { %v1113_v40 = vpop.f32.mrf.mxu1 }
 0x1f9   : > { %v1114_v43 = vadd.f32 %v1833_v5, %v1113_v40  ;;  %v1142_v61 = vmax.f32 %v1122_v51, 0.0 }
 0x1fa   : > { %v2000_v42 = vpop.f32.mrf.mxu1 }
 0x1fb   : > { %1343 = vmatmul.mubr.bf16.gmra.mxu1 %v1149_v41  ;;  %v1140_v46 = vmax.f32 %v1114_v43, 0.0  ;;  %v1125_v48 = vadd.f32 %v2000_v42, %v1833_v5 }
 0x1fc   : > { %v1116_v44 = vpop.f32.mrf.mxu1  ;;  %1352 = vmatprep.mubr.bf16.mxu1 %v2148_v2 }
 0x1fd   : > { %v1117_v45 = vadd.f32 %v1833_v5, %v1116_v44  ;;  %v1143_v60 = vmax.f32 %v1125_v48, 0.0 }
 0x1ff   : > { %v1141_v47 = vmax.f32 %v1117_v45, 0.0  ;;  %v1151_v62 = vpack.c.bf16 %v1143_v60, %v1142_v61 }
 0x201   : > { %v1150_v49 = vpack.c.bf16 %v1141_v47, %v1140_v46 }
 0x203   : > { %1353 = vmatmul.mubr.bf16.gmra.mxu1 %v1150_v49 }
 0x204   : > { %1362 = vmatprep.mubr.bf16.mxu1 %v2148_v2  ;;  %v2467_v2 = vrot.slane %v1168_v1, %v1172_v0 }
 0x20b   : > { %1363 = vmatmul.mubr.bf16.gmra.mxu1 %v1151_v62 }
 0x293   : > { %v1294_v53 = vpop.f32.mrf.mxu0 }
 0x294   : > { %v1295_v5 = vadd.f32 %v1294_v53, %v2467_v2 }
 0x295   : > { %v1296_v6 = vpop.f32.mrf.mxu0 }
 0x296   : > { %v1373_v7 = vmax.f32 %v1295_v5, 0.0  ;;  %v1297_v54 = vadd.f32 %v1296_v6, %v2469_v3 }
 0x297   : > { %v1298_v8 = vpop.f32.mrf.mxu0 }
 0x298   : > { %v1409_v9 = vrot.slane %v1373_v7, 4  ;;  %v1374_v10 = vmax.f32 %v1297_v54, 0.0  ;;  %v1299_v55 = vadd.f32 %v1298_v8, %v2467_v2 }
 0x299   : > { %v1300_v11 = vpop.f32.mrf.mxu0 }
 0x29a   : > { %v1415_v12 = vrot.slane %v1374_v10, 4  ;;  %v1375_v13 = vmax.f32 %v1299_v55, 0.0  ;;  %v1301_v56 = vadd.f32 %v1300_v11, %v2469_v3  ;;  %v1410_v15 = vmax.f32 %v1373_v7, %v1409_v9 }
 0x29b   : > { %v1304_v14 = vpop.f32.mrf.mxu0 }
 0x29c   : > { %v1421_v16 = vrot.slane %v1375_v13, 4  ;;  %v1376_v17 = vmax.f32 %v1301_v56, 0.0  ;;  %v1305_v57 = vadd.f32 %v1304_v14, %v2467_v2  ;;  %v1416_v19 = vmax.f32 %v1374_v10, %v1415_v12 }
 0x29d   : > { %v1306_v18 = vpop.f32.mrf.mxu0  ;;  %v1411_v24 = vrot.slane %v1410_v15, 2 }
 0x29e   : > { %v1422_v20 = vmax.f32 %v1375_v13, %v1421_v16  ;;  %v1427_v58 = vrot.slane %v1376_v17, 4  ;;  %v1377_v21 = vmax.f32 %v1305_v57, 0.0  ;;  %v1307_v22 = vadd.f32 %v1306_v18, %v2469_v3 }
 0x29f   : > { %v1308_v23 = vpop.f32.mrf.mxu0  ;;  %v1417_v30 = vrot.slane %v1416_v19, 2  ;;  %v1412_v38 = vmax.f32 %v1410_v15, %v1411_v24 }
 0x2a0   : > { %v1423_v25 = vrot.slane %v1422_v20, 2  ;;  %v1428_v59 = vmax.f32 %v1376_v17, %v1427_v58  ;;  %v1433_v26 = vrot.slane %v1377_v21, 4  ;;  %v1378_v27 = vmax.f32 %v1307_v22, 0.0 }
 0x2a1   : > { %v1309_v28 = vadd.f32 %v1308_v23, %v2467_v2  ;;  %v1310_v29 = vpop.f32.mrf.mxu0  ;;  %v1418_v46 = vmax.f32 %v1416_v19, %v1417_v30  ;;  %v1413_v63 = vrot.slane %v1412_v38, 1 }
 0x2a2   : > { %v1424_v31 = vmax.f32 %v1422_v20, %v1423_v25  ;;  %v1429_v32 = vrot.slane %v1428_v59, 2  ;;  %v1434_v33 = vmax.f32 %v1377_v21, %v1433_v26  ;;  %v1439_v34 = vrot.slane %v1378_v27, 4 }
 0x2a3   : > { %v1379_v35 = vmax.f32 %v1309_v28, 0.0  ;;  %v1311_v36 = vadd.f32 %v1310_v29, %v2469_v3  ;;  %v1314_v37 = vpop.f32.mrf.mxu1  ;;  %v1419_v10 = vrot.slane %v1418_v46, 1  ;;  %v1414_v17 = vmax.f32 %v1412_v38, %v1413_v63 }
 0x2a4   : > { %v1430_v39 = vmax.f32 %v1428_v59, %v1429_v32  ;;  %v1315_v40 = vadd.f32 %v1314_v37, %v2467_v2  ;;  %v1435_v41 = vrot.slane %v1434_v33, 2  ;;  %v1440_v42 = vmax.f32 %v1378_v27, %v1439_v34 }
 0x2a5   : > { %v1445_v43 = vrot.slane %v1379_v35, 4  ;;  %v1380_v44 = vmax.f32 %v1311_v36, 0.0  ;;  %v1316_v45 = vpop.f32.mrf.mxu1  ;;  %v1425_v47 = vrot.slane %v1424_v31, 1  ;;  %v1420_v23 = vmax.f32 %v1418_v46, %v1419_v10 }
 0x2a6   : > { %v1381_v48 = vmax.f32 %v1315_v40, 0.0  ;;  %v1317_v49 = vadd.f32 %v1316_v45, %v2469_v3  ;;  %v1436_v51 = vmax.f32 %v1434_v33, %v1435_v41  ;;  %v1441_v60 = vrot.slane %v1440_v42, 2 }
 0x2a7   : > { %v1446_v61 = vmax.f32 %v1379_v35, %v1445_v43  ;;  %v1451_v62 = vrot.slane %v1380_v44, 4  ;;  %v1318_v50 = vpop.f32.mrf.mxu1  ;;  %v1431_v4 = vrot.slane %v1430_v39, 1  ;;  %v1426_v55 = vmax.f32 %v1424_v31, %v1425_v47 }
 0x2a8   : > { %v1457_v0 = vrot.slane %v1381_v48, 4  ;;  %v1382_v1 = vmax.f32 %v1317_v49, 0.0  ;;  %v1437_v52 = vrot.slane %v1436_v51, 1  ;;  %v1442_v53 = vmax.f32 %v1440_v42, %v1441_v60 }
 0x2a9   : > { %v1447_v5 = vrot.slane %v1446_v61, 2  ;;  %v1452_v6 = vmax.f32 %v1380_v44, %v1451_v62  ;;  %v1320_v7 = vpop.f32.mrf.mxu1  ;;  %v1319_v9 = vadd.f32 %v1318_v50, %v2467_v2  ;;  %v1432_v57 = vmax.f32 %v1430_v39, %v1431_v4 }
 0x2aa   : > { %v1458_v54 = vmax.f32 %v1381_v48, %v1457_v0  ;;  %v1463_v8 = vrot.slane %v1382_v1, 4  ;;  %v1443_v11 = vrot.slane %v1442_v53, 1  ;;  %v1321_v16 = vadd.f32 %v1320_v7, %v2469_v3 }
 0x2ab   : > { %v1453_v12 = vrot.slane %v1452_v6, 2  ;;  %v1324_v13 = vpop.f32.mrf.mxu1  ;;  %v1448_v56 = vmax.f32 %v1446_v61, %v1447_v5  ;;  %v1383_v15 = vmax.f32 %v1319_v9, 0.0  ;;  %v1438_v18 = vmax.f32 %v1436_v51, %v1437_v52 }
 0x2ac   : > { %v1464_v14 = vmax.f32 %v1382_v1, %v1463_v8  ;;  %v1459_v58 = vrot.slane %v1458_v54, 2  ;;  %v1384_v22 = vmax.f32 %v1321_v16, 0.0  ;;  %v1634_v24 = vsel %vm1633_vm2, %v1426_v55, %v1414_v17 }
 0x2ad   : > { %v1326_v19 = vpop.f32.mrf.mxu1  ;;  %v1454_v20 = vmax.f32 %v1452_v6, %v1453_v12  ;;  %v1469_v21 = vrot.slane %v1383_v15, 4  ;;  %v1444_v25 = vmax.f32 %v1442_v53, %v1443_v11  ;;  %v1325_v59 = vadd.f32 %v1324_v13, %v2467_v2 }
 0x2ae   : > { %v1449_v27 = vrot.slane %v1448_v56, 1  ;;  %v1465_v28 = vrot.slane %v1464_v14, 2  ;;  %v1475_v30 = vrot.slane %v1384_v22, 4  ;;  %v1647_v31 = vsel %vm1633_vm2, %v1432_v57, %v1420_v23 }
 0x2af   : > { %v1328_v26 = vpop.f32.mrf.mxu1  ;;  %v1470_v29 = vmax.f32 %v1383_v15, %v1469_v21  ;;  %v1636_v32 = vsel %vm1635_vm3, %v1438_v18, %v1634_v24  ;;  %v1385_v33 = vmax.f32 %v1325_v59, 0.0  ;;  %v1327_v34 = vadd.f32 %v1326_v19, %v2469_v3 }
 0x2b0   : > { %v1455_v36 = vrot.slane %v1454_v20, 1  ;;  %v1460_v37 = vmax.f32 %v1458_v54, %v1459_v58  ;;  %v1476_v39 = vmax.f32 %v1384_v22, %v1475_v30  ;;  %v1648_v40 = vsel %vm1635_vm3, %v1444_v25, %v1647_v31 }
 0x2b1   : > { %v1330_v35 = vpop.f32.mrf.mxu1  ;;  %v1471_v38 = vrot.slane %v1470_v29, 2  ;;  %v1481_v41 = vrot.slane %v1385_v33, 4  ;;  %v1386_v42 = vmax.f32 %v1327_v34, 0.0  ;;  %v1329_v43 = vadd.f32 %v1328_v26, %v2467_v2 }
 0x2b2   : > { %v1450_v45 = vmax.f32 %v1448_v56, %v1449_v27  ;;  %v1466_v46 = vmax.f32 %v1464_v14, %v1465_v28  ;;  %v1477_v48 = vrot.slane %v1476_v39, 2  ;;  %v1331_v61 = vadd.f32 %v1330_v35, %v2469_v3 }
 0x2b3   : > { %v1334_v44 = vpop.f32.mrf.mxu1  ;;  %v1472_v47 = vmax.f32 %v1470_v29, %v1471_v38  ;;  %v1482_v49 = vmax.f32 %v1385_v33, %v1481_v41  ;;  %v1487_v51 = vrot.slane %v1386_v42, 4  ;;  %v1387_v60 = vmax.f32 %v1329_v43, 0.0  ;;  %v1405_v41 = vld [vmem:[%s2458_s29] sm:$0xff] }
 0x2b4   : > { %v1456_v50 = vmax.f32 %v1454_v20, %v1455_v36  ;;  %v1461_v63 = vrot.slane %v1460_v37, 1  ;;  %v1478_v4 = vmax.f32 %v1476_v39, %v1477_v48  ;;  %v1335_v0 = vadd.f32 %v1334_v44, %v2467_v2 }
 0x2b5   : > { %v1336_v62 = vpop.f32.mrf.mxu1  ;;  %v1483_v1 = vrot.slane %v1482_v49, 2  ;;  %v1488_v52 = vmax.f32 %v1386_v42, %v1487_v51  ;;  %v1493_v53 = vrot.slane %v1387_v60, 4  ;;  %v1388_v5 = vmax.f32 %v1331_v61, 0.0  ;;  %v1406_v61 = vld [vmem:[%s2458_s29 + $0x8] sm:$0xff] }
 0x2b6   : > { %v1467_v7 = vrot.slane %v1466_v46, 1  ;;  %v1473_v54 = vrot.slane %v1472_v47, 1  ;;  %v1389_v8 = vmax.f32 %v1335_v0, 0.0  ;;  %v1337_v9 = vadd.f32 %v1336_v62, %v2469_v3 }
 0x2b7   : > { %v1338_v6 = vpop.f32.mrf.mxu1  ;;  %v1484_v10 = vmax.f32 %v1482_v49, %v1483_v1  ;;  %v1489_v55 = vrot.slane %v1488_v52, 2  ;;  %v1494_v11 = vmax.f32 %v1387_v60, %v1493_v53  ;;  %v1499_v12 = vrot.slane %v1388_v5, 4 }
 0x2b8   : > { %v1638_v56 = vsel %vm1637_vm4, %v1450_v45, %v1636_v32  ;;  %v1462_v14 = vmax.f32 %v1460_v37, %v1461_v63  ;;  %v1479_v15 = vrot.slane %v1478_v4, 1  ;;  %v1390_v16 = vmax.f32 %v1337_v9, 0.0 }
 0x2b9   : > { %v1340_v13 = vpop.f32.mrf.mxu1  ;;  %v1485_v17 = vrot.slane %v1484_v10, 1  ;;  %v1490_v57 = vmax.f32 %v1488_v52, %v1489_v55  ;;  %v1495_v18 = vrot.slane %v1494_v11, 2  ;;  %v1500_v19 = vmax.f32 %v1388_v5, %v1499_v12 }
 0x2ba   : > { %v1649_v58 = vsel %vm1637_vm4, %v1456_v50, %v1648_v40  ;;  %v1468_v21 = vmax.f32 %v1466_v46, %v1467_v7  ;;  %v1474_v22 = vmax.f32 %v1472_v47, %v1473_v54  ;;  %v1339_v23 = vadd.f32 %v1338_v6, %v2467_v2 }
 0x2bb   : > { %v1344_v20 = vpop.f32.mrf.mxu1  ;;  %v1491_v24 = vrot.slane %v1490_v57, 1  ;;  %v1496_v25 = vmax.f32 %v1494_v11, %v1495_v18  ;;  %v1501_v59 = vrot.slane %v1500_v19, 2  ;;  %v1505_v26 = vrot.slane %v1389_v8, 4 }
 0x2bc   : > { %v1480_v28 = vmax.f32 %v1478_v4, %v1479_v15  ;;  %v1486_v29 = vmax.f32 %v1484_v10, %v1485_v17  ;;  %v1391_v30 = vmax.f32 %v1339_v23, 0.0  ;;  %v1341_v31 = vadd.f32 %v1340_v13, %v2469_v3 }
 0x2bd   : > { %v1346_v27 = vpop.f32.mrf.mxu1  ;;  %v1640_v32 = vsel %vm1639_vm5, %v1462_v14, %v1638_v56  ;;  %v1497_v33 = vrot.slane %v1496_v25, 1  ;;  %v1502_v34 = vmax.f32 %v1500_v19, %v1501_v59  ;;  %v1511_v35 = vrot.slane %v1390_v16, 4 }
 0x2be   : > { %v1650_v37 = vsel %vm1639_vm5, %v1468_v21, %v1649_v58  ;;  %v1642_v38 = vsel %vm1641_vm6, %v1474_v22, %v1640_v32  ;;  %v1492_v39 = vmax.f32 %v1490_v57, %v1491_v24  ;;  %v1392_v40 = vmax.f32 %v1341_v31, 0.0 }
 0x2bf   : > { %v1348_v36 = vpop.f32.mrf.mxu1  ;;  %v1498_v42 = vmax.f32 %v1496_v25, %v1497_v33  ;;  %v1503_v43 = vrot.slane %v1502_v34, 1  ;;  %v1506_v44 = vmax.f32 %v1389_v8, %v1505_v26  ;;  %v1517_v45 = vrot.slane %v1391_v30, 4 }
 0x2c0   : > { %v1651_v47 = vsel %vm1641_vm6, %v1480_v28, %v1650_v37  ;;  %v1644_v48 = vsel %vm1643_vm7, %v1486_v29, %v1642_v38  ;;  %v1523_v49 = vrot.slane %v1392_v40, 4  ;;  %v1345_v51 = vadd.f32 %v1344_v20, %v2467_v2 }
 0x2c1   : > { %v1350_v46 = vpop.f32.mrf.mxu1  ;;  %v1646_v60 = vsel %vm1645_vm8, %v1498_v42, %v1644_v48  ;;  %v1504_v62 = vmax.f32 %v1502_v34, %v1503_v43  ;;  %v1512_v50 = vmax.f32 %v1390_v16, %v1511_v35  ;;  %v1347_v63 = vadd.f32 %v1346_v27, %v2469_v3 }
 0x2c2   : > { %v1652_v0 = vsel %vm1643_vm7, %v1492_v39, %v1651_v47  ;;  %v1672_v1 = vmax.f32 %v1405_v41, %v1646_v60  ;;  %v1507_v53 = vrot.slane %v1506_v44, 2  ;;  %v1518_v5 = vmax.f32 %v1391_v30, %v1517_v45 }
 0x2c3   : > { %v1354_v4 = vpop.f32.mrf.mxu1  ;;  %v1653_v52 = vsel %vm1645_vm8, %v1504_v62, %v1652_v0  ;;  %v1524_v54 = vmax.f32 %v1392_v40, %v1523_v49  ;;  %v1393_v8 = vmax.f32 %v1345_v51, 0.0  ;;  %v1349_v9 = vadd.f32 %v1348_v36, %v2467_v2 }
 0x2c4   : > { %v1673_v7 = vmax.f32 %v1406_v61, %v1653_v52  ;;  %1676 = vst [vmem:[%s2458_s29] sm:$0xff] %v1672_v1  ;;  %v1513_v10 = vrot.slane %v1512_v50, 2  ;;  %v1394_v55 = vmax.f32 %v1347_v63, 0.0  ;;  %v1351_v11 = vadd.f32 %v1350_v46, %v2469_v3 }
 0x2c5   : > { %v1356_v6 = vpop.f32.mrf.mxu1  ;;  %v1395_v13 = vmax.f32 %v1349_v9, 0.0  ;;  %v1355_v56 = vadd.f32 %v1354_v4, %v2467_v2  ;;  %v1508_v15 = vmax.f32 %v1506_v44, %v1507_v53  ;;  %v1519_v16 = vrot.slane %v1518_v5, 2 }
 0x2c6   : > { %v1357_v14 = vadd.f32 %v1356_v6, %v2469_v3  ;;  %1677 = vst [vmem:[%s2458_s29 + $0x8] sm:$0xff] %v1673_v7  ;;  %v1396_v17 = vmax.f32 %v1351_v11, 0.0  ;;  %v1525_v18 = vrot.slane %v1524_v54, 2  ;;  %v1529_v19 = vrot.slane %v1393_v8, 4 }
 0x2c7   : > { %v1358_v12 = vpop.f32.mrf.mxu1  ;;  %v1397_v20 = vmax.f32 %v1355_v56, 0.0  ;;  %v1514_v21 = vmax.f32 %v1512_v50, %v1513_v10  ;;  %v1535_v22 = vrot.slane %v1394_v55, 4  ;;  %v1541_v24 = vrot.slane %v1395_v13, 4 }
 0x2c8   : > { %v1398_v58 = vmax.f32 %v1357_v14, 0.0  ;;  %v1547_v25 = vrot.slane %v1396_v17, 4  ;;  %v1509_v26 = vrot.slane %v1508_v15, 1  ;;  %v1520_v27 = vmax.f32 %v1518_v5, %v1519_v16 }
 0x2c9   : > { %v1360_v57 = vpop.f32.mrf.mxu1  ;;  %v1553_v59 = vrot.slane %v1397_v20, 4  ;;  %v1526_v28 = vmax.f32 %v1524_v54, %v1525_v18  ;;  %v1530_v29 = vmax.f32 %v1393_v8, %v1529_v19  ;;  %v1359_v31 = vadd.f32 %v1358_v12, %v2467_v2 }
 0x2ca   : > { %v1559_v30 = vrot.slane %v1398_v58, 4  ;;  %v1515_v33 = vrot.slane %v1514_v21, 1  ;;  %v1536_v34 = vmax.f32 %v1394_v55, %v1535_v22  ;;  %v1542_v35 = vmax.f32 %v1395_v13, %v1541_v24 }
 0x2cb   : > { %v1364_v23 = vpop.f32.mrf.mxu1  ;;  %v1548_v36 = vmax.f32 %v1396_v17, %v1547_v25  ;;  %v1554_v37 = vmax.f32 %v1397_v20, %v1553_v59  ;;  %v1399_v38 = vmax.f32 %v1359_v31, 0.0  ;;  %v1510_v39 = vmax.f32 %v1508_v15, %v1509_v26 }
 0x2cc   : > { %v1521_v40 = vrot.slane %v1520_v27, 1  ;;  %v1361_v41 = vadd.f32 %v1360_v57, %v2469_v3  ;;  %v1527_v42 = vrot.slane %v1526_v28, 1  ;;  %v1531_v43 = vrot.slane %v1530_v29, 2 }
 0x2cd   : > { %v1366_v32 = vpop.f32.mrf.mxu1  ;;  %v1560_v44 = vmax.f32 %v1398_v58, %v1559_v30  ;;  %v1565_v45 = vrot.slane %v1399_v38, 4  ;;  %v1516_v47 = vmax.f32 %v1514_v21, %v1515_v33  ;;  %v1537_v48 = vrot.slane %v1536_v34, 2 }
 0x2ce   : > { %v1400_v49 = vmax.f32 %v1361_v41, 0.0  ;;  %v1365_v51 = vadd.f32 %v1364_v23, %v2467_v2  ;;  %v1543_v60 = vrot.slane %v1542_v35, 2  ;;  %v1549_v61 = vrot.slane %v1548_v36, 2 }
 0x2cf   : > { %v1368_v46 = vpop.f32.mrf.mxu1  ;;  %v1555_v62 = vrot.slane %v1554_v37, 2  ;;  %v1566_v50 = vmax.f32 %v1399_v38, %v1565_v45  ;;  %v1522_v63 = vmax.f32 %v1520_v27, %v1521_v40  ;;  %v1367_v1 = vadd.f32 %v1366_v32, %v2469_v3 }
 0x2d0   : > { %v1571_v4 = vrot.slane %v1400_v49, 4  ;;  %v1401_v0 = vmax.f32 %v1365_v51, 0.0  ;;  %v1528_v52 = vmax.f32 %v1526_v28, %v1527_v42  ;;  %v1532_v53 = vmax.f32 %v1530_v29, %v1531_v43 }
 0x2d1   : > { %v1561_v5 = vrot.slane %v1560_v44, 2  ;;  %v1567_v6 = vrot.slane %v1566_v50, 2  ;;  %v1370_v7 = vpop.f32.mrf.mxu1  ;;  %v1538_v54 = vmax.f32 %v1536_v34, %v1537_v48  ;;  %v1402_v10 = vmax.f32 %v1367_v1, 0.0 }
 0x2d2   : > { %v1572_v8 = vmax.f32 %v1400_v49, %v1571_v4  ;;  %v1577_v9 = vrot.slane %v1401_v0, 4  ;;  %v1544_v55 = vmax.f32 %v1542_v35, %v1543_v60  ;;  %v1550_v11 = vmax.f32 %v1548_v36, %v1549_v61 }
 0x2d3   : > { %v1556_v12 = vmax.f32 %v1554_v37, %v1555_v62  ;;  %v1369_v13 = vadd.f32 %v1368_v46, %v2467_v2  ;;  %v1583_v15 = vrot.slane %v1402_v10, 4  ;;  %v1371_v16 = vadd.f32 %v1370_v7, %v2469_v3 }
 0x2d4   : > { %v1573_v56 = vrot.slane %v1572_v8, 2  ;;  %v1578_v14 = vmax.f32 %v1401_v0, %v1577_v9  ;;  %v1533_v17 = vrot.slane %v1532_v53, 1  ;;  %v1562_v57 = vmax.f32 %v1560_v44, %v1561_v5 }
 0x2d5   : > { %v1568_v18 = vmax.f32 %v1566_v50, %v1567_v6  ;;  %v1403_v19 = vmax.f32 %v1369_v13, 0.0  ;;  %v1584_v21 = vmax.f32 %v1402_v10, %v1583_v15  ;;  %v1404_v22 = vmax.f32 %v1371_v16, 0.0 }
 0x2d6   : > { %v1574_v20 = vmax.f32 %v1572_v8, %v1573_v56  ;;  %v1579_v58 = vrot.slane %v1578_v14, 2  ;;  %v1539_v23 = vrot.slane %v1538_v54, 1  ;;  %v1545_v24 = vrot.slane %v1544_v55, 1 }
 0x2d7   : > { %v1551_v25 = vrot.slane %v1550_v11, 1  ;;  %v1589_v59 = vrot.slane %v1403_v19, 4  ;;  %v1557_v26 = vrot.slane %v1556_v12, 1  ;;  %v1585_v2 = vrot.slane %v1584_v21, 2 }
 0x2d8   : > { %v1580_v27 = vmax.f32 %v1578_v14, %v1579_v58  ;;  %v1595_v28 = vrot.slane %v1404_v22, 4  ;;  %v1534_v29 = vmax.f32 %v1532_v53, %v1533_v17  ;;  %v1563_v30 = vrot.slane %v1562_v57, 1 }
 0x2d9   : > { %v1569_v31 = vrot.slane %v1568_v18, 1  ;;  %v1590_v3 = vmax.f32 %v1403_v19, %v1589_v59  ;;  %v1575_v32 = vrot.slane %v1574_v20, 1  ;;  %v1586_v34 = vmax.f32 %v1584_v21, %v1585_v2 }
 0x2da   : > { %v1581_v33 = vrot.slane %v1580_v27, 1  ;;  %v1596_v35 = vmax.f32 %v1404_v22, %v1595_v28  ;;  %v1654_v36 = vsel %vm1633_vm2, %v1522_v63, %v1510_v39  ;;  %v1540_v37 = vmax.f32 %v1538_v54, %v1539_v23 }
 0x2db   : > { %v1546_v38 = vmax.f32 %v1544_v55, %v1545_v24  ;;  %v1591_v40 = vrot.slane %v1590_v3, 2  ;;  %v1552_v41 = vmax.f32 %v1550_v11, %v1551_v25  ;;  %v1558_v42 = vmax.f32 %v1556_v12, %v1557_v26 }
 0x2dc   : > { %v1587_v43 = vrot.slane %v1586_v34, 1  ;;  %v1597_v44 = vrot.slane %v1596_v35, 2  ;;  %v1661_v45 = vsel %vm1633_vm2, %v1528_v52, %v1516_v47  ;;  %v1564_v46 = vmax.f32 %v1562_v57, %v1563_v30 }
 0x2dd   : > { %v1570_v48 = vmax.f32 %v1568_v18, %v1569_v31  ;;  %v1592_v49 = vmax.f32 %v1590_v3, %v1591_v40  ;;  %v1655_v51 = vsel %vm1635_vm3, %v1534_v29, %v1654_v36  ;;  %v1576_v60 = vmax.f32 %v1574_v20, %v1575_v32 }
 0x2de   : > { %v1582_v61 = vmax.f32 %v1580_v27, %v1581_v33  ;;  %v1598_v62 = vmax.f32 %v1596_v35, %v1597_v44  ;;  %v1662_v50 = vsel %vm1635_vm3, %v1540_v37, %v1661_v45  ;;  %v1656_v39 = vsel %vm1637_vm4, %v1546_v38, %v1655_v51 }
 0x2df   : > { %v1588_v63 = vmax.f32 %v1586_v34, %v1587_v43  ;;  %v1593_v4 = vrot.slane %v1592_v49, 1  ;;  %v1663_v0 = vsel %vm1637_vm4, %v1552_v41, %v1662_v50  ;;  %v1657_v47 = vsel %vm1639_vm5, %v1558_v42, %v1656_v39 }
 0x2e0   : > { %v1599_v1 = vrot.slane %v1598_v62, 1  ;;  %v1664_v52 = vsel %vm1639_vm5, %v1564_v46, %v1663_v0  ;;  %v1658_v53 = vsel %vm1641_vm6, %v1570_v48, %v1657_v47 }
 0x2e1   : > { %v1594_v5 = vmax.f32 %v1592_v49, %v1593_v4  ;;  %v1665_v6 = vsel %vm1641_vm6, %v1576_v60, %v1664_v52  ;;  %v1659_v7 = vsel %vm1643_vm7, %v1582_v61, %v1658_v53 }
 0x2e2   : > { %v1600_v54 = vmax.f32 %v1598_v62, %v1599_v1  ;;  %v1666_v8 = vsel %vm1643_vm7, %v1588_v63, %v1665_v6 }
 0x2e3   : > { %v1660_v9 = vsel %vm1645_vm8, %v1594_v5, %v1659_v7 }
 0x2e4   : > { %v1674_v10 = vmax.f32 %v1660_v9, 0.0  ;;  %v1667_v55 = vsel %vm1645_vm8, %v1600_v54, %v1666_v8 }
 0x2e5   : > { %v1675_v11 = vmax.f32 %v1667_v55, 0.0 }
 0x2e6   : > { %1678 = vst [vmem:[%s2458_s29 + $0x10] sm:$0xff] %v1674_v10 }
 0x2e7   : > { %1679 = vst [vmem:[%s2458_s29 + $0x18] sm:$0xff] %v1675_v11 }
 0x2e8 PF: > { %s19_s11 = sadd.s32 1, %s2146_s11   ;;  %s2556_s30 = smov %s2142_s10 }
 0x2e9   : > { %p16_p6 = scmp.ge.s32.totalorder %s19_s11, 4   ;;  %s2557_s10 = smov %s2559_s12 }
 0x2eb   :  { %18 = sbr.rel (!%p16_p6) target bundleno = 2 (0x2), region = 93 }

// kernel: neg.12
= control target key start
LH: loop header
LB: loop body
LE: loop exit
PB: predicated region body
PF: predicated region fallthrough
CT: control target
= control target key end

     0   :  { %s40_s0 = inlined_call_operand.vmem [shape: f32[2,16,8], index: 0, kind: input, shape index: {}]   ;;  %s41_s1 = inlined_call_operand.vmem [shape: f32[2,16,8], index: 1, kind: output, shape index: {}]  }
   0x1   :  { %v2_v0 = vld [vmem:[%s40_s0] sm:$0xff]  ;;  %v16_v1 = vld [vmem:[%s40_s0 + $0x8] sm:$0xff] }
   0x2   :  { %v5_v2 = vxor.u32 2147483648, %v2_v0  ;;  %v12_v3 = vxor.u32 2147483648, %v16_v1 }
   0x4   :  { %7 = vst [vmem:[%s41_s1] sm:$0xff] %v5_v2  ;;  %17 = vst [vmem:[%s41_s1 + $0x8] sm:$0xff] %v12_v3 }

// kernel: _lambda_.9
= control target key start
LH: loop header
LB: loop body
LE: loop exit
PB: predicated region body
PF: predicated region fallthrough
CT: control target
= control target key end

     0   :  { %s1703_s30 = smov 0   ;;  %s1705_s10 = smov 0   ;;  %s1968_s0 = inlined_call_operand.vmem [shape: bf16[16,8,8], index: 0, kind: input, shape index: {}]   ;;  %s1969_s1 = inlined_call_operand.vmem [shape: bf16[16,8,256], index: 1, kind: input, shape index: {}]   ;;  %s1970_s2 = inlined_call_operand.vmem [shape: bf16[8,128], index: 2, kind: input, shape index: {}]   ;;  %s1971_s3 = inlined_call_operand.vmem [shape: bf16[256,128], index: 3, kind: input, shape index: {}]   ;;  %s1972_s4 = inlined_call_operand.vmem [shape: f32[1,128], index: 4, kind: input, shape index: {}]   ;;  %s1973_s5 = inlined_call_operand.vmem [shape: bf16[128,128], index: 5, kind: input, shape index: {}]   ;;  %s1974_s6 = inlined_call_operand.vmem [shape: f32[1,128], index: 6, kind: input, shape index: {}]   ;;  %s1975_s7 = inlined_call_operand.vmem [shape: bf16[128,256], index: 7, kind: input, shape index: {}]   ;;  %s1976_s8 = inlined_call_operand.vmem [shape: f32[1,256], index: 8, kind: input, shape index: {}]   ;;  %s1977_s9 = inlined_call_operand.vmem [shape: f32[16,256], index: 9, kind: output, shape index: {}]  }
   0x1   :  { %s1707_s11 = smov 0  }
   0x2 LB: > { %s31_s12 = sadd.s32 1, %s1646_s10  ;;  %p1360_p0 = scmp.ge.s32.totalorder %s1650_s11, 1  ;;  %s1650_s11 = sphi %s1707_s11, %s19_s11   ;;  %s1646_s10 = sphi %s1705_s10, %s1979_s10   ;;  %s1642_s30 = sphi %s1703_s30, %s1978_s30  }
   0x3   : > { %p33_p1 = scmp.ge.s32.totalorder %s31_s12, 2  ;;  %p323_p2 = scmp.lt.s32.totalorder %s1650_s11, 3 }
   0x5   : > { %s1981_s12 = smov (%p33_p1, %s31_s12), 0  ;;  %p324_p3 = pnand %p1360_p0, %p323_p2 }
   0x6   : > { %s1361_s17 = sshll.u32 (!%p324_p3), %s1642_s30, 3  ;;  %p392_p5 = scmp.lt.s32.totalorder (!%p324_p3), %s1642_s30, 1 }
   0x7   : > { %327 = sbr.rel (%p324_p3) target bundleno = 709 (0x2c5), region = 56  ;;  %p373_p4 = scmp.lt.s32.totalorder (!%p324_p3), %s1361_s17, 15 }
   0xc   : > { %v1564_v0 = vld [vmem:[%s1971_s3 + $0x78] sm:$0xff]   ;;  %v1566_v2 = vld [vmem:[%s1971_s3 + $0x70] sm:$0xff]   ;;  %v1568_v4 = vld [vmem:[%s1971_s3 + $0x68] sm:$0xff]   ;;  %s1983_s17 = smov (!%p373_p4, %s1361_s17), 15  ;;  %vm687_vm0 = vcmask 1043456   ;;  %vm674_vm1 = vcmask 64512  }
   0xd   : > { %v1565_v1 = vld [vmem:[%s1971_s3 + $0x38] sm:$0xff]   ;;  %1430 = vmatprep.subr.bf16.mxu0 %v1564_v0  ;;  %v1567_v3 = vld [vmem:[%s1971_s3 + $0x30] sm:$0xff]   ;;  %v1569_v5 = vld [vmem:[%s1971_s3 + $0x28] sm:$0xff]   ;;  %s1428_s28 = sshll.u32 %s1983_s17, 3  ;;  %s1362_s14 = sshll.u32 %s1983_s17, 2  ;;  %vm1242_vm2 = vcmask 1041409  }
   0xe   : > { %1431 = vmatpush3.bf16.msra.mxu0 %v1565_v1  ;;  %v1570_v6 = vld [vmem:[%s1971_s3 + $0x60] sm:$0xff]   ;;  %v1572_v8 = vld [vmem:[%s1971_s3 + $0x58] sm:$0xff]   ;;  %s1757_s22 = scalar_lea.vmem %s1969_s1, %s1428_s28  ;;  %s379_s17 = scalar_lea.vmem %s1968_s0, %s1362_s14  ;;  %v1574_v10 = vld [vmem:[%s1971_s3 + $0x50] sm:$0xff]   ;;  %vm1244_vm3 = vcmask 1042434   ;;  %vm1246_vm4 = vcmask 1043459   ;;  %vm1248_vm5 = vcmask 1044484  }
   0xf   : > { %1432 = vmatprep.subr.bf16.mxu0 %v1566_v2  ;;  %v1571_v7 = vld [vmem:[%s1971_s3 + $0x20] sm:$0xff]   ;;  %v1573_v9 = vld [vmem:[%s1971_s3 + $0x18] sm:$0xff]   ;;  %v1575_v12 = vld [vmem:[%s1971_s3 + $0x10] sm:$0xff]   ;;  %vm1250_vm6 = vcmask 1045509   ;;  %vm1252_vm7 = vcmask 1046534   ;;  %vm1254_vm8 = vcmask 1047559  }
  0x10   : > { %v412_v11 = vld [vmem:[%s1970_s2] sm:$0xf]  ;;  %v1582_v13 = vld [vmem:[%s1757_s22 + $0x4] ss:$8 sps:$4 sm:$0xff]   ;;  %v1591_v19 = vld [vmem:[%s379_s17 + $0x10] sm:$0xff]   ;;  %s1985_s30 = smov (!%p392_p5, %s1642_s30), 1 }
  0x11   : > { %1537 = vmatprep.subr.msk.bf16.mxu1 %vm687_vm0, %v412_v11  ;;  %v689_v14 = vsel %vm687_vm0, %v412_v11, 0  ;;  %v1583_v15 = vld [vmem:[%s379_s17] sm:$0xff]   ;;  %621 = vmatprep.mubr.bf16.mxu0 %v1582_v13  ;;  %v1584_v16 = vld [vmem:[%s379_s17 + $0x8] sm:$0xff]   ;;  %v1592_v22 = vld [vmem:[%s379_s17 + $0x18] sm:$0xff]   ;;  %s1429_s27 = sshll.u32 %s1985_s30, 4 }
  0x12   : > { %1433 = vmatpush3.bf16.msra.mxu0 %v1567_v3  ;;  %1488 = vmatpush3.bf16.msra.mxu1 %v689_v14  ;;  %v1576_v17 = vld [vmem:[%s1971_s3 + $0x48] sm:$0xff]   ;;  %v1578_v20 = vld [vmem:[%s1971_s3 + $0x40] sm:$0xff]   ;;  %v1596_v23 = vld [vmem:[%s1973_s5 + $0x38] sm:$0xff]   ;;  %s396_s13 = scalar_lea.vmem %s1977_s9, %s1429_s27 }
  0x13   : > { %1434 = vmatprep.subr.bf16.mxu0 %v1568_v4  ;;  %1489 = vmatprep.mubr.msk.bf16.mxu1 %vm674_vm1, %v1583_v15  ;;  %v1577_v18 = vld [vmem:[%s1971_s3 + $0x8] sm:$0xff]   ;;  %v1579_v21 = vld [vmem:[%s1971_s3] sm:$0xff]   ;;  %v1597_v24 = vld [vmem:[%s1973_s5 + $0x30] sm:$0xff]  }
  0x14   : > { %v1580_v25 = vld [vmem:[%s1757_s22] ss:$8 sps:$4 sm:$0xff]   ;;  %1497 = vmatprep.subr.bf16.mxu1 %v1596_v23  ;;  %v1585_v26 = vld [vmem:[%s1757_s22 + $0x14] ss:$8 sps:$4 sm:$0xff]   ;;  %v1587_v27 = vld [vmem:[%s1757_s22 + $0x10] ss:$8 sps:$4 sm:$0xff]  }
  0x15   : > { %1490 = vmatmul.mubr.msk.bf16.vlgmr.msra.gmra.mxu1 %vm674_vm1, %v1584_v16  ;;  %v1588_v28 = vld [vmem:[%s1757_s22 + $0x24] ss:$8 sps:$4 sm:$0xff]   ;;  %v1590_v29 = vld [vmem:[%s1757_s22 + $0x20] ss:$8 sps:$4 sm:$0xff]   ;;  %v1593_v30 = vld [vmem:[%s1757_s22 + $0x34] ss:$8 sps:$4 sm:$0xff]  }
  0x16   : > { %1435 = vmatpush3.bf16.msra.mxu0 %v1569_v5  ;;  %1493 = vmatprep.mubr.msk.bf16.mxu1 %vm674_vm1, %v1591_v19  ;;  %v1595_v31 = vld [vmem:[%s1757_s22 + $0x30] ss:$8 sps:$4 sm:$0xff]   ;;  %v1598_v32 = vld [vmem:[%s1973_s5 + $0x28] sm:$0xff]   ;;  %v1599_v33 = vld [vmem:[%s1973_s5 + $0x20] sm:$0xff]  }
  0x17   : > { %1436 = vmatprep.subr.bf16.mxu0 %v1570_v6  ;;  %1498 = vmatpush3.bf16.msra.mxu1 %v1596_v23  ;;  %v1600_v34 = vld [vmem:[%s1973_s5 + $0x18] sm:$0xff]   ;;  %v1601_v35 = vld [vmem:[%s1973_s5 + $0x10] sm:$0xff]   ;;  %v1602_v36 = vld [vmem:[%s1973_s5 + $0x8] sm:$0xff]  }
  0x18   : > { %1499 = vmatprep.subr.bf16.mxu1 %v1597_v24  ;;  %v1603_v37 = vld [vmem:[%s1973_s5] sm:$0xff]   ;;  %v1822_v38 = vld [vmem:[%s1975_s7 + $0x70] ss:$8 sps:$4 sm:$0xff]   ;;  %v1606_v39 = vld [vmem:[%s1975_s7 + $0x74] ss:$8 sps:$4 sm:$0xff]  }
  0x19   : > { %v1830_v40 = vld [vmem:[%s1975_s7 + $0x64] ss:$8 sps:$4 sm:$0xff]   ;;  %v1836_v41 = vld [vmem:[%s1975_s7 + $0x60] ss:$8 sps:$4 sm:$0xff]   ;;  %v1842_v42 = vld [vmem:[%s1975_s7 + $0x54] ss:$8 sps:$4 sm:$0xff]  }
  0x1a   : > { %1437 = vmatpush3.bf16.msra.mxu0 %v1571_v7  ;;  %v1848_v43 = vld [vmem:[%s1975_s7 + $0x50] ss:$8 sps:$4 sm:$0xff]   ;;  %v1854_v44 = vld [vmem:[%s1975_s7 + $0x44] ss:$8 sps:$4 sm:$0xff]   ;;  %v1860_v45 = vld [vmem:[%s1975_s7 + $0x40] ss:$8 sps:$4 sm:$0xff]  }
  0x1b   : > { %1438 = vmatprep.subr.bf16.mxu0 %v1572_v8  ;;  %1500 = vmatpush3.bf16.msra.mxu1 %v1597_v24  ;;  %v1866_v46 = vld [vmem:[%s1975_s7 + $0x34] ss:$8 sps:$4 sm:$0xff]   ;;  %v1872_v47 = vld [vmem:[%s1975_s7 + $0x30] ss:$8 sps:$4 sm:$0xff]   ;;  %v1400_v56 = vld [vmem:[%s1972_s4] ss:$0 sm:$0xff] }
  0x1c   : > { %1501 = vmatprep.subr.bf16.mxu1 %v1598_v32 }
  0x1d   : > { %1494 = vmatmul.mubr.msk.bf16.gmra.mxu1 %vm674_vm1, %v1592_v22 }
  0x1e   : > { %1439 = vmatpush3.bf16.msra.mxu0 %v1573_v9 }
  0x1f   : > { %1440 = vmatprep.subr.bf16.mxu0 %v1574_v10  ;;  %1502 = vmatpush3.bf16.msra.mxu1 %v1598_v32 }
  0x20   : > { %1503 = vmatprep.subr.bf16.mxu1 %v1599_v33 }
  0x22   : > { %1441 = vmatpush3.bf16.msra.mxu0 %v1575_v12 }
  0x23   : > { %1442 = vmatprep.subr.bf16.mxu0 %v1576_v17  ;;  %1504 = vmatpush3.bf16.msra.mxu1 %v1599_v33 }
  0x24   : > { %1505 = vmatprep.subr.bf16.mxu1 %v1600_v34 }
  0x26   : > { %1443 = vmatpush3.bf16.msra.mxu0 %v1577_v18 }
  0x27   : > { %1444 = vmatprep.subr.bf16.mxu0 %v1578_v20  ;;  %1506 = vmatpush3.bf16.msra.mxu1 %v1600_v34 }
  0x28   : > { %1507 = vmatprep.subr.bf16.mxu1 %v1601_v35 }
  0x2a   : > { %1445 = vmatpush3.bf16.msra.mxu0 %v1579_v21 }
  0x2b   : > { %1508 = vmatpush3.bf16.msra.mxu1 %v1601_v35  ;;  %1039 = vmatprep.subr.bf16.mxu0 %v1606_v39 }
  0x2c   : > { %1509 = vmatprep.subr.bf16.mxu1 %v1602_v36 }
  0x2d   : > { %622 = vmatmul.mubr.bf16.vlgmr.msra.gmra.mxu0 %v1580_v25 }
  0x2e   : > { %629 = vmatprep.mubr.bf16.mxu0 %v1585_v26  ;;  %1040 = vmatpush1.bf16.msra.mxu0 %v1822_v38 }
  0x2f   : > { %1510 = vmatpush3.bf16.msra.mxu1 %v1602_v36  ;;  %1041 = vmatprep.subr.bf16.mxu0 %v1830_v40 }
  0x30   : > { %1511 = vmatprep.subr.bf16.mxu1 %v1603_v37 }
  0x32   : > { %1042 = vmatpush1.bf16.msra.mxu0 %v1836_v41 }
  0x33   : > { %1512 = vmatpush3.bf16.msra.mxu1 %v1603_v37  ;;  %1043 = vmatprep.subr.bf16.mxu0 %v1842_v42 }
  0x34   : > { %1521 = vmatprep.subr.bf16.mxu1 %v1606_v39 }
  0x35   : > { %630 = vmatmul.mubr.bf16.gmra.mxu0 %v1587_v27 }
  0x36   : > { %637 = vmatprep.mubr.bf16.mxu0 %v1588_v28  ;;  %1044 = vmatpush1.bf16.msra.mxu0 %v1848_v43 }
  0x37   : > { %1045 = vmatprep.subr.bf16.mxu0 %v1854_v44 }
  0x3a   : > { %1046 = vmatpush1.bf16.msra.mxu0 %v1860_v45 }
  0x3b   : > { %1047 = vmatprep.subr.bf16.mxu0 %v1866_v46 }
  0x3d   : > { %638 = vmatmul.mubr.bf16.gmra.mxu0 %v1590_v29 }
  0x3e   : > { %645 = vmatprep.mubr.bf16.mxu0 %v1593_v30  ;;  %1048 = vmatpush1.bf16.msra.mxu0 %v1872_v47 }
  0x45   : > { %646 = vmatmul.mubr.bf16.gmra.mxu0 %v1595_v31 }
  0xd5   : > { %v1491_v48 = vpop.f32.mrf.mxu1 }
  0xd7   : > { %v725_v49 = vpop.f32.mrf.mxu1 }
  0xd9   : > { %v1492_v52 = vpop.f32.mrf.mxu1 }
  0xdb   : > { %v728_v58 = vpop.f32.mrf.mxu1 }
  0xdd   : > { %v1495_v0 = vpop.f32.mrf.mxu1 }
  0xdf   : > { %v741_v8 = vpop.f32.mrf.mxu1 }
  0xe1   : > { %v1496_v15 = vpop.f32.mrf.mxu1 }
  0xe3   : > { %v744_v23 = vpop.f32.mrf.mxu1 }
  0xed   : > { %v1446_v50 = vpop.f32.mrf.mxu0 }
  0xef   : > { %v1447_v51 = vpop.f32.mrf.mxu0 }
  0xf0   : > { %v1448_v53 = vadd.f32 %v1447_v51, %v1446_v50 }
  0xf1   : > { %v1449_v54 = vpop.f32.mrf.mxu0 }
  0xf2   : > { %v726_v55 = vadd.f32 %v1448_v53, %v725_v49 }
  0xf3   : > { %v1450_v57 = vpop.f32.mrf.mxu0 }
  0xf4   : > { %v1451_v59 = vadd.f32 %v1450_v57, %v1449_v54  ;;  %v763_v61 = vadd.f32 %v1400_v56, %v726_v55  ;;  %v1401_v54 = vld [vmem:[%s1974_s6] ss:$0 sm:$0xff] }
  0xf5   : > { %v1452_v60 = vpop.f32.mrf.mxu0 }
  0xf6   : > { %v729_v62 = vadd.f32 %v1451_v59, %v728_v58  ;;  %v771_v4 = vmax.f32 %v763_v61, 0.0 }
  0xf7   : > { %v1453_v63 = vpop.f32.mrf.mxu0 }
  0xf8   : > { %v764_v1 = vadd.f32 %v1400_v56, %v729_v62  ;;  %v1454_v2 = vadd.f32 %v1453_v63, %v1452_v60 }
  0xf9   : > { %v1455_v3 = vpop.f32.mrf.mxu0 }
  0xfa   : > { %v772_v5 = vmax.f32 %v764_v1, 0.0  ;;  %v734_v6 = vadd.f32 %v1491_v48, %v1454_v2 }
  0xfb   : > { %v1456_v7 = vpop.f32.mrf.mxu0 }
  0xfc   : > { %v1457_v9 = vadd.f32 %v1456_v7, %v1455_v3  ;;  %v779_v10 = vpack.c.bf16 %v772_v5, %v771_v4  ;;  %v765_v12 = vadd.f32 %v1400_v56, %v734_v6 }
  0xfd   : > { %v1458_v11 = vpop.f32.mrf.mxu0 }
  0xfe   : > { %v737_v13 = vadd.f32 %v1492_v52, %v1457_v9  ;;  %1513 = vmatprep.mubr.bf16.mxu1 %v779_v10  ;;  %v773_v19 = vmax.f32 %v765_v12, 0.0 }
  0xff   : > { %v1459_v14 = vpop.f32.mrf.mxu0 }
 0x100   : > { %v766_v16 = vadd.f32 %v1400_v56, %v737_v13  ;;  %v1460_v17 = vadd.f32 %v1459_v14, %v1458_v11 }
 0x101   : > { %v1461_v18 = vpop.f32.mrf.mxu0 }
 0x102   : > { %v774_v20 = vmax.f32 %v766_v16, 0.0  ;;  %v742_v21 = vadd.f32 %v1460_v17, %v741_v8  ;;  %v949_v17 = vlaneseq }
 0x103   : > { %v1462_v22 = vpop.f32.mrf.mxu0 }
 0x104   : > { %v780_v24 = vpack.c.bf16 %v774_v20, %v773_v19  ;;  %v1463_v25 = vadd.f32 %v1462_v22, %v1461_v18  ;;  %v767_v27 = vadd.f32 %v1400_v56, %v742_v21  ;;  %v950_v18 = vshrl.u32 %v949_v17, 7  ;;  %v947_v20 = vld [vmem:[%s1976_s8] sm:$0x3] }
 0x105   : > { %v1464_v26 = vpop.f32.mrf.mxu0 }
 0x106   : > { %v745_v28 = vadd.f32 %v1463_v25, %v744_v23  ;;  %1514 = vmatmul.mubr.bf16.vlgmr.msra.gmra.mxu1 %v780_v24  ;;  %v775_v33 = vmax.f32 %v767_v27, 0.0  ;;  %v951_v19 = vsub.s32 0, %v950_v18  ;;  %v955_v21 = vsub.s32 1, %v950_v18 }
 0x107   : > { %v1465_v29 = vpop.f32.mrf.mxu0  ;;  %1529 = vmatpush1.bf16.msra.mxu1 %v1822_v38 }
 0x108   : > { %v768_v30 = vadd.f32 %v1400_v56, %v745_v28  ;;  %v1466_v31 = vadd.f32 %v1465_v29, %v1464_v26  ;;  %1522 = vmatprep.subr.bf16.mxu1 %v1830_v40  ;;  %v1912_v22 = vrot.slane %v947_v20, %v951_v19  ;;  %v1914_v23 = vrot.slane %v947_v20, %v955_v21 }
 0x109   : > { %v1467_v32 = vpop.f32.mrf.mxu0 }
 0x10a   : > { %v776_v34 = vmax.f32 %v768_v30, 0.0  ;;  %v750_v35 = vadd.f32 %v1495_v0, %v1466_v31 }
 0x10b   : > { %v1468_v36 = vpop.f32.mrf.mxu0  ;;  %1530 = vmatpush1.bf16.msra.mxu1 %v1836_v41  ;;  %v1621_v41 = vld [vmem:[%s1975_s7 + $0x24] ss:$8 sps:$4 sm:$0xff]  }
 0x10c   : > { %v1469_v37 = vadd.f32 %v1468_v36, %v1467_v32  ;;  %v781_v39 = vpack.c.bf16 %v776_v34, %v775_v33  ;;  %1523 = vmatprep.subr.bf16.mxu1 %v1842_v42  ;;  %v769_v48 = vadd.f32 %v1400_v56, %v750_v35  ;;  %v1619_v42 = vld [vmem:[%s1975_s7 + $0x20] ss:$8 sps:$4 sm:$0xff]   ;;  %1049 = vmatprep.subr.bf16.mxu0 %v1621_v41 }
 0x10d   : > { %1050 = vmatpush1.bf16.msra.mxu0 %v1619_v42 }
 0x10e   : > { %v753_v49 = vadd.f32 %v1496_v15, %v1469_v37  ;;  %1517 = vmatprep.mubr.bf16.mxu1 %v781_v39  ;;  %v777_v40 = vmax.f32 %v769_v48, 0.0 }
 0x10f   : > { %1531 = vmatpush1.bf16.msra.mxu1 %v1848_v43  ;;  %v1624_v43 = vld [vmem:[%s1975_s7 + $0x14] ss:$8 sps:$4 sm:$0xff]  }
 0x110   : > { %v770_v38 = vadd.f32 %v1400_v56, %v753_v49  ;;  %1524 = vmatprep.subr.bf16.mxu1 %v1854_v44  ;;  %v1622_v44 = vld [vmem:[%s1975_s7 + $0x10] ss:$8 sps:$4 sm:$0xff]   ;;  %1051 = vmatprep.subr.bf16.mxu0 %v1624_v43 }
 0x111   : > { %1052 = vmatpush1.bf16.msra.mxu0 %v1622_v44 }
 0x112   : > { %v778_v50 = vmax.f32 %v770_v38, 0.0 }
 0x113   : > { %1532 = vmatpush1.bf16.msra.mxu1 %v1860_v45  ;;  %v1627_v45 = vld [vmem:[%s1975_s7 + $0x4] ss:$8 sps:$4 sm:$0xff]  }
 0x114   : > { %v782_v51 = vpack.c.bf16 %v778_v50, %v777_v40  ;;  %1525 = vmatprep.subr.bf16.mxu1 %v1866_v46  ;;  %v1625_v46 = vld [vmem:[%s1975_s7] ss:$8 sps:$4 sm:$0xff]   ;;  %1053 = vmatprep.subr.bf16.mxu0 %v1627_v45 }
 0x115   : > { %1054 = vmatpush1.bf16.msra.mxu0 %v1625_v46 }
 0x116   : > { %1518 = vmatmul.mubr.bf16.gmra.mxu1 %v782_v51 }
 0x117   : > { %1533 = vmatpush1.bf16.msra.mxu1 %v1872_v47  ;;  %v1652_v47 = vmov 0  }
 0x118   : > { %1526 = vmatprep.subr.bf16.mxu1 %v1621_v41  ;;  %1071 = vmatprep.mubr.bf16.mxu0 %v1652_v47 }
 0x119   : > { %1101 = vmatprep.mubr.bf16.mxu1 %v1652_v47 }
 0x11b   : > { %1534 = vmatpush1.bf16.msra.mxu1 %v1619_v42 }
 0x11c   : > { %1527 = vmatprep.subr.bf16.mxu1 %v1624_v43 }
 0x11f   : > { %1535 = vmatpush1.bf16.msra.mxu1 %v1622_v44 }
 0x120   : > { %1528 = vmatprep.subr.bf16.mxu1 %v1627_v45 }
 0x123   : > { %1536 = vmatpush1.bf16.msra.mxu1 %v1625_v46 }
 0x1c6   : > { %v1515_v52 = vpop.f32.mrf.mxu1 }
 0x1c7   : > { %v897_v63 = vadd.f32 %v1515_v52, %v1401_v54 }
 0x1c8   : > { %v888_v53 = vpop.f32.mrf.mxu1 }
 0x1c9   : > { %v889_v56 = vadd.f32 %v1401_v54, %v888_v53  ;;  %v921_v2 = vmax.f32 %v897_v63, 0.0 }
 0x1ca   : > { %v1516_v55 = vpop.f32.mrf.mxu1 }
 0x1cb   : > { %v919_v59 = vmax.f32 %v889_v56, 0.0  ;;  %v900_v61 = vadd.f32 %v1516_v55, %v1401_v54 }
 0x1cc   : > { %v891_v57 = vpop.f32.mrf.mxu1 }
 0x1cd   : > { %v892_v58 = vadd.f32 %v1401_v54, %v891_v57  ;;  %v922_v0 = vmax.f32 %v900_v61, 0.0 }
 0x1cf   : > { %v920_v60 = vmax.f32 %v892_v58, 0.0  ;;  %v928_v4 = vpack.c.bf16 %v922_v0, %v921_v2 }
 0x1d1   : > { %v927_v62 = vpack.c.bf16 %v920_v60, %v919_v59 }
 0x1d3   : > { %1072 = vmatmul.mubr.bf16.vlgmr.msra.gmra.mxu0 %v927_v62 }
 0x1d4   : > { %1081 = vmatprep.mubr.bf16.mxu0 %v1652_v47 }
 0x1d6   : > { %v1519_v1 = vpop.f32.mrf.mxu1 }
 0x1d7   : > { %v913_v5 = vadd.f32 %v1519_v1, %v1401_v54 }
 0x1d8   : > { %v904_v3 = vpop.f32.mrf.mxu1 }
 0x1d9   : > { %v905_v7 = vadd.f32 %v1401_v54, %v904_v3  ;;  %v925_v10 = vmax.f32 %v913_v5, 0.0 }
 0x1da   : > { %v1520_v6 = vpop.f32.mrf.mxu1 }
 0x1db   : > { %v916_v8 = vadd.f32 %v1520_v6, %v1401_v54  ;;  %1082 = vmatmul.mubr.bf16.gmra.mxu0 %v928_v4  ;;  %v923_v13 = vmax.f32 %v905_v7, 0.0 }
 0x1dc   : > { %v907_v9 = vpop.f32.mrf.mxu1  ;;  %1091 = vmatprep.mubr.bf16.mxu0 %v1652_v47 }
 0x1dd   : > { %v926_v11 = vmax.f32 %v916_v8, 0.0  ;;  %v908_v12 = vadd.f32 %v1401_v54, %v907_v9 }
 0x1df   : > { %v930_v14 = vpack.c.bf16 %v926_v11, %v925_v10  ;;  %v924_v15 = vmax.f32 %v908_v12, 0.0 }
 0x1e1   : > { %v929_v16 = vpack.c.bf16 %v924_v15, %v923_v13  ;;  %1102 = vmatmul.mubr.bf16.vlgmr.msra.gmra.mxu1 %v930_v14 }
 0x1e3   : > { %1092 = vmatmul.mubr.bf16.gmra.mxu0 %v929_v16 }
 0x293   : > { %v1073_v24 = vpop.f32.mrf.mxu0 }
 0x294   : > { %v1074_v25 = vadd.f32 %v1073_v24, %v1912_v22 }
 0x295   : > { %v1075_v26 = vpop.f32.mrf.mxu0 }
 0x296   : > { %v1112_v27 = vmax.f32 %v1074_v25, 0.0  ;;  %v1076_v28 = vadd.f32 %v1075_v26, %v1914_v23 }
 0x297   : > { %v1077_v29 = vpop.f32.mrf.mxu0 }
 0x298   : > { %v1113_v30 = vmax.f32 %v1076_v28, 0.0  ;;  %v1078_v31 = vadd.f32 %v1077_v29, %v1912_v22  ;;  %v1130_v33 = vrot.slane %v1112_v27, 4 }
 0x299   : > { %v1079_v32 = vpop.f32.mrf.mxu0 }
 0x29a   : > { %v1136_v34 = vrot.slane %v1113_v30, 4  ;;  %v1114_v35 = vmax.f32 %v1078_v31, 0.0  ;;  %v1080_v36 = vadd.f32 %v1079_v32, %v1914_v23  ;;  %v1131_v40 = vmax.f32 %v1112_v27, %v1130_v33 }
 0x29b   : > { %v1083_v37 = vpop.f32.mrf.mxu0 }
 0x29c   : > { %v1142_v39 = vrot.slane %v1114_v35, 4  ;;  %v1115_v48 = vmax.f32 %v1080_v36, 0.0  ;;  %v1084_v49 = vadd.f32 %v1083_v37, %v1912_v22  ;;  %v1137_v50 = vmax.f32 %v1113_v30, %v1136_v34 }
 0x29d   : > { %v1085_v38 = vpop.f32.mrf.mxu0  ;;  %v1132_v52 = vrot.slane %v1131_v40, 2 }
 0x29e   : > { %v1143_v51 = vmax.f32 %v1114_v35, %v1142_v39  ;;  %v1116_v41 = vmax.f32 %v1084_v49, 0.0  ;;  %v1148_v43 = vrot.slane %v1115_v48, 4  ;;  %v1086_v44 = vadd.f32 %v1085_v38, %v1914_v23 }
 0x29f   : > { %v1087_v42 = vpop.f32.mrf.mxu0  ;;  %v1138_v53 = vrot.slane %v1137_v50, 2  ;;  %v1133_v1 = vmax.f32 %v1131_v40, %v1132_v52 }
 0x2a0   : > { %v1088_v45 = vadd.f32 %v1087_v42, %v1912_v22  ;;  %v1144_v54 = vrot.slane %v1143_v51, 2  ;;  %v1154_v55 = vrot.slane %v1116_v41, 4  ;;  %v1149_v60 = vmax.f32 %v1115_v48, %v1148_v43 }
 0x2a1   : > { %v1089_v46 = vpop.f32.mrf.mxu0  ;;  %v1103_v47 = vpop.f32.mrf.mxu1  ;;  %v1117_v61 = vmax.f32 %v1086_v44, 0.0  ;;  %v1139_v2 = vmax.f32 %v1137_v50, %v1138_v53  ;;  %v1134_v15 = vrot.slane %v1133_v1, 1 }
 0x2a2   : > { %v1118_v56 = vmax.f32 %v1088_v45, 0.0  ;;  %v1090_v57 = vadd.f32 %v1089_v46, %v1914_v23  ;;  %v1104_v59 = vadd.f32 %v1103_v47, %v1912_v22  ;;  %v1145_v3 = vmax.f32 %v1143_v51, %v1144_v54 }
 0x2a3   : > { %v1093_v58 = vpop.f32.mrf.mxu0  ;;  %v1155_v4 = vmax.f32 %v1116_v41, %v1154_v55  ;;  %v1105_v5 = vpop.f32.mrf.mxu1  ;;  %v1150_v8 = vrot.slane %v1149_v60, 2  ;;  %v1160_v9 = vrot.slane %v1117_v61, 4  ;;  %v1140_v16 = vrot.slane %v1139_v2, 1 }
 0x2a4   : > { %v1166_v62 = vrot.slane %v1118_v56, 4  ;;  %v1119_v63 = vmax.f32 %v1090_v57, 0.0  ;;  %v1094_v0 = vadd.f32 %v1093_v58, %v1912_v22  ;;  %v1124_v6 = vmax.f32 %v1104_v59, 0.0 }
 0x2a5   : > { %v1095_v10 = vpop.f32.mrf.mxu0  ;;  %v1106_v14 = vadd.f32 %v1105_v5, %v1914_v23  ;;  %v1146_v17 = vrot.slane %v1145_v3, 1  ;;  %v1156_v18 = vrot.slane %v1155_v4, 2  ;;  %v1107_v25 = vpop.f32.mrf.mxu1  ;;  %v1151_v26 = vmax.f32 %v1149_v60, %v1150_v8 }
 0x2a6   : > { %v1120_v7 = vmax.f32 %v1094_v0, 0.0  ;;  %v1167_v11 = vmax.f32 %v1118_v56, %v1166_v62  ;;  %v1172_v12 = vrot.slane %v1119_v63, 4  ;;  %v1202_v19 = vrot.slane %v1124_v6, 4 }
 0x2a7   : > { %v1125_v21 = vmax.f32 %v1106_v14, 0.0  ;;  %v1096_v24 = vadd.f32 %v1095_v10, %v1914_v23  ;;  %v1161_v27 = vmax.f32 %v1117_v61, %v1160_v9  ;;  %v1097_v28 = vpop.f32.mrf.mxu0  ;;  %v1928_v33 = vmax.f32 %v1133_v1, %v1134_v15  ;;  %v1109_v38 = vpop.f32.mrf.mxu1 }
 0x2a8   : > { %v1178_v13 = vrot.slane %v1120_v7, 4  ;;  %v1168_v29 = vrot.slane %v1167_v11, 2  ;;  %v1173_v30 = vmax.f32 %v1119_v63, %v1172_v12  ;;  %v1930_v34 = vmax.f32 %v1139_v2, %v1140_v16 }
 0x2a9   : > { %v1208_v31 = vrot.slane %v1125_v21, 4  ;;  %v1121_v32 = vmax.f32 %v1096_v24, 0.0  ;;  %v1157_v35 = vmax.f32 %v1155_v4, %v1156_v18  ;;  %v1108_v36 = vadd.f32 %v1107_v25, %v1912_v22  ;;  %v1099_v42 = vpop.f32.mrf.mxu0 }
 0x2aa   : > { %v1179_v20 = vmax.f32 %v1120_v7, %v1178_v13  ;;  %v1147_v37 = vmax.f32 %v1145_v3, %v1146_v17  ;;  %v1203_v39 = vmax.f32 %v1124_v6, %v1202_v19  ;;  %v1152_v40 = vrot.slane %v1151_v26, 1 }
 0x2ab   : > { %v1184_v49 = vrot.slane %v1121_v32, 4  ;;  %v1162_v50 = vrot.slane %v1161_v27, 2  ;;  %v1126_v51 = vmax.f32 %v1108_v36, 0.0  ;;  %v1098_v41 = vadd.f32 %v1097_v28, %v1912_v22 }
 0x2ac   : > { %v1180_v48 = vrot.slane %v1179_v20, 2  ;;  %v1169_v43 = vmax.f32 %v1167_v11, %v1168_v29  ;;  %v1174_v44 = vrot.slane %v1173_v30, 2  ;;  %v1209_v45 = vmax.f32 %v1125_v21, %v1208_v31 }
 0x2ad   : > { %v1185_v46 = vmax.f32 %v1121_v32, %v1184_v49  ;;  %v1158_v47 = vrot.slane %v1157_v35, 1  ;;  %v1214_v52 = vrot.slane %v1126_v51, 4  ;;  %v1122_v53 = vmax.f32 %v1098_v41, 0.0 }
 0x2ae   : > { %v1110_v54 = vadd.f32 %v1109_v38, %v1914_v23  ;;  %v1204_v55 = vrot.slane %v1203_v39, 2  ;;  %v1181_v56 = vmax.f32 %v1179_v20, %v1180_v48  ;;  %v1100_v58 = vadd.f32 %v1099_v42, %v1914_v23 }
 0x2af   : > { %v1186_v57 = vrot.slane %v1185_v46, 2  ;;  %v1163_v59 = vmax.f32 %v1161_v27, %v1162_v50  ;;  %v1215_v22 = vmax.f32 %v1126_v51, %v1214_v52  ;;  %v1190_v60 = vrot.slane %v1122_v53, 4 }
 0x2b0   : > { %v1127_v61 = vmax.f32 %v1110_v54, 0.0  ;;  %v1170_v62 = vrot.slane %v1169_v43, 1  ;;  %v1175_v63 = vmax.f32 %v1173_v30, %v1174_v44  ;;  %v1210_v0 = vrot.slane %v1209_v45, 2 }
 0x2b1   : > { %v1123_v1 = vmax.f32 %v1100_v58, 0.0  ;;  %v1187_v2 = vmax.f32 %v1185_v46, %v1186_v57  ;;  %v1216_v3 = vrot.slane %v1215_v22, 2  ;;  %v1191_v4 = vmax.f32 %v1122_v53, %v1190_v60 }
 0x2b2   : > { %v1220_v5 = vrot.slane %v1127_v61, 4  ;;  %v1153_v6 = vmax.f32 %v1151_v26, %v1152_v40  ;;  %v1205_v7 = vmax.f32 %v1203_v39, %v1204_v55  ;;  %v1182_v8 = vrot.slane %v1181_v56, 1 }
 0x2b3   : > { %v1196_v23 = vrot.slane %v1123_v1, 4  ;;  %v1164_v9 = vrot.slane %v1163_v59, 1  ;;  %v1217_v10 = vmax.f32 %v1215_v22, %v1216_v3  ;;  %v1192_v11 = vrot.slane %v1191_v4, 2 }
 0x2b4   : > { %v1221_v12 = vmax.f32 %v1127_v61, %v1220_v5  ;;  %v1159_v13 = vmax.f32 %v1157_v35, %v1158_v47  ;;  %v1171_v14 = vmax.f32 %v1169_v43, %v1170_v62  ;;  %v1176_v15 = vrot.slane %v1175_v63, 1 }
 0x2b5   : > { %v1197_v16 = vmax.f32 %v1123_v1, %v1196_v23  ;;  %v1211_v17 = vmax.f32 %v1209_v45, %v1210_v0  ;;  %v1188_v18 = vrot.slane %v1187_v2, 1  ;;  %v1193_v19 = vmax.f32 %v1191_v4, %v1192_v11 }
 0x2b6   : > { %v1222_v20 = vrot.slane %v1221_v12, 2  ;;  %v1243_v21 = vsel %vm1242_vm2, %v1147_v37, %v1928_v33  ;;  %v1206_v24 = vrot.slane %v1205_v7, 1  ;;  %v1183_v25 = vmax.f32 %v1181_v56, %v1182_v8 }
 0x2b7   : > { %v1198_v26 = vrot.slane %v1197_v16, 2  ;;  %v1165_v27 = vmax.f32 %v1163_v59, %v1164_v9  ;;  %v1218_v28 = vrot.slane %v1217_v10, 1  ;;  %v1194_v29 = vrot.slane %v1193_v19, 1 }
 0x2b8   : > { %v1223_v30 = vmax.f32 %v1221_v12, %v1222_v20  ;;  %v1256_v31 = vsel %vm1242_vm2, %v1153_v6, %v1930_v34  ;;  %v1245_v32 = vsel %vm1244_vm3, %v1159_v13, %v1243_v21  ;;  %v1177_v35 = vmax.f32 %v1175_v63, %v1176_v15 }
 0x2b9   : > { %v1199_v36 = vmax.f32 %v1197_v16, %v1198_v26  ;;  %v1247_v39 = vsel %vm1246_vm4, %v1171_v14, %v1245_v32  ;;  %v1212_v48 = vrot.slane %v1211_v17, 1  ;;  %v1189_v33 = vmax.f32 %v1187_v2, %v1188_v18 }
 0x2ba   : > { %v1195_v37 = vmax.f32 %v1193_v19, %v1194_v29  ;;  %v1207_v49 = vmax.f32 %v1205_v7, %v1206_v24  ;;  %v1249_v38 = vsel %vm1248_vm5, %v1183_v25, %v1247_v39  ;;  %v1224_v40 = vrot.slane %v1223_v30, 1 }
 0x2bb   : > { %v1200_v50 = vrot.slane %v1199_v36, 1  ;;  %v1257_v51 = vsel %vm1244_vm3, %v1165_v27, %v1256_v31  ;;  %v1219_v41 = vmax.f32 %v1217_v10, %v1218_v28  ;;  %v1213_v45 = vmax.f32 %v1211_v17, %v1212_v48 }
 0x2bc   : > { %v1251_v34 = vsel %vm1250_vm6, %v1195_v37, %v1249_v38  ;;  %v1258_v42 = vsel %vm1246_vm4, %v1177_v35, %v1257_v51  ;;  %v1225_v53 = vmax.f32 %v1223_v30, %v1224_v40 }
 0x2bd   : > { %v1253_v43 = vsel %vm1252_vm7, %v1207_v49, %v1251_v34  ;;  %v1201_v44 = vmax.f32 %v1199_v36, %v1200_v50  ;;  %v1259_v46 = vsel %vm1248_vm5, %v1189_v33, %v1258_v42 }
 0x2be   : > { %v1255_v47 = vsel %vm1254_vm8, %v1219_v41, %v1253_v43 }
 0x2bf   : > { %v1265_v52 = vmax.f32 %v1255_v47, 0.0  ;;  %v1260_v54 = vsel %vm1250_vm6, %v1201_v44, %v1259_v46 }
 0x2c0   : > { %v1261_v55 = vsel %vm1252_vm7, %v1213_v45, %v1260_v54 }
 0x2c1   : > { %1267 = vst [vmem:[%s396_s13] sm:$0xff] %v1265_v52  ;;  %v1262_v56 = vsel %vm1254_vm8, %v1225_v53, %v1261_v55 }
 0x2c2   : > { %v1266_v57 = vmax.f32 %v1262_v56, 0.0 }
 0x2c4   : > { %1268 = vst [vmem:[%s396_s13 + $0x8] sm:$0xff] %v1266_v57 }
 0x2c5 PF: > { %s19_s11 = sadd.s32 1, %s1650_s11   ;;  %s1978_s30 = smov %s1646_s10 }
 0x2c6   : > { %p16_p6 = scmp.ge.s32.totalorder %s19_s11, 4   ;;  %s1979_s10 = smov %s1981_s12 }
 0x2c8   :  { %18 = sbr.rel (!%p16_p6) target bundleno = 2 (0x2), region = 93 }

// kernel: neg.14
= control target key start
LH: loop header
LB: loop body
LE: loop exit
PB: predicated region body
PF: predicated region fallthrough
CT: control target
= control target key end

     0   :  { %s72_s0 = inlined_call_operand.vmem [shape: f32[2,32,16], index: 0, kind: input, shape index: {}]   ;;  %s73_s1 = inlined_call_operand.vmem [shape: f32[2,32,16], index: 1, kind: output, shape index: {}]  }
   0x1   :  { %v2_v0 = vld [vmem:[%s72_s0] sm:$0xff]  ;;  %v32_v1 = vld [vmem:[%s72_s0 + $0x10] sm:$0xff]  ;;  %v34_v2 = vld [vmem:[%s72_s0 + $0x8] sm:$0xff] }
   0x2   :  { %v5_v3 = vxor.u32 2147483648, %v2_v0  ;;  %v12_v4 = vxor.u32 2147483648, %v32_v1  ;;  %v20_v5 = vxor.u32 2147483648, %v34_v2  ;;  %v36_v6 = vld [vmem:[%s72_s0 + $0x18] sm:$0xff] }
   0x3   :  { %v28_v7 = vxor.u32 2147483648, %v36_v6 }
   0x4   :  { %7 = vst [vmem:[%s73_s1] sm:$0xff] %v5_v3  ;;  %33 = vst [vmem:[%s73_s1 + $0x10] sm:$0xff] %v12_v4 }
   0x5   :  { %35 = vst [vmem:[%s73_s1 + $0x8] sm:$0xff] %v20_v5  ;;  %37 = vst [vmem:[%s73_s1 + $0x18] sm:$0xff] %v28_v7 }

// kernel: _lambda_.10
= control target key start
LH: loop header
LB: loop body
LE: loop exit
PB: predicated region body
PF: predicated region fallthrough
CT: control target
= control target key end

     0   :  { %s1369_s18 = smov 0   ;;  %s1695_s0 = inlined_call_operand.vmem [shape: bf16[32,512], index: 0, kind: input, shape index: {}]   ;;  %s1696_s1 = inlined_call_operand.vmem [shape: bf16[512,256], index: 1, kind: input, shape index: {}]   ;;  %s1697_s2 = inlined_call_operand.vmem [shape: f32[1,256], index: 2, kind: input, shape index: {}]   ;;  %s1698_s3 = inlined_call_operand.vmem [shape: bf16[256,256], index: 3, kind: input, shape index: {}]   ;;  %s1699_s4 = inlined_call_operand.vmem [shape: f32[1,256], index: 4, kind: input, shape index: {}]   ;;  %s1700_s5 = inlined_call_operand.vmem [shape: f32[32,256], index: 5, kind: output, shape index: {}]  }
   0x1 LB: > { %s1058_s19 = sadd.s32 4294967295, %s1337_s18   ;;  %p1062_p0 = scmp.ge.s32.totalorder %s1337_s18, 1  ;;  %s1337_s18 = sphi %s1369_s18, %s15_s18  }
   0x2   : > { %p189_p1 = scmp.lt.s32.totalorder %s1337_s18, 3 }
   0x4   : > { %p190_p2 = pnand %p1062_p0, %p189_p1 }
   0x5   : > { %s1063_s9 = sshll.u32 (!%p190_p2), %s1058_s19, 1 }
   0x6   : > { %193 = sbr.rel (%p190_p2) target bundleno = 488 (0x1e8), region = 40  ;;  %p220_p3 = scmp.lt.s32.totalorder (!%p190_p2), %s1063_s9, 3 }
   0xb   : > { %v1181_v0 = vld [vmem:[%s1696_s1 + $0x74] ss:$8 sps:$4 sm:$0xff]   ;;  %v1185_v2 = vld [vmem:[%s1696_s1 + $0x70] ss:$8 sps:$4 sm:$0xff]   ;;  %v1187_v4 = vld [vmem:[%s1696_s1 + $0x64] ss:$8 sps:$4 sm:$0xff]  }
   0xc   : > { %v1183_v1 = vld [vmem:[%s1696_s1 + $0x174] ss:$8 sps:$4 sm:$0xff]   ;;  %653 = vmatprep.subr.bf16.mxu0 %v1181_v0  ;;  %v1186_v3 = vld [vmem:[%s1696_s1 + $0x170] ss:$8 sps:$4 sm:$0xff]   ;;  %v1189_v5 = vld [vmem:[%s1696_s1 + $0x164] ss:$8 sps:$4 sm:$0xff]  }
   0xd   : > { %696 = vmatprep.subr.bf16.mxu1 %v1183_v1  ;;  %654 = vmatpush1.bf16.msra.mxu0 %v1185_v2  ;;  %v1191_v6 = vld [vmem:[%s1696_s1 + $0x60] ss:$8 sps:$4 sm:$0xff]   ;;  %v1193_v8 = vld [vmem:[%s1696_s1 + $0x54] ss:$8 sps:$4 sm:$0xff]   ;;  %v1197_v10 = vld [vmem:[%s1696_s1 + $0x50] ss:$8 sps:$4 sm:$0xff]  }
   0xe   : > { %697 = vmatpush1.bf16.msra.mxu1 %v1186_v3  ;;  %655 = vmatprep.subr.bf16.mxu0 %v1187_v4  ;;  %v1192_v7 = vld [vmem:[%s1696_s1 + $0x160] ss:$8 sps:$4 sm:$0xff]   ;;  %v1195_v9 = vld [vmem:[%s1696_s1 + $0x154] ss:$8 sps:$4 sm:$0xff]   ;;  %v1198_v11 = vld [vmem:[%s1696_s1 + $0x150] ss:$8 sps:$4 sm:$0xff]  }
   0xf   : > { %698 = vmatprep.subr.bf16.mxu1 %v1189_v5  ;;  %v1199_v12 = vld [vmem:[%s1696_s1 + $0x44] ss:$8 sps:$4 sm:$0xff]   ;;  %v1203_v14 = vld [vmem:[%s1696_s1 + $0x40] ss:$8 sps:$4 sm:$0xff]   ;;  %v1205_v16 = vld [vmem:[%s1696_s1 + $0x34] ss:$8 sps:$4 sm:$0xff]  }
  0x10   : > { %v1201_v13 = vld [vmem:[%s1696_s1 + $0x144] ss:$8 sps:$4 sm:$0xff]   ;;  %v1204_v15 = vld [vmem:[%s1696_s1 + $0x140] ss:$8 sps:$4 sm:$0xff]   ;;  %v1207_v17 = vld [vmem:[%s1696_s1 + $0x134] ss:$8 sps:$4 sm:$0xff]  }
  0x11   : > { %656 = vmatpush1.bf16.msra.mxu0 %v1191_v6  ;;  %v1209_v18 = vld [vmem:[%s1696_s1 + $0x30] ss:$8 sps:$4 sm:$0xff]   ;;  %v1211_v20 = vld [vmem:[%s1696_s1 + $0x24] ss:$8 sps:$4 sm:$0xff]   ;;  %v1215_v22 = vld [vmem:[%s1696_s1 + $0x20] ss:$8 sps:$4 sm:$0xff]  }
  0x12   : > { %699 = vmatpush1.bf16.msra.mxu1 %v1192_v7  ;;  %657 = vmatprep.subr.bf16.mxu0 %v1193_v8  ;;  %v1210_v19 = vld [vmem:[%s1696_s1 + $0x130] ss:$8 sps:$4 sm:$0xff]   ;;  %v1213_v21 = vld [vmem:[%s1696_s1 + $0x124] ss:$8 sps:$4 sm:$0xff]   ;;  %v1216_v23 = vld [vmem:[%s1696_s1 + $0x120] ss:$8 sps:$4 sm:$0xff]  }
  0x13   : > { %700 = vmatprep.subr.bf16.mxu1 %v1195_v9  ;;  %v1217_v24 = vld [vmem:[%s1696_s1 + $0x14] ss:$8 sps:$4 sm:$0xff]   ;;  %v1221_v26 = vld [vmem:[%s1696_s1 + $0x10] ss:$8 sps:$4 sm:$0xff]   ;;  %v1223_v28 = vld [vmem:[%s1696_s1 + $0x4] ss:$8 sps:$4 sm:$0xff]  }
  0x14   : > { %v1219_v25 = vld [vmem:[%s1696_s1 + $0x114] ss:$8 sps:$4 sm:$0xff]   ;;  %v1222_v27 = vld [vmem:[%s1696_s1 + $0x110] ss:$8 sps:$4 sm:$0xff]   ;;  %v1225_v29 = vld [vmem:[%s1696_s1 + $0x104] ss:$8 sps:$4 sm:$0xff]  }
  0x15   : > { %658 = vmatpush1.bf16.msra.mxu0 %v1197_v10  ;;  %v1227_v30 = vld [vmem:[%s1696_s1] ss:$8 sps:$4 sm:$0xff]   ;;  %v1229_v32 = vld [vmem:[%s1696_s1 + $0xf4] ss:$8 sps:$4 sm:$0xff]   ;;  %v1233_v34 = vld [vmem:[%s1696_s1 + $0xf0] ss:$8 sps:$4 sm:$0xff]  }
  0x16   : > { %701 = vmatpush1.bf16.msra.mxu1 %v1198_v11  ;;  %659 = vmatprep.subr.bf16.mxu0 %v1199_v12  ;;  %v1228_v31 = vld [vmem:[%s1696_s1 + $0x100] ss:$8 sps:$4 sm:$0xff]   ;;  %v1231_v33 = vld [vmem:[%s1696_s1 + $0x1f4] ss:$8 sps:$4 sm:$0xff]   ;;  %v1234_v35 = vld [vmem:[%s1696_s1 + $0x1f0] ss:$8 sps:$4 sm:$0xff]  }
  0x17   : > { %702 = vmatprep.subr.bf16.mxu1 %v1201_v13  ;;  %v1235_v36 = vld [vmem:[%s1696_s1 + $0xe4] ss:$8 sps:$4 sm:$0xff]   ;;  %s1702_s9 = smov (!%p220_p3, %s1063_s9), 3  ;;  %v1239_v38 = vld [vmem:[%s1696_s1 + $0xe0] ss:$8 sps:$4 sm:$0xff]  }
  0x18   : > { %v1237_v37 = vld [vmem:[%s1696_s1 + $0x1e4] ss:$8 sps:$4 sm:$0xff]   ;;  %v1240_v39 = vld [vmem:[%s1696_s1 + $0x1e0] ss:$8 sps:$4 sm:$0xff]   ;;  %v1241_v40 = vld [vmem:[%s1696_s1 + $0xd4] ss:$8 sps:$4 sm:$0xff]  }
  0x19   : > { %660 = vmatpush1.bf16.msra.mxu0 %v1203_v14  ;;  %v1243_v41 = vld [vmem:[%s1696_s1 + $0x1d4] ss:$8 sps:$4 sm:$0xff]   ;;  %s1171_s11 = sshll.u32 %s1702_s9, 4  ;;  %v1245_v42 = vld [vmem:[%s1696_s1 + $0xd0] ss:$8 sps:$4 sm:$0xff]  }
  0x1a   : > { %703 = vmatpush1.bf16.msra.mxu1 %v1204_v15  ;;  %661 = vmatprep.subr.bf16.mxu0 %v1205_v16  ;;  %v1246_v43 = vld [vmem:[%s1696_s1 + $0x1d0] ss:$8 sps:$4 sm:$0xff]   ;;  %v1247_v44 = vld [vmem:[%s1696_s1 + $0xc4] ss:$8 sps:$4 sm:$0xff]   ;;  %s1522_s21 = scalar_lea.vmem %s1695_s0, %s1171_s11  ;;  %v1251_v46 = vld [vmem:[%s1696_s1 + $0xc0] ss:$8 sps:$4 sm:$0xff]   ;;  %s231_s22 = scalar_lea.vmem %s1700_s5, %s1171_s11 }
  0x1b   : > { %704 = vmatprep.subr.bf16.mxu1 %v1207_v17  ;;  %v1249_v45 = vld [vmem:[%s1696_s1 + $0x1c4] ss:$8 sps:$4 sm:$0xff]   ;;  %v1252_v47 = vld [vmem:[%s1696_s1 + $0x1c0] ss:$8 sps:$4 sm:$0xff]   ;;  %v1253_v48 = vld [vmem:[%s1696_s1 + $0xb4] ss:$8 sps:$4 sm:$0xff]  }
  0x1c   : > { %v1279_v49 = vld [vmem:[%s1522_s21 + $0x4] ss:$16 sps:$4 sm:$0xff]   ;;  %v1282_v51 = vld [vmem:[%s1522_s21 + $0xc] ss:$16 sps:$4 sm:$0xff]   ;;  %v1257_v52 = vld [vmem:[%s1696_s1 + $0xb0] ss:$8 sps:$4 sm:$0xff]  }
  0x1d   : > { %662 = vmatpush1.bf16.msra.mxu0 %v1209_v18  ;;  %v1255_v50 = vld [vmem:[%s1696_s1 + $0x1b4] ss:$8 sps:$4 sm:$0xff]   ;;  %685 = vmatprep.mubr.bf16.mxu0 %v1279_v49  ;;  %v1258_v53 = vld [vmem:[%s1696_s1 + $0x1b0] ss:$8 sps:$4 sm:$0xff]   ;;  %v1259_v54 = vld [vmem:[%s1696_s1 + $0xa4] ss:$8 sps:$4 sm:$0xff]  }
  0x1e   : > { %705 = vmatpush1.bf16.msra.mxu1 %v1210_v19  ;;  %663 = vmatprep.subr.bf16.mxu0 %v1211_v20  ;;  %v1261_v55 = vld [vmem:[%s1696_s1 + $0x1a4] ss:$8 sps:$4 sm:$0xff]   ;;  %v1263_v56 = vld [vmem:[%s1696_s1 + $0xa0] ss:$8 sps:$4 sm:$0xff]   ;;  %v1265_v58 = vld [vmem:[%s1696_s1 + $0x94] ss:$8 sps:$4 sm:$0xff]  }
  0x1f   : > { %706 = vmatprep.subr.bf16.mxu1 %v1213_v21  ;;  %728 = vmatprep.mubr.bf16.mxu1 %v1282_v51  ;;  %v1264_v57 = vld [vmem:[%s1696_s1 + $0x1a0] ss:$8 sps:$4 sm:$0xff]   ;;  %v1267_v59 = vld [vmem:[%s1696_s1 + $0x194] ss:$8 sps:$4 sm:$0xff]   ;;  %v1269_v60 = vld [vmem:[%s1696_s1 + $0x90] ss:$8 sps:$4 sm:$0xff]  }
  0x20   : > { %v1270_v61 = vld [vmem:[%s1696_s1 + $0x190] ss:$8 sps:$4 sm:$0xff]   ;;  %v1271_v62 = vld [vmem:[%s1696_s1 + $0x84] ss:$8 sps:$4 sm:$0xff]   ;;  %v1275_v0 = vld [vmem:[%s1696_s1 + $0x80] ss:$8 sps:$4 sm:$0xff]  }
  0x21   : > { %664 = vmatpush1.bf16.msra.mxu0 %v1215_v22  ;;  %v1273_v63 = vld [vmem:[%s1696_s1 + $0x184] ss:$8 sps:$4 sm:$0xff]   ;;  %v1276_v1 = vld [vmem:[%s1696_s1 + $0x180] ss:$8 sps:$4 sm:$0xff]   ;;  %v1285_v4 = vld [vmem:[%s1698_s3 + $0x74] ss:$8 sps:$4 sm:$0xff]  }
  0x22   : > { %707 = vmatpush1.bf16.msra.mxu1 %v1216_v23  ;;  %665 = vmatprep.subr.bf16.mxu0 %v1217_v24  ;;  %v1277_v2 = vld [vmem:[%s1522_s21] ss:$16 sps:$4 sm:$0xff]   ;;  %v1280_v3 = vld [vmem:[%s1522_s21 + $0x8] ss:$16 sps:$4 sm:$0xff]   ;;  %v1288_v6 = vld [vmem:[%s1698_s3 + $0x64] ss:$8 sps:$4 sm:$0xff]  }
  0x23   : > { %708 = vmatprep.subr.bf16.mxu1 %v1219_v25  ;;  %v1283_v5 = vld [vmem:[%s1698_s3 + $0x70] ss:$8 sps:$4 sm:$0xff]   ;;  %v1286_v7 = vld [vmem:[%s1698_s3 + $0x60] ss:$8 sps:$4 sm:$0xff]   ;;  %v1291_v8 = vld [vmem:[%s1698_s3 + $0x54] ss:$8 sps:$4 sm:$0xff]  }
  0x24   : > { %v1289_v9 = vld [vmem:[%s1698_s3 + $0x50] ss:$8 sps:$4 sm:$0xff]   ;;  %v1294_v10 = vld [vmem:[%s1698_s3 + $0x44] ss:$8 sps:$4 sm:$0xff]   ;;  %v1292_v11 = vld [vmem:[%s1698_s3 + $0x40] ss:$8 sps:$4 sm:$0xff]  }
  0x25   : > { %666 = vmatpush1.bf16.msra.mxu0 %v1221_v26  ;;  %v1297_v12 = vld [vmem:[%s1698_s3 + $0x34] ss:$8 sps:$4 sm:$0xff]   ;;  %v1295_v13 = vld [vmem:[%s1698_s3 + $0x30] ss:$8 sps:$4 sm:$0xff]   ;;  %v1300_v14 = vld [vmem:[%s1698_s3 + $0x24] ss:$8 sps:$4 sm:$0xff]  }
  0x26   : > { %709 = vmatpush1.bf16.msra.mxu1 %v1222_v27  ;;  %667 = vmatprep.subr.bf16.mxu0 %v1223_v28  ;;  %v1298_v15 = vld [vmem:[%s1698_s3 + $0x20] ss:$8 sps:$4 sm:$0xff]   ;;  %v1303_v16 = vld [vmem:[%s1698_s3 + $0x14] ss:$8 sps:$4 sm:$0xff]   ;;  %v1301_v17 = vld [vmem:[%s1698_s3 + $0x10] ss:$8 sps:$4 sm:$0xff]  }
  0x27   : > { %710 = vmatprep.subr.bf16.mxu1 %v1225_v29  ;;  %v1306_v18 = vld [vmem:[%s1698_s3 + $0x4] ss:$8 sps:$4 sm:$0xff]   ;;  %v1304_v19 = vld [vmem:[%s1698_s3] ss:$8 sps:$4 sm:$0xff]   ;;  %v1309_v20 = vld [vmem:[%s1698_s3 + $0xf4] ss:$8 sps:$4 sm:$0xff]  }
  0x28   : > { %v1307_v21 = vld [vmem:[%s1698_s3 + $0xf0] ss:$8 sps:$4 sm:$0xff]   ;;  %v1312_v22 = vld [vmem:[%s1698_s3 + $0xe4] ss:$8 sps:$4 sm:$0xff]   ;;  %v1310_v23 = vld [vmem:[%s1698_s3 + $0xe0] ss:$8 sps:$4 sm:$0xff]  }
  0x29   : > { %668 = vmatpush1.bf16.msra.mxu0 %v1227_v30  ;;  %v1315_v24 = vld [vmem:[%s1698_s3 + $0xd4] ss:$8 sps:$4 sm:$0xff]   ;;  %v1313_v25 = vld [vmem:[%s1698_s3 + $0xd0] ss:$8 sps:$4 sm:$0xff]   ;;  %v1318_v26 = vld [vmem:[%s1698_s3 + $0xc4] ss:$8 sps:$4 sm:$0xff]  }
  0x2a   : > { %711 = vmatpush1.bf16.msra.mxu1 %v1228_v31  ;;  %669 = vmatprep.subr.bf16.mxu0 %v1229_v32  ;;  %v1316_v27 = vld [vmem:[%s1698_s3 + $0xc0] ss:$8 sps:$4 sm:$0xff]   ;;  %v1321_v28 = vld [vmem:[%s1698_s3 + $0xb4] ss:$8 sps:$4 sm:$0xff]   ;;  %v1319_v29 = vld [vmem:[%s1698_s3 + $0xb0] ss:$8 sps:$4 sm:$0xff]  }
  0x2b   : > { %712 = vmatprep.subr.bf16.mxu1 %v1231_v33  ;;  %v1324_v30 = vld [vmem:[%s1698_s3 + $0xa4] ss:$8 sps:$4 sm:$0xff]   ;;  %v1322_v31 = vld [vmem:[%s1698_s3 + $0xa0] ss:$8 sps:$4 sm:$0xff]   ;;  %v1327_v32 = vld [vmem:[%s1698_s3 + $0x94] ss:$8 sps:$4 sm:$0xff]  }
  0x2c   : > { %v1325_v33 = vld [vmem:[%s1698_s3 + $0x90] ss:$8 sps:$4 sm:$0xff]  }
  0x2d   : > { %670 = vmatpush2.bf16.msra.mxu0 %v1233_v34  ;;  %v1330_v34 = vld [vmem:[%s1698_s3 + $0x84] ss:$8 sps:$4 sm:$0xff]  }
  0x2e   : > { %713 = vmatpush2.bf16.msra.mxu1 %v1234_v35  ;;  %671 = vmatprep.subr.bf16.mxu0 %v1235_v36  ;;  %v1328_v35 = vld [vmem:[%s1698_s3 + $0x80] ss:$8 sps:$4 sm:$0xff]   ;;  %v303_v36 = vlaneseq }
  0x2f   : > { %714 = vmatprep.subr.bf16.mxu1 %v1237_v37 }
  0x30   : > { %v304_v37 = vshrl.u32 %v303_v36, 7 }
  0x31   : > { %672 = vmatpush2.bf16.msra.mxu0 %v1239_v38 }
  0x32   : > { %715 = vmatpush2.bf16.msra.mxu1 %v1240_v39  ;;  %673 = vmatprep.subr.bf16.mxu0 %v1241_v40  ;;  %v309_v38 = vsub.s32 1, %v304_v37  ;;  %v305_v39 = vsub.s32 0, %v304_v37  ;;  %v301_v40 = vld [vmem:[%s1697_s2] sm:$0x3] }
  0x33   : > { %716 = vmatprep.subr.bf16.mxu1 %v1243_v41 }
  0x34   : > { %v310_v41 = vrot.slane %v301_v40, %v309_v38 }
  0x35   : > { %674 = vmatpush2.bf16.msra.mxu0 %v1245_v42  ;;  %v306_v42 = vrot.slane %v301_v40, %v305_v39 }
  0x36   : > { %717 = vmatpush2.bf16.msra.mxu1 %v1246_v43  ;;  %675 = vmatprep.subr.bf16.mxu0 %v1247_v44 }
  0x37   : > { %718 = vmatprep.subr.bf16.mxu1 %v1249_v45 }
  0x39   : > { %676 = vmatpush2.bf16.msra.mxu0 %v1251_v46 }
  0x3a   : > { %719 = vmatpush2.bf16.msra.mxu1 %v1252_v47  ;;  %677 = vmatprep.subr.bf16.mxu0 %v1253_v48 }
  0x3b   : > { %720 = vmatprep.subr.bf16.mxu1 %v1255_v50 }
  0x3d   : > { %678 = vmatpush2.bf16.msra.mxu0 %v1257_v52 }
  0x3e   : > { %721 = vmatpush2.bf16.msra.mxu1 %v1258_v53  ;;  %679 = vmatprep.subr.bf16.mxu0 %v1259_v54 }
  0x3f   : > { %722 = vmatprep.subr.bf16.mxu1 %v1261_v55 }
  0x41   : > { %680 = vmatpush2.bf16.msra.mxu0 %v1263_v56 }
  0x42   : > { %723 = vmatpush2.bf16.msra.mxu1 %v1264_v57  ;;  %681 = vmatprep.subr.bf16.mxu0 %v1265_v58 }
  0x43   : > { %724 = vmatprep.subr.bf16.mxu1 %v1267_v59 }
  0x45   : > { %682 = vmatpush2.bf16.msra.mxu0 %v1269_v60 }
  0x46   : > { %725 = vmatpush2.bf16.msra.mxu1 %v1270_v61  ;;  %683 = vmatprep.subr.bf16.mxu0 %v1271_v62 }
  0x47   : > { %726 = vmatprep.subr.bf16.mxu1 %v1273_v63 }
  0x49   : > { %684 = vmatpush2.bf16.msra.mxu0 %v1275_v0 }
  0x4a   : > { %727 = vmatpush2.bf16.msra.mxu1 %v1276_v1  ;;  %949 = vmatprep.subr.bf16.mxu0 %v1285_v4  ;;  %v777_v1 = vld [vmem:[%s1699_s4] sm:$0x3] }
  0x4c   : > { %686 = vmatmul.mubr.bf16.vlgmr.msra.gmra.mxu0 %v1277_v2  ;;  %v782_v2 = vrot.slane %v777_v1, %v305_v39 }
  0x4d   : > { %729 = vmatmul.mubr.bf16.vlgmr.msra.gmra.mxu1 %v1280_v3  ;;  %950 = vmatpush1.bf16.msra.mxu0 %v1283_v5  ;;  %v786_v3 = vrot.slane %v777_v1, %v309_v38 }
  0x4e   : > { %951 = vmatprep.subr.bf16.mxu0 %v1288_v6 }
  0x51   : > { %952 = vmatpush1.bf16.msra.mxu0 %v1286_v7 }
  0x52   : > { %953 = vmatprep.subr.bf16.mxu0 %v1291_v8 }
  0x55   : > { %954 = vmatpush1.bf16.msra.mxu0 %v1289_v9 }
  0x56   : > { %955 = vmatprep.subr.bf16.mxu0 %v1294_v10 }
  0x59   : > { %956 = vmatpush1.bf16.msra.mxu0 %v1292_v11 }
  0x5a   : > { %957 = vmatprep.subr.bf16.mxu0 %v1297_v12 }
  0x5d   : > { %958 = vmatpush1.bf16.msra.mxu0 %v1295_v13 }
  0x5e   : > { %959 = vmatprep.subr.bf16.mxu0 %v1300_v14 }
  0x61   : > { %960 = vmatpush1.bf16.msra.mxu0 %v1298_v15 }
  0x62   : > { %961 = vmatprep.subr.bf16.mxu0 %v1303_v16 }
  0x65   : > { %962 = vmatpush1.bf16.msra.mxu0 %v1301_v17 }
  0x66   : > { %963 = vmatprep.subr.bf16.mxu0 %v1306_v18 }
  0x69   : > { %964 = vmatpush1.bf16.msra.mxu0 %v1304_v19 }
  0x6a   : > { %965 = vmatprep.subr.bf16.mxu0 %v1309_v20 }
  0x6d   : > { %966 = vmatpush2.bf16.msra.mxu0 %v1307_v21 }
  0x6e   : > { %967 = vmatprep.subr.bf16.mxu0 %v1312_v22 }
  0x71   : > { %968 = vmatpush2.bf16.msra.mxu0 %v1310_v23 }
  0x72   : > { %969 = vmatprep.subr.bf16.mxu0 %v1315_v24 }
  0x75   : > { %970 = vmatpush2.bf16.msra.mxu0 %v1313_v25 }
  0x76   : > { %971 = vmatprep.subr.bf16.mxu0 %v1318_v26 }
  0x79   : > { %972 = vmatpush2.bf16.msra.mxu0 %v1316_v27 }
  0x7a   : > { %973 = vmatprep.subr.bf16.mxu0 %v1321_v28 }
  0x7d   : > { %974 = vmatpush2.bf16.msra.mxu0 %v1319_v29 }
  0x7e   : > { %975 = vmatprep.subr.bf16.mxu0 %v1324_v30 }
  0x81   : > { %976 = vmatpush2.bf16.msra.mxu0 %v1322_v31 }
  0x82   : > { %977 = vmatprep.subr.bf16.mxu0 %v1327_v32 }
  0x85   : > { %978 = vmatpush2.bf16.msra.mxu0 %v1325_v33 }
  0x86   : > { %979 = vmatprep.subr.bf16.mxu0 %v1330_v34 }
  0x89   : > { %980 = vmatpush2.bf16.msra.mxu0 %v1328_v35 }
 0x10c   : > { %v687_v43 = vpop.f32.mrf.mxu0 }
 0x10d   : > { %v730_v44 = vpop.f32.mrf.mxu1  ;;  %v688_v48 = vadd.f32 %v687_v43, %v306_v42 }
 0x10e   : > { %v689_v45 = vpop.f32.mrf.mxu0 }
 0x10f   : > { %v732_v46 = vpop.f32.mrf.mxu1  ;;  %v690_v47 = vadd.f32 %v689_v45, %v310_v41  ;;  %v731_v56 = vadd.f32 %v730_v44, %v688_v48 }
 0x110   : > { %v691_v49 = vpop.f32.mrf.mxu0 }
 0x111   : > { %v734_v50 = vpop.f32.mrf.mxu1  ;;  %v692_v51 = vadd.f32 %v691_v49, %v306_v42  ;;  %v733_v53 = vadd.f32 %v732_v46, %v690_v47  ;;  %v739_v62 = vmax.f32 %v731_v56, 0.0 }
 0x112   : > { %v693_v52 = vpop.f32.mrf.mxu0 }
 0x113   : > { %v735_v54 = vadd.f32 %v734_v50, %v692_v51  ;;  %v694_v55 = vadd.f32 %v693_v52, %v310_v41  ;;  %v736_v57 = vpop.f32.mrf.mxu1  ;;  %v740_v60 = vmax.f32 %v733_v53, 0.0 }
 0x115   : > { %v737_v58 = vadd.f32 %v736_v57, %v694_v55  ;;  %v741_v59 = vmax.f32 %v735_v54, 0.0 }
 0x117   : > { %v742_v61 = vmax.f32 %v737_v58, 0.0  ;;  %v743_v0 = vpack.c.bf16 %v741_v59, %v739_v62 }
 0x119   : > { %v744_v63 = vpack.c.bf16 %v742_v61, %v740_v60 }
 0x11b   : > { %981 = vmatprep.mubr.bf16.mxu0 %v744_v63 }
 0x11c   : > { %982 = vmatmul.mubr.bf16.vlgmr.msra.gmra.mxu0 %v743_v0 }
 0x1dc   : > { %v983_v4 = vpop.f32.mrf.mxu0 }
 0x1dd   : > { %v984_v5 = vadd.f32 %v983_v4, %v782_v2 }
 0x1de   : > { %v985_v6 = vpop.f32.mrf.mxu0 }
 0x1df   : > { %v992_v7 = vmax.f32 %v984_v5, 0.0  ;;  %v986_v8 = vadd.f32 %v985_v6, %v786_v3 }
 0x1e0   : > { %v987_v9 = vpop.f32.mrf.mxu0 }
 0x1e1   : > { %996 = vst [vmem:[%s231_s22] sm:$0xff] %v992_v7  ;;  %v993_v10 = vmax.f32 %v986_v8, 0.0  ;;  %v988_v11 = vadd.f32 %v987_v9, %v782_v2 }
 0x1e2   : > { %v989_v12 = vpop.f32.mrf.mxu0 }
 0x1e3   : > { %997 = vst [vmem:[%s231_s22 + $0x8] sm:$0xff] %v993_v10  ;;  %v994_v13 = vmax.f32 %v988_v11, 0.0  ;;  %v990_v14 = vadd.f32 %v989_v12, %v786_v3 }
 0x1e5   : > { %998 = vst [vmem:[%s231_s22 + $0x10] sm:$0xff] %v994_v13  ;;  %v995_v15 = vmax.f32 %v990_v14, 0.0 }
 0x1e7   : > { %999 = vst [vmem:[%s231_s22 + $0x18] sm:$0xff] %v995_v15 }
 0x1e8 PF: > { %s15_s18 = sadd.s32 1, %s1337_s18  }
 0x1e9   : > { %p12_p4 = scmp.ge.s32.totalorder %s15_s18, 4  }
 0x1eb   :  { %14 = sbr.rel (!%p12_p4) target bundleno = 1 (0x1), region = 70 }

// kernel: _lambda_.11
= control target key start
LH: loop header
LB: loop body
LE: loop exit
PB: predicated region body
PF: predicated region fallthrough
CT: control target
= control target key end

     0   :  { %10 = vsyncpa [#allocation3], 0  ;;  %s1995_s0 = inlined_call_operand.vmem [shape: bf16[64,512], index: 0, kind: input, shape index: {}]   ;;  %s1996_s1 = inlined_call_operand.vmem [shape: bf16[512,256], index: 1, kind: input, shape index: {}]   ;;  %s1997_s2 = inlined_call_operand.vmem [shape: f32[1,256], index: 2, kind: input, shape index: {}]   ;;  %s1998_s3 = inlined_call_operand.vmem [shape: bf16[256,256], index: 3, kind: input, shape index: {}]   ;;  %s1999_s4 = inlined_call_operand.vmem [shape: f32[1,256], index: 4, kind: input, shape index: {}]   ;;  %s2000_s5 = inlined_call_operand.hbm [shape: f32[64,256], index: 5, kind: output, shape index: {}]  }
   0x1   :  { %12 = vsyncpa [#allocation3 + $0x1], 0  ;;  %s1586_s18 = smov 0   ;;  %s1588_s19 = smov 0  }
   0x2   :  { %s1590_s20 = smov 0   ;;  %s1592_s21 = smov 0  }
   0x3 LB: > { %s1607_s22 = sadd.s32 4294967295, %s1551_s21   ;;  %s1141_s23 = sadd.s32 4294967294, %s1551_s21   ;;  %s1551_s21 = sphi %s1592_s21, %s2006_s21   ;;  %s1547_s20 = sphi %s1590_s20, %s2005_s20   ;;  %s1543_s19 = sphi %s1588_s19, %s2004_s19   ;;  %s1539_s18 = sphi %s1586_s18, %s2003_s18  }
   0x4   : > { %s1611_s24 = sadd.s32 1, %s1551_s21   ;;  %s135_s25 = sadd.s32 1, %s1547_s20 }
   0x5   : > { %s132_s26 = ssub.s32 %s1551_s21, %s1611_s24  ;;  %p145_p0 = scmp.ne.s32.totalorder %s1547_s20, %s1543_s19 }
   0x6   : > { %p133_p1 = scmp.eq.s32.totalorder %s132_s26, 0  ;;  %p146_p2 = scmp.eq.s32.totalorder %s1607_s22, 1 }
   0x7   : > { %p151_p3 = scmp.ne.s32.totalorder %s1543_s19, %s1539_s18  ;;  %p152_p4 = scmp.eq.s32.totalorder %s1141_s23, 1 }
   0x8   : > { %s1622_s27 = scalar_select %p133_p1, %s1547_s20, %s135_s25  }
   0x9   : > { %p1624_p5 = por %p146_p2, %p145_p0  ;;  %p1628_p6 = por %p152_p4, %p151_p3 }
   0xa   : > { %p1144_p7 = scmp.ge.s32.totalorder %s1551_s21, 1  ;;  %p192_p8 = scmp.lt.s32.totalorder %s1551_s21, 3 }
   0xc   : > { %p193_p9 = pnand %p1144_p7, %p192_p8 }
   0xd   : > { %s1146_s17 = sshll.u32 (!%p193_p9), %s1607_s22, 2  ;;  %s218_s23 = sand.u32 (!%p193_p9), 1, %s1543_s19  }
   0xe   : > { %196 = sbr.rel (%p193_p9) target bundleno = 517 (0x205), region = 40  ;;  %p222_p10 = scmp.lt.s32.totalorder (!%p193_p9), %s1146_s17, 7 }
   0xf   : > { %s1145_s25 = sshll.u32 (!%p193_p9), %s218_s23, 6  ;;  %s1553_s12 = smov (!%p193_p9), [#allocation2]  }
  0x10   : > { %s220_s26 = scalar_lea.vmem (!%p193_p9), [#allocation2], %s1145_s25  ;;  %s1495_s13 = sshll.u32 (!%p193_p9), %s1553_s12, 4  ;;  %s1496_s13 = int_to_ptr.vmem [resolvable:$false] %s1495_s13 }
  0x11   : > { %s1079_s6 = sshll.u32 (!%p193_p9), %s220_s26, 4  ;;  %s1951_s6 = int_to_ptr.vmem [resolvable:$true] %s1079_s6 }
  0x12   : > { %s1491_s10 = scalar_lea.vmem (!%p193_p9), %s1951_s6, 1024  ;;  %p1498_p0 = scmp.lt.s32.totalorder (!%p193_p9), %s1951_s6, %s1496_s13 }
  0x13   : > { %v1335_v0 = vld [vmem:[%s1996_s1 + $0x74] ss:$8 sps:$4 sm:$0xff]   ;;  %v1339_v2 = vld [vmem:[%s1996_s1 + $0x70] ss:$8 sps:$4 sm:$0xff]   ;;  %v1341_v4 = vld [vmem:[%s1996_s1 + $0x64] ss:$8 sps:$4 sm:$0xff]   ;;  %p1492_p11 = scmp.ne.s32.totalorder %s1951_s6, %s1491_s10 }
  0x14   : > { %v1337_v1 = vld [vmem:[%s1996_s1 + $0x174] ss:$8 sps:$4 sm:$0xff]   ;;  %673 = vmatprep.subr.bf16.mxu0 %v1335_v0  ;;  %v1340_v3 = vld [vmem:[%s1996_s1 + $0x170] ss:$8 sps:$4 sm:$0xff]   ;;  %v1343_v5 = vld [vmem:[%s1996_s1 + $0x164] ss:$8 sps:$4 sm:$0xff]  }
  0x15   : > { %726 = vmatprep.subr.bf16.mxu1 %v1337_v1  ;;  %674 = vmatpush1.bf16.msra.mxu0 %v1339_v2  ;;  %v1345_v6 = vld [vmem:[%s1996_s1 + $0x60] ss:$8 sps:$4 sm:$0xff]   ;;  %v1347_v8 = vld [vmem:[%s1996_s1 + $0x54] ss:$8 sps:$4 sm:$0xff]   ;;  %v1351_v10 = vld [vmem:[%s1996_s1 + $0x50] ss:$8 sps:$4 sm:$0xff]   ;;  %p1493_p12 = pnand %p1492_p11, %p1624_p5 }
  0x16   : > { %727 = vmatpush1.bf16.msra.mxu1 %v1340_v3  ;;  %675 = vmatprep.subr.bf16.mxu0 %v1341_v4  ;;  %v1346_v7 = vld [vmem:[%s1996_s1 + $0x160] ss:$8 sps:$4 sm:$0xff]   ;;  %v1349_v9 = vld [vmem:[%s1996_s1 + $0x154] ss:$8 sps:$4 sm:$0xff]   ;;  %v1352_v11 = vld [vmem:[%s1996_s1 + $0x150] ss:$8 sps:$4 sm:$0xff]  }
  0x17   : > { %728 = vmatprep.subr.bf16.mxu1 %v1343_v5  ;;  %v1353_v12 = vld [vmem:[%s1996_s1 + $0x44] ss:$8 sps:$4 sm:$0xff]   ;;  %v1357_v14 = vld [vmem:[%s1996_s1 + $0x40] ss:$8 sps:$4 sm:$0xff]   ;;  %v1359_v16 = vld [vmem:[%s1996_s1 + $0x34] ss:$8 sps:$4 sm:$0xff]   ;;  %p1494_p13 = pneg %p1493_p12 }
  0x18   : > { %v1355_v13 = vld [vmem:[%s1996_s1 + $0x144] ss:$8 sps:$4 sm:$0xff]   ;;  %v1358_v15 = vld [vmem:[%s1996_s1 + $0x140] ss:$8 sps:$4 sm:$0xff]   ;;  %v1361_v17 = vld [vmem:[%s1996_s1 + $0x134] ss:$8 sps:$4 sm:$0xff]  }
  0x19   : > { %676 = vmatpush1.bf16.msra.mxu0 %v1345_v6  ;;  %v1363_v18 = vld [vmem:[%s1996_s1 + $0x30] ss:$8 sps:$4 sm:$0xff]   ;;  %v1365_v20 = vld [vmem:[%s1996_s1 + $0x24] ss:$8 sps:$4 sm:$0xff]   ;;  %v1369_v22 = vld [vmem:[%s1996_s1 + $0x20] ss:$8 sps:$4 sm:$0xff]  }
  0x1a   : > { %729 = vmatpush1.bf16.msra.mxu1 %v1346_v7  ;;  %677 = vmatprep.subr.bf16.mxu0 %v1347_v8  ;;  %v1364_v19 = vld [vmem:[%s1996_s1 + $0x130] ss:$8 sps:$4 sm:$0xff]   ;;  %v1367_v21 = vld [vmem:[%s1996_s1 + $0x124] ss:$8 sps:$4 sm:$0xff]   ;;  %v1370_v23 = vld [vmem:[%s1996_s1 + $0x120] ss:$8 sps:$4 sm:$0xff]  }
  0x1b   : > { %730 = vmatprep.subr.bf16.mxu1 %v1349_v9  ;;  %v1371_v24 = vld [vmem:[%s1996_s1 + $0x14] ss:$8 sps:$4 sm:$0xff]   ;;  %v1375_v26 = vld [vmem:[%s1996_s1 + $0x10] ss:$8 sps:$4 sm:$0xff]   ;;  %v1377_v28 = vld [vmem:[%s1996_s1 + $0x4] ss:$8 sps:$4 sm:$0xff]  }
  0x1c   : > { %v1373_v25 = vld [vmem:[%s1996_s1 + $0x114] ss:$8 sps:$4 sm:$0xff]   ;;  %v1376_v27 = vld [vmem:[%s1996_s1 + $0x110] ss:$8 sps:$4 sm:$0xff]   ;;  %v1379_v29 = vld [vmem:[%s1996_s1 + $0x104] ss:$8 sps:$4 sm:$0xff]  }
  0x1d   : > { %678 = vmatpush1.bf16.msra.mxu0 %v1351_v10  ;;  %v1381_v30 = vld [vmem:[%s1996_s1] ss:$8 sps:$4 sm:$0xff]   ;;  %v1383_v32 = vld [vmem:[%s1996_s1 + $0xf4] ss:$8 sps:$4 sm:$0xff]   ;;  %v1387_v34 = vld [vmem:[%s1996_s1 + $0xf0] ss:$8 sps:$4 sm:$0xff]  }
  0x1e   : > { %731 = vmatpush1.bf16.msra.mxu1 %v1352_v11  ;;  %679 = vmatprep.subr.bf16.mxu0 %v1353_v12  ;;  %v1382_v31 = vld [vmem:[%s1996_s1 + $0x100] ss:$8 sps:$4 sm:$0xff]   ;;  %v1385_v33 = vld [vmem:[%s1996_s1 + $0x1f4] ss:$8 sps:$4 sm:$0xff]   ;;  %v1388_v35 = vld [vmem:[%s1996_s1 + $0x1f0] ss:$8 sps:$4 sm:$0xff]  }
  0x1f   : > { %732 = vmatprep.subr.bf16.mxu1 %v1355_v13  ;;  %v1389_v36 = vld [vmem:[%s1996_s1 + $0xe4] ss:$8 sps:$4 sm:$0xff]   ;;  %s2008_s17 = smov (!%p222_p10, %s1146_s17), 7  ;;  %v1393_v38 = vld [vmem:[%s1996_s1 + $0xe0] ss:$8 sps:$4 sm:$0xff]  }
  0x20   : > { %v1391_v37 = vld [vmem:[%s1996_s1 + $0x1e4] ss:$8 sps:$4 sm:$0xff]   ;;  %v1394_v39 = vld [vmem:[%s1996_s1 + $0x1e0] ss:$8 sps:$4 sm:$0xff]   ;;  %v1395_v40 = vld [vmem:[%s1996_s1 + $0xd4] ss:$8 sps:$4 sm:$0xff]  }
  0x21   : > { %680 = vmatpush1.bf16.msra.mxu0 %v1357_v14  ;;  %v1397_v41 = vld [vmem:[%s1996_s1 + $0x1d4] ss:$8 sps:$4 sm:$0xff]   ;;  %s1259_s11 = sshll.u32 %s2008_s17, 4  ;;  %v1399_v42 = vld [vmem:[%s1996_s1 + $0xd0] ss:$8 sps:$4 sm:$0xff]   ;;  %s1261_s17 = sshll.u32 %s1607_s22, 10 }
  0x22   : > { %733 = vmatpush1.bf16.msra.mxu1 %v1358_v15  ;;  %681 = vmatprep.subr.bf16.mxu0 %v1359_v16  ;;  %v1400_v43 = vld [vmem:[%s1996_s1 + $0x1d0] ss:$8 sps:$4 sm:$0xff]   ;;  %v1401_v44 = vld [vmem:[%s1996_s1 + $0xc4] ss:$8 sps:$4 sm:$0xff]   ;;  %s1773_s30 = scalar_lea.vmem %s1995_s0, %s1259_s11  ;;  %v1405_v46 = vld [vmem:[%s1996_s1 + $0xc0] ss:$8 sps:$4 sm:$0xff]   ;;  %s1949_s9 = scalar_lea.hbm %s2000_s5, %s1261_s17 }
  0x23   : > { %734 = vmatprep.subr.bf16.mxu1 %v1361_v17  ;;  %v1403_v45 = vld [vmem:[%s1996_s1 + $0x1c4] ss:$8 sps:$4 sm:$0xff]   ;;  %v1406_v47 = vld [vmem:[%s1996_s1 + $0x1c0] ss:$8 sps:$4 sm:$0xff]   ;;  %v1407_v48 = vld [vmem:[%s1996_s1 + $0xb4] ss:$8 sps:$4 sm:$0xff]  }
  0x24   : > { %v1433_v49 = vld [vmem:[%s1773_s30 + $0x4] ss:$16 sps:$4 sm:$0xff]   ;;  %v1436_v51 = vld [vmem:[%s1773_s30 + $0xc] ss:$16 sps:$4 sm:$0xff]   ;;  %v1411_v52 = vld [vmem:[%s1996_s1 + $0xb0] ss:$8 sps:$4 sm:$0xff]  }
  0x25   : > { %682 = vmatpush1.bf16.msra.mxu0 %v1363_v18  ;;  %v1409_v50 = vld [vmem:[%s1996_s1 + $0x1b4] ss:$8 sps:$4 sm:$0xff]   ;;  %705 = vmatprep.mubr.bf16.mxu0 %v1433_v49  ;;  %v1412_v53 = vld [vmem:[%s1996_s1 + $0x1b0] ss:$8 sps:$4 sm:$0xff]   ;;  %v1413_v54 = vld [vmem:[%s1996_s1 + $0xa4] ss:$8 sps:$4 sm:$0xff]  }
  0x26   : > { %735 = vmatpush1.bf16.msra.mxu1 %v1364_v19  ;;  %683 = vmatprep.subr.bf16.mxu0 %v1365_v20  ;;  %v1415_v55 = vld [vmem:[%s1996_s1 + $0x1a4] ss:$8 sps:$4 sm:$0xff]   ;;  %v1417_v56 = vld [vmem:[%s1996_s1 + $0xa0] ss:$8 sps:$4 sm:$0xff]   ;;  %v1419_v58 = vld [vmem:[%s1996_s1 + $0x94] ss:$8 sps:$4 sm:$0xff]  }
  0x27   : > { %736 = vmatprep.subr.bf16.mxu1 %v1367_v21  ;;  %758 = vmatprep.mubr.bf16.mxu1 %v1436_v51  ;;  %v1418_v57 = vld [vmem:[%s1996_s1 + $0x1a0] ss:$8 sps:$4 sm:$0xff]   ;;  %v1421_v59 = vld [vmem:[%s1996_s1 + $0x194] ss:$8 sps:$4 sm:$0xff]   ;;  %v1423_v60 = vld [vmem:[%s1996_s1 + $0x90] ss:$8 sps:$4 sm:$0xff]  }
  0x28   : > { %v1424_v61 = vld [vmem:[%s1996_s1 + $0x190] ss:$8 sps:$4 sm:$0xff]   ;;  %v1425_v62 = vld [vmem:[%s1996_s1 + $0x84] ss:$8 sps:$4 sm:$0xff]   ;;  %v1429_v0 = vld [vmem:[%s1996_s1 + $0x80] ss:$8 sps:$4 sm:$0xff]  }
  0x29   : > { %684 = vmatpush1.bf16.msra.mxu0 %v1369_v22  ;;  %v1427_v63 = vld [vmem:[%s1996_s1 + $0x184] ss:$8 sps:$4 sm:$0xff]   ;;  %v1430_v1 = vld [vmem:[%s1996_s1 + $0x180] ss:$8 sps:$4 sm:$0xff]   ;;  %v1445_v3 = vld [vmem:[%s1998_s3 + $0x74] ss:$8 sps:$4 sm:$0xff]  }
  0x2a   : > { %737 = vmatpush1.bf16.msra.mxu1 %v1370_v23  ;;  %685 = vmatprep.subr.bf16.mxu0 %v1371_v24  ;;  %v1431_v2 = vld [vmem:[%s1773_s30] ss:$16 sps:$4 sm:$0xff]   ;;  %v1434_v4 = vld [vmem:[%s1773_s30 + $0x8] ss:$16 sps:$4 sm:$0xff]   ;;  %v1437_v5 = vld [vmem:[%s1773_s30 + $0x24] ss:$16 sps:$4 sm:$0xff]  }
  0x2b   : > { %738 = vmatprep.subr.bf16.mxu1 %v1373_v25  ;;  %v1439_v6 = vld [vmem:[%s1773_s30 + $0x2c] ss:$16 sps:$4 sm:$0xff]   ;;  %v1443_v7 = vld [vmem:[%s1998_s3 + $0x70] ss:$8 sps:$4 sm:$0xff]   ;;  %v1446_v9 = vld [vmem:[%s1998_s3 + $0x60] ss:$8 sps:$4 sm:$0xff]  }
  0x2c   : > { %v1448_v8 = vld [vmem:[%s1998_s3 + $0x64] ss:$8 sps:$4 sm:$0xff]   ;;  %v1451_v10 = vld [vmem:[%s1998_s3 + $0x54] ss:$8 sps:$4 sm:$0xff]   ;;  %v1441_v11 = vld [vmem:[%s1773_s30 + $0x20] ss:$16 sps:$4 sm:$0xff]  }
  0x2d   : > { %686 = vmatpush1.bf16.msra.mxu0 %v1375_v26  ;;  %v1442_v12 = vld [vmem:[%s1773_s30 + $0x28] ss:$16 sps:$4 sm:$0xff]   ;;  %v1454_v14 = vld [vmem:[%s1998_s3 + $0x44] ss:$8 sps:$4 sm:$0xff]   ;;  %v1457_v16 = vld [vmem:[%s1998_s3 + $0x34] ss:$8 sps:$4 sm:$0xff]  }
  0x2e   : > { %739 = vmatpush1.bf16.msra.mxu1 %v1376_v27  ;;  %687 = vmatprep.subr.bf16.mxu0 %v1377_v28  ;;  %v1449_v13 = vld [vmem:[%s1998_s3 + $0x50] ss:$8 sps:$4 sm:$0xff]   ;;  %v1452_v15 = vld [vmem:[%s1998_s3 + $0x40] ss:$8 sps:$4 sm:$0xff]   ;;  %v1460_v18 = vld [vmem:[%s1998_s3 + $0x24] ss:$8 sps:$4 sm:$0xff]  }
  0x2f   : > { %740 = vmatprep.subr.bf16.mxu1 %v1379_v29  ;;  %v1455_v17 = vld [vmem:[%s1998_s3 + $0x30] ss:$8 sps:$4 sm:$0xff]   ;;  %v1458_v19 = vld [vmem:[%s1998_s3 + $0x20] ss:$8 sps:$4 sm:$0xff]   ;;  %v1463_v20 = vld [vmem:[%s1998_s3 + $0x14] ss:$8 sps:$4 sm:$0xff]  }
  0x30   : > { %v1461_v21 = vld [vmem:[%s1998_s3 + $0x10] ss:$8 sps:$4 sm:$0xff]   ;;  %v1466_v22 = vld [vmem:[%s1998_s3 + $0x4] ss:$8 sps:$4 sm:$0xff]   ;;  %v1464_v23 = vld [vmem:[%s1998_s3] ss:$8 sps:$4 sm:$0xff]  }
  0x31   : > { %688 = vmatpush1.bf16.msra.mxu0 %v1381_v30  ;;  %v1469_v24 = vld [vmem:[%s1998_s3 + $0xf4] ss:$8 sps:$4 sm:$0xff]   ;;  %v1467_v25 = vld [vmem:[%s1998_s3 + $0xf0] ss:$8 sps:$4 sm:$0xff]   ;;  %v1472_v26 = vld [vmem:[%s1998_s3 + $0xe4] ss:$8 sps:$4 sm:$0xff]  }
  0x32   : > { %741 = vmatpush1.bf16.msra.mxu1 %v1382_v31  ;;  %689 = vmatprep.subr.bf16.mxu0 %v1383_v32  ;;  %v1470_v27 = vld [vmem:[%s1998_s3 + $0xe0] ss:$8 sps:$4 sm:$0xff]   ;;  %v1475_v28 = vld [vmem:[%s1998_s3 + $0xd4] ss:$8 sps:$4 sm:$0xff]   ;;  %v1473_v29 = vld [vmem:[%s1998_s3 + $0xd0] ss:$8 sps:$4 sm:$0xff]  }
  0x33   : > { %742 = vmatprep.subr.bf16.mxu1 %v1385_v33  ;;  %v1478_v30 = vld [vmem:[%s1998_s3 + $0xc4] ss:$8 sps:$4 sm:$0xff]   ;;  %v1476_v31 = vld [vmem:[%s1998_s3 + $0xc0] ss:$8 sps:$4 sm:$0xff]   ;;  %v1481_v32 = vld [vmem:[%s1998_s3 + $0xb4] ss:$8 sps:$4 sm:$0xff]  }
  0x34   : > { %v1479_v33 = vld [vmem:[%s1998_s3 + $0xb0] ss:$8 sps:$4 sm:$0xff]   ;;  %s1955_s22 = scalar_lea.sflag [#allocation3], %s218_s23  ;;  %s1497_s11 = scalar_lea.vmem %s1496_s13, 2048 }
  0x35   : > { %690 = vmatpush2.bf16.msra.mxu0 %v1387_v34  ;;  %v1484_v34 = vld [vmem:[%s1998_s3 + $0xa4] ss:$8 sps:$4 sm:$0xff]   ;;  %p1499_p1 = scmp.lt.s32.totalorder %s1497_s11, %s1491_s10 }
  0x36   : > { %743 = vmatpush2.bf16.msra.mxu1 %v1388_v35  ;;  %691 = vmatprep.subr.bf16.mxu0 %v1389_v36  ;;  %v1482_v35 = vld [vmem:[%s1998_s3 + $0xa0] ss:$8 sps:$4 sm:$0xff]   ;;  %v1487_v36 = vld [vmem:[%s1998_s3 + $0x94] ss:$8 sps:$4 sm:$0xff]  }
  0x37   : > { %744 = vmatprep.subr.bf16.mxu1 %v1391_v37  ;;  %v1485_v37 = vld [vmem:[%s1998_s3 + $0x90] ss:$8 sps:$4 sm:$0xff]   ;;  %p1500_p2 = por %p1499_p1, %p1498_p0 }
  0x39   : > { %692 = vmatpush2.bf16.msra.mxu0 %v1393_v38  ;;  %v1490_v38 = vld [vmem:[%s1998_s3 + $0x84] ss:$8 sps:$4 sm:$0xff]   ;;  %p1501_p3 = pnand %p1500_p2, %p1494_p13 }
  0x3a   : > { %745 = vmatpush2.bf16.msra.mxu1 %v1394_v39  ;;  %693 = vmatprep.subr.bf16.mxu0 %v1395_v40  ;;  %v1488_v39 = vld [vmem:[%s1998_s3 + $0x80] ss:$8 sps:$4 sm:$0xff]   ;;  %v303_v40 = vlaneseq }
  0x3b   : > { %746 = vmatprep.subr.bf16.mxu1 %v1397_v41 }
  0x3c   : > { %v304_v41 = vshrl.u32 %v303_v40, 7 }
  0x3d   : > { %694 = vmatpush2.bf16.msra.mxu0 %v1399_v42 }
  0x3e   : > { %747 = vmatpush2.bf16.msra.mxu1 %v1400_v43  ;;  %695 = vmatprep.subr.bf16.mxu0 %v1401_v44  ;;  %v309_v42 = vsub.s32 1, %v304_v41  ;;  %v305_v43 = vsub.s32 0, %v304_v41  ;;  %v301_v44 = vld [vmem:[%s1997_s2] sm:$0x3] }
  0x3f   : > { %748 = vmatprep.subr.bf16.mxu1 %v1403_v45 }
  0x40   : > { %v310_v45 = vrot.slane %v301_v44, %v309_v42 }
  0x41   : > { %696 = vmatpush2.bf16.msra.mxu0 %v1405_v46  ;;  %v306_v46 = vrot.slane %v301_v44, %v305_v43 }
  0x42   : > { %749 = vmatpush2.bf16.msra.mxu1 %v1406_v47  ;;  %697 = vmatprep.subr.bf16.mxu0 %v1407_v48 }
  0x43   : > { %750 = vmatprep.subr.bf16.mxu1 %v1409_v50 }
  0x45   : > { %698 = vmatpush2.bf16.msra.mxu0 %v1411_v52 }
  0x46   : > { %751 = vmatpush2.bf16.msra.mxu1 %v1412_v53  ;;  %699 = vmatprep.subr.bf16.mxu0 %v1413_v54 }
  0x47   : > { %752 = vmatprep.subr.bf16.mxu1 %v1415_v55 }
  0x49   : > { %700 = vmatpush2.bf16.msra.mxu0 %v1417_v56 }
  0x4a   : > { %753 = vmatpush2.bf16.msra.mxu1 %v1418_v57  ;;  %701 = vmatprep.subr.bf16.mxu0 %v1419_v58 }
  0x4b   : > { %754 = vmatprep.subr.bf16.mxu1 %v1421_v59 }
  0x4d   : > { %702 = vmatpush2.bf16.msra.mxu0 %v1423_v60 }
  0x4e   : > { %755 = vmatpush2.bf16.msra.mxu1 %v1424_v61  ;;  %703 = vmatprep.subr.bf16.mxu0 %v1425_v62 }
  0x4f   : > { %756 = vmatprep.subr.bf16.mxu1 %v1427_v63 }
  0x51   : > { %704 = vmatpush2.bf16.msra.mxu0 %v1429_v0 }
  0x52   : > { %757 = vmatpush2.bf16.msra.mxu1 %v1430_v1  ;;  %995 = vmatprep.subr.bf16.mxu0 %v1445_v3 }
  0x53   : > { %1262 = vmatprep.subr.bf16.mxu1 %v1445_v3 }
  0x54   : > { %706 = vmatmul.mubr.bf16.vlgmr.msra.gmra.mxu0 %v1431_v2 }
  0x55   : > { %759 = vmatmul.mubr.bf16.vlgmr.msra.gmra.mxu1 %v1434_v4  ;;  %715 = vmatprep.mubr.bf16.mxu0 %v1437_v5 }
  0x56   : > { %768 = vmatprep.mubr.bf16.mxu1 %v1439_v6  ;;  %996 = vmatpush1.bf16.msra.mxu0 %v1443_v7 }
  0x57   : > { %1278 = vmatpush1.bf16.msra.mxu1 %v1443_v7  ;;  %997 = vmatprep.subr.bf16.mxu0 %v1448_v8 }
  0x58   : > { %1263 = vmatprep.subr.bf16.mxu1 %v1448_v8 }
  0x5a   : > { %998 = vmatpush1.bf16.msra.mxu0 %v1446_v9 }
  0x5b   : > { %1279 = vmatpush1.bf16.msra.mxu1 %v1446_v9  ;;  %999 = vmatprep.subr.bf16.mxu0 %v1451_v10 }
  0x5c   : > { %1264 = vmatprep.subr.bf16.mxu1 %v1451_v10  ;;  %716 = vmatmul.mubr.bf16.gmra.mxu0 %v1441_v11 }
  0x5d   : > { %769 = vmatmul.mubr.bf16.gmra.mxu1 %v1442_v12 }
  0x5e   : > { %1000 = vmatpush1.bf16.msra.mxu0 %v1449_v13 }
  0x5f   : > { %1280 = vmatpush1.bf16.msra.mxu1 %v1449_v13  ;;  %1001 = vmatprep.subr.bf16.mxu0 %v1454_v14 }
  0x60   : > { %1265 = vmatprep.subr.bf16.mxu1 %v1454_v14 }
  0x62   : > { %1002 = vmatpush1.bf16.msra.mxu0 %v1452_v15 }
  0x63   : > { %1281 = vmatpush1.bf16.msra.mxu1 %v1452_v15  ;;  %1003 = vmatprep.subr.bf16.mxu0 %v1457_v16 }
  0x64   : > { %1266 = vmatprep.subr.bf16.mxu1 %v1457_v16 }
  0x66   : > { %1004 = vmatpush1.bf16.msra.mxu0 %v1455_v17 }
  0x67   : > { %1282 = vmatpush1.bf16.msra.mxu1 %v1455_v17  ;;  %1005 = vmatprep.subr.bf16.mxu0 %v1460_v18 }
  0x68   : > { %1267 = vmatprep.subr.bf16.mxu1 %v1460_v18 }
  0x6a   : > { %1006 = vmatpush1.bf16.msra.mxu0 %v1458_v19 }
  0x6b   : > { %1283 = vmatpush1.bf16.msra.mxu1 %v1458_v19  ;;  %1007 = vmatprep.subr.bf16.mxu0 %v1463_v20 }
  0x6c   : > { %1268 = vmatprep.subr.bf16.mxu1 %v1463_v20 }
  0x6e   : > { %1008 = vmatpush1.bf16.msra.mxu0 %v1461_v21 }
  0x6f   : > { %1284 = vmatpush1.bf16.msra.mxu1 %v1461_v21  ;;  %1009 = vmatprep.subr.bf16.mxu0 %v1466_v22 }
  0x70   : > { %1269 = vmatprep.subr.bf16.mxu1 %v1466_v22 }
  0x72   : > { %1010 = vmatpush1.bf16.msra.mxu0 %v1464_v23 }
  0x73   : > { %1285 = vmatpush1.bf16.msra.mxu1 %v1464_v23  ;;  %1011 = vmatprep.subr.bf16.mxu0 %v1469_v24 }
  0x74   : > { %1270 = vmatprep.subr.bf16.mxu1 %v1469_v24 }
  0x76   : > { %1012 = vmatpush2.bf16.msra.mxu0 %v1467_v25 }
  0x77   : > { %1286 = vmatpush2.bf16.msra.mxu1 %v1467_v25  ;;  %1013 = vmatprep.subr.bf16.mxu0 %v1472_v26 }
  0x78   : > { %1271 = vmatprep.subr.bf16.mxu1 %v1472_v26 }
  0x7a   : > { %1014 = vmatpush2.bf16.msra.mxu0 %v1470_v27 }
  0x7b   : > { %1287 = vmatpush2.bf16.msra.mxu1 %v1470_v27  ;;  %1015 = vmatprep.subr.bf16.mxu0 %v1475_v28  ;;  %v823_v27 = vld [vmem:[%s1999_s4] sm:$0x3] }
  0x7c   : > { %1272 = vmatprep.subr.bf16.mxu1 %v1475_v28  ;;  %v828_v28 = vrot.slane %v823_v27, %v305_v43 }
  0x7e   : > { %1016 = vmatpush2.bf16.msra.mxu0 %v1473_v29 }
  0x7f   : > { %1288 = vmatpush2.bf16.msra.mxu1 %v1473_v29  ;;  %1017 = vmatprep.subr.bf16.mxu0 %v1478_v30  ;;  %v832_v29 = vrot.slane %v823_v27, %v309_v42 }
  0x80   : > { %1273 = vmatprep.subr.bf16.mxu1 %v1478_v30 }
  0x82   : > { %1018 = vmatpush2.bf16.msra.mxu0 %v1476_v31 }
  0x83   : > { %1289 = vmatpush2.bf16.msra.mxu1 %v1476_v31  ;;  %1019 = vmatprep.subr.bf16.mxu0 %v1481_v32 }
  0x84   : > { %1274 = vmatprep.subr.bf16.mxu1 %v1481_v32 }
  0x86   : > { %1020 = vmatpush2.bf16.msra.mxu0 %v1479_v33 }
  0x87   : > { %1290 = vmatpush2.bf16.msra.mxu1 %v1479_v33  ;;  %1021 = vmatprep.subr.bf16.mxu0 %v1484_v34 }
  0x88   : > { %1275 = vmatprep.subr.bf16.mxu1 %v1484_v34 }
  0x8a   : > { %1022 = vmatpush2.bf16.msra.mxu0 %v1482_v35 }
  0x8b   : > { %1291 = vmatpush2.bf16.msra.mxu1 %v1482_v35  ;;  %1023 = vmatprep.subr.bf16.mxu0 %v1487_v36 }
  0x8c   : > { %1276 = vmatprep.subr.bf16.mxu1 %v1487_v36 }
  0x8e   : > { %1024 = vmatpush2.bf16.msra.mxu0 %v1485_v37 }
  0x8f   : > { %1292 = vmatpush2.bf16.msra.mxu1 %v1485_v37  ;;  %1025 = vmatprep.subr.bf16.mxu0 %v1490_v38 }
  0x90   : > { %1277 = vmatprep.subr.bf16.mxu1 %v1490_v38 }
  0x92   : > { %1026 = vmatpush2.bf16.msra.mxu0 %v1488_v39 }
  0x93   : > { %1293 = vmatpush2.bf16.msra.mxu1 %v1488_v39 }
 0x114   : > { %v707_v47 = vpop.f32.mrf.mxu0 }
 0x115   : > { %v760_v48 = vpop.f32.mrf.mxu1  ;;  %v708_v52 = vadd.f32 %v707_v47, %v306_v46 }
 0x116   : > { %v709_v49 = vpop.f32.mrf.mxu0 }
 0x117   : > { %v762_v50 = vpop.f32.mrf.mxu1  ;;  %v710_v51 = vadd.f32 %v709_v49, %v310_v45  ;;  %v761_v61 = vadd.f32 %v760_v48, %v708_v52 }
 0x118   : > { %v711_v53 = vpop.f32.mrf.mxu0 }
 0x119   : > { %v764_v54 = vpop.f32.mrf.mxu1  ;;  %v712_v55 = vadd.f32 %v711_v53, %v306_v46  ;;  %v763_v58 = vadd.f32 %v762_v50, %v710_v51  ;;  %v779_v7 = vmax.f32 %v761_v61, 0.0 }
 0x11a   : > { %v713_v56 = vpop.f32.mrf.mxu0 }
 0x11b   : > { %v766_v57 = vpop.f32.mrf.mxu1  ;;  %v765_v59 = vadd.f32 %v764_v54, %v712_v55  ;;  %v714_v60 = vadd.f32 %v713_v56, %v310_v45  ;;  %v780_v4 = vmax.f32 %v763_v58, 0.0 }
 0x11c   : > { %v717_v62 = vpop.f32.mrf.mxu0 }
 0x11d   : > { %v770_v63 = vpop.f32.mrf.mxu1  ;;  %v767_v0 = vadd.f32 %v766_v57, %v714_v60  ;;  %v781_v1 = vmax.f32 %v765_v59, 0.0  ;;  %v718_v8 = vadd.f32 %v717_v62, %v306_v46 }
 0x11e   : > { %v719_v2 = vpop.f32.mrf.mxu0 }
 0x11f   : > { %v772_v3 = vpop.f32.mrf.mxu1  ;;  %v782_v5 = vmax.f32 %v767_v0, 0.0  ;;  %v720_v6 = vadd.f32 %v719_v2, %v310_v45  ;;  %v787_v13 = vpack.c.bf16 %v781_v1, %v779_v7  ;;  %v771_v18 = vadd.f32 %v770_v63, %v718_v8 }
 0x120   : > { %v721_v9 = vpop.f32.mrf.mxu0 }
 0x121   : > { %v774_v10 = vpop.f32.mrf.mxu1  ;;  %v788_v11 = vpack.c.bf16 %v782_v5, %v780_v4  ;;  %v722_v12 = vadd.f32 %v721_v9, %v306_v46  ;;  %v773_v15 = vadd.f32 %v772_v3, %v720_v6  ;;  %v783_v24 = vmax.f32 %v771_v18, 0.0 }
 0x122   : > { %v723_v14 = vpop.f32.mrf.mxu0 }
 0x123   : > { %v775_v16 = vadd.f32 %v774_v10, %v722_v12  ;;  %v724_v17 = vadd.f32 %v723_v14, %v310_v45  ;;  %1027 = vmatprep.mubr.bf16.mxu0 %v788_v11  ;;  %v776_v19 = vpop.f32.mrf.mxu1  ;;  %v784_v22 = vmax.f32 %v773_v15, 0.0 }
 0x124   : > { %1028 = vmatmul.mubr.bf16.vlgmr.msra.gmra.mxu0 %v787_v13 }
 0x125   : > { %v777_v20 = vadd.f32 %v776_v19, %v724_v17  ;;  %v785_v21 = vmax.f32 %v775_v16, 0.0 }
 0x127   : > { %v786_v23 = vmax.f32 %v777_v20, 0.0  ;;  %v789_v26 = vpack.c.bf16 %v785_v21, %v783_v24 }
 0x129   : > { %v790_v25 = vpack.c.bf16 %v786_v23, %v784_v22 }
 0x12b   : > { %1037 = vmatprep.mubr.bf16.mxu1 %v790_v25 }
 0x12c   : > { %1038 = vmatmul.mubr.bf16.vlgmr.msra.gmra.mxu1 %v789_v26 }
 0x1e4   : > { %v1029_v30 = vpop.f32.mrf.mxu0 }
 0x1e5   : > { %v1030_v31 = vadd.f32 %v1029_v30, %v828_v28 }
 0x1e6   : > { %v1031_v32 = vpop.f32.mrf.mxu0 }
 0x1e7   : > { %v1048_v33 = vmax.f32 %v1030_v31, 0.0  ;;  %v1032_v34 = vadd.f32 %v1031_v32, %v832_v29 }
 0x1e8   : > { %v1033_v35 = vpop.f32.mrf.mxu0 }
 0x1e9   : > { %1056 = vst [vmem:[%s220_s26] sm:$0xff] %v1048_v33  ;;  %v1049_v36 = vmax.f32 %v1032_v34, 0.0  ;;  %v1034_v37 = vadd.f32 %v1033_v35, %v828_v28 }
 0x1ea   : > { %v1035_v38 = vpop.f32.mrf.mxu0 }
 0x1eb   : > { %1057 = vst [vmem:[%s220_s26 + $0x8] sm:$0xff] %v1049_v36  ;;  %v1050_v39 = vmax.f32 %v1034_v37, 0.0  ;;  %v1036_v40 = vadd.f32 %v1035_v38, %v832_v29 }
 0x1ec   : > { %v1039_v41 = vpop.f32.mrf.mxu1 }
 0x1ed   : > { %1058 = vst [vmem:[%s220_s26 + $0x10] sm:$0xff] %v1050_v39  ;;  %v1051_v43 = vmax.f32 %v1036_v40, 0.0  ;;  %v1040_v44 = vadd.f32 %v1039_v41, %v828_v28 }
 0x1ee   : > { %v1041_v42 = vpop.f32.mrf.mxu1 }
 0x1ef   : > { %1059 = vst [vmem:[%s220_s26 + $0x18] sm:$0xff] %v1051_v43  ;;  %v1052_v45 = vmax.f32 %v1040_v44, 0.0  ;;  %v1042_v46 = vadd.f32 %v1041_v42, %v832_v29 }
 0x1f0   : > { %v1043_v47 = vpop.f32.mrf.mxu1 }
 0x1f1   : > { %1060 = vst [vmem:[%s220_s26 + $0x20] sm:$0xff] %v1052_v45  ;;  %v1053_v48 = vmax.f32 %v1042_v46, 0.0  ;;  %v1044_v49 = vadd.f32 %v1043_v47, %v828_v28 }
 0x1f2   : > { %v1045_v50 = vpop.f32.mrf.mxu1 }
 0x1f3   : > { %1061 = vst [vmem:[%s220_s26 + $0x28] sm:$0xff] %v1053_v48  ;;  %v1054_v51 = vmax.f32 %v1044_v49, 0.0  ;;  %v1046_v52 = vadd.f32 %v1045_v50, %v832_v29 }
 0x1f5   : > { %1062 = vst [vmem:[%s220_s26 + $0x30] sm:$0xff] %v1054_v51  ;;  %v1055_v53 = vmax.f32 %v1046_v52, 0.0 }
 0x1f7   : > { %1063 = vst [vmem:[%s220_s26 + $0x38] sm:$0xff] %v1055_v53 }
 0x1f8   : > { %1504 = shalt.err (!%p1501_p3)
}
 0x1f9   : > { %s1505_s30 = scalar_lea.hbm %s1949_s9, 1024  ;;  %s1509_s16 = scalar_lea.hbm %s2000_s5, 2048 }
 0x1fa   : > { %p1506_p4 = scmp.ne.s32.totalorder %s1949_s9, %s1505_s30  ;;  %p1510_p9 = scmp.lt.s32.totalorder %s1949_s9, %s2000_s5 }
 0x1fb   : > { %p1511_p10 = scmp.lt.s32.totalorder %s1509_s16, %s1505_s30 }
 0x1fc   : > { %p1507_p7 = pnand %p1506_p4, %p1624_p5 }
 0x1fd   : > { %p1512_p11 = por %p1511_p10, %p1510_p9 }
 0x1fe   : > { %p1508_p8 = pneg %p1507_p7 }
 0x200   : > { %p1513_p12 = pnand %p1512_p11, %p1508_p8 }
 0x202   : > { %1516 = shalt.err (!%p1513_p12)
}
 0x203   : > { %s1554_s26 = smov 256   ;;  %s1555_s17 = smov 16  }
 0x204   : > { %1294 = dma.vmem_to_hbm [thread:$0]  (%p1624_p5), %s1951_s6, 1024, %s1949_s9, %s1955_s22, %s1554_s26, %s1554_s26, %s1555_s17  }
 0x205 PF: > { %p1300_p13 = scmp.ge.s32.totalorder %s1551_s21, 2  ;;  %s1094_s7 = sand.u32 1, %s1539_s18  }
 0x206   : > { %s1095_s8 = scalar_lea.sflag [#allocation3], %s1094_s7 }
 0x207   : > { %p1297_p0 = pnand %p1300_p13, %p1628_p6 }
 0x209   : > { %p1298_p1 = pneg %p1297_p0 }
 0x20b   : > { %1534 = dma.done.wait (%p1298_p1), %s1095_s8, 1024  }
 0x20c   : > { %1536 = vsyncadd (%p1298_p1), %s1095_s8, 4294966272  ;;  %p15_p2 = scmp.ge.s32.totalorder %s1611_s24, 4   ;;  %s2003_s18 = smov %s1543_s19 }
 0x20d   : > { %s2004_s19 = smov %s1547_s20  ;;  %s2005_s20 = smov %s1622_s27 }
 0x20e   : > { %s2006_s21 = smov %s1611_s24  ;;  %17 = sbr.rel (!%p15_p2) target bundleno = 3 (0x3), region = 75 }
 0x213   :  { %1100 = vsyncpa [#allocation3], 1 }
 0x214   :  { %1102 = vsyncpa [#allocation3 + $0x1], 1 }

</bundles_post_ra>
